<compile_context>
chip_gen: v7x
topology: tpu7x:2x2x1
jax: 0.10.0
libtpu: 0.0.40
codegen_flags: <defaults>
</compile_context>

<pallas_src>
import functools

import jax
import jax.numpy as jnp
from jax.experimental import pallas as pl
from jax.experimental.pallas import tpu as pltpu


# ------------------------------- helpers ------------------------------------

def _round_up(a, b):
    return -(-a // b) * b


def _default_vmem_limit():
    try:
        cap = int(pltpu.get_tpu_info().vmem_capacity_bytes)
    except Exception:
        cap = 64 << 20  # conservative (v7x-sized) fallback
    return max(32 << 20, min((cap * 3) // 4, 112 << 20))


_VMEM_LIMIT = _default_vmem_limit()


def _choose_tm(m, target=512):
    """Row tile: prefer `target`; otherwise split M into >=2 tiles (mult of 8)."""
    if m >= 2 * target:
        return target
    return max(8, _round_up(-(-m // 2), 8))


# ----------------------------- Pallas kernels --------------------------------

def _conv_gemm_kernel(p_ref, w_ref, o_ref, *stats_refs, act):
    """(tm, K) @ (K, Cout) on the MXU (bf16 in, f32 accumulate).

    Optional fused LeakyReLU epilogue and fused per-tile BatchNorm statistics
    (per-channel sum / sum-of-squares over the tile's rows).
    """
    y = jnp.dot(p_ref[...], w_ref[...], preferred_element_type=jnp.float32)
    if stats_refs:
        (s_ref,) = stats_refs
        s = jnp.sum(y, axis=0, keepdims=True)          # (1, Cout)
        sq = jnp.sum(y * y, axis=0, keepdims=True)     # (1, Cout)
        s_ref[0] = jnp.concatenate([s, sq], axis=0)    # (2, Cout)
    if act == "leaky_relu":
        y = jnp.where(y >= 0, y, 0.2 * y)
    o_ref[...] = y.astype(o_ref.dtype)


def _affine_lrelu_kernel(y_ref, scale_ref, shift_ref, o_ref, *, slope):
    """BatchNorm apply (per-channel affine) + LeakyReLU; f32 math, bf16 out."""
    z = y_ref[...].astype(jnp.float32) * scale_ref[...] + shift_ref[...]
    o_ref[...] = jnp.where(z >= 0, z, slope * z).astype(o_ref.dtype)


def _head_kernel(p_ref, w_ref, o_ref):
    """Final 512->1 conv as a VPU multiply + lane reduction, fused sigmoid."""
    p = p_ref[...].astype(jnp.float32)
    w = w_ref[...].astype(jnp.float32)
    y = jnp.sum(p * w, axis=-1, keepdims=True)         # (M, 1)
    o_ref[...] = 1.0 / (1.0 + jnp.exp(-y))


# ----------------------------- kernel wrappers --------------------------------

def conv_gemm(patches, w_mat, act="none", with_stats=False):
    """(M, K) @ (K, Cout) GEMM, tiled over M, optional fused BN statistics."""
    m, k = patches.shape
    kw, cout = w_mat.shape
    assert kw == k
    tm = _choose_tm(m)
    grid = pl.cdiv(m, tm)
    mp = grid * tm
    if mp != m:
        # zero rows: contribute nothing to sum / sum-of-squares, sliced off below
        patches = jnp.pad(patches, ((0, mp - m), (0, 0)))

    out_shape = [jax.ShapeDtypeStruct((mp, cout), jnp.bfloat16)]
    out_specs = [pl.BlockSpec((tm, cout), lambda i: (i, 0))]
    if with_stats:
        out_shape.append(jax.ShapeDtypeStruct((grid, 2, cout), jnp.float32))
        out_specs.append(pl.BlockSpec((1, 2, cout), lambda i: (i, 0, 0)))

    res = pl.pallas_call(
        functools.partial(_conv_gemm_kernel, act=act),
        out_shape=tuple(out_shape) if with_stats else out_shape[0],
        grid_spec=pltpu.PrefetchScalarGridSpec(
            num_scalar_prefetch=0,
            grid=(grid,),
            in_specs=[
                pl.BlockSpec((tm, k), lambda i: (i, 0)),
                pl.BlockSpec((k, cout), lambda i: (0, 0)),
            ],
            out_specs=tuple(out_specs) if with_stats else out_specs[0],
        ),
        compiler_params=pltpu.CompilerParams(
            dimension_semantics=("parallel",),
            vmem_limit_bytes=_VMEM_LIMIT,
        ),
    )(patches, w_mat)

    if with_stats:
        y, stats = res
    else:
        y, stats = res, None
    if mp != m:
        y = y[:m]
    return y, stats


def batchnorm_lrelu_apply(y2d, stats, gamma, beta, eps=1e-5, slope=0.2):
    """Training-mode BatchNorm (biased batch variance) + LeakyReLU(0.2).

    Statistics come from the fused GEMM epilogue; this kernel only applies the
    per-channel affine + activation, tiled/pipelined over M.
    """
    m, c = y2d.shape
    sums = jnp.sum(stats[:, 0, :], axis=0)
    sumsq = jnp.sum(stats[:, 1, :], axis=0)
    mean = sums / m
    var = jnp.maximum(sumsq / m - mean * mean, 0.0)      # biased variance
    scale = (gamma * jax.lax.rsqrt(var + eps)).astype(jnp.float32)
    shift = (beta - mean * scale).astype(jnp.float32)

    tm = _choose_tm(m)
    grid = pl.cdiv(m, tm)
    mp = grid * tm
    if mp != m:
        y2d = jnp.pad(y2d, ((0, mp - m), (0, 0)))

    out = pl.pallas_call(
        functools.partial(_affine_lrelu_kernel, slope=slope),
        out_shape=jax.ShapeDtypeStruct((mp, c), jnp.bfloat16),
        grid_spec=pltpu.PrefetchScalarGridSpec(
            num_scalar_prefetch=0,
            grid=(grid,),
            in_specs=[
                pl.BlockSpec((tm, c), lambda i: (i, 0)),
                pl.BlockSpec((1, c), lambda i: (0, 0)),
                pl.BlockSpec((1, c), lambda i: (0, 0)),
            ],
            out_specs=pl.BlockSpec((tm, c), lambda i: (i, 0)),
        ),
        compiler_params=pltpu.CompilerParams(
            dimension_semantics=("parallel",),
            vmem_limit_bytes=_VMEM_LIMIT,
        ),
    )(y2d, scale.reshape(1, c), shift.reshape(1, c))
    return out[:m] if mp != m else out


def head_conv_sigmoid(x_nhwc, w):
    """Conv(Cin->1, k, 1, 0) + Sigmoid as a VPU reduce; returns (N*Ho*Wo,)."""
    cout, cin, k, _ = w.shape
    patches, _, _ = im2col_nhwc(x_nhwc, k, stride=1, pad=0)      # (M, K) bf16
    m, kk = patches.shape
    w_row = jnp.transpose(w, (2, 3, 1, 0)).reshape(kk, cout).T   # (1, K)
    w_row = w_row.astype(jnp.bfloat16)

    out = pl.pallas_call(
        _head_kernel,
        out_shape=jax.ShapeDtypeStruct((m, 1), jnp.float32),
        grid_spec=pltpu.PrefetchScalarGridSpec(
            num_scalar_prefetch=0,
            grid=(1,),
            in_specs=[
                pl.BlockSpec((m, kk), lambda i: (0, 0)),
                pl.BlockSpec((1, kk), lambda i: (0, 0)),
            ],
            out_specs=pl.BlockSpec((m, 1), lambda i: (0, 0)),
        ),
        compiler_params=pltpu.CompilerParams(
            dimension_semantics=("arbitrary",),
            vmem_limit_bytes=_VMEM_LIMIT,
        ),
    )(patches, w_row)
    # PyTorch: .view(-1, 1).squeeze(1)
    return out.reshape(-1)


# ------------------------------- JAX glue -------------------------------------

def im2col_nhwc(x, k, stride, pad):
    """x: (N, H, W, C) -> patches (N*Ho*Wo, k*k*C), column order = (kh, kw, C)."""
    n, h, w, c = x.shape
    if pad:
        x = jnp.pad(x, ((0, 0), (pad, pad), (pad, pad), (0, 0)))
    ho = (h + 2 * pad - k) // stride + 1
    wo = (w + 2 * pad - k) // stride + 1
    cols = []
    for i in range(k):
        for j in range(k):
            cols.append(x[:, i:i + stride * ho:stride, j:j + stride * wo:stride, :])
    patches = jnp.concatenate(cols, axis=-1)             # (N, Ho, Wo, k*k*C)
    return patches.reshape(n * ho * wo, k * k * c), ho, wo


def conv2d(x_nhwc, w, stride, pad, act="none", with_stats=False):
    """x: NHWC bf16, w: PyTorch layout (Cout, Cin, k, k) f32.

    Returns (y2d (M, Cout) bf16, stats-or-None, Ho, Wo) with M = N*Ho*Wo.
    """
    cout, cin, k, _ = w.shape
    patches, ho, wo = im2col_nhwc(x_nhwc, k, stride, pad)
    w_mat = jnp.transpose(w, (2, 3, 1, 0)).reshape(k * k * cin, cout)
    w_mat = w_mat.astype(jnp.bfloat16)
    cp = _round_up(max(cout, 128), 128)                  # lane-dense output cols
    if cp != cout:
        w_mat = jnp.pad(w_mat, ((0, 0), (0, cp - cout)))
    y, stats = conv_gemm(patches, w_mat, act=act, with_stats=with_stats)
    if cp != cout:
        y = y[:, :cout]
        if stats is not None:
            stats = stats[..., :cout]
    return y, stats, ho, wo


def init_params(channels=3, key=jax.random.PRNGKey(0)):
    ks = jax.random.split(key, 5)

    def conv_w(k, cout, cin):
        return 0.02 * jax.random.normal(k, (cout, cin, 4, 4), jnp.float32)

    return {
        "w1": conv_w(ks[0], 64, channels),
        "w2": conv_w(ks[1], 128, 64),
        "g2": jnp.ones((128,), jnp.float32), "b2": jnp.zeros((128,), jnp.float32),
        "w3": conv_w(ks[2], 256, 128),
        "g3": jnp.ones((256,), jnp.float32), "b3": jnp.zeros((256,), jnp.float32),
        "w4": conv_w(ks[3], 512, 256),
        "g4": jnp.ones((512,), jnp.float32), "b4": jnp.zeros((512,), jnp.float32),
        "w5": conv_w(ks[4], 1, 512),
    }


def discriminator_forward(x_nchw, p):
    # single layout change: NCHW -> NHWC, bf16 activations internally
    x = jnp.transpose(x_nchw, (0, 2, 3, 1)).astype(jnp.bfloat16)
    n = x.shape[0]

    # Conv(3->64, 4, 2, 1) + LeakyReLU(0.2), fused in the GEMM epilogue
    y, _, ho, wo = conv2d(x, p["w1"], stride=2, pad=1, act="leaky_relu")
    x = y.reshape(n, ho, wo, -1)

    # three Conv + BatchNorm(batch stats) + LeakyReLU blocks
    for wk, gk, bk in (("w2", "g2", "b2"), ("w3", "g3", "b3"), ("w4", "g4", "b4")):
        y, stats, ho, wo = conv2d(x, p[wk], stride=2, pad=1, act="none",
                                  with_stats=True)
        y = batchnorm_lrelu_apply(y, stats, p[gk], p[bk])
        x = y.reshape(n, ho, wo, -1)

    # Conv(512->1, 4, 1, 0) + Sigmoid, then .view(-1, 1).squeeze(1)
    return head_conv_sigmoid(x, p["w5"])                 # (N,)


if __name__ == "__main__":
    key = jax.random.PRNGKey(0)
    kx, kp = jax.random.split(key)
    # DCGAN discriminator expects 64x64 inputs so the last conv yields 1x1.
    x = jax.random.normal(kx, (2, 3, 64, 64), jnp.float32)
    params = init_params(channels=3, key=kp)

    out = jax.jit(discriminator_forward)(x, params)
    out = jax.block_until_ready(out)

    assert out.shape == (2,), out.shape
    assert bool(jnp.all(jnp.isfinite(out)))
    assert bool(jnp.all((out >= 0.0) & (out <= 1.0)))
    print("KERNEL_OK")
</pallas_src>

<mosaic_0001>
module attributes {stable_mosaic.version = 11 : i64} {
  func.func @_conv_gemm_kernel(%arg0: i32, %arg1: memref<512x48xbf16, #tpu.memory_space<vmem>>, %arg2: memref<48x128xbf16, #tpu.memory_space<vmem>>, %arg3: memref<512x128xbf16, #tpu.memory_space<vmem>>) attributes {dimension_semantics = [#tpu.dimension_semantics<parallel>], iteration_bounds = array<i64: 4>, scalar_prefetch = 0 : i64, scratch_operands = 0 : i64, tpu.core_type = #tpu.core_type<tc>, window_params = [{transform_indices = @transform_0, window_bounds = array<i64: 512, 48>}, {pipeline_mode = #tpu.pipeline_mode<synchronous>, transform_indices = @transform_1, window_bounds = array<i64: 48, 128>}, {transform_indices = @transform_2, window_bounds = array<i64: 512, 128>}]} {
    %c0 = arith.constant 0 : index
    %c0_0 = arith.constant 0 : index
    %0 = vector.load %arg1[%c0, %c0_0] : memref<512x48xbf16, #tpu.memory_space<vmem>>, vector<512x48xbf16>
    %c0_1 = arith.constant 0 : index
    %c0_2 = arith.constant 0 : index
    %1 = vector.load %arg2[%c0_1, %c0_2] : memref<48x128xbf16, #tpu.memory_space<vmem>>, vector<48x128xbf16>
    %cst = arith.constant dense<0.000000e+00> : vector<512x128xf32>
    %2 = tpu.matmul %0, %1, %cst {dimension_numbers = #tpu.dot_dimension_numbers<[1], [0], [0], [1], [0, 0, 1, 1], [], []>} : vector<512x48xbf16>, vector<48x128xbf16>, vector<512x128xf32> -> vector<512x128xf32>
    %cst_3 = arith.constant 0.000000e+00 : f32
    %3 = vector.broadcast %cst_3 : f32 to vector<512x128xf32>
    %4 = arith.cmpf oge, %2, %3 : vector<512x128xf32>
    %cst_4 = arith.constant 2.000000e-01 : f32
    %5 = vector.broadcast %cst_4 : f32 to vector<512x128xf32>
    %6 = arith.mulf %5, %2 : vector<512x128xf32>
    %7 = arith.select %4, %2, %6 : vector<512x128xi1>, vector<512x128xf32>
    %8 = arith.truncf %7 : vector<512x128xf32> to vector<512x128xbf16>
    %c0_5 = arith.constant 0 : index
    %c0_6 = arith.constant 0 : index
    %9 = vector.load %arg3[%c0_5, %c0_6] : memref<512x128xbf16, #tpu.memory_space<vmem>>, vector<512x128xbf16>
    tpu.vector_store %arg3[%c0_5, %c0_6], %8 {strides = array<i32>} : memref<512x128xbf16, #tpu.memory_space<vmem>>, vector<512x128xbf16>,
    return
  }
  func.func @transform_0(%arg0: i32) -> (i32, i32) {
    %c0_i32 = arith.constant 0 : i32
    %c0_i32_0 = arith.constant 0 : i32
    return %arg0, %c0_i32 : i32, i32
  }
  func.func @transform_1(%arg0: i32) -> (i32, i32) {
    %c0_i32 = arith.constant 0 : i32
    %c0_i32_0 = arith.constant 0 : i32
    %c0_i32_1 = arith.constant 0 : i32
    return %c0_i32, %c0_i32_0 : i32, i32
  }
  func.func @transform_2(%arg0: i32) -> (i32, i32) {
    %c0_i32 = arith.constant 0 : i32
    %c0_i32_0 = arith.constant 0 : i32
    return %arg0, %c0_i32 : i32, i32
  }
}

module attributes {stable_mosaic.version = 11 : i64} {
  func.func @_conv_gemm_kernel(%arg0: i32, %arg1: memref<256x1024xbf16, #tpu.memory_space<vmem>>, %arg2: memref<1024x128xbf16, #tpu.memory_space<vmem>>, %arg3: memref<256x128xbf16, #tpu.memory_space<vmem>>, %arg4: memref<1x2x128xf32, #tpu.memory_space<vmem>>) attributes {dimension_semantics = [#tpu.dimension_semantics<parallel>], iteration_bounds = array<i64: 2>, scalar_prefetch = 0 : i64, scratch_operands = 0 : i64, tpu.core_type = #tpu.core_type<tc>, window_params = [{transform_indices = @transform_0, window_bounds = array<i64: 256, 1024>}, {pipeline_mode = #tpu.pipeline_mode<synchronous>, transform_indices = @transform_1, window_bounds = array<i64: 1024, 128>}, {transform_indices = @transform_2, window_bounds = array<i64: 256, 128>}, {transform_indices = @transform_3, window_bounds = array<i64: 1, 2, 128>}]} {
    %c0 = arith.constant 0 : index
    %c0_0 = arith.constant 0 : index
    %0 = vector.load %arg1[%c0, %c0_0] : memref<256x1024xbf16, #tpu.memory_space<vmem>>, vector<256x1024xbf16>
    %c0_1 = arith.constant 0 : index
    %c0_2 = arith.constant 0 : index
    %1 = vector.load %arg2[%c0_1, %c0_2] : memref<1024x128xbf16, #tpu.memory_space<vmem>>, vector<1024x128xbf16>
    %cst = arith.constant dense<0.000000e+00> : vector<256x128xf32>
    %2 = tpu.matmul %0, %1, %cst {dimension_numbers = #tpu.dot_dimension_numbers<[1], [0], [0], [1], [0, 0, 1, 1], [], []>} : vector<256x1024xbf16>, vector<1024x128xbf16>, vector<256x128xf32> -> vector<256x128xf32>
    %cst_3 = arith.constant dense<0.000000e+00> : vector<128xf32>
    %3 = vector.multi_reduction <add>, %2, %cst_3 [0] : vector<256x128xf32> to vector<128xf32>
    %4 = vector.shape_cast %3 : vector<128xf32> to vector<1x128xf32>
    %5 = arith.mulf %2, %2 : vector<256x128xf32>
    %cst_4 = arith.constant dense<0.000000e+00> : vector<128xf32>
    %6 = vector.multi_reduction <add>, %5, %cst_4 [0] : vector<256x128xf32> to vector<128xf32>
    %7 = vector.shape_cast %6 : vector<128xf32> to vector<1x128xf32>
    %8 = tpu.concatenate %4, %7 in 0 : vector<1x128xf32>, vector<1x128xf32> -> vector<2x128xf32>
    %c0_5 = arith.constant 0 : index
    %c0_6 = arith.constant 0 : index
    %c0_7 = arith.constant 0 : index
    %9 = vector.load %arg4[%c0_5, %c0_6, %c0_7] : memref<1x2x128xf32, #tpu.memory_space<vmem>>, vector<1x2x128xf32>
    %10 = vector.shape_cast %9 : vector<1x2x128xf32> to vector<2x128xf32>
    %11 = vector.shape_cast %8 : vector<2x128xf32> to vector<1x2x128xf32>
    tpu.vector_store %arg4[%c0_5, %c0_6, %c0_7], %11 {strides = array<i32>} : memref<1x2x128xf32, #tpu.memory_space<vmem>>, vector<1x2x128xf32>,
    %12 = arith.truncf %2 : vector<256x128xf32> to vector<256x128xbf16>
    %c0_8 = arith.constant 0 : index
    %c0_9 = arith.constant 0 : index
    %13 = vector.load %arg3[%c0_8, %c0_9] : memref<256x128xbf16, #tpu.memory_space<vmem>>, vector<256x128xbf16>
    tpu.vector_store %arg3[%c0_8, %c0_9], %12 {strides = array<i32>} : memref<256x128xbf16, #tpu.memory_space<vmem>>, vector<256x128xbf16>,
    return
  }
  func.func @transform_0(%arg0: i32) -> (i32, i32) {
    %c0_i32 = arith.constant 0 : i32
    %c0_i32_0 = arith.constant 0 : i32
    return %arg0, %c0_i32 : i32, i32
  }
  func.func @transform_1(%arg0: i32) -> (i32, i32) {
    %c0_i32 = arith.constant 0 : i32
    %c0_i32_0 = arith.constant 0 : i32
    %c0_i32_1 = arith.constant 0 : i32
    return %c0_i32, %c0_i32_0 : i32, i32
  }
  func.func @transform_2(%arg0: i32) -> (i32, i32) {
    %c0_i32 = arith.constant 0 : i32
    %c0_i32_0 = arith.constant 0 : i32
    return %arg0, %c0_i32 : i32, i32
  }
  func.func @transform_3(%arg0: i32) -> (i32, i32, i32) {
    %c0_i32 = arith.constant 0 : i32
    %c0_i32_0 = arith.constant 0 : i32
    %c0_i32_1 = arith.constant 0 : i32
    return %arg0, %c0_i32, %c0_i32_0 : i32, i32, i32
  }
}

module attributes {stable_mosaic.version = 11 : i64} {
  func.func @_affine_lrelu_kernel(%arg0: i32, %arg1: memref<256x128xbf16, #tpu.memory_space<vmem>>, %arg2: memref<1x128xf32, #tpu.memory_space<vmem>>, %arg3: memref<1x128xf32, #tpu.memory_space<vmem>>, %arg4: memref<256x128xbf16, #tpu.memory_space<vmem>>) attributes {dimension_semantics = [#tpu.dimension_semantics<parallel>], iteration_bounds = array<i64: 2>, scalar_prefetch = 0 : i64, scratch_operands = 0 : i64, tpu.core_type = #tpu.core_type<tc>, window_params = [{transform_indices = @transform_0, window_bounds = array<i64: 256, 128>}, {pipeline_mode = #tpu.pipeline_mode<synchronous>, transform_indices = @transform_1, window_bounds = array<i64: 1, 128>}, {pipeline_mode = #tpu.pipeline_mode<synchronous>, transform_indices = @transform_2, window_bounds = array<i64: 1, 128>}, {transform_indices = @transform_3, window_bounds = array<i64: 256, 128>}]} {
    %c0 = arith.constant 0 : index
    %c0_0 = arith.constant 0 : index
    %0 = vector.load %arg1[%c0, %c0_0] : memref<256x128xbf16, #tpu.memory_space<vmem>>, vector<256x128xbf16>
    %1 = arith.extf %0 : vector<256x128xbf16> to vector<256x128xf32>
    %c0_1 = arith.constant 0 : index
    %c0_2 = arith.constant 0 : index
    %2 = vector.load %arg2[%c0_1, %c0_2] : memref<1x128xf32, #tpu.memory_space<vmem>>, vector<1x128xf32>
    %3 = vector.broadcast %2 : vector<1x128xf32> to vector<256x128xf32>
    %4 = arith.mulf %1, %3 : vector<256x128xf32>
    %c0_3 = arith.constant 0 : index
    %c0_4 = arith.constant 0 : index
    %5 = vector.load %arg3[%c0_3, %c0_4] : memref<1x128xf32, #tpu.memory_space<vmem>>, vector<1x128xf32>
    %6 = vector.broadcast %5 : vector<1x128xf32> to vector<256x128xf32>
    %7 = arith.addf %4, %6 : vector<256x128xf32>
    %cst = arith.constant 0.000000e+00 : f32
    %8 = vector.broadcast %cst : f32 to vector<256x128xf32>
    %9 = arith.cmpf oge, %7, %8 : vector<256x128xf32>
    %cst_5 = arith.constant 2.000000e-01 : f32
    %10 = vector.broadcast %cst_5 : f32 to vector<256x128xf32>
    %11 = arith.mulf %10, %7 : vector<256x128xf32>
    %12 = arith.select %9, %7, %11 : vector<256x128xi1>, vector<256x128xf32>
    %13 = arith.truncf %12 : vector<256x128xf32> to vector<256x128xbf16>
    %c0_6 = arith.constant 0 : index
    %c0_7 = arith.constant 0 : index
    %14 = vector.load %arg4[%c0_6, %c0_7] : memref<256x128xbf16, #tpu.memory_space<vmem>>, vector<256x128xbf16>
    tpu.vector_store %arg4[%c0_6, %c0_7], %13 {strides = array<i32>} : memref<256x128xbf16, #tpu.memory_space<vmem>>, vector<256x128xbf16>,
    return
  }
  func.func @transform_0(%arg0: i32) -> (i32, i32) {
    %c0_i32 = arith.constant 0 : i32
    %c0_i32_0 = arith.constant 0 : i32
    return %arg0, %c0_i32 : i32, i32
  }
  func.func @transform_1(%arg0: i32) -> (i32, i32) {
    %c0_i32 = arith.constant 0 : i32
    %c0_i32_0 = arith.constant 0 : i32
    %c0_i32_1 = arith.constant 0 : i32
    return %c0_i32, %c0_i32_0 : i32, i32
  }
  func.func @transform_2(%arg0: i32) -> (i32, i32) {
    %c0_i32 = arith.constant 0 : i32
    %c0_i32_0 = arith.constant 0 : i32
    %c0_i32_1 = arith.constant 0 : i32
    return %c0_i32, %c0_i32_0 : i32, i32
  }
  func.func @transform_3(%arg0: i32) -> (i32, i32) {
    %c0_i32 = arith.constant 0 : i32
    %c0_i32_0 = arith.constant 0 : i32
    return %arg0, %c0_i32 : i32, i32
  }
}

module attributes {stable_mosaic.version = 11 : i64} {
  func.func @_conv_gemm_kernel(%arg0: i32, %arg1: memref<64x2048xbf16, #tpu.memory_space<vmem>>, %arg2: memref<2048x256xbf16, #tpu.memory_space<vmem>>, %arg3: memref<64x256xbf16, #tpu.memory_space<vmem>>, %arg4: memref<1x2x256xf32, #tpu.memory_space<vmem>>) attributes {dimension_semantics = [#tpu.dimension_semantics<parallel>], iteration_bounds = array<i64: 2>, scalar_prefetch = 0 : i64, scratch_operands = 0 : i64, tpu.core_type = #tpu.core_type<tc>, window_params = [{transform_indices = @transform_0, window_bounds = array<i64: 64, 2048>}, {pipeline_mode = #tpu.pipeline_mode<synchronous>, transform_indices = @transform_1, window_bounds = array<i64: 2048, 256>}, {transform_indices = @transform_2, window_bounds = array<i64: 64, 256>}, {transform_indices = @transform_3, window_bounds = array<i64: 1, 2, 256>}]} {
    %c0 = arith.constant 0 : index
    %c0_0 = arith.constant 0 : index
    %0 = vector.load %arg1[%c0, %c0_0] : memref<64x2048xbf16, #tpu.memory_space<vmem>>, vector<64x2048xbf16>
    %c0_1 = arith.constant 0 : index
    %c0_2 = arith.constant 0 : index
    %1 = vector.load %arg2[%c0_1, %c0_2] : memref<2048x256xbf16, #tpu.memory_space<vmem>>, vector<2048x256xbf16>
    %cst = arith.constant dense<0.000000e+00> : vector<64x256xf32>
    %2 = tpu.matmul %0, %1, %cst {dimension_numbers = #tpu.dot_dimension_numbers<[1], [0], [0], [1], [0, 0, 1, 1], [], []>} : vector<64x2048xbf16>, vector<2048x256xbf16>, vector<64x256xf32> -> vector<64x256xf32>
    %cst_3 = arith.constant dense<0.000000e+00> : vector<256xf32>
    %3 = vector.multi_reduction <add>, %2, %cst_3 [0] : vector<64x256xf32> to vector<256xf32>
    %4 = vector.shape_cast %3 : vector<256xf32> to vector<1x256xf32>
    %5 = arith.mulf %2, %2 : vector<64x256xf32>
    %cst_4 = arith.constant dense<0.000000e+00> : vector<256xf32>
    %6 = vector.multi_reduction <add>, %5, %cst_4 [0] : vector<64x256xf32> to vector<256xf32>
    %7 = vector.shape_cast %6 : vector<256xf32> to vector<1x256xf32>
    %8 = tpu.concatenate %4, %7 in 0 : vector<1x256xf32>, vector<1x256xf32> -> vector<2x256xf32>
    %c0_5 = arith.constant 0 : index
    %c0_6 = arith.constant 0 : index
    %c0_7 = arith.constant 0 : index
    %9 = vector.load %arg4[%c0_5, %c0_6, %c0_7] : memref<1x2x256xf32, #tpu.memory_space<vmem>>, vector<1x2x256xf32>
    %10 = vector.shape_cast %9 : vector<1x2x256xf32> to vector<2x256xf32>
    %11 = vector.shape_cast %8 : vector<2x256xf32> to vector<1x2x256xf32>
    tpu.vector_store %arg4[%c0_5, %c0_6, %c0_7], %11 {strides = array<i32>} : memref<1x2x256xf32, #tpu.memory_space<vmem>>, vector<1x2x256xf32>,
    %12 = arith.truncf %2 : vector<64x256xf32> to vector<64x256xbf16>
    %c0_8 = arith.constant 0 : index
    %c0_9 = arith.constant 0 : index
    %13 = vector.load %arg3[%c0_8, %c0_9] : memref<64x256xbf16, #tpu.memory_space<vmem>>, vector<64x256xbf16>
    tpu.vector_store %arg3[%c0_8, %c0_9], %12 {strides = array<i32>} : memref<64x256xbf16, #tpu.memory_space<vmem>>, vector<64x256xbf16>,
    return
  }
  func.func @transform_0(%arg0: i32) -> (i32, i32) {
    %c0_i32 = arith.constant 0 : i32
    %c0_i32_0 = arith.constant 0 : i32
    return %arg0, %c0_i32 : i32, i32
  }
  func.func @transform_1(%arg0: i32) -> (i32, i32) {
    %c0_i32 = arith.constant 0 : i32
    %c0_i32_0 = arith.constant 0 : i32
    %c0_i32_1 = arith.constant 0 : i32
    return %c0_i32, %c0_i32_0 : i32, i32
  }
  func.func @transform_2(%arg0: i32) -> (i32, i32) {
    %c0_i32 = arith.constant 0 : i32
    %c0_i32_0 = arith.constant 0 : i32
    return %arg0, %c0_i32 : i32, i32
  }
  func.func @transform_3(%arg0: i32) -> (i32, i32, i32) {
    %c0_i32 = arith.constant 0 : i32
    %c0_i32_0 = arith.constant 0 : i32
    %c0_i32_1 = arith.constant 0 : i32
    return %arg0, %c0_i32, %c0_i32_0 : i32, i32, i32
  }
}

module attributes {stable_mosaic.version = 11 : i64} {
  func.func @_affine_lrelu_kernel(%arg0: i32, %arg1: memref<64x256xbf16, #tpu.memory_space<vmem>>, %arg2: memref<1x256xf32, #tpu.memory_space<vmem>>, %arg3: memref<1x256xf32, #tpu.memory_space<vmem>>, %arg4: memref<64x256xbf16, #tpu.memory_space<vmem>>) attributes {dimension_semantics = [#tpu.dimension_semantics<parallel>], iteration_bounds = array<i64: 2>, scalar_prefetch = 0 : i64, scratch_operands = 0 : i64, tpu.core_type = #tpu.core_type<tc>, window_params = [{transform_indices = @transform_0, window_bounds = array<i64: 64, 256>}, {pipeline_mode = #tpu.pipeline_mode<synchronous>, transform_indices = @transform_1, window_bounds = array<i64: 1, 256>}, {pipeline_mode = #tpu.pipeline_mode<synchronous>, transform_indices = @transform_2, window_bounds = array<i64: 1, 256>}, {transform_indices = @transform_3, window_bounds = array<i64: 64, 256>}]} {
    %c0 = arith.constant 0 : index
    %c0_0 = arith.constant 0 : index
    %0 = vector.load %arg1[%c0, %c0_0] : memref<64x256xbf16, #tpu.memory_space<vmem>>, vector<64x256xbf16>
    %1 = arith.extf %0 : vector<64x256xbf16> to vector<64x256xf32>
    %c0_1 = arith.constant 0 : index
    %c0_2 = arith.constant 0 : index
    %2 = vector.load %arg2[%c0_1, %c0_2] : memref<1x256xf32, #tpu.memory_space<vmem>>, vector<1x256xf32>
    %3 = vector.broadcast %2 : vector<1x256xf32> to vector<64x256xf32>
    %4 = arith.mulf %1, %3 : vector<64x256xf32>
    %c0_3 = arith.constant 0 : index
    %c0_4 = arith.constant 0 : index
    %5 = vector.load %arg3[%c0_3, %c0_4] : memref<1x256xf32, #tpu.memory_space<vmem>>, vector<1x256xf32>
    %6 = vector.broadcast %5 : vector<1x256xf32> to vector<64x256xf32>
    %7 = arith.addf %4, %6 : vector<64x256xf32>
    %cst = arith.constant 0.000000e+00 : f32
    %8 = vector.broadcast %cst : f32 to vector<64x256xf32>
    %9 = arith.cmpf oge, %7, %8 : vector<64x256xf32>
    %cst_5 = arith.constant 2.000000e-01 : f32
    %10 = vector.broadcast %cst_5 : f32 to vector<64x256xf32>
    %11 = arith.mulf %10, %7 : vector<64x256xf32>
    %12 = arith.select %9, %7, %11 : vector<64x256xi1>, vector<64x256xf32>
    %13 = arith.truncf %12 : vector<64x256xf32> to vector<64x256xbf16>
    %c0_6 = arith.constant 0 : index
    %c0_7 = arith.constant 0 : index
    %14 = vector.load %arg4[%c0_6, %c0_7] : memref<64x256xbf16, #tpu.memory_space<vmem>>, vector<64x256xbf16>
    tpu.vector_store %arg4[%c0_6, %c0_7], %13 {strides = array<i32>} : memref<64x256xbf16, #tpu.memory_space<vmem>>, vector<64x256xbf16>,
    return
  }
  func.func @transform_0(%arg0: i32) -> (i32, i32) {
    %c0_i32 = arith.constant 0 : i32
    %c0_i32_0 = arith.constant 0 : i32
    return %arg0, %c0_i32 : i32, i32
  }
  func.func @transform_1(%arg0: i32) -> (i32, i32) {
    %c0_i32 = arith.constant 0 : i32
    %c0_i32_0 = arith.constant 0 : i32
    %c0_i32_1 = arith.constant 0 : i32
    return %c0_i32, %c0_i32_0 : i32, i32
  }
  func.func @transform_2(%arg0: i32) -> (i32, i32) {
    %c0_i32 = arith.constant 0 : i32
    %c0_i32_0 = arith.constant 0 : i32
    %c0_i32_1 = arith.constant 0 : i32
    return %c0_i32, %c0_i32_0 : i32, i32
  }
  func.func @transform_3(%arg0: i32) -> (i32, i32) {
    %c0_i32 = arith.constant 0 : i32
    %c0_i32_0 = arith.constant 0 : i32
    return %arg0, %c0_i32 : i32, i32
  }
}

module attributes {stable_mosaic.version = 11 : i64} {
  func.func @_conv_gemm_kernel(%arg0: i32, %arg1: memref<16x4096xbf16, #tpu.memory_space<vmem>>, %arg2: memref<4096x512xbf16, #tpu.memory_space<vmem>>, %arg3: memref<16x512xbf16, #tpu.memory_space<vmem>>, %arg4: memref<1x2x512xf32, #tpu.memory_space<vmem>>) attributes {dimension_semantics = [#tpu.dimension_semantics<parallel>], iteration_bounds = array<i64: 2>, scalar_prefetch = 0 : i64, scratch_operands = 0 : i64, tpu.core_type = #tpu.core_type<tc>, window_params = [{transform_indices = @transform_0, window_bounds = array<i64: 16, 4096>}, {pipeline_mode = #tpu.pipeline_mode<synchronous>, transform_indices = @transform_1, window_bounds = array<i64: 4096, 512>}, {transform_indices = @transform_2, window_bounds = array<i64: 16, 512>}, {transform_indices = @transform_3, window_bounds = array<i64: 1, 2, 512>}]} {
    %c0 = arith.constant 0 : index
    %c0_0 = arith.constant 0 : index
    %0 = vector.load %arg1[%c0, %c0_0] : memref<16x4096xbf16, #tpu.memory_space<vmem>>, vector<16x4096xbf16>
    %c0_1 = arith.constant 0 : index
    %c0_2 = arith.constant 0 : index
    %1 = vector.load %arg2[%c0_1, %c0_2] : memref<4096x512xbf16, #tpu.memory_space<vmem>>, vector<4096x512xbf16>
    %cst = arith.constant dense<0.000000e+00> : vector<16x512xf32>
    %2 = tpu.matmul %0, %1, %cst {dimension_numbers = #tpu.dot_dimension_numbers<[1], [0], [0], [1], [0, 0, 1, 1], [], []>} : vector<16x4096xbf16>, vector<4096x512xbf16>, vector<16x512xf32> -> vector<16x512xf32>
    %cst_3 = arith.constant dense<0.000000e+00> : vector<512xf32>
    %3 = vector.multi_reduction <add>, %2, %cst_3 [0] : vector<16x512xf32> to vector<512xf32>
    %4 = vector.shape_cast %3 : vector<512xf32> to vector<1x512xf32>
    %5 = arith.mulf %2, %2 : vector<16x512xf32>
    %cst_4 = arith.constant dense<0.000000e+00> : vector<512xf32>
    %6 = vector.multi_reduction <add>, %5, %cst_4 [0] : vector<16x512xf32> to vector<512xf32>
    %7 = vector.shape_cast %6 : vector<512xf32> to vector<1x512xf32>
    %8 = tpu.concatenate %4, %7 in 0 : vector<1x512xf32>, vector<1x512xf32> -> vector<2x512xf32>
    %c0_5 = arith.constant 0 : index
    %c0_6 = arith.constant 0 : index
    %c0_7 = arith.constant 0 : index
    %9 = vector.load %arg4[%c0_5, %c0_6, %c0_7] : memref<1x2x512xf32, #tpu.memory_space<vmem>>, vector<1x2x512xf32>
    %10 = vector.shape_cast %9 : vector<1x2x512xf32> to vector<2x512xf32>
    %11 = vector.shape_cast %8 : vector<2x512xf32> to vector<1x2x512xf32>
    tpu.vector_store %arg4[%c0_5, %c0_6, %c0_7], %11 {strides = array<i32>} : memref<1x2x512xf32, #tpu.memory_space<vmem>>, vector<1x2x512xf32>,
    %12 = arith.truncf %2 : vector<16x512xf32> to vector<16x512xbf16>
    %c0_8 = arith.constant 0 : index
    %c0_9 = arith.constant 0 : index
    %13 = vector.load %arg3[%c0_8, %c0_9] : memref<16x512xbf16, #tpu.memory_space<vmem>>, vector<16x512xbf16>
    tpu.vector_store %arg3[%c0_8, %c0_9], %12 {strides = array<i32>} : memref<16x512xbf16, #tpu.memory_space<vmem>>, vector<16x512xbf16>,
    return
  }
  func.func @transform_0(%arg0: i32) -> (i32, i32) {
    %c0_i32 = arith.constant 0 : i32
    %c0_i32_0 = arith.constant 0 : i32
    return %arg0, %c0_i32 : i32, i32
  }
  func.func @transform_1(%arg0: i32) -> (i32, i32) {
    %c0_i32 = arith.constant 0 : i32
    %c0_i32_0 = arith.constant 0 : i32
    %c0_i32_1 = arith.constant 0 : i32
    return %c0_i32, %c0_i32_0 : i32, i32
  }
  func.func @transform_2(%arg0: i32) -> (i32, i32) {
    %c0_i32 = arith.constant 0 : i32
    %c0_i32_0 = arith.constant 0 : i32
    return %arg0, %c0_i32 : i32, i32
  }
  func.func @transform_3(%arg0: i32) -> (i32, i32, i32) {
    %c0_i32 = arith.constant 0 : i32
    %c0_i32_0 = arith.constant 0 : i32
    %c0_i32_1 = arith.constant 0 : i32
    return %arg0, %c0_i32, %c0_i32_0 : i32, i32, i32
  }
}

module attributes {stable_mosaic.version = 11 : i64} {
  func.func @_affine_lrelu_kernel(%arg0: i32, %arg1: memref<16x512xbf16, #tpu.memory_space<vmem>>, %arg2: memref<1x512xf32, #tpu.memory_space<vmem>>, %arg3: memref<1x512xf32, #tpu.memory_space<vmem>>, %arg4: memref<16x512xbf16, #tpu.memory_space<vmem>>) attributes {dimension_semantics = [#tpu.dimension_semantics<parallel>], iteration_bounds = array<i64: 2>, scalar_prefetch = 0 : i64, scratch_operands = 0 : i64, tpu.core_type = #tpu.core_type<tc>, window_params = [{transform_indices = @transform_0, window_bounds = array<i64: 16, 512>}, {pipeline_mode = #tpu.pipeline_mode<synchronous>, transform_indices = @transform_1, window_bounds = array<i64: 1, 512>}, {pipeline_mode = #tpu.pipeline_mode<synchronous>, transform_indices = @transform_2, window_bounds = array<i64: 1, 512>}, {transform_indices = @transform_3, window_bounds = array<i64: 16, 512>}]} {
    %c0 = arith.constant 0 : index
    %c0_0 = arith.constant 0 : index
    %0 = vector.load %arg1[%c0, %c0_0] : memref<16x512xbf16, #tpu.memory_space<vmem>>, vector<16x512xbf16>
    %1 = arith.extf %0 : vector<16x512xbf16> to vector<16x512xf32>
    %c0_1 = arith.constant 0 : index
    %c0_2 = arith.constant 0 : index
    %2 = vector.load %arg2[%c0_1, %c0_2] : memref<1x512xf32, #tpu.memory_space<vmem>>, vector<1x512xf32>
    %3 = vector.broadcast %2 : vector<1x512xf32> to vector<16x512xf32>
    %4 = arith.mulf %1, %3 : vector<16x512xf32>
    %c0_3 = arith.constant 0 : index
    %c0_4 = arith.constant 0 : index
    %5 = vector.load %arg3[%c0_3, %c0_4] : memref<1x512xf32, #tpu.memory_space<vmem>>, vector<1x512xf32>
    %6 = vector.broadcast %5 : vector<1x512xf32> to vector<16x512xf32>
    %7 = arith.addf %4, %6 : vector<16x512xf32>
    %cst = arith.constant 0.000000e+00 : f32
    %8 = vector.broadcast %cst : f32 to vector<16x512xf32>
    %9 = arith.cmpf oge, %7, %8 : vector<16x512xf32>
    %cst_5 = arith.constant 2.000000e-01 : f32
    %10 = vector.broadcast %cst_5 : f32 to vector<16x512xf32>
    %11 = arith.mulf %10, %7 : vector<16x512xf32>
    %12 = arith.select %9, %7, %11 : vector<16x512xi1>, vector<16x512xf32>
    %13 = arith.truncf %12 : vector<16x512xf32> to vector<16x512xbf16>
    %c0_6 = arith.constant 0 : index
    %c0_7 = arith.constant 0 : index
    %14 = vector.load %arg4[%c0_6, %c0_7] : memref<16x512xbf16, #tpu.memory_space<vmem>>, vector<16x512xbf16>
    tpu.vector_store %arg4[%c0_6, %c0_7], %13 {strides = array<i32>} : memref<16x512xbf16, #tpu.memory_space<vmem>>, vector<16x512xbf16>,
    return
  }
  func.func @transform_0(%arg0: i32) -> (i32, i32) {
    %c0_i32 = arith.constant 0 : i32
    %c0_i32_0 = arith.constant 0 : i32
    return %arg0, %c0_i32 : i32, i32
  }
  func.func @transform_1(%arg0: i32) -> (i32, i32) {
    %c0_i32 = arith.constant 0 : i32
    %c0_i32_0 = arith.constant 0 : i32
    %c0_i32_1 = arith.constant 0 : i32
    return %c0_i32, %c0_i32_0 : i32, i32
  }
  func.func @transform_2(%arg0: i32) -> (i32, i32) {
    %c0_i32 = arith.constant 0 : i32
    %c0_i32_0 = arith.constant 0 : i32
    %c0_i32_1 = arith.constant 0 : i32
    return %c0_i32, %c0_i32_0 : i32, i32
  }
  func.func @transform_3(%arg0: i32) -> (i32, i32) {
    %c0_i32 = arith.constant 0 : i32
    %c0_i32_0 = arith.constant 0 : i32
    return %arg0, %c0_i32 : i32, i32
  }
}

module attributes {stable_mosaic.version = 11 : i64} {
  func.func @_head_kernel(%arg0: i32, %arg1: memref<2x8192xbf16, #tpu.memory_space<vmem>>, %arg2: memref<1x8192xbf16, #tpu.memory_space<vmem>>, %arg3: memref<2x1xf32, #tpu.memory_space<vmem>>) attributes {dimension_semantics = [#tpu.dimension_semantics<arbitrary>], iteration_bounds = array<i64: 1>, scalar_prefetch = 0 : i64, scratch_operands = 0 : i64, tpu.core_type = #tpu.core_type<tc>, window_params = [{pipeline_mode = #tpu.pipeline_mode<synchronous>, transform_indices = @transform_0, window_bounds = array<i64: 2, 8192>}, {pipeline_mode = #tpu.pipeline_mode<synchronous>, transform_indices = @transform_1, window_bounds = array<i64: 1, 8192>}, {pipeline_mode = #tpu.pipeline_mode<synchronous>, transform_indices = @transform_2, window_bounds = array<i64: 2, 1>}]} {
    %c0 = arith.constant 0 : index
    %c0_0 = arith.constant 0 : index
    %0 = vector.load %arg1[%c0, %c0_0] : memref<2x8192xbf16, #tpu.memory_space<vmem>>, vector<2x8192xbf16>
    %1 = arith.extf %0 : vector<2x8192xbf16> to vector<2x8192xf32>
    %c0_1 = arith.constant 0 : index
    %c0_2 = arith.constant 0 : index
    %2 = vector.load %arg2[%c0_1, %c0_2] : memref<1x8192xbf16, #tpu.memory_space<vmem>>, vector<1x8192xbf16>
    %3 = arith.extf %2 : vector<1x8192xbf16> to vector<1x8192xf32>
    %4 = vector.broadcast %3 : vector<1x8192xf32> to vector<2x8192xf32>
    %5 = arith.mulf %1, %4 : vector<2x8192xf32>
    %cst = arith.constant dense<0.000000e+00> : vector<2xf32>
    %6 = vector.multi_reduction <add>, %5, %cst [1] : vector<2x8192xf32> to vector<2xf32>
    %7 = vector.shape_cast %6 : vector<2xf32> to vector<2x1xf32>
    %cst_3 = arith.constant 0.000000e+00 : f32
    %8 = vector.broadcast %cst_3 : f32 to vector<2x1xf32>
    %9 = arith.subf %8, %7 : vector<2x1xf32>
    %10 = math.exp %9 : vector<2x1xf32>
    %cst_4 = arith.constant 1.000000e+00 : f32
    %11 = vector.broadcast %cst_4 : f32 to vector<2x1xf32>
    %12 = arith.addf %11, %10 : vector<2x1xf32>
    %cst_5 = arith.constant 1.000000e+00 : f32
    %13 = vector.broadcast %cst_5 : f32 to vector<2x1xf32>
    %14 = arith.divf %13, %12 : vector<2x1xf32>
    %c0_6 = arith.constant 0 : index
    %c0_7 = arith.constant 0 : index
    %15 = vector.load %arg3[%c0_6, %c0_7] : memref<2x1xf32, #tpu.memory_space<vmem>>, vector<2x1xf32>
    tpu.vector_store %arg3[%c0_6, %c0_7], %14 {strides = array<i32>} : memref<2x1xf32, #tpu.memory_space<vmem>>, vector<2x1xf32>,
    return
  }
  func.func @transform_0(%arg0: i32) -> (i32, i32) {
    %c0_i32 = arith.constant 0 : i32
    %c0_i32_0 = arith.constant 0 : i32
    %c0_i32_1 = arith.constant 0 : i32
    return %c0_i32, %c0_i32_0 : i32, i32
  }
  func.func @transform_1(%arg0: i32) -> (i32, i32) {
    %c0_i32 = arith.constant 0 : i32
    %c0_i32_0 = arith.constant 0 : i32
    %c0_i32_1 = arith.constant 0 : i32
    return %c0_i32, %c0_i32_0 : i32, i32
  }
  func.func @transform_2(%arg0: i32) -> (i32, i32) {
    %c0_i32 = arith.constant 0 : i32
    %c0_i32_0 = arith.constant 0 : i32
    %c0_i32_1 = arith.constant 0 : i32
    return %c0_i32, %c0_i32_0 : i32, i32
  }
}

</mosaic_0001>

<bundles_post_ra>
// kernel: discriminator_forward.8
= control target key start
LH: loop header
LB: loop body
LE: loop exit
PB: predicated region body
PF: predicated region fallthrough
CT: control target
= control target key end

     0   :  { %s1924_s9 = smov 0   ;;  %s2064_s0 = inlined_call_operand.vmem [shape: bf16[2048,48], index: 0, kind: input, shape index: {}]   ;;  %s2065_s1 = inlined_call_operand.vmem [shape: bf16[48,128], index: 1, kind: input, shape index: {}]   ;;  %s2066_s2 = inlined_call_operand.vmem [shape: bf16[2048,128], index: 2, kind: output, shape index: {}]  }
   0x1 LB: > { %s1350_s10 = sadd.s32 4294967295, %s1907_s9   ;;  %p1354_p0 = scmp.ge.s32.totalorder %s1907_s9, 1  ;;  %s1907_s9 = sphi %s1924_s9, %s12_s9  }
   0x2   : > { %p113_p1 = scmp.lt.s32.totalorder %s1907_s9, 5 }
   0x4   : > { %p114_p2 = pnand %p1354_p0, %p113_p1 }
   0x5   : > { %v1866_v0 = vld [vmem:[%s2065_s1] sm:$0xff] (!%p114_p2)   ;;  %s1355_s13 = sshll.u32 (!%p114_p2), %s1350_s10, 6  ;;  %v1867_v1 = vld [vmem:[%s2065_s1 + $0x8] sm:$0xff] (!%p114_p2)   ;;  %v1868_v2 = vld [vmem:[%s2065_s1 + $0x10] sm:$0xff] (!%p114_p2)   ;;  %vm396_vm0 = vcmask (!%p114_p2), 392192  }
   0x6   : > { %117 = sbr.rel (%p114_p2) target bundleno = 297 (0x129), region = 28  ;;  %p136_p3 = scmp.lt.s32.totalorder (!%p114_p2), %s1355_s13, 255  ;;  %1782 = vmatprep.subr.bf16.mxu0 (!%p114_p2), %v1866_v0  ;;  %1852 = vmatprep.subr.bf16.mxu1 (!%p114_p2), %v1866_v0 }
   0x7   : > { %1783 = vmatpush3.bf16.msra.mxu0 (!%p114_p2), %v1866_v0  ;;  %1855 = vmatpush3.bf16.msra.mxu1 (!%p114_p2), %v1866_v0 }
   0x8   : > { %1784 = vmatprep.subr.bf16.mxu0 (!%p114_p2), %v1867_v1  ;;  %1853 = vmatprep.subr.bf16.mxu1 (!%p114_p2), %v1867_v1 }
   0xb   : > { %1785 = vmatpush3.bf16.msra.mxu0 (!%p114_p2), %v1867_v1  ;;  %1856 = vmatpush3.bf16.msra.mxu1 (!%p114_p2), %v1867_v1 }
   0xc   : > { %1786 = vmatprep.subr.bf16.mxu0 (!%p114_p2), %v1868_v2  ;;  %1854 = vmatprep.subr.bf16.mxu1 (!%p114_p2), %v1868_v2 }
   0xd   : > { %s2068_s13 = smov (!%p136_p3, %s1355_s13), 255 }
   0xe   : > { %s1356_s18 = sshll.u32 %s2068_s13, 2 }
   0xf   : > { %s1949_s21 = scalar_lea.vmem %s2064_s0, %s1356_s18  ;;  %1787 = vmatpush3.bf16.msra.mxu0 %v1868_v2  ;;  %1857 = vmatpush3.bf16.msra.mxu1 %v1868_v2  ;;  %s2020_s24 = scalar_lea.vmem %s2066_s2, %s1356_s18 }
  0x10   : > { %v1869_v3 = vld [vmem:[%s1949_s21] sm:$0xff]   ;;  %v1871_v5 = vld [vmem:[%s1949_s21 + $0x8] sm:$0xff]   ;;  %v1873_v7 = vld [vmem:[%s1949_s21 + $0x10] sm:$0xff]  }
  0x11   : > { %v1870_v4 = vld [vmem:[%s1949_s21 + $0x80] sm:$0xff]   ;;  %1788 = vmatprep.mubr.msk.bf16.mxu0 %vm396_vm0, %v1869_v3  ;;  %v1872_v6 = vld [vmem:[%s1949_s21 + $0x88] sm:$0xff]   ;;  %v1874_v8 = vld [vmem:[%s1949_s21 + $0x90] sm:$0xff]  }
  0x12   : > { %1820 = vmatprep.mubr.msk.bf16.mxu1 %vm396_vm0, %v1870_v4  ;;  %1789 = vmatmul.mubr.msk.bf16.vlgmr.msra.gmra.mrb[0].mxu0 %vm396_vm0, %v1871_v5  ;;  %v1875_v9 = vld [vmem:[%s1949_s21 + $0x18] sm:$0xff]   ;;  %v1877_v11 = vld [vmem:[%s1949_s21 + $0x20] sm:$0xff]   ;;  %v1879_v13 = vld [vmem:[%s1949_s21 + $0x28] sm:$0xff]  }
  0x13   : > { %1821 = vmatmul.mubr.msk.bf16.vlgmr.msra.gmra.mrb[0].mxu1 %vm396_vm0, %v1872_v6  ;;  %1792 = vmatprep.mubr.msk.bf16.mxu0 %vm396_vm0, %v1873_v7  ;;  %v1876_v10 = vld [vmem:[%s1949_s21 + $0x98] sm:$0xff]   ;;  %v1878_v12 = vld [vmem:[%s1949_s21 + $0xa0] sm:$0xff]   ;;  %v1880_v14 = vld [vmem:[%s1949_s21 + $0xa8] sm:$0xff]  }
  0x14   : > { %1824 = vmatprep.mubr.msk.bf16.mxu1 %vm396_vm0, %v1874_v8  ;;  %v1881_v15 = vld [vmem:[%s1949_s21 + $0x30] sm:$0xff]   ;;  %v1883_v17 = vld [vmem:[%s1949_s21 + $0x38] sm:$0xff]   ;;  %v1885_v19 = vld [vmem:[%s1949_s21 + $0x40] sm:$0xff]  }
  0x15   : > { %v1882_v16 = vld [vmem:[%s1949_s21 + $0xb0] sm:$0xff]   ;;  %v1884_v18 = vld [vmem:[%s1949_s21 + $0xb8] sm:$0xff]   ;;  %v1886_v20 = vld [vmem:[%s1949_s21 + $0xc0] sm:$0xff]  }
  0x16   : > { %v1887_v21 = vld [vmem:[%s1949_s21 + $0x48] sm:$0xff]   ;;  %v1889_v23 = vld [vmem:[%s1949_s21 + $0x50] sm:$0xff]   ;;  %v1891_v25 = vld [vmem:[%s1949_s21 + $0x58] sm:$0xff]  }
  0x17   : > { %v1888_v22 = vld [vmem:[%s1949_s21 + $0xc8] sm:$0xff]   ;;  %v1890_v24 = vld [vmem:[%s1949_s21 + $0xd0] sm:$0xff]   ;;  %v1892_v26 = vld [vmem:[%s1949_s21 + $0xd8] sm:$0xff]  }
  0x18   : > { %v1893_v27 = vld [vmem:[%s1949_s21 + $0x60] sm:$0xff]   ;;  %v1895_v29 = vld [vmem:[%s1949_s21 + $0x68] sm:$0xff]   ;;  %v1897_v31 = vld [vmem:[%s1949_s21 + $0x70] sm:$0xff]  }
  0x19   : > { %v1894_v28 = vld [vmem:[%s1949_s21 + $0xe0] sm:$0xff]   ;;  %v1896_v30 = vld [vmem:[%s1949_s21 + $0xe8] sm:$0xff]   ;;  %v1898_v32 = vld [vmem:[%s1949_s21 + $0xf0] sm:$0xff]  }
  0x1a   : > { %1793 = vmatmul.mubr.msk.bf16.gmra.mrb[4].mxu0 %vm396_vm0, %v1875_v9  ;;  %v1899_v33 = vld [vmem:[%s1949_s21 + $0x78] sm:$0xff]  }
  0x1b   : > { %1825 = vmatmul.mubr.msk.bf16.gmra.mrb[4].mxu1 %vm396_vm0, %v1876_v10  ;;  %1796 = vmatprep.mubr.msk.bf16.mxu0 %vm396_vm0, %v1877_v11  ;;  %v1900_v34 = vld [vmem:[%s1949_s21 + $0xf8] sm:$0xff]  }
  0x1c   : > { %1828 = vmatprep.mubr.msk.bf16.mxu1 %vm396_vm0, %v1878_v12 }
  0x22   : > { %1797 = vmatmul.mubr.msk.bf16.gmra.mrb[8].mxu0 %vm396_vm0, %v1879_v13 }
  0x23   : > { %1829 = vmatmul.mubr.msk.bf16.gmra.mrb[8].mxu1 %vm396_vm0, %v1880_v14  ;;  %1800 = vmatprep.mubr.msk.bf16.mxu0 %vm396_vm0, %v1881_v15 }
  0x24   : > { %1832 = vmatprep.mubr.msk.bf16.mxu1 %vm396_vm0, %v1882_v16 }
  0x2a   : > { %1801 = vmatmul.mubr.msk.bf16.gmra.mrb[12].mxu0 %vm396_vm0, %v1883_v17 }
  0x2b   : > { %1833 = vmatmul.mubr.msk.bf16.gmra.mrb[12].mxu1 %vm396_vm0, %v1884_v18  ;;  %1804 = vmatprep.mubr.msk.bf16.mxu0 %vm396_vm0, %v1885_v19 }
  0x2c   : > { %1836 = vmatprep.mubr.msk.bf16.mxu1 %vm396_vm0, %v1886_v20 }
  0x32   : > { %1805 = vmatmul.mubr.msk.bf16.gmra.mrb[16].mxu0 %vm396_vm0, %v1887_v21 }
  0x33   : > { %1837 = vmatmul.mubr.msk.bf16.gmra.mrb[16].mxu1 %vm396_vm0, %v1888_v22  ;;  %1808 = vmatprep.mubr.msk.bf16.mxu0 %vm396_vm0, %v1889_v23 }
  0x34   : > { %1840 = vmatprep.mubr.msk.bf16.mxu1 %vm396_vm0, %v1890_v24 }
  0x3a   : > { %1809 = vmatmul.mubr.msk.bf16.gmra.mrb[20].mxu0 %vm396_vm0, %v1891_v25 }
  0x3b   : > { %1841 = vmatmul.mubr.msk.bf16.gmra.mrb[20].mxu1 %vm396_vm0, %v1892_v26  ;;  %1812 = vmatprep.mubr.msk.bf16.mxu0 %vm396_vm0, %v1893_v27 }
  0x3c   : > { %1844 = vmatprep.mubr.msk.bf16.mxu1 %vm396_vm0, %v1894_v28 }
  0x42   : > { %1813 = vmatmul.mubr.msk.bf16.gmra.mrb[24].mxu0 %vm396_vm0, %v1895_v29 }
  0x43   : > { %1845 = vmatmul.mubr.msk.bf16.gmra.mrb[24].mxu1 %vm396_vm0, %v1896_v30  ;;  %1816 = vmatprep.mubr.msk.bf16.mxu0 %vm396_vm0, %v1897_v31 }
  0x44   : > { %1848 = vmatprep.mubr.msk.bf16.mxu1 %vm396_vm0, %v1898_v32 }
  0x4a   : > { %1817 = vmatmul.mubr.msk.bf16.gmra.mrb[28].mxu0 %vm396_vm0, %v1899_v33 }
  0x4b   : > { %1849 = vmatmul.mubr.msk.bf16.gmra.mrb[28].mxu1 %vm396_vm0, %v1900_v34 }
  0xe5   : > { %v1790_v35 = vpop.f32.mrb[0].mxu0 }
  0xe6   : > { %v1822_v36 = vpop.f32.mrb[0].mxu1  ;;  %vm784_vm1 = vcmp.ge.f32.partialorder %v1790_v35, 0.0  ;;  %v848_v37 = vmul.f32 0.2, %v1790_v35  ;;  %v527_v39 = vpop.f32.mrb[1].mxu0 }
  0xe7   : > { %v880_v38 = vmul.f32 0.2, %v1822_v36  ;;  %vm816_vm2 = vcmp.ge.f32.partialorder %v1822_v36, 0.0  ;;  %v655_v40 = vpop.f32.mrb[1].mxu1  ;;  %v846_v41 = vmul.f32 0.2, %v527_v39 }
  0xe8   : > { %v1791_v42 = vpop.f32.mrb[2].mxu0  ;;  %v1823_v43 = vpop.f32.mrb[2].mxu1  ;;  %v912_v44 = vsel %vm784_vm1, %v1790_v35, %v848_v37  ;;  %v878_v45 = vmul.f32 0.2, %v655_v40  ;;  %vm782_vm4 = vcmp.ge.f32.partialorder %v527_v39, 0.0  ;;  %vm814_vm6 = vcmp.ge.f32.partialorder %v655_v40, 0.0 }
  0xe9   : > { %vm785_vm3 = vcmp.ge.f32.partialorder %v1791_v42, 0.0  ;;  %v849_v46 = vmul.f32 0.2, %v1791_v42  ;;  %v944_v47 = vsel %vm816_vm2, %v1822_v36, %v880_v38  ;;  %vm817_vm5 = vcmp.ge.f32.partialorder %v1823_v43, 0.0  ;;  %v530_v49 = vpop.f32.mrb[3].mxu0  ;;  %v658_v50 = vpop.f32.mrb[3].mxu1 }
  0xea   : > { %v881_v48 = vmul.f32 0.2, %v1823_v43  ;;  %vm783_vm7 = vcmp.ge.f32.partialorder %v530_v49, 0.0  ;;  %v847_v52 = vmul.f32 0.2, %v530_v49  ;;  %vm815_vm8 = vcmp.ge.f32.partialorder %v658_v50, 0.0 }
  0xeb   : > { %v913_v51 = vsel %vm785_vm3, %v1791_v42, %v849_v46  ;;  %v879_v55 = vmul.f32 0.2, %v658_v50  ;;  %v910_v56 = vsel %vm782_vm4, %v527_v39, %v846_v41  ;;  %v942_v61 = vsel %vm814_vm6, %v655_v40, %v878_v45 }
  0xec   : > { %v1564_v53 = vpack.c.bf16 %v913_v51, %v912_v44  ;;  %v945_v54 = vsel %vm817_vm5, %v1823_v43, %v881_v48  ;;  %v911_v58 = vsel %vm783_vm7, %v530_v49, %v847_v52 }
  0xed   : > { %v1644_v57 = vpack.c.bf16 %v945_v54, %v944_v47  ;;  %v1794_v59 = vpop.f32.mrb[4].mxu0  ;;  %v1559_v62 = vpack.c.bf16 %v911_v58, %v910_v56  ;;  %v943_v63 = vsel %vm815_vm8, %v658_v50, %v879_v55 }
  0xee   : > { %v1826_v60 = vpop.f32.mrb[4].mxu1  ;;  %1716 = vst [vmem:[%s2020_s24 + $0x8] sm:$0xff] %v1564_v53   ;;  %v852_v0 = vmul.f32 0.2, %v1794_v59  ;;  %v543_v1 = vpop.f32.mrb[5].mxu0  ;;  %v1639_v3 = vpack.c.bf16 %v943_v63, %v942_v61  ;;  %vm788_vm9 = vcmp.ge.f32.partialorder %v1794_v59, 0.0 }
  0xef   : > { %v671_v2 = vpop.f32.mrb[5].mxu1  ;;  %1732 = vst [vmem:[%s2020_s24 + $0x88] sm:$0xff] %v1644_v57   ;;  %v884_v4 = vmul.f32 0.2, %v1826_v60  ;;  %v1795_v5 = vpop.f32.mrb[6].mxu0  ;;  %1560 = vst [vmem:[%s2020_s24] sm:$0xff] %v1559_v62   ;;  %vm820_vm10 = vcmp.ge.f32.partialorder %v1826_v60, 0.0 }
  0xf0   : > { %v1827_v6 = vpop.f32.mrb[6].mxu1  ;;  %v850_v7 = vmul.f32 0.2, %v543_v1  ;;  %v882_v8 = vmul.f32 0.2, %v671_v2  ;;  %v546_v9 = vpop.f32.mrb[7].mxu0  ;;  %v916_v12 = vsel %vm788_vm9, %v1794_v59, %v852_v0 }
  0xf1   : > { %1731 = vst [vmem:[%s2020_s24 + $0x80] sm:$0xff] %v1639_v3   ;;  %vm786_vm11 = vcmp.ge.f32.partialorder %v543_v1, 0.0  ;;  %vm789_vm12 = vcmp.ge.f32.partialorder %v1795_v5, 0.0  ;;  %v853_v10 = vmul.f32 0.2, %v1795_v5  ;;  %vm821_vm13 = vcmp.ge.f32.partialorder %v1827_v6, 0.0 }
  0xf2   : > { %v674_v11 = vpop.f32.mrb[7].mxu1  ;;  %vm818_vm14 = vcmp.ge.f32.partialorder %v671_v2, 0.0  ;;  %v885_v13 = vmul.f32 0.2, %v1827_v6  ;;  %vm787_vm15 = vcmp.ge.f32.partialorder %v546_v9, 0.0  ;;  %v948_v17 = vsel %vm820_vm10, %v1826_v60, %v884_v4 }
  0xf3   : > { %v917_v14 = vsel %vm789_vm12, %v1795_v5, %v853_v10  ;;  %v851_v15 = vmul.f32 0.2, %v546_v9  ;;  %vm819_vm0 = vcmp.ge.f32.partialorder %v674_v11, 0.0  ;;  %v883_v16 = vmul.f32 0.2, %v674_v11 }
  0xf4   : > { %v914_v18 = vsel %vm786_vm11, %v543_v1, %v850_v7  ;;  %v1574_v19 = vpack.c.bf16 %v917_v14, %v916_v12  ;;  %v949_v20 = vsel %vm821_vm13, %v1827_v6, %v885_v13  ;;  %v946_v21 = vsel %vm818_vm14, %v671_v2, %v882_v8 }
  0xf5   : > { %v1654_v22 = vpack.c.bf16 %v949_v20, %v948_v17  ;;  %v915_v23 = vsel %vm787_vm15, %v546_v9, %v851_v15  ;;  %v947_v24 = vsel %vm819_vm0, %v674_v11, %v883_v16  ;;  %v1798_v25 = vpop.f32.mrb[8].mxu0 }
  0xf6   : > { %v1830_v26 = vpop.f32.mrb[8].mxu1  ;;  %1718 = vst [vmem:[%s2020_s24 + $0x18] sm:$0xff] %v1574_v19   ;;  %v1569_v27 = vpack.c.bf16 %v915_v23, %v914_v18  ;;  %v1649_v28 = vpack.c.bf16 %v947_v24, %v946_v21  ;;  %vm792_vm1 = vcmp.ge.f32.partialorder %v1798_v25, 0.0  ;;  %v856_v29 = vmul.f32 0.2, %v1798_v25  ;;  %v559_v30 = vpop.f32.mrb[9].mxu0 }
  0xf7   : > { %v687_v31 = vpop.f32.mrb[9].mxu1  ;;  %1734 = vst [vmem:[%s2020_s24 + $0x98] sm:$0xff] %v1654_v22   ;;  %vm824_vm2 = vcmp.ge.f32.partialorder %v1830_v26, 0.0  ;;  %v888_v32 = vmul.f32 0.2, %v1830_v26  ;;  %v1799_v35 = vpop.f32.mrb[10].mxu0 }
  0xf8   : > { %1717 = vst [vmem:[%s2020_s24 + $0x10] sm:$0xff] %v1569_v27   ;;  %1733 = vst [vmem:[%s2020_s24 + $0x90] sm:$0xff] %v1649_v28   ;;  %v854_v33 = vmul.f32 0.2, %v559_v30  ;;  %v886_v34 = vmul.f32 0.2, %v687_v31  ;;  %v920_v37 = vsel %vm792_vm1, %v1798_v25, %v856_v29 }
  0xf9   : > { %v1831_v36 = vpop.f32.mrb[10].mxu1  ;;  %vm790_vm3 = vcmp.ge.f32.partialorder %v559_v30, 0.0  ;;  %vm793_vm4 = vcmp.ge.f32.partialorder %v1799_v35, 0.0  ;;  %v857_v38 = vmul.f32 0.2, %v1799_v35  ;;  %v562_v39 = vpop.f32.mrb[11].mxu0  ;;  %v952_v45 = vsel %vm824_vm2, %v1830_v26, %v888_v32 }
  0xfa   : > { %v690_v40 = vpop.f32.mrb[11].mxu1  ;;  %vm822_vm5 = vcmp.ge.f32.partialorder %v687_v31, 0.0  ;;  %vm825_vm6 = vcmp.ge.f32.partialorder %v1831_v36, 0.0  ;;  %v889_v41 = vmul.f32 0.2, %v1831_v36  ;;  %vm791_vm7 = vcmp.ge.f32.partialorder %v562_v39, 0.0 }
  0xfb   : > { %v921_v42 = vsel %vm793_vm4, %v1799_v35, %v857_v38  ;;  %v855_v43 = vmul.f32 0.2, %v562_v39  ;;  %vm823_vm8 = vcmp.ge.f32.partialorder %v690_v40, 0.0  ;;  %v887_v44 = vmul.f32 0.2, %v690_v40 }
  0xfc   : > { %v918_v46 = vsel %vm790_vm3, %v559_v30, %v854_v33  ;;  %v1584_v47 = vpack.c.bf16 %v921_v42, %v920_v37  ;;  %v953_v48 = vsel %vm825_vm6, %v1831_v36, %v889_v41  ;;  %v950_v49 = vsel %vm822_vm5, %v687_v31, %v886_v34 }
  0xfd   : > { %v1664_v50 = vpack.c.bf16 %v953_v48, %v952_v45  ;;  %v919_v51 = vsel %vm791_vm7, %v562_v39, %v855_v43  ;;  %v951_v52 = vsel %vm823_vm8, %v690_v40, %v887_v44  ;;  %v1802_v53 = vpop.f32.mrb[12].mxu0 }
  0xfe   : > { %v1834_v54 = vpop.f32.mrb[12].mxu1  ;;  %1720 = vst [vmem:[%s2020_s24 + $0x28] sm:$0xff] %v1584_v47   ;;  %v1579_v55 = vpack.c.bf16 %v919_v51, %v918_v46  ;;  %v1659_v56 = vpack.c.bf16 %v951_v52, %v950_v49  ;;  %vm796_vm9 = vcmp.ge.f32.partialorder %v1802_v53, 0.0  ;;  %v860_v57 = vmul.f32 0.2, %v1802_v53  ;;  %v575_v58 = vpop.f32.mrb[13].mxu0 }
  0xff   : > { %v703_v59 = vpop.f32.mrb[13].mxu1  ;;  %1736 = vst [vmem:[%s2020_s24 + $0xa8] sm:$0xff] %v1664_v50   ;;  %vm828_vm10 = vcmp.ge.f32.partialorder %v1834_v54, 0.0  ;;  %v892_v60 = vmul.f32 0.2, %v1834_v54  ;;  %v1803_v63 = vpop.f32.mrb[14].mxu0 }
 0x100   : > { %1719 = vst [vmem:[%s2020_s24 + $0x20] sm:$0xff] %v1579_v55   ;;  %1735 = vst [vmem:[%s2020_s24 + $0xa0] sm:$0xff] %v1659_v56   ;;  %v858_v61 = vmul.f32 0.2, %v575_v58  ;;  %v890_v62 = vmul.f32 0.2, %v703_v59  ;;  %v924_v1 = vsel %vm796_vm9, %v1802_v53, %v860_v57 }
 0x101   : > { %v1835_v0 = vpop.f32.mrb[14].mxu1  ;;  %vm794_vm11 = vcmp.ge.f32.partialorder %v575_v58, 0.0  ;;  %vm797_vm12 = vcmp.ge.f32.partialorder %v1803_v63, 0.0  ;;  %v861_v2 = vmul.f32 0.2, %v1803_v63  ;;  %v578_v3 = vpop.f32.mrb[15].mxu0  ;;  %v956_v9 = vsel %vm828_vm10, %v1834_v54, %v892_v60 }
 0x102   : > { %v706_v4 = vpop.f32.mrb[15].mxu1  ;;  %vm826_vm13 = vcmp.ge.f32.partialorder %v703_v59, 0.0  ;;  %vm829_vm14 = vcmp.ge.f32.partialorder %v1835_v0, 0.0  ;;  %v893_v5 = vmul.f32 0.2, %v1835_v0  ;;  %vm795_vm15 = vcmp.ge.f32.partialorder %v578_v3, 0.0 }
 0x103   : > { %v925_v6 = vsel %vm797_vm12, %v1803_v63, %v861_v2  ;;  %v859_v7 = vmul.f32 0.2, %v578_v3  ;;  %vm827_vm0 = vcmp.ge.f32.partialorder %v706_v4, 0.0  ;;  %v891_v8 = vmul.f32 0.2, %v706_v4 }
 0x104   : > { %v922_v10 = vsel %vm794_vm11, %v575_v58, %v858_v61  ;;  %v1594_v11 = vpack.c.bf16 %v925_v6, %v924_v1  ;;  %v957_v12 = vsel %vm829_vm14, %v1835_v0, %v893_v5  ;;  %v954_v13 = vsel %vm826_vm13, %v703_v59, %v890_v62 }
 0x105   : > { %v1674_v14 = vpack.c.bf16 %v957_v12, %v956_v9  ;;  %v923_v15 = vsel %vm795_vm15, %v578_v3, %v859_v7  ;;  %v955_v16 = vsel %vm827_vm0, %v706_v4, %v891_v8  ;;  %v1806_v17 = vpop.f32.mrb[16].mxu0 }
 0x106   : > { %v1838_v18 = vpop.f32.mrb[16].mxu1  ;;  %1722 = vst [vmem:[%s2020_s24 + $0x38] sm:$0xff] %v1594_v11   ;;  %v1589_v19 = vpack.c.bf16 %v923_v15, %v922_v10  ;;  %v1669_v20 = vpack.c.bf16 %v955_v16, %v954_v13  ;;  %vm800_vm1 = vcmp.ge.f32.partialorder %v1806_v17, 0.0  ;;  %v864_v21 = vmul.f32 0.2, %v1806_v17  ;;  %v591_v22 = vpop.f32.mrb[17].mxu0 }
 0x107   : > { %v719_v23 = vpop.f32.mrb[17].mxu1  ;;  %1738 = vst [vmem:[%s2020_s24 + $0xb8] sm:$0xff] %v1674_v14   ;;  %vm832_vm2 = vcmp.ge.f32.partialorder %v1838_v18, 0.0  ;;  %v896_v24 = vmul.f32 0.2, %v1838_v18  ;;  %v1807_v27 = vpop.f32.mrb[18].mxu0 }
 0x108   : > { %1721 = vst [vmem:[%s2020_s24 + $0x30] sm:$0xff] %v1589_v19   ;;  %1737 = vst [vmem:[%s2020_s24 + $0xb0] sm:$0xff] %v1669_v20   ;;  %v862_v25 = vmul.f32 0.2, %v591_v22  ;;  %v894_v26 = vmul.f32 0.2, %v719_v23  ;;  %v928_v29 = vsel %vm800_vm1, %v1806_v17, %v864_v21 }
 0x109   : > { %v1839_v28 = vpop.f32.mrb[18].mxu1  ;;  %vm798_vm3 = vcmp.ge.f32.partialorder %v591_v22, 0.0  ;;  %vm801_vm4 = vcmp.ge.f32.partialorder %v1807_v27, 0.0  ;;  %v865_v30 = vmul.f32 0.2, %v1807_v27  ;;  %v594_v31 = vpop.f32.mrb[19].mxu0  ;;  %v960_v37 = vsel %vm832_vm2, %v1838_v18, %v896_v24 }
 0x10a   : > { %v722_v32 = vpop.f32.mrb[19].mxu1  ;;  %vm830_vm5 = vcmp.ge.f32.partialorder %v719_v23, 0.0  ;;  %vm833_vm6 = vcmp.ge.f32.partialorder %v1839_v28, 0.0  ;;  %v897_v33 = vmul.f32 0.2, %v1839_v28  ;;  %vm799_vm7 = vcmp.ge.f32.partialorder %v594_v31, 0.0 }
 0x10b   : > { %v929_v34 = vsel %vm801_vm4, %v1807_v27, %v865_v30  ;;  %v863_v35 = vmul.f32 0.2, %v594_v31  ;;  %vm831_vm8 = vcmp.ge.f32.partialorder %v722_v32, 0.0  ;;  %v895_v36 = vmul.f32 0.2, %v722_v32 }
 0x10c   : > { %v926_v38 = vsel %vm798_vm3, %v591_v22, %v862_v25  ;;  %v1604_v39 = vpack.c.bf16 %v929_v34, %v928_v29  ;;  %v961_v40 = vsel %vm833_vm6, %v1839_v28, %v897_v33  ;;  %v958_v41 = vsel %vm830_vm5, %v719_v23, %v894_v26 }
 0x10d   : > { %v1684_v42 = vpack.c.bf16 %v961_v40, %v960_v37  ;;  %v927_v43 = vsel %vm799_vm7, %v594_v31, %v863_v35  ;;  %v959_v44 = vsel %vm831_vm8, %v722_v32, %v895_v36  ;;  %v1810_v45 = vpop.f32.mrb[20].mxu0 }
 0x10e   : > { %v1842_v46 = vpop.f32.mrb[20].mxu1  ;;  %1724 = vst [vmem:[%s2020_s24 + $0x48] sm:$0xff] %v1604_v39   ;;  %v1599_v47 = vpack.c.bf16 %v927_v43, %v926_v38  ;;  %v1679_v48 = vpack.c.bf16 %v959_v44, %v958_v41  ;;  %vm804_vm9 = vcmp.ge.f32.partialorder %v1810_v45, 0.0  ;;  %v868_v49 = vmul.f32 0.2, %v1810_v45  ;;  %v607_v50 = vpop.f32.mrb[21].mxu0 }
 0x10f   : > { %v735_v51 = vpop.f32.mrb[21].mxu1  ;;  %1740 = vst [vmem:[%s2020_s24 + $0xc8] sm:$0xff] %v1684_v42   ;;  %vm836_vm10 = vcmp.ge.f32.partialorder %v1842_v46, 0.0  ;;  %v900_v52 = vmul.f32 0.2, %v1842_v46  ;;  %v1811_v55 = vpop.f32.mrb[22].mxu0 }
 0x110   : > { %1723 = vst [vmem:[%s2020_s24 + $0x40] sm:$0xff] %v1599_v47   ;;  %1739 = vst [vmem:[%s2020_s24 + $0xc0] sm:$0xff] %v1679_v48   ;;  %v866_v53 = vmul.f32 0.2, %v607_v50  ;;  %v898_v54 = vmul.f32 0.2, %v735_v51  ;;  %v932_v57 = vsel %vm804_vm9, %v1810_v45, %v868_v49 }
 0x111   : > { %v1843_v56 = vpop.f32.mrb[22].mxu1  ;;  %vm802_vm11 = vcmp.ge.f32.partialorder %v607_v50, 0.0  ;;  %vm805_vm12 = vcmp.ge.f32.partialorder %v1811_v55, 0.0  ;;  %v869_v58 = vmul.f32 0.2, %v1811_v55  ;;  %v610_v59 = vpop.f32.mrb[23].mxu0  ;;  %v964_v1 = vsel %vm836_vm10, %v1842_v46, %v900_v52 }
 0x112   : > { %v738_v60 = vpop.f32.mrb[23].mxu1  ;;  %vm834_vm13 = vcmp.ge.f32.partialorder %v735_v51, 0.0  ;;  %vm837_vm14 = vcmp.ge.f32.partialorder %v1843_v56, 0.0  ;;  %v901_v61 = vmul.f32 0.2, %v1843_v56  ;;  %vm803_vm15 = vcmp.ge.f32.partialorder %v610_v59, 0.0 }
 0x113   : > { %v933_v62 = vsel %vm805_vm12, %v1811_v55, %v869_v58  ;;  %v867_v63 = vmul.f32 0.2, %v610_v59  ;;  %vm835_vm0 = vcmp.ge.f32.partialorder %v738_v60, 0.0  ;;  %v899_v0 = vmul.f32 0.2, %v738_v60 }
 0x114   : > { %v930_v2 = vsel %vm802_vm11, %v607_v50, %v866_v53  ;;  %v1614_v3 = vpack.c.bf16 %v933_v62, %v932_v57  ;;  %v965_v4 = vsel %vm837_vm14, %v1843_v56, %v901_v61  ;;  %v962_v5 = vsel %vm834_vm13, %v735_v51, %v898_v54 }
 0x115   : > { %v1694_v6 = vpack.c.bf16 %v965_v4, %v964_v1  ;;  %v931_v7 = vsel %vm803_vm15, %v610_v59, %v867_v63  ;;  %v963_v8 = vsel %vm835_vm0, %v738_v60, %v899_v0  ;;  %v1814_v9 = vpop.f32.mrb[24].mxu0 }
 0x116   : > { %v1846_v10 = vpop.f32.mrb[24].mxu1  ;;  %1726 = vst [vmem:[%s2020_s24 + $0x58] sm:$0xff] %v1614_v3   ;;  %v1609_v11 = vpack.c.bf16 %v931_v7, %v930_v2  ;;  %v1689_v12 = vpack.c.bf16 %v963_v8, %v962_v5  ;;  %vm808_vm1 = vcmp.ge.f32.partialorder %v1814_v9, 0.0  ;;  %v872_v13 = vmul.f32 0.2, %v1814_v9  ;;  %v623_v14 = vpop.f32.mrb[25].mxu0 }
 0x117   : > { %v751_v15 = vpop.f32.mrb[25].mxu1  ;;  %1742 = vst [vmem:[%s2020_s24 + $0xd8] sm:$0xff] %v1694_v6   ;;  %vm840_vm2 = vcmp.ge.f32.partialorder %v1846_v10, 0.0  ;;  %v904_v16 = vmul.f32 0.2, %v1846_v10  ;;  %v1815_v19 = vpop.f32.mrb[26].mxu0 }
 0x118   : > { %1725 = vst [vmem:[%s2020_s24 + $0x50] sm:$0xff] %v1609_v11   ;;  %1741 = vst [vmem:[%s2020_s24 + $0xd0] sm:$0xff] %v1689_v12   ;;  %v870_v17 = vmul.f32 0.2, %v623_v14  ;;  %v902_v18 = vmul.f32 0.2, %v751_v15  ;;  %v936_v21 = vsel %vm808_vm1, %v1814_v9, %v872_v13 }
 0x119   : > { %v1847_v20 = vpop.f32.mrb[26].mxu1  ;;  %vm806_vm3 = vcmp.ge.f32.partialorder %v623_v14, 0.0  ;;  %vm809_vm4 = vcmp.ge.f32.partialorder %v1815_v19, 0.0  ;;  %v873_v22 = vmul.f32 0.2, %v1815_v19  ;;  %v626_v23 = vpop.f32.mrb[27].mxu0  ;;  %v968_v29 = vsel %vm840_vm2, %v1846_v10, %v904_v16 }
 0x11a   : > { %v754_v24 = vpop.f32.mrb[27].mxu1  ;;  %vm838_vm5 = vcmp.ge.f32.partialorder %v751_v15, 0.0  ;;  %vm841_vm6 = vcmp.ge.f32.partialorder %v1847_v20, 0.0  ;;  %v905_v25 = vmul.f32 0.2, %v1847_v20  ;;  %vm807_vm7 = vcmp.ge.f32.partialorder %v626_v23, 0.0 }
 0x11b   : > { %v937_v26 = vsel %vm809_vm4, %v1815_v19, %v873_v22  ;;  %v871_v27 = vmul.f32 0.2, %v626_v23  ;;  %vm839_vm8 = vcmp.ge.f32.partialorder %v754_v24, 0.0  ;;  %v903_v28 = vmul.f32 0.2, %v754_v24 }
 0x11c   : > { %v934_v30 = vsel %vm806_vm3, %v623_v14, %v870_v17  ;;  %v1624_v31 = vpack.c.bf16 %v937_v26, %v936_v21  ;;  %v969_v32 = vsel %vm841_vm6, %v1847_v20, %v905_v25  ;;  %v966_v33 = vsel %vm838_vm5, %v751_v15, %v902_v18 }
 0x11d   : > { %v1704_v34 = vpack.c.bf16 %v969_v32, %v968_v29  ;;  %v935_v35 = vsel %vm807_vm7, %v626_v23, %v871_v27  ;;  %v967_v36 = vsel %vm839_vm8, %v754_v24, %v903_v28  ;;  %v1818_v37 = vpop.f32.mrb[28].mxu0 }
 0x11e   : > { %v1850_v38 = vpop.f32.mrb[28].mxu1  ;;  %1728 = vst [vmem:[%s2020_s24 + $0x68] sm:$0xff] %v1624_v31   ;;  %v1619_v39 = vpack.c.bf16 %v935_v35, %v934_v30  ;;  %v1699_v40 = vpack.c.bf16 %v967_v36, %v966_v33  ;;  %vm812_vm9 = vcmp.ge.f32.partialorder %v1818_v37, 0.0  ;;  %v876_v41 = vmul.f32 0.2, %v1818_v37  ;;  %v639_v42 = vpop.f32.mrb[29].mxu0 }
 0x11f   : > { %v767_v43 = vpop.f32.mrb[29].mxu1  ;;  %1744 = vst [vmem:[%s2020_s24 + $0xe8] sm:$0xff] %v1704_v34   ;;  %vm844_vm10 = vcmp.ge.f32.partialorder %v1850_v38, 0.0  ;;  %v908_v44 = vmul.f32 0.2, %v1850_v38  ;;  %v1819_v47 = vpop.f32.mrb[30].mxu0 }
 0x120   : > { %1727 = vst [vmem:[%s2020_s24 + $0x60] sm:$0xff] %v1619_v39   ;;  %1743 = vst [vmem:[%s2020_s24 + $0xe0] sm:$0xff] %v1699_v40   ;;  %v874_v45 = vmul.f32 0.2, %v639_v42  ;;  %v906_v46 = vmul.f32 0.2, %v767_v43  ;;  %v940_v49 = vsel %vm812_vm9, %v1818_v37, %v876_v41 }
 0x121   : > { %v1851_v48 = vpop.f32.mrb[30].mxu1  ;;  %vm810_vm11 = vcmp.ge.f32.partialorder %v639_v42, 0.0  ;;  %vm813_vm12 = vcmp.ge.f32.partialorder %v1819_v47, 0.0  ;;  %v877_v50 = vmul.f32 0.2, %v1819_v47  ;;  %v642_v51 = vpop.f32.mrb[31].mxu0  ;;  %v972_v57 = vsel %vm844_vm10, %v1850_v38, %v908_v44 }
 0x122   : > { %v770_v52 = vpop.f32.mrb[31].mxu1  ;;  %vm842_vm13 = vcmp.ge.f32.partialorder %v767_v43, 0.0  ;;  %vm845_vm14 = vcmp.ge.f32.partialorder %v1851_v48, 0.0  ;;  %v909_v53 = vmul.f32 0.2, %v1851_v48  ;;  %vm811_vm15 = vcmp.ge.f32.partialorder %v642_v51, 0.0 }
 0x123   : > { %v941_v54 = vsel %vm813_vm12, %v1819_v47, %v877_v50  ;;  %v875_v55 = vmul.f32 0.2, %v642_v51  ;;  %vm843_vm0 = vcmp.ge.f32.partialorder %v770_v52, 0.0  ;;  %v907_v56 = vmul.f32 0.2, %v770_v52 }
 0x124   : > { %v938_v58 = vsel %vm810_vm11, %v639_v42, %v874_v45  ;;  %v1634_v59 = vpack.c.bf16 %v941_v54, %v940_v49  ;;  %v973_v60 = vsel %vm845_vm14, %v1851_v48, %v909_v53  ;;  %v970_v61 = vsel %vm842_vm13, %v767_v43, %v906_v46 }
 0x125   : > { %v1714_v62 = vpack.c.bf16 %v973_v60, %v972_v57  ;;  %v939_v63 = vsel %vm811_vm15, %v642_v51, %v875_v55  ;;  %v971_v0 = vsel %vm843_vm0, %v770_v52, %v907_v56 }
 0x126   : > { %1730 = vst [vmem:[%s2020_s24 + $0x78] sm:$0xff] %v1634_v59   ;;  %v1629_v1 = vpack.c.bf16 %v939_v63, %v938_v58  ;;  %v1709_v2 = vpack.c.bf16 %v971_v0, %v970_v61 }
 0x127   : > { %1746 = vst [vmem:[%s2020_s24 + $0xf8] sm:$0xff] %v1714_v62  }
 0x128   : > { %1729 = vst [vmem:[%s2020_s24 + $0x70] sm:$0xff] %v1629_v1   ;;  %1745 = vst [vmem:[%s2020_s24 + $0xf0] sm:$0xff] %v1709_v2  }
 0x129 PF: > { %s12_s9 = sadd.s32 1, %s1907_s9  }
 0x12a   : > { %p9_p4 = scmp.ge.s32.totalorder %s12_s9, 6  }
 0x12c   :  { %11 = sbr.rel (!%p9_p4) target bundleno = 1 (0x1), region = 58 }

// kernel: discriminator_forward.10
= control target key start
LH: loop header
LB: loop body
LE: loop exit
PB: predicated region body
PF: predicated region fallthrough
CT: control target
= control target key end

     0   :  { %s915_s12 = smov 0   ;;  %s1050_s0 = inlined_call_operand.vmem [shape: bf16[512,128], index: 0, kind: input, shape index: {}]   ;;  %s1051_s1 = inlined_call_operand.vmem [shape: f32[1,128], index: 1, kind: input, shape index: {}]   ;;  %s1052_s2 = inlined_call_operand.vmem [shape: f32[1,128], index: 2, kind: input, shape index: {}]   ;;  %s1053_s3 = inlined_call_operand.vmem [shape: bf16[512,128], index: 3, kind: output, shape index: {}]  }
   0x1 LB: > { %s628_s13 = sadd.s32 4294967295, %s893_s12   ;;  %p632_p0 = scmp.ge.s32.totalorder %s893_s12, 1  ;;  %s893_s12 = sphi %s915_s12, %s13_s12  }
   0x2   : > { %p138_p1 = scmp.lt.s32.totalorder %s893_s12, 3 }
   0x4   : > { %p139_p2 = pnand %p632_p0, %p138_p1 }
   0x5   : > { %s633_s14 = sshll.u32 (!%p139_p2), %s628_s13, 5  ;;  %v936_v0 = vld [vmem:[%s1051_s1] ss:$0 sm:$0xff] (!%p139_p2) }
   0x6   : > { %142 = sbr.rel (%p139_p2) target bundleno = 76 (0x4c), region = 32  ;;  %p163_p3 = scmp.lt.s32.totalorder (!%p139_p2), %s633_s14, 63  ;;  %v945_v9 = vld [vmem:[%s1052_s2] ss:$0 sm:$0xff] (!%p139_p2) }
   0xd   : > { %s1055_s14 = smov (!%p163_p3, %s633_s14), 63 }
   0xe   : > { %s634_s15 = sshll.u32 %s1055_s14, 2 }
   0xf   : > { %s931_s18 = scalar_lea.vmem %s1050_s0, %s634_s15  ;;  %s968_s25 = scalar_lea.vmem %s1053_s3, %s634_s15 }
  0x10   : > { %v706_v1 = vld [vmem:[%s931_s18] sm:$0xff]   ;;  %v849_v2 = vld [vmem:[%s931_s18 + $0x8] sm:$0xff]   ;;  %v850_v3 = vld [vmem:[%s931_s18 + $0x10] sm:$0xff]  }
  0x11   : > { %v707_v4 = vunpack.c.l.bf16 %v706_v1  ;;  %v708_v5 = vunpack.c.h.bf16 %v706_v1  ;;  %v711_v6 = vunpack.c.l.bf16 %v849_v2  ;;  %v712_v7 = vunpack.c.h.bf16 %v849_v2  ;;  %v851_v8 = vld [vmem:[%s931_s18 + $0x18] sm:$0xff]   ;;  %v852_v36 = vld [vmem:[%s931_s18 + $0x20] sm:$0xff]   ;;  %v853_v41 = vld [vmem:[%s931_s18 + $0x28] sm:$0xff]  }
  0x12   : > { %v715_v10 = vunpack.c.l.bf16 %v850_v3  ;;  %v716_v11 = vunpack.c.h.bf16 %v850_v3  ;;  %v719_v12 = vunpack.c.l.bf16 %v851_v8  ;;  %v720_v13 = vunpack.c.h.bf16 %v851_v8  ;;  %v854_v52 = vld [vmem:[%s931_s18 + $0x30] sm:$0xff]   ;;  %v855_v53 = vld [vmem:[%s931_s18 + $0x38] sm:$0xff]  }
  0x13   : > { %v245_v14 = vmul.f32 %v707_v4, %v936_v0  ;;  %v246_v15 = vmul.f32 %v708_v5, %v936_v0  ;;  %v247_v16 = vmul.f32 %v711_v6, %v936_v0  ;;  %v248_v17 = vmul.f32 %v712_v7, %v936_v0 }
  0x14   : > { %v249_v18 = vmul.f32 %v715_v10, %v936_v0  ;;  %v250_v19 = vmul.f32 %v716_v11, %v936_v0  ;;  %v251_v20 = vmul.f32 %v719_v12, %v936_v0  ;;  %v252_v21 = vmul.f32 %v720_v13, %v936_v0 }
  0x15   : > { %v284_v22 = vadd.f32 %v945_v9, %v245_v14  ;;  %v285_v23 = vadd.f32 %v945_v9, %v246_v15  ;;  %v286_v24 = vadd.f32 %v945_v9, %v247_v16  ;;  %v287_v25 = vadd.f32 %v945_v9, %v248_v17 }
  0x16   : > { %v288_v26 = vadd.f32 %v945_v9, %v249_v18  ;;  %v289_v27 = vadd.f32 %v945_v9, %v250_v19  ;;  %v290_v28 = vadd.f32 %v945_v9, %v251_v20  ;;  %v291_v29 = vadd.f32 %v945_v9, %v252_v21  ;;  %v856_v20 = vld [vmem:[%s931_s18 + $0x40] sm:$0xff]  }
  0x17   : > { %vm316_vm0 = vcmp.ge.f32.partialorder %v284_v22, 0.0  ;;  %vm317_vm1 = vcmp.ge.f32.partialorder %v285_v23, 0.0  ;;  %v348_v30 = vmul.f32 0.2, %v284_v22  ;;  %v349_v31 = vmul.f32 0.2, %v285_v23 }
  0x18   : > { %vm318_vm2 = vcmp.ge.f32.partialorder %v286_v24, 0.0  ;;  %vm319_vm3 = vcmp.ge.f32.partialorder %v287_v25, 0.0  ;;  %v350_v32 = vmul.f32 0.2, %v286_v24  ;;  %v351_v33 = vmul.f32 0.2, %v287_v25 }
  0x19   : > { %v380_v34 = vsel %vm316_vm0, %v284_v22, %v348_v30  ;;  %v381_v35 = vsel %vm317_vm1, %v285_v23, %v349_v31  ;;  %vm320_vm4 = vcmp.ge.f32.partialorder %v288_v26, 0.0  ;;  %vm321_vm5 = vcmp.ge.f32.partialorder %v289_v27, 0.0 }
  0x1a   : > { %v772_v37 = vpack.c.bf16 %v381_v35, %v380_v34  ;;  %v382_v38 = vsel %vm318_vm2, %v286_v24, %v350_v32  ;;  %v383_v39 = vsel %vm319_vm3, %v287_v25, %v351_v33  ;;  %v352_v40 = vmul.f32 0.2, %v288_v26  ;;  %v857_v24 = vld [vmem:[%s931_s18 + $0x48] sm:$0xff]  }
  0x1b   : > { %v777_v42 = vpack.c.bf16 %v383_v39, %v382_v38  ;;  %v353_v43 = vmul.f32 0.2, %v289_v27  ;;  %vm322_vm6 = vcmp.ge.f32.partialorder %v290_v28, 0.0  ;;  %vm323_vm7 = vcmp.ge.f32.partialorder %v291_v29, 0.0 }
  0x1c   : > { %773 = vst [vmem:[%s968_s25] sm:$0xff] %v772_v37   ;;  %v384_v44 = vsel %vm320_vm4, %v288_v26, %v352_v40  ;;  %v354_v45 = vmul.f32 0.2, %v290_v28  ;;  %v355_v46 = vmul.f32 0.2, %v291_v29  ;;  %v723_v47 = vunpack.c.l.bf16 %v852_v36 }
  0x1d   : > { %864 = vst [vmem:[%s968_s25 + $0x8] sm:$0xff] %v777_v42   ;;  %v385_v48 = vsel %vm321_vm5, %v289_v27, %v353_v43  ;;  %v724_v49 = vunpack.c.h.bf16 %v852_v36  ;;  %v727_v50 = vunpack.c.l.bf16 %v853_v41  ;;  %v728_v51 = vunpack.c.h.bf16 %v853_v41  ;;  %v858_v36 = vld [vmem:[%s931_s18 + $0x50] sm:$0xff]  }
  0x1e   : > { %v782_v54 = vpack.c.bf16 %v385_v48, %v384_v44  ;;  %v386_v55 = vsel %vm322_vm6, %v290_v28, %v354_v45  ;;  %v387_v56 = vsel %vm323_vm7, %v291_v29, %v355_v46  ;;  %v253_v57 = vmul.f32 %v723_v47, %v936_v0 }
  0x1f   : > { %v787_v58 = vpack.c.bf16 %v387_v56, %v386_v55  ;;  %v254_v59 = vmul.f32 %v724_v49, %v936_v0  ;;  %v255_v60 = vmul.f32 %v727_v50, %v936_v0  ;;  %v256_v61 = vmul.f32 %v728_v51, %v936_v0  ;;  %v859_v55 = vld [vmem:[%s931_s18 + $0x58] sm:$0xff]  }
  0x20   : > { %865 = vst [vmem:[%s968_s25 + $0x10] sm:$0xff] %v782_v54   ;;  %v292_v62 = vadd.f32 %v945_v9, %v253_v57  ;;  %v731_v63 = vunpack.c.l.bf16 %v854_v52  ;;  %v732_v1 = vunpack.c.h.bf16 %v854_v52  ;;  %v735_v2 = vunpack.c.l.bf16 %v855_v53 }
  0x21   : > { %866 = vst [vmem:[%s968_s25 + $0x18] sm:$0xff] %v787_v58   ;;  %v293_v3 = vadd.f32 %v945_v9, %v254_v59  ;;  %v294_v4 = vadd.f32 %v945_v9, %v255_v60  ;;  %v295_v5 = vadd.f32 %v945_v9, %v256_v61  ;;  %v736_v6 = vunpack.c.h.bf16 %v855_v53 }
  0x22   : > { %vm324_vm8 = vcmp.ge.f32.partialorder %v292_v62, 0.0  ;;  %v356_v7 = vmul.f32 0.2, %v292_v62  ;;  %v257_v8 = vmul.f32 %v731_v63, %v936_v0  ;;  %v258_v10 = vmul.f32 %v732_v1, %v936_v0  ;;  %v860_v1 = vld [vmem:[%s931_s18 + $0x60] sm:$0xff]  }
  0x23   : > { %vm325_vm9 = vcmp.ge.f32.partialorder %v293_v3, 0.0  ;;  %v357_v11 = vmul.f32 0.2, %v293_v3  ;;  %vm326_vm10 = vcmp.ge.f32.partialorder %v294_v4, 0.0  ;;  %vm327_vm11 = vcmp.ge.f32.partialorder %v295_v5, 0.0 }
  0x24   : > { %v388_v12 = vsel %vm324_vm8, %v292_v62, %v356_v7  ;;  %v358_v13 = vmul.f32 0.2, %v294_v4  ;;  %v359_v14 = vmul.f32 0.2, %v295_v5  ;;  %v296_v15 = vadd.f32 %v945_v9, %v257_v8 }
  0x25   : > { %v389_v16 = vsel %vm325_vm9, %v293_v3, %v357_v11  ;;  %v297_v17 = vadd.f32 %v945_v9, %v258_v10  ;;  %v259_v18 = vmul.f32 %v735_v2, %v936_v0  ;;  %v260_v19 = vmul.f32 %v736_v6, %v936_v0  ;;  %v861_v6 = vld [vmem:[%s931_s18 + $0x68] sm:$0xff]  }
  0x26   : > { %v792_v21 = vpack.c.bf16 %v389_v16, %v388_v12  ;;  %v390_v22 = vsel %vm326_vm10, %v294_v4, %v358_v13  ;;  %v391_v23 = vsel %vm327_vm11, %v295_v5, %v359_v14  ;;  %vm328_vm12 = vcmp.ge.f32.partialorder %v296_v15, 0.0 }
  0x27   : > { %v797_v25 = vpack.c.bf16 %v391_v23, %v390_v22  ;;  %vm329_vm13 = vcmp.ge.f32.partialorder %v297_v17, 0.0  ;;  %v360_v26 = vmul.f32 0.2, %v296_v15  ;;  %v361_v27 = vmul.f32 0.2, %v297_v17  ;;  %v862_v22 = vld [vmem:[%s931_s18 + $0x70] sm:$0xff]  }
  0x28   : > { %867 = vst [vmem:[%s968_s25 + $0x20] sm:$0xff] %v792_v21   ;;  %v298_v28 = vadd.f32 %v945_v9, %v259_v18  ;;  %v299_v29 = vadd.f32 %v945_v9, %v260_v19  ;;  %v739_v30 = vunpack.c.l.bf16 %v856_v20  ;;  %v740_v31 = vunpack.c.h.bf16 %v856_v20 }
  0x29   : > { %868 = vst [vmem:[%s968_s25 + $0x28] sm:$0xff] %v797_v25   ;;  %v392_v32 = vsel %vm328_vm12, %v296_v15, %v360_v26  ;;  %v393_v33 = vsel %vm329_vm13, %v297_v17, %v361_v27  ;;  %v743_v34 = vunpack.c.l.bf16 %v857_v24  ;;  %v744_v35 = vunpack.c.h.bf16 %v857_v24 }
  0x2a   : > { %v802_v37 = vpack.c.bf16 %v393_v33, %v392_v32  ;;  %vm330_vm14 = vcmp.ge.f32.partialorder %v298_v28, 0.0  ;;  %vm331_vm15 = vcmp.ge.f32.partialorder %v299_v29, 0.0  ;;  %v362_v38 = vmul.f32 0.2, %v298_v28 }
  0x2b   : > { %v363_v39 = vmul.f32 0.2, %v299_v29  ;;  %v261_v40 = vmul.f32 %v739_v30, %v936_v0  ;;  %v262_v41 = vmul.f32 %v740_v31, %v936_v0  ;;  %v263_v42 = vmul.f32 %v743_v34, %v936_v0 }
  0x2c   : > { %869 = vst [vmem:[%s968_s25 + $0x30] sm:$0xff] %v802_v37   ;;  %v394_v43 = vsel %vm330_vm14, %v298_v28, %v362_v38  ;;  %v264_v44 = vmul.f32 %v744_v35, %v936_v0  ;;  %v747_v45 = vunpack.c.l.bf16 %v858_v36  ;;  %v748_v46 = vunpack.c.h.bf16 %v858_v36 }
  0x2d   : > { %v395_v47 = vsel %vm331_vm15, %v299_v29, %v363_v39  ;;  %v300_v48 = vadd.f32 %v945_v9, %v261_v40  ;;  %v301_v49 = vadd.f32 %v945_v9, %v262_v41  ;;  %v302_v50 = vadd.f32 %v945_v9, %v263_v42  ;;  %v863_v41 = vld [vmem:[%s931_s18 + $0x78] sm:$0xff]  }
  0x2e   : > { %v807_v51 = vpack.c.bf16 %v395_v47, %v394_v43  ;;  %v303_v52 = vadd.f32 %v945_v9, %v264_v44  ;;  %v265_v53 = vmul.f32 %v747_v45, %v936_v0  ;;  %v266_v54 = vmul.f32 %v748_v46, %v936_v0 }
  0x2f   : > { %vm332_vm0 = vcmp.ge.f32.partialorder %v300_v48, 0.0  ;;  %vm333_vm1 = vcmp.ge.f32.partialorder %v301_v49, 0.0  ;;  %v364_v56 = vmul.f32 0.2, %v300_v48  ;;  %v365_v57 = vmul.f32 0.2, %v301_v49 }
  0x30   : > { %870 = vst [vmem:[%s968_s25 + $0x38] sm:$0xff] %v807_v51   ;;  %vm334_vm2 = vcmp.ge.f32.partialorder %v302_v50, 0.0  ;;  %vm335_vm3 = vcmp.ge.f32.partialorder %v303_v52, 0.0  ;;  %v366_v58 = vmul.f32 0.2, %v302_v50  ;;  %v304_v62 = vadd.f32 %v945_v9, %v265_v53 }
  0x31   : > { %v367_v59 = vmul.f32 0.2, %v303_v52  ;;  %v396_v60 = vsel %vm332_vm0, %v300_v48, %v364_v56  ;;  %v397_v61 = vsel %vm333_vm1, %v301_v49, %v365_v57  ;;  %v305_v63 = vadd.f32 %v945_v9, %v266_v54 }
  0x32   : > { %v812_v2 = vpack.c.bf16 %v397_v61, %v396_v60  ;;  %v398_v3 = vsel %vm334_vm2, %v302_v50, %v366_v58  ;;  %v751_v5 = vunpack.c.l.bf16 %v859_v55  ;;  %vm336_vm4 = vcmp.ge.f32.partialorder %v304_v62, 0.0 }
  0x33   : > { %v399_v4 = vsel %vm335_vm3, %v303_v52, %v367_v59  ;;  %vm337_vm5 = vcmp.ge.f32.partialorder %v305_v63, 0.0  ;;  %v368_v8 = vmul.f32 0.2, %v304_v62  ;;  %v369_v10 = vmul.f32 0.2, %v305_v63 }
  0x34   : > { %v817_v7 = vpack.c.bf16 %v399_v4, %v398_v3  ;;  %871 = vst [vmem:[%s968_s25 + $0x40] sm:$0xff] %v812_v2   ;;  %v752_v11 = vunpack.c.h.bf16 %v859_v55  ;;  %v267_v12 = vmul.f32 %v751_v5, %v936_v0  ;;  %v755_v13 = vunpack.c.l.bf16 %v860_v1 }
  0x35   : > { %v400_v14 = vsel %vm336_vm4, %v304_v62, %v368_v8  ;;  %v756_v15 = vunpack.c.h.bf16 %v860_v1  ;;  %v759_v16 = vunpack.c.l.bf16 %v861_v6  ;;  %v760_v17 = vunpack.c.h.bf16 %v861_v6 }
  0x36   : > { %872 = vst [vmem:[%s968_s25 + $0x48] sm:$0xff] %v817_v7   ;;  %v401_v18 = vsel %vm337_vm5, %v305_v63, %v369_v10  ;;  %v268_v19 = vmul.f32 %v752_v11, %v936_v0  ;;  %v306_v20 = vadd.f32 %v945_v9, %v267_v12  ;;  %v269_v21 = vmul.f32 %v755_v13, %v936_v0 }
  0x37   : > { %v822_v23 = vpack.c.bf16 %v401_v18, %v400_v14  ;;  %v270_v24 = vmul.f32 %v756_v15, %v936_v0  ;;  %v271_v25 = vmul.f32 %v759_v16, %v936_v0  ;;  %v272_v26 = vmul.f32 %v760_v17, %v936_v0 }
  0x38   : > { %v307_v27 = vadd.f32 %v945_v9, %v268_v19  ;;  %vm338_vm6 = vcmp.ge.f32.partialorder %v306_v20, 0.0  ;;  %v370_v28 = vmul.f32 0.2, %v306_v20  ;;  %v308_v29 = vadd.f32 %v945_v9, %v269_v21 }
  0x39   : > { %873 = vst [vmem:[%s968_s25 + $0x50] sm:$0xff] %v822_v23   ;;  %v309_v30 = vadd.f32 %v945_v9, %v270_v24  ;;  %v310_v31 = vadd.f32 %v945_v9, %v271_v25  ;;  %v311_v32 = vadd.f32 %v945_v9, %v272_v26  ;;  %v763_v33 = vunpack.c.l.bf16 %v862_v22 }
  0x3a   : > { %vm339_vm7 = vcmp.ge.f32.partialorder %v307_v27, 0.0  ;;  %v371_v34 = vmul.f32 0.2, %v307_v27  ;;  %v402_v35 = vsel %vm338_vm6, %v306_v20, %v370_v28  ;;  %vm340_vm8 = vcmp.ge.f32.partialorder %v308_v29, 0.0 }
  0x3b   : > { %vm341_vm9 = vcmp.ge.f32.partialorder %v309_v30, 0.0  ;;  %v372_v36 = vmul.f32 0.2, %v308_v29  ;;  %v373_v37 = vmul.f32 0.2, %v309_v30  ;;  %vm342_vm10 = vcmp.ge.f32.partialorder %v310_v31, 0.0 }
  0x3c   : > { %v403_v38 = vsel %vm339_vm7, %v307_v27, %v371_v34  ;;  %vm343_vm11 = vcmp.ge.f32.partialorder %v311_v32, 0.0  ;;  %v374_v39 = vmul.f32 0.2, %v310_v31  ;;  %v375_v40 = vmul.f32 0.2, %v311_v32 }
  0x3d   : > { %v827_v42 = vpack.c.bf16 %v403_v38, %v402_v35  ;;  %v404_v43 = vsel %vm340_vm8, %v308_v29, %v372_v36  ;;  %v405_v44 = vsel %vm341_vm9, %v309_v30, %v373_v37  ;;  %v764_v45 = vunpack.c.h.bf16 %v862_v22 }
  0x3e   : > { %v832_v46 = vpack.c.bf16 %v405_v44, %v404_v43  ;;  %v406_v47 = vsel %vm342_vm10, %v310_v31, %v374_v39  ;;  %v407_v48 = vsel %vm343_vm11, %v311_v32, %v375_v40  ;;  %v273_v49 = vmul.f32 %v763_v33, %v936_v0 }
  0x3f   : > { %874 = vst [vmem:[%s968_s25 + $0x58] sm:$0xff] %v827_v42   ;;  %v837_v50 = vpack.c.bf16 %v407_v48, %v406_v47  ;;  %v274_v51 = vmul.f32 %v764_v45, %v936_v0  ;;  %v767_v52 = vunpack.c.l.bf16 %v863_v41  ;;  %v768_v53 = vunpack.c.h.bf16 %v863_v41 }
  0x40   : > { %875 = vst [vmem:[%s968_s25 + $0x60] sm:$0xff] %v832_v46   ;;  %v312_v54 = vadd.f32 %v945_v9, %v273_v49 }
  0x41   : > { %876 = vst [vmem:[%s968_s25 + $0x68] sm:$0xff] %v837_v50   ;;  %v313_v55 = vadd.f32 %v945_v9, %v274_v51  ;;  %v275_v56 = vmul.f32 %v767_v52, %v936_v0  ;;  %v276_v57 = vmul.f32 %v768_v53, %v936_v0 }
  0x42   : > { %vm344_vm12 = vcmp.ge.f32.partialorder %v312_v54, 0.0  ;;  %v376_v58 = vmul.f32 0.2, %v312_v54 }
  0x43   : > { %vm345_vm13 = vcmp.ge.f32.partialorder %v313_v55, 0.0  ;;  %v377_v59 = vmul.f32 0.2, %v313_v55  ;;  %v314_v60 = vadd.f32 %v945_v9, %v275_v56  ;;  %v315_v61 = vadd.f32 %v945_v9, %v276_v57 }
  0x44   : > { %v408_v62 = vsel %vm344_vm12, %v312_v54, %v376_v58 }
  0x45   : > { %v409_v63 = vsel %vm345_vm13, %v313_v55, %v377_v59  ;;  %vm346_vm14 = vcmp.ge.f32.partialorder %v314_v60, 0.0  ;;  %vm347_vm15 = vcmp.ge.f32.partialorder %v315_v61, 0.0  ;;  %v378_v1 = vmul.f32 0.2, %v314_v60 }
  0x46   : > { %v842_v2 = vpack.c.bf16 %v409_v63, %v408_v62  ;;  %v379_v3 = vmul.f32 0.2, %v315_v61 }
  0x47   : > { %v410_v4 = vsel %vm346_vm14, %v314_v60, %v378_v1 }
  0x48   : > { %877 = vst [vmem:[%s968_s25 + $0x70] sm:$0xff] %v842_v2   ;;  %v411_v5 = vsel %vm347_vm15, %v315_v61, %v379_v3 }
  0x49   : > { %v847_v0 = vpack.c.bf16 %v411_v5, %v410_v4 }
  0x4b   : > { %878 = vst [vmem:[%s968_s25 + $0x78] sm:$0xff] %v847_v0  }
  0x4c PF: > { %s13_s12 = sadd.s32 1, %s893_s12  }
  0x4d   : > { %p10_p4 = scmp.ge.s32.totalorder %s13_s12, 4  }
  0x4f   :  { %12 = sbr.rel (!%p10_p4) target bundleno = 1 (0x1), region = 62 }

// kernel: discriminator_forward.9
= control target key start
LH: loop header
LB: loop body
LE: loop exit
PB: predicated region body
PF: predicated region fallthrough
CT: control target
= control target key end

     0   :  { %s3382_s12 = smov 0   ;;  %s3847_s0 = inlined_call_operand.vmem [shape: bf16[512,1024], index: 0, kind: input, shape index: {}]   ;;  %s3848_s1 = inlined_call_operand.vmem [shape: bf16[1024,128], index: 1, kind: input, shape index: {}]   ;;  %s3849_s2 = inlined_call_operand.vmem [shape: bf16[512,128], index: 2, kind: output, shape index: {0}]   ;;  %s3850_s3 = inlined_call_operand.vmem [shape: f32[2,2,128], index: 3, kind: output, shape index: {1}]  }
   0x1 LB: > { %s3388_s13 = sadd.s32 4294967295, %s3360_s12   ;;  %p2473_p0 = scmp.ge.s32.totalorder %s3360_s12, 1  ;;  %s3360_s12 = sphi %s3382_s12, %s14_s12  }
   0x2   : > { %p142_p1 = scmp.lt.s32.totalorder %s3360_s12, 3 }
   0x4   : > { %p143_p2 = pnand %p2473_p0, %p142_p1 }
   0x5   : > { %v3290_v0 = vld [vmem:[%s3848_s1 + $0x40] sm:$0xff] (!%p143_p2)   ;;  %v3294_v4 = vld [vmem:[%s3848_s1 + $0x48] sm:$0xff] (!%p143_p2)   ;;  %v3298_v8 = vld [vmem:[%s3848_s1 + $0x50] sm:$0xff] (!%p143_p2)   ;;  %s2474_s21 = sshll.u32 (!%p143_p2), %s3388_s13, 5  ;;  %p184_p4 = scmp.lt.s32.totalorder (!%p143_p2), %s3388_s13, 1  ;;  %vm2219_vm0 = vcmask (!%p143_p2), 1040384  }
   0x6   : > { %146 = sbr.rel (%p143_p2) target bundleno = 526 (0x20e), region = 28  ;;  %v3291_v1 = vld [vmem:[%s3848_s1 + $0xc0] sm:$0xff] (!%p143_p2)   ;;  %2834 = vmatprep.subr.bf16.mxu0 (!%p143_p2), %v3290_v0  ;;  %v3295_v5 = vld [vmem:[%s3848_s1 + $0xc8] sm:$0xff] (!%p143_p2)   ;;  %v3299_v9 = vld [vmem:[%s3848_s1 + $0xd0] sm:$0xff] (!%p143_p2)   ;;  %p172_p3 = scmp.lt.s32.totalorder (!%p143_p2), %s2474_s21, 63 }
   0x7   : > { %v3292_v2 = vld [vmem:[%s3848_s1] sm:$0xff] (!%p143_p2)   ;;  %2946 = vmatprep.subr.bf16.mxu1 (!%p143_p2), %v3291_v1  ;;  %v3296_v6 = vld [vmem:[%s3848_s1 + $0x8] sm:$0xff] (!%p143_p2)   ;;  %v3300_v10 = vld [vmem:[%s3848_s1 + $0x10] sm:$0xff] (!%p143_p2)  }
   0x8   : > { %v3293_v3 = vld [vmem:[%s3848_s1 + $0x80] sm:$0xff] (!%p143_p2)   ;;  %2835 = vmatpush3.bf16.msra.mxu0 (!%p143_p2), %v3292_v2  ;;  %v3297_v7 = vld [vmem:[%s3848_s1 + $0x88] sm:$0xff] (!%p143_p2)   ;;  %v3301_v11 = vld [vmem:[%s3848_s1 + $0x90] sm:$0xff] (!%p143_p2)  }
   0x9   : > { %2947 = vmatpush3.bf16.msra.mxu1 (!%p143_p2), %v3293_v3  ;;  %2836 = vmatprep.subr.bf16.mxu0 (!%p143_p2), %v3294_v4  ;;  %v3302_v12 = vld [vmem:[%s3848_s1 + $0x58] sm:$0xff] (!%p143_p2)   ;;  %v3306_v16 = vld [vmem:[%s3848_s1 + $0x60] sm:$0xff] (!%p143_p2)   ;;  %v3310_v20 = vld [vmem:[%s3848_s1 + $0x68] sm:$0xff] (!%p143_p2)  }
   0xa   : > { %2948 = vmatprep.subr.bf16.mxu1 (!%p143_p2), %v3295_v5  ;;  %v3303_v13 = vld [vmem:[%s3848_s1 + $0xd8] sm:$0xff] (!%p143_p2)   ;;  %v3307_v17 = vld [vmem:[%s3848_s1 + $0xe0] sm:$0xff] (!%p143_p2)   ;;  %v3311_v21 = vld [vmem:[%s3848_s1 + $0xe8] sm:$0xff] (!%p143_p2)  }
   0xb   : > { %v3304_v14 = vld [vmem:[%s3848_s1 + $0x18] sm:$0xff] (!%p143_p2)   ;;  %v3308_v18 = vld [vmem:[%s3848_s1 + $0x20] sm:$0xff] (!%p143_p2)   ;;  %v3312_v22 = vld [vmem:[%s3848_s1 + $0x28] sm:$0xff] (!%p143_p2)  }
   0xc   : > { %2837 = vmatpush3.bf16.msra.mxu0 (!%p143_p2), %v3296_v6  ;;  %v3305_v15 = vld [vmem:[%s3848_s1 + $0x98] sm:$0xff] (!%p143_p2)   ;;  %v3309_v19 = vld [vmem:[%s3848_s1 + $0xa0] sm:$0xff] (!%p143_p2)   ;;  %v3313_v23 = vld [vmem:[%s3848_s1 + $0xa8] sm:$0xff] (!%p143_p2)  }
   0xd   : > { %2949 = vmatpush3.bf16.msra.mxu1 %v3297_v7  ;;  %2838 = vmatprep.subr.bf16.mxu0 %v3298_v8  ;;  %s3852_s21 = smov (!%p172_p3, %s2474_s21), 63  ;;  %v3314_v24 = vld [vmem:[%s3848_s1 + $0x70] sm:$0xff]   ;;  %v3318_v28 = vld [vmem:[%s3848_s1 + $0x78] sm:$0xff]   ;;  %v3322_v40 = vld [vmem:[%s3848_s1 + $0x140] sm:$0xff]   ;;  %s3854_s13 = smov (!%p184_p4, %s3388_s13), 1 }
   0xe   : > { %2950 = vmatprep.subr.bf16.mxu1 %v3299_v9  ;;  %v3315_v25 = vld [vmem:[%s3848_s1 + $0xf0] sm:$0xff]   ;;  %s2706_s19 = sshll.u32 %s3852_s21, 5  ;;  %v3319_v29 = vld [vmem:[%s3848_s1 + $0xf8] sm:$0xff]   ;;  %v3323_v41 = vld [vmem:[%s3848_s1 + $0x100] sm:$0xff]  }
   0xf   : > { %v3316_v26 = vld [vmem:[%s3848_s1 + $0x30] sm:$0xff]   ;;  %s3489_s29 = scalar_lea.vmem %s3847_s0, %s2706_s19  ;;  %v3320_v30 = vld [vmem:[%s3848_s1 + $0x38] sm:$0xff]   ;;  %v3324_v42 = vld [vmem:[%s3848_s1 + $0x1c0] sm:$0xff]  }
  0x10   : > { %2839 = vmatpush3.bf16.msra.mxu0 %v3300_v10  ;;  %v3317_v27 = vld [vmem:[%s3848_s1 + $0xb0] sm:$0xff]   ;;  %v3321_v31 = vld [vmem:[%s3848_s1 + $0xb8] sm:$0xff]   ;;  %v189_v32 = vld [vmem:[%s3489_s29] sm:$0xff] }
  0x11   : > { %2951 = vmatpush3.bf16.msra.mxu1 %v3301_v11  ;;  %2840 = vmatprep.subr.bf16.mxu0 %v3302_v12  ;;  %v193_v33 = vld [vmem:[%s3489_s29 + $0x20] sm:$0xff]  ;;  %v190_v34 = vld [vmem:[%s3489_s29 + $0x8] sm:$0xff]  ;;  %v3330_v2 = vld [vmem:[%s3848_s1 + $0x150] sm:$0xff]  }
  0x12   : > { %2952 = vmatprep.subr.bf16.mxu1 %v3303_v13  ;;  %v2480_v35 = vcombine.low %v189_v32, %v193_v33  ;;  %v2481_v36 = vcombine.high %v189_v32, %v193_v33  ;;  %v194_v37 = vld [vmem:[%s3489_s29 + $0x28] sm:$0xff]  ;;  %v3325_v43 = vld [vmem:[%s3848_s1 + $0x180] sm:$0xff]   ;;  %v3331_v4 = vld [vmem:[%s3848_s1 + $0x110] sm:$0xff]  }
  0x13   : > { %v2482_v38 = vcombine.low %v190_v34, %v194_v37  ;;  %v2483_v39 = vcombine.high %v190_v34, %v194_v37  ;;  %v197_v44 = vld [vmem:[%s3489_s29 + $0x40] sm:$0xff]  ;;  %v198_v47 = vld [vmem:[%s3489_s29 + $0x48] sm:$0xff]  ;;  %v3332_v7 = vld [vmem:[%s3848_s1 + $0x1d0] sm:$0xff]  }
  0x14   : > { %2841 = vmatpush3.bf16.msra.mxu0 %v3304_v14  ;;  %1501 = vmatprep.mubr.bf16.mxu0 %v2481_v36  ;;  %v201_v45 = vld [vmem:[%s3489_s29 + $0x60] sm:$0xff]  ;;  %v202_v48 = vld [vmem:[%s3489_s29 + $0x68] sm:$0xff]  ;;  %v3333_v9 = vld [vmem:[%s3848_s1 + $0x190] sm:$0xff]  }
  0x15   : > { %2953 = vmatpush3.bf16.msra.mxu1 %v3305_v15  ;;  %2842 = vmatprep.subr.bf16.mxu0 %v3306_v16  ;;  %v2489_v46 = vcombine.high %v197_v44, %v201_v45  ;;  %v205_v49 = vld [vmem:[%s3489_s29 + $0x80] sm:$0xff]  ;;  %v2491_v50 = vcombine.high %v198_v47, %v202_v48  ;;  %v206_v52 = vld [vmem:[%s3489_s29 + $0x88] sm:$0xff]  ;;  %v2488_v54 = vcombine.low %v197_v44, %v201_v45  ;;  %v3334_v14 = vld [vmem:[%s3848_s1 + $0x158] sm:$0xff]  }
  0x16   : > { %2954 = vmatprep.subr.bf16.mxu1 %v3307_v17  ;;  %1662 = vmatprep.mubr.bf16.mxu1 %v2483_v39  ;;  %v209_v51 = vld [vmem:[%s3489_s29 + $0xa0] sm:$0xff]  ;;  %v210_v53 = vld [vmem:[%s3489_s29 + $0xa8] sm:$0xff]  ;;  %v2490_v56 = vcombine.low %v198_v47, %v202_v48  ;;  %v3335_v15 = vld [vmem:[%s3848_s1 + $0x118] sm:$0xff]  }
  0x17   : > { %v3326_v55 = vld [vmem:[%s3848_s1 + $0x148] sm:$0xff]   ;;  %v2497_v57 = vcombine.high %v205_v49, %v209_v51  ;;  %v2499_v59 = vcombine.high %v206_v52, %v210_v53  ;;  %v213_v62 = vld [vmem:[%s3489_s29 + $0xc0] sm:$0xff]  ;;  %v2496_v3 = vcombine.low %v205_v49, %v209_v51  ;;  %v2498_v5 = vcombine.low %v206_v52, %v210_v53  ;;  %v3336_v17 = vld [vmem:[%s3848_s1 + $0x1d8] sm:$0xff]  }
  0x18   : > { %2843 = vmatpush3.bf16.msra.mxu0 %v3308_v18  ;;  %v3327_v58 = vld [vmem:[%s3848_s1 + $0x108] sm:$0xff]   ;;  %v217_v63 = vld [vmem:[%s3489_s29 + $0xe0] sm:$0xff]  ;;  %v3347_v47 = vld [vmem:[%s3848_s1 + $0x130] sm:$0xff]  }
  0x19   : > { %2955 = vmatpush3.bf16.msra.mxu1 %v3309_v19  ;;  %2844 = vmatprep.subr.bf16.mxu0 %v3310_v20  ;;  %v3328_v60 = vld [vmem:[%s3848_s1 + $0x1c8] sm:$0xff]   ;;  %v2505_v6 = vcombine.high %v213_v62, %v217_v63  ;;  %v221_v10 = vld [vmem:[%s3489_s29 + $0x100] sm:$0xff]  ;;  %v2504_v16 = vcombine.low %v213_v62, %v217_v63  ;;  %v3337_v20 = vld [vmem:[%s3848_s1 + $0x198] sm:$0xff]  }
  0x1a   : > { %2956 = vmatprep.subr.bf16.mxu1 %v3311_v21  ;;  %v3329_v61 = vld [vmem:[%s3848_s1 + $0x188] sm:$0xff]   ;;  %v225_v11 = vld [vmem:[%s3489_s29 + $0x120] sm:$0xff]  ;;  %v3348_v48 = vld [vmem:[%s3848_s1 + $0x1f0] sm:$0xff]  }
  0x1b   : > { %v214_v0 = vld [vmem:[%s3489_s29 + $0xc8] sm:$0xff]  ;;  %v2513_v19 = vcombine.high %v221_v10, %v225_v11  ;;  %v3349_v49 = vld [vmem:[%s3848_s1 + $0x1b0] sm:$0xff]   ;;  %v249_v51 = vld [vmem:[%s3489_s29 + $0x1e0] sm:$0xff] }
  0x1c   : > { %2845 = vmatpush3.bf16.msra.mxu0 %v3312_v22  ;;  %v218_v1 = vld [vmem:[%s3489_s29 + $0xe8] sm:$0xff]  ;;  %v229_v22 = vld [vmem:[%s3489_s29 + $0x140] sm:$0xff] }
  0x1d   : > { %2957 = vmatpush3.bf16.msra.mxu1 %v3313_v23  ;;  %2846 = vmatprep.subr.bf16.mxu0 %v3314_v24  ;;  %v2507_v8 = vcombine.high %v214_v0, %v218_v1  ;;  %v222_v12 = vld [vmem:[%s3489_s29 + $0x108] sm:$0xff]  ;;  %v2506_v18 = vcombine.low %v214_v0, %v218_v1  ;;  %v233_v23 = vld [vmem:[%s3489_s29 + $0x160] sm:$0xff] }
  0x1e   : > { %2958 = vmatprep.subr.bf16.mxu1 %v3315_v25  ;;  %v226_v13 = vld [vmem:[%s3489_s29 + $0x128] sm:$0xff]  ;;  %v3338_v24 = vld [vmem:[%s3848_s1 + $0x160] sm:$0xff]   ;;  %v2521_v32 = vcombine.high %v229_v22, %v233_v23 }
  0x1f   : > { %v2515_v21 = vcombine.high %v222_v12, %v226_v13  ;;  %v230_v25 = vld [vmem:[%s3489_s29 + $0x148] sm:$0xff]  ;;  %v253_v62 = vld [vmem:[%s3489_s29 + $0x200] sm:$0xff] }
  0x20   : > { %2847 = vmatpush3.bf16.msra.mxu0 %v3316_v26  ;;  %v234_v26 = vld [vmem:[%s3489_s29 + $0x168] sm:$0xff]  ;;  %v257_v63 = vld [vmem:[%s3489_s29 + $0x220] sm:$0xff] }
  0x21   : > { %2959 = vmatpush3.bf16.msra.mxu1 %v3317_v27  ;;  %2848 = vmatprep.subr.bf16.mxu0 %v3318_v28  ;;  %v3339_v27 = vld [vmem:[%s3848_s1 + $0x120] sm:$0xff]   ;;  %v2523_v33 = vcombine.high %v230_v25, %v234_v26  ;;  %v3342_v34 = vld [vmem:[%s3848_s1 + $0x168] sm:$0xff]  }
  0x22   : > { %2960 = vmatprep.subr.bf16.mxu1 %v3319_v29  ;;  %v3340_v28 = vld [vmem:[%s3848_s1 + $0x1e0] sm:$0xff]   ;;  %v3343_v36 = vld [vmem:[%s3848_s1 + $0x128] sm:$0xff]  }
  0x23   : > { %v3341_v29 = vld [vmem:[%s3848_s1 + $0x1a0] sm:$0xff]   ;;  %v3344_v37 = vld [vmem:[%s3848_s1 + $0x1e8] sm:$0xff]  }
  0x24   : > { %2849 = vmatpush3.bf16.msra.mxu0 %v3320_v30  ;;  %v2512_v30 = vcombine.low %v221_v10, %v225_v11  ;;  %v3345_v39 = vld [vmem:[%s3848_s1 + $0x1a8] sm:$0xff]   ;;  %v2544_v10 = vcombine.low %v253_v62, %v257_v63 }
  0x25   : > { %2961 = vmatpush3.bf16.msra.mxu1 %v3321_v31  ;;  %3058 = vmatprep.subr.bf16.mxu0 %v3322_v40  ;;  %v2514_v31 = vcombine.low %v222_v12, %v226_v13  ;;  %v238_v40 = vld [vmem:[%s3489_s29 + $0x188] sm:$0xff] }
  0x26   : > { %3170 = vmatprep.subr.bf16.mxu1 %v3324_v42  ;;  %v2520_v42 = vcombine.low %v229_v22, %v233_v23  ;;  %v246_v52 = vld [vmem:[%s3489_s29 + $0x1c8] sm:$0xff]  ;;  %v277_v22 = vld [vmem:[%s3489_s29 + $0x2c0] sm:$0xff] }
  0x27   : > { %1502 = vmatmul.mubr.bf16.vlgmr.msra.gmra.mrb[0].mxu0 %v2480_v35  ;;  %v237_v35 = vld [vmem:[%s3489_s29 + $0x180] sm:$0xff]  ;;  %v250_v53 = vld [vmem:[%s3489_s29 + $0x1e8] sm:$0xff] }
  0x28   : > { %1663 = vmatmul.mubr.bf16.vlgmr.msra.gmra.mrb[0].mxu1 %v2482_v38  ;;  %3059 = vmatpush3.bf16.msra.mxu0 %v3323_v41  ;;  %v241_v38 = vld [vmem:[%s3489_s29 + $0x1a0] sm:$0xff]  ;;  %v242_v41 = vld [vmem:[%s3489_s29 + $0x1a8] sm:$0xff] }
  0x29   : > { %3171 = vmatpush3.bf16.msra.mxu1 %v3325_v43  ;;  %1509 = vmatprep.mubr.bf16.mxu0 %v2489_v46  ;;  %v2522_v43 = vcombine.low %v230_v25, %v234_v26  ;;  %v2529_v44 = vcombine.high %v237_v35, %v241_v38  ;;  %v2531_v45 = vcombine.high %v238_v40, %v242_v41  ;;  %v3346_v46 = vld [vmem:[%s3848_s1 + $0x170] sm:$0xff]   ;;  %v254_v0 = vld [vmem:[%s3489_s29 + $0x208] sm:$0xff]  ;;  %v281_v23 = vld [vmem:[%s3489_s29 + $0x2e0] sm:$0xff] }
  0x2a   : > { %1670 = vmatprep.mubr.bf16.mxu1 %v2491_v50  ;;  %3060 = vmatprep.subr.bf16.mxu0 %v3326_v55  ;;  %v245_v50 = vld [vmem:[%s3489_s29 + $0x1c0] sm:$0xff]  ;;  %v3350_v55 = vld [vmem:[%s3848_s1 + $0x178] sm:$0xff]   ;;  %v258_v1 = vld [vmem:[%s3489_s29 + $0x228] sm:$0xff] }
  0x2b   : > { %3172 = vmatprep.subr.bf16.mxu1 %v3328_v60  ;;  %v3352_v60 = vld [vmem:[%s3848_s1 + $0x1f8] sm:$0xff]   ;;  %v2546_v11 = vcombine.low %v254_v0, %v258_v1  ;;  %v282_v25 = vld [vmem:[%s3489_s29 + $0x2e8] sm:$0xff] }
  0x2c   : > { %3061 = vmatpush3.bf16.msra.mxu0 %v3327_v58  ;;  %v3351_v58 = vld [vmem:[%s3848_s1 + $0x138] sm:$0xff]  }
  0x2d   : > { %3173 = vmatpush3.bf16.msra.mxu1 %v3329_v61  ;;  %3062 = vmatprep.subr.bf16.mxu0 %v3330_v2  ;;  %v3353_v61 = vld [vmem:[%s3848_s1 + $0x1b8] sm:$0xff]   ;;  %v2536_v2 = vcombine.low %v245_v50, %v249_v51 }
  0x2e   : > { %3174 = vmatprep.subr.bf16.mxu1 %v3332_v7  ;;  %v265_v7 = vld [vmem:[%s3489_s29 + $0x260] sm:$0xff] }
  0x2f   : > { %1510 = vmatmul.mubr.bf16.gmra.mrb[4].mxu0 %v2488_v54  ;;  %v2528_v54 = vcombine.low %v237_v35, %v241_v38  ;;  %v293_v38 = vld [vmem:[%s3489_s29 + $0x340] sm:$0xff] }
  0x30   : > { %1671 = vmatmul.mubr.bf16.gmra.mrb[4].mxu1 %v2490_v56  ;;  %1517 = vmatprep.mubr.bf16.mxu0 %v2497_v57  ;;  %v2530_v56 = vcombine.low %v238_v40, %v242_v41  ;;  %v2537_v57 = vcombine.high %v245_v50, %v249_v51  ;;  %v294_v40 = vld [vmem:[%s3489_s29 + $0x348] sm:$0xff] }
  0x31   : > { %1678 = vmatprep.mubr.bf16.mxu1 %v2499_v59  ;;  %3063 = vmatpush3.bf16.msra.mxu0 %v3331_v4  ;;  %v2539_v59 = vcombine.high %v246_v52, %v250_v53  ;;  %v2545_v4 = vcombine.high %v253_v62, %v257_v63  ;;  %v298_v41 = vld [vmem:[%s3489_s29 + $0x368] sm:$0xff]  ;;  %v191_v62 = vld [vmem:[%s3489_s29 + $0x10] sm:$0xff] }
  0x32   : > { %3175 = vmatpush3.bf16.msra.mxu1 %v3333_v9  ;;  %3064 = vmatprep.subr.bf16.mxu0 %v3334_v14  ;;  %v266_v9 = vld [vmem:[%s3489_s29 + $0x268] sm:$0xff]  ;;  %v269_v14 = vld [vmem:[%s3489_s29 + $0x280] sm:$0xff]  ;;  %v2586_v51 = vcombine.low %v294_v40, %v298_v41  ;;  %v195_v63 = vld [vmem:[%s3489_s29 + $0x30] sm:$0xff] }
  0x33   : > { %3176 = vmatprep.subr.bf16.mxu1 %v3336_v17  ;;  %v274_v17 = vld [vmem:[%s3489_s29 + $0x2a8] sm:$0xff] }
  0x35   : > { %3065 = vmatpush3.bf16.msra.mxu0 %v3335_v15  ;;  %v273_v15 = vld [vmem:[%s3489_s29 + $0x2a0] sm:$0xff] }
  0x36   : > { %3177 = vmatpush3.bf16.msra.mxu1 %v3337_v20  ;;  %3066 = vmatprep.subr.bf16.mxu0 %v3338_v24  ;;  %v2561_v20 = vcombine.high %v269_v14, %v273_v15  ;;  %v278_v24 = vld [vmem:[%s3489_s29 + $0x2c8] sm:$0xff]  ;;  %v2560_v26 = vcombine.low %v269_v14, %v273_v15  ;;  %v207_v14 = vld [vmem:[%s3489_s29 + $0x90] sm:$0xff] }
  0x37   : > { %1518 = vmatmul.mubr.bf16.gmra.mrb[8].mxu0 %v2496_v3  ;;  %3178 = vmatprep.subr.bf16.mxu1 %v3340_v28  ;;  %v2538_v3 = vcombine.low %v246_v52, %v250_v53  ;;  %v2569_v28 = vcombine.high %v277_v22, %v281_v23  ;;  %v2570_v35 = vcombine.low %v278_v24, %v282_v25  ;;  %v211_v15 = vld [vmem:[%s3489_s29 + $0xb0] sm:$0xff] }
  0x38   : > { %1679 = vmatmul.mubr.bf16.gmra.mrb[8].mxu1 %v2498_v5  ;;  %1525 = vmatprep.mubr.bf16.mxu0 %v2505_v6  ;;  %v2547_v5 = vcombine.high %v254_v0, %v258_v1  ;;  %v261_v6 = vld [vmem:[%s3489_s29 + $0x240] sm:$0xff]  ;;  %v192_v0 = vld [vmem:[%s3489_s29 + $0x18] sm:$0xff] }
  0x39   : > { %1686 = vmatprep.mubr.bf16.mxu1 %v2507_v8  ;;  %3067 = vmatpush3.bf16.msra.mxu0 %v3339_v27  ;;  %v262_v8 = vld [vmem:[%s3489_s29 + $0x248] sm:$0xff]  ;;  %v2553_v12 = vcombine.high %v261_v6, %v265_v7  ;;  %v196_v1 = vld [vmem:[%s3489_s29 + $0x38] sm:$0xff] }
  0x3a   : > { %3179 = vmatpush3.bf16.msra.mxu1 %v3341_v29  ;;  %3068 = vmatprep.subr.bf16.mxu0 %v3342_v34  ;;  %v2555_v13 = vcombine.high %v262_v8, %v266_v9  ;;  %v2571_v29 = vcombine.high %v278_v24, %v282_v25  ;;  %v2568_v34 = vcombine.low %v277_v22, %v281_v23  ;;  %v215_v22 = vld [vmem:[%s3489_s29 + $0xd0] sm:$0xff]  ;;  %v216_v24 = vld [vmem:[%s3489_s29 + $0xd8] sm:$0xff] }
  0x3b   : > { %3180 = vmatprep.subr.bf16.mxu1 %v3344_v37  ;;  %v219_v23 = vld [vmem:[%s3489_s29 + $0xf0] sm:$0xff]  ;;  %v220_v25 = vld [vmem:[%s3489_s29 + $0xf8] sm:$0xff] }
  0x3d   : > { %3069 = vmatpush3.bf16.msra.mxu0 %v3343_v36 }
  0x3e   : > { %3181 = vmatpush3.bf16.msra.mxu1 %v3345_v39  ;;  %3070 = vmatprep.subr.bf16.mxu0 %v3346_v46  ;;  %v297_v39 = vld [vmem:[%s3489_s29 + $0x360] sm:$0xff] }
  0x3f   : > { %1526 = vmatmul.mubr.bf16.gmra.mrb[12].mxu0 %v2504_v16  ;;  %3182 = vmatprep.subr.bf16.mxu1 %v3348_v48  ;;  %v270_v16 = vld [vmem:[%s3489_s29 + $0x288] sm:$0xff]  ;;  %v301_v46 = vld [vmem:[%s3489_s29 + $0x380] sm:$0xff]  ;;  %v2584_v50 = vcombine.low %v293_v38, %v297_v39 }
  0x40   : > { %1687 = vmatmul.mubr.bf16.gmra.mrb[12].mxu1 %v2506_v18  ;;  %1533 = vmatprep.mubr.bf16.mxu0 %v2513_v19  ;;  %v2552_v18 = vcombine.low %v261_v6, %v265_v7  ;;  %v2554_v19 = vcombine.low %v262_v8, %v266_v9  ;;  %v2562_v27 = vcombine.low %v270_v16, %v274_v17  ;;  %v302_v48 = vld [vmem:[%s3489_s29 + $0x388] sm:$0xff]  ;;  %v199_v6 = vld [vmem:[%s3489_s29 + $0x50] sm:$0xff]  ;;  %v200_v8 = vld [vmem:[%s3489_s29 + $0x58] sm:$0xff] }
  0x41   : > { %1694 = vmatprep.mubr.bf16.mxu1 %v2515_v21  ;;  %3071 = vmatpush3.bf16.msra.mxu0 %v3347_v47  ;;  %v2563_v21 = vcombine.high %v270_v16, %v274_v17  ;;  %v305_v47 = vld [vmem:[%s3489_s29 + $0x3a0] sm:$0xff]  ;;  %v203_v7 = vld [vmem:[%s3489_s29 + $0x70] sm:$0xff]  ;;  %v204_v9 = vld [vmem:[%s3489_s29 + $0x78] sm:$0xff] }
  0x42   : > { %3183 = vmatpush3.bf16.msra.mxu1 %v3349_v49  ;;  %3072 = vmatprep.subr.bf16.mxu0 %v3350_v55  ;;  %v306_v49 = vld [vmem:[%s3489_s29 + $0x3a8] sm:$0xff]  ;;  %v2593_v52 = vcombine.high %v301_v46, %v305_v47  ;;  %v313_v55 = vld [vmem:[%s3489_s29 + $0x3e0] sm:$0xff]  ;;  %v208_v16 = vld [vmem:[%s3489_s29 + $0x98] sm:$0xff] }
  0x43   : > { %3184 = vmatprep.subr.bf16.mxu1 %v3352_v60  ;;  %v2595_v53 = vcombine.high %v302_v48, %v306_v49  ;;  %v212_v17 = vld [vmem:[%s3489_s29 + $0xb8] sm:$0xff] }
  0x45   : > { %3073 = vmatpush3.bf16.msra.mxu0 %v3351_v58  ;;  %v2592_v58 = vcombine.low %v301_v46, %v305_v47  ;;  %v239_v46 = vld [vmem:[%s3489_s29 + $0x190] sm:$0xff] }
  0x46   : > { %3185 = vmatpush3.bf16.msra.mxu1 %v3353_v61  ;;  %v243_v47 = vld [vmem:[%s3489_s29 + $0x1b0] sm:$0xff] }
  0x47   : > { %1534 = vmatmul.mubr.bf16.gmra.mrb[16].mxu0 %v2512_v30  ;;  %v285_v30 = vld [vmem:[%s3489_s29 + $0x300] sm:$0xff] }
  0x48   : > { %1695 = vmatmul.mubr.bf16.gmra.mrb[16].mxu1 %v2514_v31  ;;  %1541 = vmatprep.mubr.bf16.mxu0 %v2521_v32  ;;  %v289_v31 = vld [vmem:[%s3489_s29 + $0x320] sm:$0xff]  ;;  %v286_v32 = vld [vmem:[%s3489_s29 + $0x308] sm:$0xff] }
  0x49   : > { %1702 = vmatprep.mubr.bf16.mxu1 %v2523_v33  ;;  %v290_v33 = vld [vmem:[%s3489_s29 + $0x328] sm:$0xff]  ;;  %v2577_v36 = vcombine.high %v285_v30, %v289_v31 }
  0x4a   : > { %v2579_v37 = vcombine.high %v286_v32, %v290_v33 }
  0x4f   : > { %1542 = vmatmul.mubr.bf16.gmra.mrb[20].mxu0 %v2520_v42  ;;  %v2576_v42 = vcombine.low %v285_v30, %v289_v31  ;;  %v223_v30 = vld [vmem:[%s3489_s29 + $0x110] sm:$0xff] }
  0x50   : > { %1703 = vmatmul.mubr.bf16.gmra.mrb[20].mxu1 %v2522_v43  ;;  %1549 = vmatprep.mubr.bf16.mxu0 %v2529_v44  ;;  %v2578_v43 = vcombine.low %v286_v32, %v290_v33  ;;  %v2585_v44 = vcombine.high %v293_v38, %v297_v39  ;;  %v227_v31 = vld [vmem:[%s3489_s29 + $0x130] sm:$0xff]  ;;  %v224_v32 = vld [vmem:[%s3489_s29 + $0x118] sm:$0xff] }
  0x51   : > { %1710 = vmatprep.mubr.bf16.mxu1 %v2531_v45  ;;  %v2587_v45 = vcombine.high %v294_v40, %v298_v41  ;;  %v228_v33 = vld [vmem:[%s3489_s29 + $0x138] sm:$0xff]  ;;  %v231_v38 = vld [vmem:[%s3489_s29 + $0x150] sm:$0xff] }
  0x52   : > { %v235_v39 = vld [vmem:[%s3489_s29 + $0x170] sm:$0xff]  ;;  %v232_v40 = vld [vmem:[%s3489_s29 + $0x158] sm:$0xff] }
  0x53   : > { %v236_v41 = vld [vmem:[%s3489_s29 + $0x178] sm:$0xff] }
  0x57   : > { %1550 = vmatmul.mubr.bf16.gmra.mrb[24].mxu0 %v2528_v54  ;;  %v309_v54 = vld [vmem:[%s3489_s29 + $0x3c0] sm:$0xff] }
  0x58   : > { %1711 = vmatmul.mubr.bf16.gmra.mrb[24].mxu1 %v2530_v56  ;;  %1557 = vmatprep.mubr.bf16.mxu0 %v2537_v57  ;;  %v310_v56 = vld [vmem:[%s3489_s29 + $0x3c8] sm:$0xff]  ;;  %v2601_v60 = vcombine.high %v309_v54, %v313_v55 }
  0x59   : > { %1718 = vmatprep.mubr.bf16.mxu1 %v2539_v59  ;;  %v314_v57 = vld [vmem:[%s3489_s29 + $0x3e8] sm:$0xff]  ;;  %v2594_v59 = vcombine.low %v302_v48, %v306_v49  ;;  %v240_v48 = vld [vmem:[%s3489_s29 + $0x198] sm:$0xff] }
  0x5a   : > { %v2603_v61 = vcombine.high %v310_v56, %v314_v57  ;;  %v244_v49 = vld [vmem:[%s3489_s29 + $0x1b8] sm:$0xff] }
  0x5f   : > { %1558 = vmatmul.mubr.bf16.gmra.mrb[28].mxu0 %v2536_v2  ;;  %v2600_v2 = vcombine.low %v309_v54, %v313_v55  ;;  %v247_v54 = vld [vmem:[%s3489_s29 + $0x1d0] sm:$0xff] }
  0x60   : > { %1719 = vmatmul.mubr.bf16.gmra.mrb[28].mxu1 %v2538_v3  ;;  %1565 = vmatprep.mubr.bf16.mxu0 %v2545_v4  ;;  %v2602_v3 = vcombine.low %v310_v56, %v314_v57  ;;  %v2485_v4 = vcombine.high %v191_v62, %v195_v63  ;;  %v251_v55 = vld [vmem:[%s3489_s29 + $0x1f0] sm:$0xff]  ;;  %v248_v56 = vld [vmem:[%s3489_s29 + $0x1d8] sm:$0xff] }
  0x61   : > { %1726 = vmatprep.mubr.bf16.mxu1 %v2547_v5  ;;  %v2487_v5 = vcombine.high %v192_v0, %v196_v1  ;;  %v252_v57 = vld [vmem:[%s3489_s29 + $0x1f8] sm:$0xff] }
  0x67   : > { %1566 = vmatmul.mubr.bf16.gmra.mrb[32].mxu0 %v2544_v10  ;;  %v2484_v10 = vcombine.low %v191_v62, %v195_v63  ;;  %v255_v62 = vld [vmem:[%s3489_s29 + $0x210] sm:$0xff] }
  0x68   : > { %1727 = vmatmul.mubr.bf16.gmra.mrb[32].mxu1 %v2546_v11  ;;  %1573 = vmatprep.mubr.bf16.mxu0 %v2553_v12  ;;  %v2486_v11 = vcombine.low %v192_v0, %v196_v1  ;;  %v2493_v12 = vcombine.high %v199_v6, %v203_v7  ;;  %v259_v63 = vld [vmem:[%s3489_s29 + $0x230] sm:$0xff]  ;;  %v256_v0 = vld [vmem:[%s3489_s29 + $0x218] sm:$0xff] }
  0x69   : > { %1734 = vmatprep.mubr.bf16.mxu1 %v2555_v13  ;;  %v2495_v13 = vcombine.high %v200_v8, %v204_v9  ;;  %v260_v1 = vld [vmem:[%s3489_s29 + $0x238] sm:$0xff] }
  0x6f   : > { %1574 = vmatmul.mubr.bf16.gmra.mrb[36].mxu0 %v2552_v18  ;;  %v2492_v18 = vcombine.low %v199_v6, %v203_v7  ;;  %v263_v6 = vld [vmem:[%s3489_s29 + $0x250] sm:$0xff] }
  0x70   : > { %1735 = vmatmul.mubr.bf16.gmra.mrb[36].mxu1 %v2554_v19  ;;  %1581 = vmatprep.mubr.bf16.mxu0 %v2561_v20  ;;  %v2494_v19 = vcombine.low %v200_v8, %v204_v9  ;;  %v2501_v20 = vcombine.high %v207_v14, %v211_v15  ;;  %v267_v7 = vld [vmem:[%s3489_s29 + $0x270] sm:$0xff]  ;;  %v264_v8 = vld [vmem:[%s3489_s29 + $0x258] sm:$0xff] }
  0x71   : > { %1742 = vmatprep.mubr.bf16.mxu1 %v2563_v21  ;;  %v2503_v21 = vcombine.high %v208_v16, %v212_v17  ;;  %v268_v9 = vld [vmem:[%s3489_s29 + $0x278] sm:$0xff] }
  0x77   : > { %1582 = vmatmul.mubr.bf16.gmra.mrb[40].mxu0 %v2560_v26  ;;  %v2500_v26 = vcombine.low %v207_v14, %v211_v15  ;;  %v271_v14 = vld [vmem:[%s3489_s29 + $0x290] sm:$0xff] }
  0x78   : > { %1743 = vmatmul.mubr.bf16.gmra.mrb[40].mxu1 %v2562_v27  ;;  %1589 = vmatprep.mubr.bf16.mxu0 %v2569_v28  ;;  %v2502_v27 = vcombine.low %v208_v16, %v212_v17  ;;  %v2509_v28 = vcombine.high %v215_v22, %v219_v23  ;;  %v275_v15 = vld [vmem:[%s3489_s29 + $0x2b0] sm:$0xff]  ;;  %v272_v16 = vld [vmem:[%s3489_s29 + $0x298] sm:$0xff] }
  0x79   : > { %1750 = vmatprep.mubr.bf16.mxu1 %v2571_v29  ;;  %v2511_v29 = vcombine.high %v216_v24, %v220_v25  ;;  %v276_v17 = vld [vmem:[%s3489_s29 + $0x2b8] sm:$0xff] }
  0x7f   : > { %1590 = vmatmul.mubr.bf16.gmra.mrb[44].mxu0 %v2568_v34  ;;  %v2508_v34 = vcombine.low %v215_v22, %v219_v23  ;;  %v279_v22 = vld [vmem:[%s3489_s29 + $0x2d0] sm:$0xff] }
  0x80   : > { %1751 = vmatmul.mubr.bf16.gmra.mrb[44].mxu1 %v2570_v35  ;;  %1597 = vmatprep.mubr.bf16.mxu0 %v2577_v36  ;;  %v2510_v35 = vcombine.low %v216_v24, %v220_v25  ;;  %v2517_v36 = vcombine.high %v223_v30, %v227_v31  ;;  %v283_v23 = vld [vmem:[%s3489_s29 + $0x2f0] sm:$0xff]  ;;  %v280_v24 = vld [vmem:[%s3489_s29 + $0x2d8] sm:$0xff] }
  0x81   : > { %1758 = vmatprep.mubr.bf16.mxu1 %v2579_v37  ;;  %v2519_v37 = vcombine.high %v224_v32, %v228_v33  ;;  %v284_v25 = vld [vmem:[%s3489_s29 + $0x2f8] sm:$0xff] }
  0x87   : > { %1598 = vmatmul.mubr.bf16.gmra.mrb[48].mxu0 %v2576_v42  ;;  %v2516_v42 = vcombine.low %v223_v30, %v227_v31  ;;  %v287_v30 = vld [vmem:[%s3489_s29 + $0x310] sm:$0xff] }
  0x88   : > { %1759 = vmatmul.mubr.bf16.gmra.mrb[48].mxu1 %v2578_v43  ;;  %1605 = vmatprep.mubr.bf16.mxu0 %v2585_v44  ;;  %v2518_v43 = vcombine.low %v224_v32, %v228_v33  ;;  %v2525_v44 = vcombine.high %v231_v38, %v235_v39  ;;  %v291_v31 = vld [vmem:[%s3489_s29 + $0x330] sm:$0xff]  ;;  %v288_v33 = vld [vmem:[%s3489_s29 + $0x318] sm:$0xff] }
  0x89   : > { %1766 = vmatprep.mubr.bf16.mxu1 %v2587_v45  ;;  %v2527_v45 = vcombine.high %v232_v40, %v236_v41 }
  0x8f   : > { %1606 = vmatmul.mubr.bf16.gmra.mrb[52].mxu0 %v2584_v50  ;;  %v2524_v50 = vcombine.low %v231_v38, %v235_v39 }
  0x90   : > { %1767 = vmatmul.mubr.bf16.gmra.mrb[52].mxu1 %v2586_v51  ;;  %1613 = vmatprep.mubr.bf16.mxu0 %v2593_v52  ;;  %v2526_v51 = vcombine.low %v232_v40, %v236_v41  ;;  %v2533_v52 = vcombine.high %v239_v46, %v243_v47  ;;  %v2574_v41 = vcombine.low %v280_v24, %v284_v25 }
  0x91   : > { %1774 = vmatprep.mubr.bf16.mxu1 %v2595_v53  ;;  %v2535_v53 = vcombine.high %v240_v48, %v244_v49 }
  0x97   : > { %1614 = vmatmul.mubr.bf16.gmra.mrb[56].mxu0 %v2592_v58  ;;  %v2532_v58 = vcombine.low %v239_v46, %v243_v47 }
  0x98   : > { %1775 = vmatmul.mubr.bf16.gmra.mrb[56].mxu1 %v2594_v59  ;;  %1621 = vmatprep.mubr.bf16.mxu0 %v2601_v60  ;;  %v2534_v59 = vcombine.low %v240_v48, %v244_v49  ;;  %v2541_v60 = vcombine.high %v247_v54, %v251_v55 }
  0x99   : > { %1782 = vmatprep.mubr.bf16.mxu1 %v2603_v61  ;;  %v2543_v61 = vcombine.high %v248_v56, %v252_v57 }
  0x9f   : > { %1622 = vmatmul.mubr.bf16.gmra.mrb[60].mxu0 %v2600_v2  ;;  %v2540_v2 = vcombine.low %v247_v54, %v251_v55  ;;  %v296_v55 = vld [vmem:[%s3489_s29 + $0x358] sm:$0xff] }
  0xa0   : > { %1783 = vmatmul.mubr.bf16.gmra.mrb[60].mxu1 %v2602_v3  ;;  %1823 = vmatprep.mubr.bf16.mxu0 %v2485_v4  ;;  %v2542_v3 = vcombine.low %v248_v56, %v252_v57  ;;  %v2549_v4 = vcombine.high %v255_v62, %v259_v63  ;;  %v300_v56 = vld [vmem:[%s3489_s29 + $0x378] sm:$0xff] }
  0xa1   : > { %1984 = vmatprep.mubr.bf16.mxu1 %v2487_v5  ;;  %v2551_v5 = vcombine.high %v256_v0, %v260_v1 }
  0xa7   : > { %1824 = vmatmul.mubr.bf16.vlgmr.msra.gmra.mrb[64].mxu0 %v2484_v10  ;;  %v2548_v10 = vcombine.low %v255_v62, %v259_v63 }
  0xa8   : > { %1985 = vmatmul.mubr.bf16.vlgmr.msra.gmra.mrb[64].mxu1 %v2486_v11  ;;  %1831 = vmatprep.mubr.bf16.mxu0 %v2493_v12  ;;  %v2550_v11 = vcombine.low %v256_v0, %v260_v1  ;;  %v2557_v12 = vcombine.high %v263_v6, %v267_v7 }
  0xa9   : > { %1992 = vmatprep.mubr.bf16.mxu1 %v2495_v13  ;;  %v2559_v13 = vcombine.high %v264_v8, %v268_v9 }
  0xaf   : > { %1832 = vmatmul.mubr.bf16.gmra.mrb[68].mxu0 %v2492_v18  ;;  %v2556_v18 = vcombine.low %v263_v6, %v267_v7 }
  0xb0   : > { %1993 = vmatmul.mubr.bf16.gmra.mrb[68].mxu1 %v2494_v19  ;;  %1839 = vmatprep.mubr.bf16.mxu0 %v2501_v20  ;;  %v2558_v19 = vcombine.low %v264_v8, %v268_v9  ;;  %v2565_v20 = vcombine.high %v271_v14, %v275_v15 }
  0xb1   : > { %2000 = vmatprep.mubr.bf16.mxu1 %v2503_v21  ;;  %v2567_v21 = vcombine.high %v272_v16, %v276_v17 }
  0xb7   : > { %1840 = vmatmul.mubr.bf16.gmra.mrb[72].mxu0 %v2500_v26  ;;  %v2564_v26 = vcombine.low %v271_v14, %v275_v15  ;;  %v308_v14 = vld [vmem:[%s3489_s29 + $0x3b8] sm:$0xff] }
  0xb8   : > { %2001 = vmatmul.mubr.bf16.gmra.mrb[72].mxu1 %v2502_v27  ;;  %1847 = vmatprep.mubr.bf16.mxu0 %v2509_v28  ;;  %v2566_v27 = vcombine.low %v272_v16, %v276_v17  ;;  %v2573_v28 = vcombine.high %v279_v22, %v283_v23 }
  0xb9   : > { %2008 = vmatprep.mubr.bf16.mxu1 %v2511_v29  ;;  %v2575_v29 = vcombine.high %v280_v24, %v284_v25 }
  0xbf   : > { %1848 = vmatmul.mubr.bf16.gmra.mrb[76].mxu0 %v2508_v34  ;;  %v292_v34 = vld [vmem:[%s3489_s29 + $0x338] sm:$0xff] }
  0xc0   : > { %2009 = vmatmul.mubr.bf16.gmra.mrb[76].mxu1 %v2510_v35  ;;  %1855 = vmatprep.mubr.bf16.mxu0 %v2517_v36  ;;  %v2583_v46 = vcombine.high %v288_v33, %v292_v34  ;;  %v2582_v63 = vcombine.low %v288_v33, %v292_v34  ;;  %v315_v33 = vld [vmem:[%s3489_s29 + $0x3f0] sm:$0xff] }
  0xc1   : > { %2016 = vmatprep.mubr.bf16.mxu1 %v2519_v37  ;;  %v2572_v37 = vcombine.low %v279_v22, %v283_v23 }
  0xc7   : > { %1856 = vmatmul.mubr.bf16.gmra.mrb[80].mxu0 %v2516_v42  ;;  %v2581_v42 = vcombine.high %v287_v30, %v291_v31 }
  0xc8   : > { %2017 = vmatmul.mubr.bf16.gmra.mrb[80].mxu1 %v2518_v43  ;;  %1863 = vmatprep.mubr.bf16.mxu0 %v2525_v44 }
  0xc9   : > { %2024 = vmatprep.mubr.bf16.mxu1 %v2527_v45 }
  0xcf   : > { %1864 = vmatmul.mubr.bf16.gmra.mrb[84].mxu0 %v2524_v50 }
  0xd0   : > { %2025 = vmatmul.mubr.bf16.gmra.mrb[84].mxu1 %v2526_v51  ;;  %1871 = vmatprep.mubr.bf16.mxu0 %v2533_v52  ;;  %v295_v52 = vld [vmem:[%s3489_s29 + $0x350] sm:$0xff] }
  0xd1   : > { %2032 = vmatprep.mubr.bf16.mxu1 %v2535_v53  ;;  %v299_v53 = vld [vmem:[%s3489_s29 + $0x370] sm:$0xff] }
  0xd2   : > { %v2589_v0 = vcombine.high %v295_v52, %v299_v53  ;;  %v2588_v17 = vcombine.low %v295_v52, %v299_v53 }
  0xd7   : > { %1872 = vmatmul.mubr.bf16.gmra.mrb[88].mxu0 %v2532_v58 }
  0xd8   : > { %2033 = vmatmul.mubr.bf16.gmra.mrb[88].mxu1 %v2534_v59  ;;  %1879 = vmatprep.mubr.bf16.mxu0 %v2541_v60  ;;  %v2580_v59 = vcombine.low %v287_v30, %v291_v31 }
  0xd9   : > { %2040 = vmatprep.mubr.bf16.mxu1 %v2543_v61 }
  0xdf   : > { %1880 = vmatmul.mubr.bf16.gmra.mrb[92].mxu0 %v2540_v2 }
  0xe0   : > { %2041 = vmatmul.mubr.bf16.gmra.mrb[92].mxu1 %v2542_v3  ;;  %1887 = vmatprep.mubr.bf16.mxu0 %v2549_v4  ;;  %v2591_v4 = vcombine.high %v296_v55, %v300_v56 }
  0xe1   : > { %2048 = vmatprep.mubr.bf16.mxu1 %v2551_v5 }
  0xe7   : > { %1888 = vmatmul.mubr.bf16.gmra.mrb[96].mxu0 %v2548_v10  ;;  %v303_v10 = vld [vmem:[%s3489_s29 + $0x390] sm:$0xff] }
  0xe8   : > { %2049 = vmatmul.mubr.bf16.gmra.mrb[96].mxu1 %v2550_v11  ;;  %1895 = vmatprep.mubr.bf16.mxu0 %v2557_v12  ;;  %v307_v11 = vld [vmem:[%s3489_s29 + $0x3b0] sm:$0xff] }
  0xe9   : > { %2056 = vmatprep.mubr.bf16.mxu1 %v2559_v13  ;;  %v304_v13 = vld [vmem:[%s3489_s29 + $0x398] sm:$0xff]  ;;  %v2597_v22 = vcombine.high %v303_v10, %v307_v11 }
  0xef   : > { %1896 = vmatmul.mubr.bf16.gmra.mrb[100].mxu0 %v2556_v18 }
  0xf0   : > { %2057 = vmatmul.mubr.bf16.gmra.mrb[100].mxu1 %v2558_v19  ;;  %1903 = vmatprep.mubr.bf16.mxu0 %v2565_v20 }
  0xf1   : > { %2064 = vmatprep.mubr.bf16.mxu1 %v2567_v21  ;;  %v2590_v21 = vcombine.low %v296_v55, %v300_v56 }
  0xf7   : > { %1904 = vmatmul.mubr.bf16.gmra.mrb[104].mxu0 %v2564_v26  ;;  %v2599_v26 = vcombine.high %v304_v13, %v308_v14 }
  0xf8   : > { %2065 = vmatmul.mubr.bf16.gmra.mrb[104].mxu1 %v2566_v27  ;;  %1911 = vmatprep.mubr.bf16.mxu0 %v2573_v28 }
  0xf9   : > { %2072 = vmatprep.mubr.bf16.mxu1 %v2575_v29 }
  0xfa   : > { %v2850_v32 = vpop.f32.mrb[0].mxu0 }
  0xfb   : > { %v2962_v35 = vpop.f32.mrb[0].mxu1  ;;  %v2851_v36 = vpop.f32.mrb[1].mxu0 }
  0xfc   : > { %v2852_v38 = vadd.f32 %v2851_v36, %v2850_v32  ;;  %v2963_v39 = vpop.f32.mrb[1].mxu1  ;;  %v2853_v40 = vpop.f32.mrb[2].mxu0  ;;  %v311_v32 = vld [vmem:[%s3489_s29 + $0x3d0] sm:$0xff]  ;;  %v316_v36 = vld [vmem:[%s3489_s29 + $0x3f8] sm:$0xff] }
  0xfd   : > { %v2964_v43 = vadd.f32 %v2963_v39, %v2962_v35  ;;  %v2965_v44 = vpop.f32.mrb[2].mxu1  ;;  %v2854_v45 = vpop.f32.mrb[3].mxu0  ;;  %v312_v35 = vld [vmem:[%s3489_s29 + $0x3d8] sm:$0xff]  ;;  %v2596_v39 = vcombine.low %v303_v10, %v307_v11  ;;  %s2478_s29 = sshll.u32 %s3852_s21, 2  ;;  %s2479_s21 = sshll.u32 %s3854_s13, 1 }
  0xfe   : > { %v2855_v47 = vadd.f32 %v2854_v45, %v2853_v40  ;;  %v2966_v48 = vpop.f32.mrb[3].mxu1  ;;  %s3791_s4 = scalar_lea.vmem %s3849_s2, %s2478_s29  ;;  %s187_s7 = scalar_lea.vmem %s3850_s3, %s2479_s21 }
  0xff   : > { %v3709_v49 = vadd.f32 %v2964_v43, %v2852_v38  ;;  %v2967_v50 = vadd.f32 %v2966_v48, %v2965_v44  ;;  %1912 = vmatmul.mubr.bf16.gmra.mrb[108].mxu0 %v2572_v37  ;;  %v2598_v43 = vcombine.low %v304_v13, %v308_v14  ;;  %v2605_v44 = vcombine.high %v311_v32, %v315_v33 }
 0x100   : > { %2073 = vmatmul.mubr.bf16.gmra.mrb[108].mxu1 %v2574_v41  ;;  %1919 = vmatprep.mubr.bf16.mxu0 %v2581_v42  ;;  %v2607_v48 = vcombine.high %v312_v35, %v316_v36 }
 0x101   : > { %v3711_v51 = vadd.f32 %v2967_v50, %v2855_v47  ;;  %2080 = vmatprep.mubr.bf16.mxu1 %v2583_v46 }
 0x102   : > { %v2856_v54 = vpop.f32.mrb[4].mxu0 }
 0x103   : > { %v2968_v57 = vpop.f32.mrb[4].mxu1  ;;  %v2857_v58 = vpop.f32.mrb[5].mxu0 }
 0x104   : > { %v2858_v60 = vadd.f32 %v2857_v58, %v2856_v54  ;;  %v2969_v61 = vpop.f32.mrb[5].mxu1  ;;  %v2859_v62 = vpop.f32.mrb[6].mxu0 }
 0x105   : > { %v2970_v1 = vadd.f32 %v2969_v61, %v2968_v57  ;;  %v2971_v2 = vpop.f32.mrb[6].mxu1  ;;  %v2860_v3 = vpop.f32.mrb[7].mxu0 }
 0x106   : > { %v2861_v5 = vadd.f32 %v2860_v3, %v2859_v62  ;;  %v2972_v6 = vpop.f32.mrb[7].mxu1 }
 0x107   : > { %v3717_v7 = vadd.f32 %v2970_v1, %v2858_v60  ;;  %v2973_v8 = vadd.f32 %v2972_v6, %v2971_v2  ;;  %1920 = vmatmul.mubr.bf16.gmra.mrb[112].mxu0 %v2580_v59  ;;  %v2604_v59 = vcombine.low %v311_v32, %v315_v33 }
 0x108   : > { %2081 = vmatmul.mubr.bf16.gmra.mrb[112].mxu1 %v2582_v63  ;;  %1927 = vmatprep.mubr.bf16.mxu0 %v2589_v0  ;;  %v2606_v63 = vcombine.low %v312_v35, %v316_v36 }
 0x109   : > { %v3719_v9 = vadd.f32 %v2973_v8, %v2861_v5  ;;  %2088 = vmatprep.mubr.bf16.mxu1 %v2591_v4 }
 0x10a   : > { %v2862_v12 = vpop.f32.mrb[8].mxu0 }
 0x10b   : > { %v2974_v15 = vpop.f32.mrb[8].mxu1  ;;  %v2863_v16 = vpop.f32.mrb[9].mxu0 }
 0x10c   : > { %v2864_v18 = vadd.f32 %v2863_v16, %v2862_v12  ;;  %v2975_v19 = vpop.f32.mrb[9].mxu1  ;;  %v2865_v20 = vpop.f32.mrb[10].mxu0 }
 0x10d   : > { %v2976_v23 = vadd.f32 %v2975_v19, %v2974_v15  ;;  %v2977_v24 = vpop.f32.mrb[10].mxu1  ;;  %v2866_v25 = vpop.f32.mrb[11].mxu0 }
 0x10e   : > { %v2867_v27 = vadd.f32 %v2866_v25, %v2865_v20  ;;  %v2978_v28 = vpop.f32.mrb[11].mxu1 }
 0x10f   : > { %v3725_v29 = vadd.f32 %v2976_v23, %v2864_v18  ;;  %v2979_v30 = vadd.f32 %v2978_v28, %v2977_v24  ;;  %1928 = vmatmul.mubr.bf16.gmra.mrb[116].mxu0 %v2588_v17 }
 0x110   : > { %2089 = vmatmul.mubr.bf16.gmra.mrb[116].mxu1 %v2590_v21  ;;  %1935 = vmatprep.mubr.bf16.mxu0 %v2597_v22 }
 0x111   : > { %v3727_v31 = vadd.f32 %v2979_v30, %v2867_v27  ;;  %2096 = vmatprep.mubr.bf16.mxu1 %v2599_v26 }
 0x112   : > { %v2868_v34 = vpop.f32.mrb[12].mxu0 }
 0x113   : > { %v2980_v37 = vpop.f32.mrb[12].mxu1  ;;  %v2869_v38 = vpop.f32.mrb[13].mxu0 }
 0x114   : > { %v2870_v40 = vadd.f32 %v2869_v38, %v2868_v34  ;;  %v2981_v41 = vpop.f32.mrb[13].mxu1  ;;  %v2871_v42 = vpop.f32.mrb[14].mxu0 }
 0x115   : > { %v2982_v45 = vadd.f32 %v2981_v41, %v2980_v37  ;;  %v2983_v46 = vpop.f32.mrb[14].mxu1  ;;  %v2872_v47 = vpop.f32.mrb[15].mxu0 }
 0x116   : > { %v2873_v50 = vadd.f32 %v2872_v47, %v2871_v42  ;;  %v2984_v52 = vpop.f32.mrb[15].mxu1 }
 0x117   : > { %v3733_v53 = vadd.f32 %v2982_v45, %v2870_v40  ;;  %v2985_v54 = vadd.f32 %v2984_v52, %v2983_v46  ;;  %1936 = vmatmul.mubr.bf16.gmra.mrb[120].mxu0 %v2596_v39 }
 0x118   : > { %2097 = vmatmul.mubr.bf16.gmra.mrb[120].mxu1 %v2598_v43  ;;  %1943 = vmatprep.mubr.bf16.mxu0 %v2605_v44 }
 0x119   : > { %v3735_v55 = vadd.f32 %v2985_v54, %v2873_v50  ;;  %2104 = vmatprep.mubr.bf16.mxu1 %v2607_v48 }
 0x11a   : > { %v2874_v56 = vpop.f32.mrb[16].mxu0 }
 0x11b   : > { %v2986_v57 = vpop.f32.mrb[16].mxu1  ;;  %v2875_v58 = vpop.f32.mrb[17].mxu0 }
 0x11c   : > { %v2876_v60 = vadd.f32 %v2875_v58, %v2874_v56  ;;  %v2987_v61 = vpop.f32.mrb[17].mxu1  ;;  %v2877_v62 = vpop.f32.mrb[18].mxu0 }
 0x11d   : > { %v2988_v0 = vadd.f32 %v2987_v61, %v2986_v57  ;;  %v2989_v1 = vpop.f32.mrb[18].mxu1  ;;  %v2878_v2 = vpop.f32.mrb[19].mxu0 }
 0x11e   : > { %v2879_v3 = vadd.f32 %v2878_v2, %v2877_v62  ;;  %v2990_v4 = vpop.f32.mrb[19].mxu1 }
 0x11f   : > { %v3737_v5 = vadd.f32 %v2988_v0, %v2876_v60  ;;  %v2991_v6 = vadd.f32 %v2990_v4, %v2989_v1  ;;  %1944 = vmatmul.mubr.bf16.gmra.mrb[124].mxu0 %v2604_v59 }
 0x120   : > { %2105 = vmatmul.mubr.bf16.gmra.mrb[124].mxu1 %v2606_v63 }
 0x121   : > { %v3739_v8 = vadd.f32 %v2991_v6, %v2879_v3 }
 0x122   : > { %v2880_v10 = vpop.f32.mrb[20].mxu0 }
 0x123   : > { %v2992_v11 = vpop.f32.mrb[20].mxu1  ;;  %v2881_v12 = vpop.f32.mrb[21].mxu0 }
 0x124   : > { %v2882_v13 = vadd.f32 %v2881_v12, %v2880_v10  ;;  %v2993_v14 = vpop.f32.mrb[21].mxu1  ;;  %v2883_v15 = vpop.f32.mrb[22].mxu0 }
 0x125   : > { %v2994_v16 = vadd.f32 %v2993_v14, %v2992_v11  ;;  %v2995_v17 = vpop.f32.mrb[22].mxu1  ;;  %v2884_v18 = vpop.f32.mrb[23].mxu0 }
 0x126   : > { %v2885_v19 = vadd.f32 %v2884_v18, %v2883_v15  ;;  %v2996_v20 = vpop.f32.mrb[23].mxu1 }
 0x127   : > { %v3741_v21 = vadd.f32 %v2994_v16, %v2882_v13  ;;  %v2997_v22 = vadd.f32 %v2996_v20, %v2995_v17 }
 0x129   : > { %v3743_v23 = vadd.f32 %v2997_v22, %v2885_v19 }
 0x12a   : > { %v2886_v24 = vpop.f32.mrb[24].mxu0 }
 0x12b   : > { %v2998_v25 = vpop.f32.mrb[24].mxu1  ;;  %v2887_v26 = vpop.f32.mrb[25].mxu0 }
 0x12c   : > { %v2888_v27 = vadd.f32 %v2887_v26, %v2886_v24  ;;  %v2999_v28 = vpop.f32.mrb[25].mxu1  ;;  %v2889_v30 = vpop.f32.mrb[26].mxu0 }
 0x12d   : > { %v3000_v32 = vadd.f32 %v2999_v28, %v2998_v25  ;;  %v3001_v33 = vpop.f32.mrb[26].mxu1  ;;  %v2890_v34 = vpop.f32.mrb[27].mxu0 }
 0x12e   : > { %v2891_v35 = vadd.f32 %v2890_v34, %v2889_v30  ;;  %v3002_v36 = vpop.f32.mrb[27].mxu1 }
 0x12f   : > { %v3745_v37 = vadd.f32 %v3000_v32, %v2888_v27  ;;  %v3003_v38 = vadd.f32 %v3002_v36, %v3001_v33 }
 0x131   : > { %v3747_v39 = vadd.f32 %v3003_v38, %v2891_v35 }
 0x132   : > { %v2892_v40 = vpop.f32.mrb[28].mxu0 }
 0x133   : > { %v3004_v41 = vpop.f32.mrb[28].mxu1  ;;  %v2893_v42 = vpop.f32.mrb[29].mxu0 }
 0x134   : > { %v2894_v43 = vadd.f32 %v2893_v42, %v2892_v40  ;;  %v3005_v44 = vpop.f32.mrb[29].mxu1  ;;  %v2895_v45 = vpop.f32.mrb[30].mxu0 }
 0x135   : > { %v3006_v46 = vadd.f32 %v3005_v44, %v3004_v41  ;;  %v3007_v47 = vpop.f32.mrb[30].mxu1  ;;  %v2896_v48 = vpop.f32.mrb[31].mxu0 }
 0x136   : > { %v2897_v50 = vadd.f32 %v2896_v48, %v2895_v45  ;;  %v3008_v52 = vpop.f32.mrb[31].mxu1 }
 0x137   : > { %v3749_v54 = vadd.f32 %v3006_v46, %v2894_v43  ;;  %v3009_v56 = vadd.f32 %v3008_v52, %v3007_v47 }
 0x139   : > { %v3751_v57 = vadd.f32 %v3009_v56, %v2897_v50 }
 0x13a   : > { %v2898_v58 = vpop.f32.mrb[32].mxu0 }
 0x13b   : > { %v3010_v59 = vpop.f32.mrb[32].mxu1  ;;  %v2899_v60 = vpop.f32.mrb[33].mxu0 }
 0x13c   : > { %v2900_v61 = vadd.f32 %v2899_v60, %v2898_v58  ;;  %v3011_v62 = vpop.f32.mrb[33].mxu1  ;;  %v2901_v63 = vpop.f32.mrb[34].mxu0 }
 0x13d   : > { %v3012_v0 = vadd.f32 %v3011_v62, %v3010_v59  ;;  %v3013_v1 = vpop.f32.mrb[34].mxu1  ;;  %v2902_v2 = vpop.f32.mrb[35].mxu0 }
 0x13e   : > { %v2903_v3 = vadd.f32 %v2902_v2, %v2901_v63  ;;  %v3014_v4 = vpop.f32.mrb[35].mxu1 }
 0x13f   : > { %v3753_v6 = vadd.f32 %v3012_v0, %v2900_v61  ;;  %v3015_v10 = vadd.f32 %v3014_v4, %v3013_v1 }
 0x141   : > { %v3755_v11 = vadd.f32 %v3015_v10, %v2903_v3 }
 0x142   : > { %v2904_v12 = vpop.f32.mrb[36].mxu0 }
 0x143   : > { %v3016_v13 = vpop.f32.mrb[36].mxu1  ;;  %v2905_v14 = vpop.f32.mrb[37].mxu0 }
 0x144   : > { %v2906_v15 = vadd.f32 %v2905_v14, %v2904_v12  ;;  %v3017_v16 = vpop.f32.mrb[37].mxu1  ;;  %v2907_v17 = vpop.f32.mrb[38].mxu0 }
 0x145   : > { %v3018_v18 = vadd.f32 %v3017_v16, %v3016_v13  ;;  %v3019_v19 = vpop.f32.mrb[38].mxu1  ;;  %v2908_v20 = vpop.f32.mrb[39].mxu0 }
 0x146   : > { %v2909_v22 = vadd.f32 %v2908_v20, %v2907_v17  ;;  %v3020_v24 = vpop.f32.mrb[39].mxu1 }
 0x147   : > { %v3757_v25 = vadd.f32 %v3018_v18, %v2906_v15  ;;  %v3021_v26 = vadd.f32 %v3020_v24, %v3019_v19 }
 0x149   : > { %v3759_v27 = vadd.f32 %v3021_v26, %v2909_v22 }
 0x14a   : > { %v2910_v28 = vpop.f32.mrb[40].mxu0 }
 0x14b   : > { %v3022_v30 = vpop.f32.mrb[40].mxu1  ;;  %v2911_v32 = vpop.f32.mrb[41].mxu0 }
 0x14c   : > { %v2912_v33 = vadd.f32 %v2911_v32, %v2910_v28  ;;  %v3023_v34 = vpop.f32.mrb[41].mxu1  ;;  %v2913_v35 = vpop.f32.mrb[42].mxu0 }
 0x14d   : > { %v3024_v36 = vadd.f32 %v3023_v34, %v3022_v30  ;;  %v3025_v38 = vpop.f32.mrb[42].mxu1  ;;  %v2914_v40 = vpop.f32.mrb[43].mxu0 }
 0x14e   : > { %v2915_v41 = vadd.f32 %v2914_v40, %v2913_v35  ;;  %v3026_v42 = vpop.f32.mrb[43].mxu1 }
 0x14f   : > { %v3761_v43 = vadd.f32 %v3024_v36, %v2912_v33  ;;  %v3027_v44 = vadd.f32 %v3026_v42, %v3025_v38 }
 0x151   : > { %v3763_v45 = vadd.f32 %v3027_v44, %v2915_v41 }
 0x152   : > { %v2916_v46 = vpop.f32.mrb[44].mxu0 }
 0x153   : > { %v3028_v47 = vpop.f32.mrb[44].mxu1  ;;  %v2917_v48 = vpop.f32.mrb[45].mxu0 }
 0x154   : > { %v2918_v50 = vadd.f32 %v2917_v48, %v2916_v46  ;;  %v3029_v52 = vpop.f32.mrb[45].mxu1  ;;  %v2919_v56 = vpop.f32.mrb[46].mxu0 }
 0x155   : > { %v3030_v58 = vadd.f32 %v3029_v52, %v3028_v47  ;;  %v3031_v59 = vpop.f32.mrb[46].mxu1  ;;  %v2920_v60 = vpop.f32.mrb[47].mxu0 }
 0x156   : > { %v2921_v61 = vadd.f32 %v2920_v60, %v2919_v56  ;;  %v3032_v62 = vpop.f32.mrb[47].mxu1 }
 0x157   : > { %v3765_v63 = vadd.f32 %v3030_v58, %v2918_v50  ;;  %v3033_v0 = vadd.f32 %v3032_v62, %v3031_v59 }
 0x159   : > { %v3767_v1 = vadd.f32 %v3033_v0, %v2921_v61 }
 0x15a   : > { %v2922_v2 = vpop.f32.mrb[48].mxu0 }
 0x15b   : > { %v3034_v3 = vpop.f32.mrb[48].mxu1  ;;  %v2923_v4 = vpop.f32.mrb[49].mxu0 }
 0x15c   : > { %v2924_v10 = vadd.f32 %v2923_v4, %v2922_v2  ;;  %v3035_v12 = vpop.f32.mrb[49].mxu1  ;;  %v2925_v13 = vpop.f32.mrb[50].mxu0 }
 0x15d   : > { %v3036_v14 = vadd.f32 %v3035_v12, %v3034_v3  ;;  %v3037_v15 = vpop.f32.mrb[50].mxu1  ;;  %v2926_v16 = vpop.f32.mrb[51].mxu0 }
 0x15e   : > { %v2927_v17 = vadd.f32 %v2926_v16, %v2925_v13  ;;  %v3038_v18 = vpop.f32.mrb[51].mxu1 }
 0x15f   : > { %v3769_v19 = vadd.f32 %v3036_v14, %v2924_v10  ;;  %v3039_v20 = vadd.f32 %v3038_v18, %v3037_v15 }
 0x161   : > { %v3771_v22 = vadd.f32 %v3039_v20, %v2927_v17 }
 0x162   : > { %v2928_v24 = vpop.f32.mrb[52].mxu0 }
 0x163   : > { %v3040_v26 = vpop.f32.mrb[52].mxu1  ;;  %v2929_v28 = vpop.f32.mrb[53].mxu0 }
 0x164   : > { %v2930_v30 = vadd.f32 %v2929_v28, %v2928_v24  ;;  %v3041_v32 = vpop.f32.mrb[53].mxu1  ;;  %v2931_v33 = vpop.f32.mrb[54].mxu0 }
 0x165   : > { %v3042_v34 = vadd.f32 %v3041_v32, %v3040_v26  ;;  %v3043_v35 = vpop.f32.mrb[54].mxu1  ;;  %v2932_v36 = vpop.f32.mrb[55].mxu0 }
 0x166   : > { %v2933_v38 = vadd.f32 %v2932_v36, %v2931_v33  ;;  %v3044_v40 = vpop.f32.mrb[55].mxu1 }
 0x167   : > { %v3773_v41 = vadd.f32 %v3042_v34, %v2930_v30  ;;  %v3045_v42 = vadd.f32 %v3044_v40, %v3043_v35 }
 0x169   : > { %v3775_v44 = vadd.f32 %v3045_v42, %v2933_v38 }
 0x16a   : > { %v2934_v46 = vpop.f32.mrb[56].mxu0 }
 0x16b   : > { %v3046_v47 = vpop.f32.mrb[56].mxu1  ;;  %v2935_v48 = vpop.f32.mrb[57].mxu0 }
 0x16c   : > { %v2936_v50 = vadd.f32 %v2935_v48, %v2934_v46  ;;  %v3047_v52 = vpop.f32.mrb[57].mxu1  ;;  %v2937_v56 = vpop.f32.mrb[58].mxu0 }
 0x16d   : > { %v3048_v58 = vadd.f32 %v3047_v52, %v3046_v47  ;;  %v3049_v59 = vpop.f32.mrb[58].mxu1  ;;  %v2938_v60 = vpop.f32.mrb[59].mxu0 }
 0x16e   : > { %v2939_v61 = vadd.f32 %v2938_v60, %v2937_v56  ;;  %v3050_v62 = vpop.f32.mrb[59].mxu1 }
 0x16f   : > { %v3777_v0 = vadd.f32 %v3048_v58, %v2936_v50  ;;  %v3051_v2 = vadd.f32 %v3050_v62, %v3049_v59 }
 0x171   : > { %v3779_v3 = vadd.f32 %v3051_v2, %v2939_v61 }
 0x172   : > { %v2940_v4 = vpop.f32.mrb[60].mxu0 }
 0x173   : > { %v3052_v10 = vpop.f32.mrb[60].mxu1  ;;  %v2941_v12 = vpop.f32.mrb[61].mxu0 }
 0x174   : > { %v2942_v13 = vadd.f32 %v2941_v12, %v2940_v4  ;;  %v3053_v14 = vpop.f32.mrb[61].mxu1  ;;  %v2943_v15 = vpop.f32.mrb[62].mxu0 }
 0x175   : > { %v3054_v16 = vadd.f32 %v3053_v14, %v3052_v10  ;;  %v3055_v17 = vpop.f32.mrb[62].mxu1  ;;  %v2944_v18 = vpop.f32.mrb[63].mxu0 }
 0x176   : > { %v2945_v20 = vadd.f32 %v2944_v18, %v2943_v15  ;;  %v3056_v24 = vpop.f32.mrb[63].mxu1 }
 0x177   : > { %v3781_v26 = vadd.f32 %v3054_v16, %v2942_v13  ;;  %v3057_v28 = vadd.f32 %v3056_v24, %v3055_v17 }
 0x179   : > { %v3783_v30 = vadd.f32 %v3057_v28, %v2945_v20 }
 0x17a   : > { %v3074_v32 = vpop.f32.mrb[64].mxu0 }
 0x17b   : > { %v3186_v33 = vpop.f32.mrb[64].mxu1  ;;  %v3075_v34 = vpop.f32.mrb[65].mxu0 }
 0x17c   : > { %v3076_v35 = vadd.f32 %v3075_v34, %v3074_v32  ;;  %v3187_v36 = vpop.f32.mrb[65].mxu1  ;;  %v3077_v38 = vpop.f32.mrb[66].mxu0 }
 0x17d   : > { %v3188_v40 = vadd.f32 %v3187_v36, %v3186_v33  ;;  %v3189_v42 = vpop.f32.mrb[66].mxu1  ;;  %v3078_v46 = vpop.f32.mrb[67].mxu0 }
 0x17e   : > { %v1826_v47 = vadd.f32 %v3076_v35, %v3709_v49  ;;  %v3079_v48 = vadd.f32 %v3078_v46, %v3077_v38  ;;  %v3190_v50 = vpop.f32.mrb[67].mxu1 }
 0x17f   : > { %v3191_v52 = vadd.f32 %v3190_v50, %v3189_v42 }
 0x180   : > { %v1987_v56 = vadd.f32 %v3188_v40, %v1826_v47  ;;  %v1829_v58 = vadd.f32 %v3079_v48, %v3711_v51 }
 0x182   : > { %v1990_v59 = vadd.f32 %v3191_v52, %v1829_v58  ;;  %v3080_v60 = vpop.f32.mrb[68].mxu0  ;;  %v2150_v61 = vmul.f32 %v1987_v56, %v1987_v56 }
 0x183   : > { %v3192_v62 = vpop.f32.mrb[68].mxu1  ;;  %v3081_v2 = vpop.f32.mrb[69].mxu0 }
 0x184   : > { %v2113_v4 = vadd.f32 %v1990_v59, %v1987_v56  ;;  %v2151_v49 = vmul.f32 %v1990_v59, %v1990_v59  ;;  %v2742_v10 = vpack.c.bf16 %v1990_v59, %v1987_v56  ;;  %v3082_v12 = vadd.f32 %v3081_v2, %v3080_v60  ;;  %v3193_v13 = vpop.f32.mrb[69].mxu1  ;;  %v3083_v14 = vpop.f32.mrb[70].mxu0 }
 0x185   : > { %v3194_v15 = vadd.f32 %v3193_v13, %v3192_v62  ;;  %v3195_v51 = vpop.f32.mrb[70].mxu1  ;;  %v3084_v16 = vpop.f32.mrb[71].mxu0 }
 0x186   : > { %v2182_v17 = vadd.f32 %v2151_v49, %v2150_v61  ;;  %2743 = vst [vmem:[%s3791_s4] sm:$0xff] %v2742_v10   ;;  %v1834_v18 = vadd.f32 %v3082_v12, %v3717_v7  ;;  %v3085_v20 = vadd.f32 %v3084_v16, %v3083_v14  ;;  %v3196_v24 = vpop.f32.mrb[71].mxu1 }
 0x187   : > { %v3197_v28 = vadd.f32 %v3196_v24, %v3195_v51 }
 0x188   : > { %v1995_v32 = vadd.f32 %v3194_v15, %v1834_v18  ;;  %v1837_v33 = vadd.f32 %v3085_v20, %v3719_v9 }
 0x18a   : > { %v2114_v34 = vadd.f32 %v2113_v4, %v1995_v32  ;;  %v2152_v35 = vmul.f32 %v1995_v32, %v1995_v32  ;;  %v1998_v36 = vadd.f32 %v3197_v28, %v1837_v33  ;;  %v3086_v38 = vpop.f32.mrb[72].mxu0 }
 0x18b   : > { %v3198_v40 = vpop.f32.mrb[72].mxu1  ;;  %v3087_v42 = vpop.f32.mrb[73].mxu0 }
 0x18c   : > { %v2183_v46 = vadd.f32 %v2182_v17, %v2152_v35  ;;  %v2115_v47 = vadd.f32 %v2114_v34, %v1998_v36  ;;  %v2153_v48 = vmul.f32 %v1998_v36, %v1998_v36  ;;  %v2747_v50 = vpack.c.bf16 %v1998_v36, %v1995_v32  ;;  %v3199_v52 = vpop.f32.mrb[73].mxu1  ;;  %v3089_v56 = vpop.f32.mrb[74].mxu0 }
 0x18d   : > { %v3088_v7 = vadd.f32 %v3087_v42, %v3086_v38  ;;  %v3200_v58 = vadd.f32 %v3199_v52, %v3198_v40  ;;  %v3201_v59 = vpop.f32.mrb[74].mxu1  ;;  %v3090_v60 = vpop.f32.mrb[75].mxu0 }
 0x18e   : > { %v2184_v61 = vadd.f32 %v2183_v46, %v2153_v48  ;;  %2819 = vst [vmem:[%s3791_s4 + $0x8] sm:$0xff] %v2747_v50   ;;  %v3091_v9 = vadd.f32 %v3090_v60, %v3089_v56  ;;  %v3202_v62 = vpop.f32.mrb[75].mxu1 }
 0x18f   : > { %v1842_v2 = vadd.f32 %v3088_v7, %v3725_v29  ;;  %v3203_v4 = vadd.f32 %v3202_v62, %v3201_v59 }
 0x190   : > { %v1845_v49 = vadd.f32 %v3091_v9, %v3727_v31 }
 0x191   : > { %v2003_v10 = vadd.f32 %v3200_v58, %v1842_v2 }
 0x192   : > { %v2006_v12 = vadd.f32 %v3203_v4, %v1845_v49  ;;  %v3092_v13 = vpop.f32.mrb[76].mxu0 }
 0x193   : > { %v2116_v14 = vadd.f32 %v2115_v47, %v2003_v10  ;;  %v2154_v15 = vmul.f32 %v2003_v10, %v2003_v10  ;;  %v3204_v51 = vpop.f32.mrb[76].mxu1  ;;  %v3093_v16 = vpop.f32.mrb[77].mxu0 }
 0x194   : > { %v2155_v17 = vmul.f32 %v2006_v12, %v2006_v12  ;;  %v2752_v18 = vpack.c.bf16 %v2006_v12, %v2003_v10  ;;  %v3094_v20 = vadd.f32 %v3093_v16, %v3092_v13  ;;  %v3205_v24 = vpop.f32.mrb[77].mxu1  ;;  %v3095_v28 = vpop.f32.mrb[78].mxu0 }
 0x195   : > { %v2185_v32 = vadd.f32 %v2184_v61, %v2154_v15  ;;  %v2117_v33 = vadd.f32 %v2116_v14, %v2006_v12  ;;  %v3206_v34 = vadd.f32 %v3205_v24, %v3204_v51  ;;  %v3207_v29 = vpop.f32.mrb[78].mxu1  ;;  %v3096_v35 = vpop.f32.mrb[79].mxu0 }
 0x196   : > { %2820 = vst [vmem:[%s3791_s4 + $0x10] sm:$0xff] %v2752_v18   ;;  %v1850_v31 = vadd.f32 %v3094_v20, %v3733_v53  ;;  %v3097_v36 = vadd.f32 %v3096_v35, %v3095_v28  ;;  %v3208_v38 = vpop.f32.mrb[79].mxu1 }
 0x197   : > { %v2186_v40 = vadd.f32 %v2185_v32, %v2155_v17  ;;  %v3209_v42 = vadd.f32 %v3208_v38, %v3207_v29 }
 0x198   : > { %v2011_v46 = vadd.f32 %v3206_v34, %v1850_v31  ;;  %v1853_v47 = vadd.f32 %v3097_v36, %v3735_v55 }
 0x19a   : > { %v2118_v48 = vadd.f32 %v2117_v33, %v2011_v46  ;;  %v2156_v50 = vmul.f32 %v2011_v46, %v2011_v46  ;;  %v2014_v52 = vadd.f32 %v3209_v42, %v1853_v47  ;;  %v3098_v56 = vpop.f32.mrb[80].mxu0 }
 0x19b   : > { %v3210_v7 = vpop.f32.mrb[80].mxu1  ;;  %v3099_v58 = vpop.f32.mrb[81].mxu0 }
 0x19c   : > { %v2187_v59 = vadd.f32 %v2186_v40, %v2156_v50  ;;  %v2119_v60 = vadd.f32 %v2118_v48, %v2014_v52  ;;  %v2157_v61 = vmul.f32 %v2014_v52, %v2014_v52  ;;  %v2757_v9 = vpack.c.bf16 %v2014_v52, %v2011_v46  ;;  %v3211_v62 = vpop.f32.mrb[81].mxu1  ;;  %v3101_v53 = vpop.f32.mrb[82].mxu0 }
 0x19d   : > { %v3100_v2 = vadd.f32 %v3099_v58, %v3098_v56  ;;  %v3212_v4 = vadd.f32 %v3211_v62, %v3210_v7  ;;  %v3213_v49 = vpop.f32.mrb[82].mxu1  ;;  %v3102_v10 = vpop.f32.mrb[83].mxu0 }
 0x19e   : > { %v2188_v12 = vadd.f32 %v2187_v59, %v2157_v61  ;;  %2821 = vst [vmem:[%s3791_s4 + $0x18] sm:$0xff] %v2757_v9   ;;  %v3103_v55 = vadd.f32 %v3102_v10, %v3101_v53  ;;  %v3214_v13 = vpop.f32.mrb[83].mxu1 }
 0x19f   : > { %v1858_v14 = vadd.f32 %v3100_v2, %v3737_v5  ;;  %v3215_v15 = vadd.f32 %v3214_v13, %v3213_v49 }
 0x1a0   : > { %v1861_v51 = vadd.f32 %v3103_v55, %v3739_v8 }
 0x1a1   : > { %v2019_v16 = vadd.f32 %v3212_v4, %v1858_v14 }
 0x1a2   : > { %v2022_v17 = vadd.f32 %v3215_v15, %v1861_v51  ;;  %v3104_v18 = vpop.f32.mrb[84].mxu0 }
 0x1a3   : > { %v2120_v20 = vadd.f32 %v2119_v60, %v2019_v16  ;;  %v2158_v24 = vmul.f32 %v2019_v16, %v2019_v16  ;;  %v3216_v28 = vpop.f32.mrb[84].mxu1  ;;  %v3105_v32 = vpop.f32.mrb[85].mxu0 }
 0x1a4   : > { %v2159_v33 = vmul.f32 %v2022_v17, %v2022_v17  ;;  %v2762_v34 = vpack.c.bf16 %v2022_v17, %v2019_v16  ;;  %v3106_v29 = vadd.f32 %v3105_v32, %v3104_v18  ;;  %v3217_v35 = vpop.f32.mrb[85].mxu1  ;;  %v3107_v31 = vpop.f32.mrb[86].mxu0 }
 0x1a5   : > { %v2189_v36 = vadd.f32 %v2188_v12, %v2158_v24  ;;  %v2121_v38 = vadd.f32 %v2120_v20, %v2022_v17  ;;  %v3218_v40 = vadd.f32 %v3217_v35, %v3216_v28  ;;  %v3219_v5 = vpop.f32.mrb[86].mxu1  ;;  %v3108_v42 = vpop.f32.mrb[87].mxu0 }
 0x1a6   : > { %2822 = vst [vmem:[%s3791_s4 + $0x20] sm:$0xff] %v2762_v34   ;;  %v1866_v8 = vadd.f32 %v3106_v29, %v3741_v21  ;;  %v3109_v46 = vadd.f32 %v3108_v42, %v3107_v31  ;;  %v3220_v47 = vpop.f32.mrb[87].mxu1 }
 0x1a7   : > { %v2190_v48 = vadd.f32 %v2189_v36, %v2159_v33  ;;  %v3221_v50 = vadd.f32 %v3220_v47, %v3219_v5 }
 0x1a8   : > { %v2027_v52 = vadd.f32 %v3218_v40, %v1866_v8  ;;  %v1869_v56 = vadd.f32 %v3109_v46, %v3743_v23 }
 0x1aa   : > { %v2122_v7 = vadd.f32 %v2121_v38, %v2027_v52  ;;  %v2160_v58 = vmul.f32 %v2027_v52, %v2027_v52  ;;  %v2030_v59 = vadd.f32 %v3221_v50, %v1869_v56  ;;  %v3110_v60 = vpop.f32.mrb[88].mxu0 }
 0x1ab   : > { %v3222_v61 = vpop.f32.mrb[88].mxu1  ;;  %v3111_v9 = vpop.f32.mrb[89].mxu0 }
 0x1ac   : > { %v2191_v62 = vadd.f32 %v2190_v48, %v2160_v58  ;;  %v2123_v53 = vadd.f32 %v2122_v7, %v2030_v59  ;;  %v2161_v2 = vmul.f32 %v2030_v59, %v2030_v59  ;;  %v2767_v4 = vpack.c.bf16 %v2030_v59, %v2027_v52  ;;  %v3223_v49 = vpop.f32.mrb[89].mxu1  ;;  %v3113_v21 = vpop.f32.mrb[90].mxu0 }
 0x1ad   : > { %v3112_v10 = vadd.f32 %v3111_v9, %v3110_v60  ;;  %v3224_v12 = vadd.f32 %v3223_v49, %v3222_v61  ;;  %v3225_v55 = vpop.f32.mrb[90].mxu1  ;;  %v3114_v13 = vpop.f32.mrb[91].mxu0 }
 0x1ae   : > { %v2192_v14 = vadd.f32 %v2191_v62, %v2161_v2  ;;  %2823 = vst [vmem:[%s3791_s4 + $0x28] sm:$0xff] %v2767_v4   ;;  %v3115_v23 = vadd.f32 %v3114_v13, %v3113_v21  ;;  %v3226_v15 = vpop.f32.mrb[91].mxu1 }
 0x1af   : > { %v1874_v51 = vadd.f32 %v3112_v10, %v3745_v37  ;;  %v3227_v16 = vadd.f32 %v3226_v15, %v3225_v55 }
 0x1b0   : > { %v1877_v17 = vadd.f32 %v3115_v23, %v3747_v39 }
 0x1b1   : > { %v2035_v18 = vadd.f32 %v3224_v12, %v1874_v51 }
 0x1b2   : > { %v2038_v20 = vadd.f32 %v3227_v16, %v1877_v17  ;;  %v3116_v24 = vpop.f32.mrb[92].mxu0 }
 0x1b3   : > { %v2124_v28 = vadd.f32 %v2123_v53, %v2035_v18  ;;  %v2162_v32 = vmul.f32 %v2035_v18, %v2035_v18  ;;  %v3228_v33 = vpop.f32.mrb[92].mxu1  ;;  %v3117_v34 = vpop.f32.mrb[93].mxu0 }
 0x1b4   : > { %v2163_v29 = vmul.f32 %v2038_v20, %v2038_v20  ;;  %v2772_v35 = vpack.c.bf16 %v2038_v20, %v2035_v18  ;;  %v3118_v31 = vadd.f32 %v3117_v34, %v3116_v24  ;;  %v3229_v36 = vpop.f32.mrb[93].mxu1  ;;  %v3119_v38 = vpop.f32.mrb[94].mxu0 }
 0x1b5   : > { %v2193_v40 = vadd.f32 %v2192_v14, %v2162_v32  ;;  %v2125_v5 = vadd.f32 %v2124_v28, %v2038_v20  ;;  %v3230_v42 = vadd.f32 %v3229_v36, %v3228_v33  ;;  %v3231_v37 = vpop.f32.mrb[94].mxu1  ;;  %v3120_v8 = vpop.f32.mrb[95].mxu0 }
 0x1b6   : > { %2824 = vst [vmem:[%s3791_s4 + $0x30] sm:$0xff] %v2772_v35   ;;  %v1882_v39 = vadd.f32 %v3118_v31, %v3749_v54  ;;  %v3121_v46 = vadd.f32 %v3120_v8, %v3119_v38  ;;  %v3232_v47 = vpop.f32.mrb[95].mxu1 }
 0x1b7   : > { %v2194_v48 = vadd.f32 %v2193_v40, %v2163_v29  ;;  %v3233_v50 = vadd.f32 %v3232_v47, %v3231_v37 }
 0x1b8   : > { %v2043_v52 = vadd.f32 %v3230_v42, %v1882_v39  ;;  %v1885_v56 = vadd.f32 %v3121_v46, %v3751_v57 }
 0x1ba   : > { %v2126_v7 = vadd.f32 %v2125_v5, %v2043_v52  ;;  %v2164_v58 = vmul.f32 %v2043_v52, %v2043_v52  ;;  %v2046_v59 = vadd.f32 %v3233_v50, %v1885_v56  ;;  %v3122_v60 = vpop.f32.mrb[96].mxu0 }
 0x1bb   : > { %v3234_v61 = vpop.f32.mrb[96].mxu1  ;;  %v3123_v9 = vpop.f32.mrb[97].mxu0 }
 0x1bc   : > { %v2195_v62 = vadd.f32 %v2194_v48, %v2164_v58  ;;  %v2127_v53 = vadd.f32 %v2126_v7, %v2046_v59  ;;  %v2165_v2 = vmul.f32 %v2046_v59, %v2046_v59  ;;  %v2777_v4 = vpack.c.bf16 %v2046_v59, %v2043_v52  ;;  %v3235_v49 = vpop.f32.mrb[97].mxu1  ;;  %v3125_v54 = vpop.f32.mrb[98].mxu0 }
 0x1bd   : > { %v3124_v21 = vadd.f32 %v3123_v9, %v3122_v60  ;;  %v3236_v10 = vadd.f32 %v3235_v49, %v3234_v61  ;;  %v3237_v12 = vpop.f32.mrb[98].mxu1  ;;  %v3126_v55 = vpop.f32.mrb[99].mxu0 }
 0x1be   : > { %v2196_v13 = vadd.f32 %v2195_v62, %v2165_v2  ;;  %2825 = vst [vmem:[%s3791_s4 + $0x38] sm:$0xff] %v2777_v4   ;;  %v3127_v57 = vadd.f32 %v3126_v55, %v3125_v54  ;;  %v3238_v14 = vpop.f32.mrb[99].mxu1 }
 0x1bf   : > { %v1890_v23 = vadd.f32 %v3124_v21, %v3753_v6  ;;  %v3239_v15 = vadd.f32 %v3238_v14, %v3237_v12 }
 0x1c0   : > { %v1893_v51 = vadd.f32 %v3127_v57, %v3755_v11 }
 0x1c1   : > { %v2051_v16 = vadd.f32 %v3236_v10, %v1890_v23 }
 0x1c2   : > { %v2054_v17 = vadd.f32 %v3239_v15, %v1893_v51  ;;  %v3128_v18 = vpop.f32.mrb[100].mxu0 }
 0x1c3   : > { %v2128_v20 = vadd.f32 %v2127_v53, %v2051_v16  ;;  %v2166_v24 = vmul.f32 %v2051_v16, %v2051_v16  ;;  %v3240_v28 = vpop.f32.mrb[100].mxu1  ;;  %v3129_v32 = vpop.f32.mrb[101].mxu0 }
 0x1c4   : > { %v2167_v33 = vmul.f32 %v2054_v17, %v2054_v17  ;;  %v2782_v34 = vpack.c.bf16 %v2054_v17, %v2051_v16  ;;  %v3130_v29 = vadd.f32 %v3129_v32, %v3128_v18  ;;  %v3241_v35 = vpop.f32.mrb[101].mxu1  ;;  %v3131_v31 = vpop.f32.mrb[102].mxu0 }
 0x1c5   : > { %v2197_v36 = vadd.f32 %v2196_v13, %v2166_v24  ;;  %v2129_v38 = vadd.f32 %v2128_v20, %v2054_v17  ;;  %v3242_v40 = vadd.f32 %v3241_v35, %v3240_v28  ;;  %v3243_v6 = vpop.f32.mrb[102].mxu1  ;;  %v3132_v5 = vpop.f32.mrb[103].mxu0 }
 0x1c6   : > { %2826 = vst [vmem:[%s3791_s4 + $0x40] sm:$0xff] %v2782_v34   ;;  %v1898_v11 = vadd.f32 %v3130_v29, %v3757_v25  ;;  %v3133_v42 = vadd.f32 %v3132_v5, %v3131_v31  ;;  %v3244_v37 = vpop.f32.mrb[103].mxu1 }
 0x1c7   : > { %v2198_v8 = vadd.f32 %v2197_v36, %v2167_v33  ;;  %v3245_v39 = vadd.f32 %v3244_v37, %v3243_v6 }
 0x1c8   : > { %v2059_v46 = vadd.f32 %v3242_v40, %v1898_v11  ;;  %v1901_v47 = vadd.f32 %v3133_v42, %v3759_v27 }
 0x1ca   : > { %v2130_v48 = vadd.f32 %v2129_v38, %v2059_v46  ;;  %v2168_v50 = vmul.f32 %v2059_v46, %v2059_v46  ;;  %v2062_v52 = vadd.f32 %v3245_v39, %v1901_v47  ;;  %v3134_v56 = vpop.f32.mrb[104].mxu0 }
 0x1cb   : > { %v3246_v7 = vpop.f32.mrb[104].mxu1  ;;  %v3135_v58 = vpop.f32.mrb[105].mxu0 }
 0x1cc   : > { %v2199_v59 = vadd.f32 %v2198_v8, %v2168_v50  ;;  %v2131_v60 = vadd.f32 %v2130_v48, %v2062_v52  ;;  %v2169_v61 = vmul.f32 %v2062_v52, %v2062_v52  ;;  %v2787_v9 = vpack.c.bf16 %v2062_v52, %v2059_v46  ;;  %v3247_v62 = vpop.f32.mrb[105].mxu1  ;;  %v3137_v25 = vpop.f32.mrb[106].mxu0 }
 0x1cd   : > { %v3136_v53 = vadd.f32 %v3135_v58, %v3134_v56  ;;  %v3248_v2 = vadd.f32 %v3247_v62, %v3246_v7  ;;  %v3249_v4 = vpop.f32.mrb[106].mxu1  ;;  %v3138_v49 = vpop.f32.mrb[107].mxu0 }
 0x1ce   : > { %v2200_v54 = vadd.f32 %v2199_v59, %v2169_v61  ;;  %2827 = vst [vmem:[%s3791_s4 + $0x48] sm:$0xff] %v2787_v9   ;;  %v3139_v27 = vadd.f32 %v3138_v49, %v3137_v25  ;;  %v3250_v21 = vpop.f32.mrb[107].mxu1 }
 0x1cf   : > { %v1906_v10 = vadd.f32 %v3136_v53, %v3761_v43  ;;  %v3251_v12 = vadd.f32 %v3250_v21, %v3249_v4 }
 0x1d0   : > { %v1909_v55 = vadd.f32 %v3139_v27, %v3763_v45 }
 0x1d1   : > { %v2067_v13 = vadd.f32 %v3248_v2, %v1906_v10 }
 0x1d2   : > { %v2070_v57 = vadd.f32 %v3251_v12, %v1909_v55  ;;  %v3140_v14 = vpop.f32.mrb[108].mxu0 }
 0x1d3   : > { %v2132_v23 = vadd.f32 %v2131_v60, %v2067_v13  ;;  %v2170_v15 = vmul.f32 %v2067_v13, %v2067_v13  ;;  %v3252_v51 = vpop.f32.mrb[108].mxu1  ;;  %v3141_v16 = vpop.f32.mrb[109].mxu0 }
 0x1d4   : > { %v2171_v17 = vmul.f32 %v2070_v57, %v2070_v57  ;;  %v2792_v18 = vpack.c.bf16 %v2070_v57, %v2067_v13  ;;  %v3142_v20 = vadd.f32 %v3141_v16, %v3140_v14  ;;  %v3253_v24 = vpop.f32.mrb[109].mxu1  ;;  %v3143_v28 = vpop.f32.mrb[110].mxu0 }
 0x1d5   : > { %v2201_v32 = vadd.f32 %v2200_v54, %v2170_v15  ;;  %v2133_v33 = vadd.f32 %v2132_v23, %v2070_v57  ;;  %v3254_v34 = vadd.f32 %v3253_v24, %v3252_v51  ;;  %v3255_v43 = vpop.f32.mrb[110].mxu1  ;;  %v3144_v29 = vpop.f32.mrb[111].mxu0 }
 0x1d6   : > { %2828 = vst [vmem:[%s3791_s4 + $0x50] sm:$0xff] %v2792_v18   ;;  %v1914_v45 = vadd.f32 %v3142_v20, %v3765_v63  ;;  %v3145_v35 = vadd.f32 %v3144_v29, %v3143_v28  ;;  %v3256_v31 = vpop.f32.mrb[111].mxu1 }
 0x1d7   : > { %v2202_v36 = vadd.f32 %v2201_v32, %v2171_v17  ;;  %v3257_v38 = vadd.f32 %v3256_v31, %v3255_v43 }
 0x1d8   : > { %v2075_v40 = vadd.f32 %v3254_v34, %v1914_v45  ;;  %v1917_v6 = vadd.f32 %v3145_v35, %v3767_v1 }
 0x1da   : > { %v2134_v5 = vadd.f32 %v2133_v33, %v2075_v40  ;;  %v2172_v11 = vmul.f32 %v2075_v40, %v2075_v40  ;;  %v2078_v42 = vadd.f32 %v3257_v38, %v1917_v6  ;;  %v3146_v37 = vpop.f32.mrb[112].mxu0 }
 0x1db   : > { %v3258_v8 = vpop.f32.mrb[112].mxu1  ;;  %v3147_v39 = vpop.f32.mrb[113].mxu0 }
 0x1dc   : > { %v2203_v46 = vadd.f32 %v2202_v36, %v2172_v11  ;;  %v2135_v47 = vadd.f32 %v2134_v5, %v2078_v42  ;;  %v2173_v48 = vmul.f32 %v2078_v42, %v2078_v42  ;;  %v2797_v50 = vpack.c.bf16 %v2078_v42, %v2075_v40  ;;  %v3259_v52 = vpop.f32.mrb[113].mxu1  ;;  %v3149_v63 = vpop.f32.mrb[114].mxu0 }
 0x1dd   : > { %v3148_v56 = vadd.f32 %v3147_v39, %v3146_v37  ;;  %v3260_v7 = vadd.f32 %v3259_v52, %v3258_v8  ;;  %v3261_v58 = vpop.f32.mrb[114].mxu1  ;;  %v3150_v59 = vpop.f32.mrb[115].mxu0 }
 0x1de   : > { %v2204_v60 = vadd.f32 %v2203_v46, %v2173_v48  ;;  %2829 = vst [vmem:[%s3791_s4 + $0x58] sm:$0xff] %v2797_v50   ;;  %v3151_v1 = vadd.f32 %v3150_v59, %v3149_v63  ;;  %v3262_v61 = vpop.f32.mrb[115].mxu1 }
 0x1df   : > { %v1922_v9 = vadd.f32 %v3148_v56, %v3769_v19  ;;  %v3263_v62 = vadd.f32 %v3262_v61, %v3261_v58 }
 0x1e0   : > { %v1925_v25 = vadd.f32 %v3151_v1, %v3771_v22 }
 0x1e1   : > { %v2083_v53 = vadd.f32 %v3260_v7, %v1922_v9 }
 0x1e2   : > { %v2086_v2 = vadd.f32 %v3263_v62, %v1925_v25  ;;  %v3152_v4 = vpop.f32.mrb[116].mxu0 }
 0x1e3   : > { %v2136_v49 = vadd.f32 %v2135_v47, %v2083_v53  ;;  %v2174_v54 = vmul.f32 %v2083_v53, %v2083_v53  ;;  %v3264_v27 = vpop.f32.mrb[116].mxu1  ;;  %v3153_v21 = vpop.f32.mrb[117].mxu0 }
 0x1e4   : > { %v2175_v10 = vmul.f32 %v2086_v2, %v2086_v2  ;;  %v2802_v12 = vpack.c.bf16 %v2086_v2, %v2083_v53  ;;  %v3154_v55 = vadd.f32 %v3153_v21, %v3152_v4  ;;  %v3265_v13 = vpop.f32.mrb[117].mxu1  ;;  %v3155_v57 = vpop.f32.mrb[118].mxu0 }
 0x1e5   : > { %v2205_v14 = vadd.f32 %v2204_v60, %v2174_v54  ;;  %v2137_v23 = vadd.f32 %v2136_v49, %v2086_v2  ;;  %v3266_v15 = vadd.f32 %v3265_v13, %v3264_v27  ;;  %v3267_v19 = vpop.f32.mrb[118].mxu1  ;;  %v3156_v51 = vpop.f32.mrb[119].mxu0 }
 0x1e6   : > { %2830 = vst [vmem:[%s3791_s4 + $0x60] sm:$0xff] %v2802_v12   ;;  %v1930_v22 = vadd.f32 %v3154_v55, %v3773_v41  ;;  %v3157_v16 = vadd.f32 %v3156_v51, %v3155_v57  ;;  %v3268_v17 = vpop.f32.mrb[119].mxu1 }
 0x1e7   : > { %v2206_v18 = vadd.f32 %v2205_v14, %v2175_v10  ;;  %v3269_v20 = vadd.f32 %v3268_v17, %v3267_v19 }
 0x1e8   : > { %v2091_v24 = vadd.f32 %v3266_v15, %v1930_v22  ;;  %v1933_v28 = vadd.f32 %v3157_v16, %v3775_v44 }
 0x1ea   : > { %v2138_v32 = vadd.f32 %v2137_v23, %v2091_v24  ;;  %v2176_v33 = vmul.f32 %v2091_v24, %v2091_v24  ;;  %v2094_v34 = vadd.f32 %v3269_v20, %v1933_v28  ;;  %v3158_v43 = vpop.f32.mrb[120].mxu0 }
 0x1eb   : > { %v3270_v29 = vpop.f32.mrb[120].mxu1  ;;  %v3159_v45 = vpop.f32.mrb[121].mxu0 }
 0x1ec   : > { %v2207_v35 = vadd.f32 %v2206_v18, %v2176_v33  ;;  %v2139_v31 = vadd.f32 %v2138_v32, %v2094_v34  ;;  %v2177_v36 = vmul.f32 %v2094_v34, %v2094_v34  ;;  %v2807_v38 = vpack.c.bf16 %v2094_v34, %v2091_v24  ;;  %v3271_v40 = vpop.f32.mrb[121].mxu1  ;;  %v3161_v41 = vpop.f32.mrb[122].mxu0 }
 0x1ed   : > { %v3160_v6 = vadd.f32 %v3159_v45, %v3158_v43  ;;  %v3272_v5 = vadd.f32 %v3271_v40, %v3270_v29  ;;  %v3273_v11 = vpop.f32.mrb[122].mxu1  ;;  %v3162_v42 = vpop.f32.mrb[123].mxu0 }
 0x1ee   : > { %v2208_v37 = vadd.f32 %v2207_v35, %v2177_v36  ;;  %2831 = vst [vmem:[%s3791_s4 + $0x68] sm:$0xff] %v2807_v38   ;;  %v3163_v44 = vadd.f32 %v3162_v42, %v3161_v41  ;;  %v3274_v8 = vpop.f32.mrb[123].mxu1 }
 0x1ef   : > { %v1938_v39 = vadd.f32 %v3160_v6, %v3777_v0  ;;  %v3275_v46 = vadd.f32 %v3274_v8, %v3273_v11 }
 0x1f0   : > { %v1941_v47 = vadd.f32 %v3163_v44, %v3779_v3 }
 0x1f1   : > { %v2099_v48 = vadd.f32 %v3272_v5, %v1938_v39 }
 0x1f2   : > { %v2102_v50 = vadd.f32 %v3275_v46, %v1941_v47  ;;  %v3164_v52 = vpop.f32.mrb[124].mxu0 }
 0x1f3   : > { %v2140_v63 = vadd.f32 %v2139_v31, %v2099_v48  ;;  %v2178_v56 = vmul.f32 %v2099_v48, %v2099_v48  ;;  %v3276_v7 = vpop.f32.mrb[124].mxu1  ;;  %v3165_v58 = vpop.f32.mrb[125].mxu0 }
 0x1f4   : > { %v2179_v59 = vmul.f32 %v2102_v50, %v2102_v50  ;;  %v2812_v60 = vpack.c.bf16 %v2102_v50, %v2099_v48  ;;  %v3166_v1 = vadd.f32 %v3165_v58, %v3164_v52  ;;  %v3277_v61 = vpop.f32.mrb[125].mxu1  ;;  %v3167_v9 = vpop.f32.mrb[126].mxu0 }
 0x1f5   : > { %v2209_v62 = vadd.f32 %v2208_v37, %v2178_v56  ;;  %v2141_v25 = vadd.f32 %v2140_v63, %v2102_v50  ;;  %v3278_v53 = vadd.f32 %v3277_v61, %v3276_v7  ;;  %v3279_v0 = vpop.f32.mrb[126].mxu1  ;;  %v3168_v2 = vpop.f32.mrb[127].mxu0 }
 0x1f6   : > { %2832 = vst [vmem:[%s3791_s4 + $0x70] sm:$0xff] %v2812_v60   ;;  %v1946_v3 = vadd.f32 %v3166_v1, %v3781_v26  ;;  %v3169_v4 = vadd.f32 %v3168_v2, %v3167_v9  ;;  %v3280_v49 = vpop.f32.mrb[127].mxu1 }
 0x1f7   : > { %v2210_v54 = vadd.f32 %v2209_v62, %v2179_v59  ;;  %v3281_v27 = vadd.f32 %v3280_v49, %v3279_v0 }
 0x1f8   : > { %v2107_v21 = vadd.f32 %v3278_v53, %v1946_v3  ;;  %v1949_v10 = vadd.f32 %v3169_v4, %v3783_v30 }
 0x1fa   : > { %v2142_v12 = vadd.f32 %v2141_v25, %v2107_v21  ;;  %v2180_v55 = vmul.f32 %v2107_v21, %v2107_v21  ;;  %v2110_v13 = vadd.f32 %v3281_v27, %v1949_v10 }
 0x1fc   : > { %v2211_v57 = vadd.f32 %v2210_v54, %v2180_v55  ;;  %v2143_v14 = vadd.f32 %v2142_v12, %v2110_v13  ;;  %v2181_v23 = vmul.f32 %v2110_v13, %v2110_v13  ;;  %v2817_v15 = vpack.c.bf16 %v2110_v13, %v2107_v21 }
 0x1fe   : > { %v2144_v19 = vrot.slane %v2143_v14, 4  ;;  %v2212_v51 = vadd.f32 %v2211_v57, %v2181_v23  ;;  %2833 = vst [vmem:[%s3791_s4 + $0x78] sm:$0xff] %v2817_v15  }
 0x200   : > { %v2145_v26 = vadd.f32 %v2144_v19, %v2143_v14  ;;  %v2213_v22 = vrot.slane %v2212_v51, 4 }
 0x202   : > { %v2146_v16 = vrot.slane %v2145_v26, 2  ;;  %v2214_v17 = vadd.f32 %v2213_v22, %v2212_v51 }
 0x204   : > { %v2147_v18 = vadd.f32 %v2146_v16, %v2145_v26  ;;  %v2215_v20 = vrot.slane %v2214_v17, 2 }
 0x206   : > { %v2148_v30 = vrot.slane %v2147_v18, 1  ;;  %v2216_v24 = vadd.f32 %v2215_v20, %v2214_v17 }
 0x208   : > { %v2217_v28 = vrot.slane %v2216_v24, 1  ;;  %v2149_v32 = vadd.f32 %v2148_v30, %v2147_v18 }
 0x20a   : > { %v2218_v33 = vadd.f32 %v2217_v28, %v2216_v24 }
 0x20c   : > { %v2220_v34 = vsel %vm2219_vm0, %v2149_v32, %v2218_v33 }
 0x20d   : > { %2221 = vst [vmem:[%s187_s7] sm:$0x3] %v2220_v34 }
 0x20e PF: > { %s14_s12 = sadd.s32 1, %s3360_s12  }
 0x20f   : > { %p11_p5 = scmp.ge.s32.totalorder %s14_s12, 4  }
 0x211   :  { %13 = sbr.rel (!%p11_p5) target bundleno = 1 (0x1), region = 70 }

// kernel: discriminator_forward.11
= control target key start
LH: loop header
LB: loop body
LE: loop exit
PB: predicated region body
PF: predicated region fallthrough
CT: control target
= control target key end

     0   :  { %s3813_s12 = smov 0   ;;  %s4734_s0 = inlined_call_operand.vmem [shape: bf16[128,2048], index: 0, kind: input, shape index: {}]   ;;  %s4735_s1 = inlined_call_operand.vmem [shape: bf16[2048,256], index: 1, kind: input, shape index: {}]   ;;  %s4736_s2 = inlined_call_operand.vmem [shape: bf16[128,256], index: 2, kind: output, shape index: {0}]   ;;  %s4737_s3 = inlined_call_operand.vmem [shape: f32[2,2,256], index: 3, kind: output, shape index: {1}]  }
   0x1 LB: > { %s3819_s13 = sadd.s32 4294967295, %s3791_s12   ;;  %p2930_p0 = scmp.ge.s32.totalorder %s3791_s12, 1  ;;  %s3791_s12 = sphi %s3813_s12, %s14_s12  }
   0x2   : > { %p142_p1 = scmp.lt.s32.totalorder %s3791_s12, 3 }
   0x4   : > { %p143_p2 = pnand %p2930_p0, %p142_p1 }
   0x5   : > { %v3401_v0 = vld [vmem:[%s4735_s1 + $0x4] ss:$8 sps:$4 sm:$0xff] (!%p143_p2)   ;;  %v3405_v2 = vld [vmem:[%s4735_s1] ss:$8 sps:$4 sm:$0xff] (!%p143_p2)   ;;  %v3407_v4 = vld [vmem:[%s4735_s1 + $0x14] ss:$8 sps:$4 sm:$0xff] (!%p143_p2)  }
   0x6   : > { %146 = sbr.rel (%p143_p2) target bundleno = 524 (0x20c), region = 28  ;;  %v3403_v1 = vld [vmem:[%s4735_s1 + $0x404] ss:$8 sps:$4 sm:$0xff] (!%p143_p2)   ;;  %2112 = vmatprep.subr.bf16.mxu1 (!%p143_p2), %v3401_v0  ;;  %v3406_v3 = vld [vmem:[%s4735_s1 + $0x400] ss:$8 sps:$4 sm:$0xff] (!%p143_p2)   ;;  %s2931_s24 = sshll.u32 (!%p143_p2), %s3819_s13, 3 }
   0x7   : > { %2404 = vmatprep.subr.bf16.mxu0 (!%p143_p2), %v3403_v1  ;;  %2113 = vmatpush1.bf16.msra.mxu1 (!%p143_p2), %v3405_v2  ;;  %v3409_v5 = vld [vmem:[%s4735_s1 + $0x414] ss:$8 sps:$4 sm:$0xff] (!%p143_p2)   ;;  %v3411_v6 = vld [vmem:[%s4735_s1 + $0x10] ss:$8 sps:$4 sm:$0xff] (!%p143_p2)   ;;  %v3413_v8 = vld [vmem:[%s4735_s1 + $0x24] ss:$8 sps:$4 sm:$0xff] (!%p143_p2)  }
   0x8   : > { %2405 = vmatpush1.bf16.msra.mxu0 (!%p143_p2), %v3406_v3  ;;  %2114 = vmatprep.subr.bf16.mxu1 (!%p143_p2), %v3407_v4  ;;  %v3412_v7 = vld [vmem:[%s4735_s1 + $0x410] ss:$8 sps:$4 sm:$0xff] (!%p143_p2)   ;;  %v3415_v9 = vld [vmem:[%s4735_s1 + $0x424] ss:$8 sps:$4 sm:$0xff] (!%p143_p2)   ;;  %v3417_v10 = vld [vmem:[%s4735_s1 + $0x20] ss:$8 sps:$4 sm:$0xff] (!%p143_p2)  }
   0x9   : > { %2406 = vmatprep.subr.bf16.mxu0 (!%p143_p2), %v3409_v5  ;;  %v3418_v11 = vld [vmem:[%s4735_s1 + $0x420] ss:$8 sps:$4 sm:$0xff] (!%p143_p2)   ;;  %v3419_v12 = vld [vmem:[%s4735_s1 + $0x34] ss:$8 sps:$4 sm:$0xff] (!%p143_p2)   ;;  %v3423_v14 = vld [vmem:[%s4735_s1 + $0x30] ss:$8 sps:$4 sm:$0xff] (!%p143_p2)  }
   0xa   : > { %v3421_v13 = vld [vmem:[%s4735_s1 + $0x434] ss:$8 sps:$4 sm:$0xff] (!%p143_p2)   ;;  %v3424_v15 = vld [vmem:[%s4735_s1 + $0x430] ss:$8 sps:$4 sm:$0xff] (!%p143_p2)   ;;  %v3425_v16 = vld [vmem:[%s4735_s1 + $0x44] ss:$8 sps:$4 sm:$0xff] (!%p143_p2)  }
   0xb   : > { %2115 = vmatpush1.bf16.msra.mxu1 (!%p143_p2), %v3411_v6  ;;  %v3427_v17 = vld [vmem:[%s4735_s1 + $0x444] ss:$8 sps:$4 sm:$0xff] (!%p143_p2)   ;;  %v3429_v18 = vld [vmem:[%s4735_s1 + $0x40] ss:$8 sps:$4 sm:$0xff] (!%p143_p2)   ;;  %v3431_v20 = vld [vmem:[%s4735_s1 + $0x54] ss:$8 sps:$4 sm:$0xff] (!%p143_p2)  }
   0xc   : > { %2407 = vmatpush1.bf16.msra.mxu0 (!%p143_p2), %v3412_v7  ;;  %2116 = vmatprep.subr.bf16.mxu1 (!%p143_p2), %v3413_v8  ;;  %v3430_v19 = vld [vmem:[%s4735_s1 + $0x440] ss:$8 sps:$4 sm:$0xff] (!%p143_p2)   ;;  %v3433_v21 = vld [vmem:[%s4735_s1 + $0x454] ss:$8 sps:$4 sm:$0xff] (!%p143_p2)   ;;  %v3435_v22 = vld [vmem:[%s4735_s1 + $0x50] ss:$8 sps:$4 sm:$0xff] (!%p143_p2)  }
   0xd   : > { %2408 = vmatprep.subr.bf16.mxu0 %v3415_v9  ;;  %v3436_v23 = vld [vmem:[%s4735_s1 + $0x450] ss:$8 sps:$4 sm:$0xff]   ;;  %v3437_v24 = vld [vmem:[%s4735_s1 + $0x64] ss:$8 sps:$4 sm:$0xff]   ;;  %v3441_v26 = vld [vmem:[%s4735_s1 + $0x60] ss:$8 sps:$4 sm:$0xff]  }
   0xe   : > { %v3439_v25 = vld [vmem:[%s4735_s1 + $0x464] ss:$8 sps:$4 sm:$0xff]   ;;  %v3442_v27 = vld [vmem:[%s4735_s1 + $0x460] ss:$8 sps:$4 sm:$0xff]   ;;  %v3443_v28 = vld [vmem:[%s4735_s1 + $0x74] ss:$8 sps:$4 sm:$0xff]  }
   0xf   : > { %2117 = vmatpush1.bf16.msra.mxu1 %v3417_v10  ;;  %v3445_v29 = vld [vmem:[%s4735_s1 + $0x474] ss:$8 sps:$4 sm:$0xff]   ;;  %v3447_v30 = vld [vmem:[%s4735_s1 + $0x70] ss:$8 sps:$4 sm:$0xff]   ;;  %v3449_v32 = vld [vmem:[%s4735_s1 + $0x84] ss:$8 sps:$4 sm:$0xff]  }
  0x10   : > { %2409 = vmatpush1.bf16.msra.mxu0 %v3418_v11  ;;  %2118 = vmatprep.subr.bf16.mxu1 %v3419_v12  ;;  %v3448_v31 = vld [vmem:[%s4735_s1 + $0x470] ss:$8 sps:$4 sm:$0xff]   ;;  %p174_p3 = scmp.lt.s32.totalorder %s2931_s24, 15  ;;  %v3451_v33 = vld [vmem:[%s4735_s1 + $0x484] ss:$8 sps:$4 sm:$0xff]   ;;  %p187_p4 = scmp.lt.s32.totalorder %s3819_s13, 1 }
  0x11   : > { %2410 = vmatprep.subr.bf16.mxu0 %v3421_v13  ;;  %v3453_v34 = vld [vmem:[%s4735_s1 + $0x80] ss:$8 sps:$4 sm:$0xff]   ;;  %v3455_v36 = vld [vmem:[%s4735_s1 + $0x94] ss:$8 sps:$4 sm:$0xff]   ;;  %v3459_v38 = vld [vmem:[%s4735_s1 + $0x90] ss:$8 sps:$4 sm:$0xff]  }
  0x12   : > { %v3454_v35 = vld [vmem:[%s4735_s1 + $0x480] ss:$8 sps:$4 sm:$0xff]   ;;  %s4739_s24 = smov (!%p174_p3, %s2931_s24), 15  ;;  %v3457_v37 = vld [vmem:[%s4735_s1 + $0x494] ss:$8 sps:$4 sm:$0xff]   ;;  %s4741_s13 = smov (!%p187_p4, %s3819_s13), 1 }
  0x13   : > { %2119 = vmatpush1.bf16.msra.mxu1 %v3423_v14  ;;  %v3460_v39 = vld [vmem:[%s4735_s1 + $0x490] ss:$8 sps:$4 sm:$0xff]   ;;  %v3461_v40 = vld [vmem:[%s4735_s1 + $0xa4] ss:$8 sps:$4 sm:$0xff]   ;;  %s3270_s22 = sshll.u32 %s4739_s24, 6  ;;  %s3271_s18 = sshll.u32 %s4739_s24, 3 }
  0x14   : > { %2411 = vmatpush1.bf16.msra.mxu0 %v3424_v15  ;;  %2120 = vmatprep.subr.bf16.mxu1 %v3425_v16  ;;  %v3463_v41 = vld [vmem:[%s4735_s1 + $0x4a4] ss:$8 sps:$4 sm:$0xff]   ;;  %v3465_v42 = vld [vmem:[%s4735_s1 + $0xa0] ss:$8 sps:$4 sm:$0xff]   ;;  %s3962_s5 = scalar_lea.vmem %s4734_s0, %s3270_s22  ;;  %v3467_v44 = vld [vmem:[%s4735_s1 + $0xb4] ss:$8 sps:$4 sm:$0xff]   ;;  %s4716_s20 = scalar_lea.vmem %s4736_s2, %s3271_s18 }
  0x15   : > { %2412 = vmatprep.subr.bf16.mxu0 %v3427_v17  ;;  %v3466_v43 = vld [vmem:[%s4735_s1 + $0x4a0] ss:$8 sps:$4 sm:$0xff]   ;;  %v3469_v45 = vld [vmem:[%s4735_s1 + $0x4b4] ss:$8 sps:$4 sm:$0xff]   ;;  %v3471_v46 = vld [vmem:[%s4735_s1 + $0xb0] ss:$8 sps:$4 sm:$0xff]  }
  0x16   : > { %v3472_v47 = vld [vmem:[%s4735_s1 + $0x4b0] ss:$8 sps:$4 sm:$0xff]   ;;  %v192_v48 = vld [vmem:[%s3962_s5] sm:$0xff]  ;;  %v3479_v58 = vld [vmem:[%s4735_s1 + $0xd4] ss:$8 sps:$4 sm:$0xff]   ;;  %vm2764_vm0 = vcmask 1040384  }
  0x17   : > { %2121 = vmatpush1.bf16.msra.mxu1 %v3429_v18  ;;  %v200_v49 = vld [vmem:[%s3962_s5 + $0x40] sm:$0xff]  ;;  %v3481_v59 = vld [vmem:[%s4735_s1 + $0x4d4] ss:$8 sps:$4 sm:$0xff]   ;;  %v3483_v60 = vld [vmem:[%s4735_s1 + $0xd0] ss:$8 sps:$4 sm:$0xff]   ;;  %s3272_s24 = sshll.u32 %s4741_s13, 2 }
  0x18   : > { %2413 = vmatpush1.bf16.msra.mxu0 %v3430_v19  ;;  %2122 = vmatprep.subr.bf16.mxu1 %v3431_v20  ;;  %v3473_v50 = vld [vmem:[%s4735_s1 + $0xc4] ss:$8 sps:$4 sm:$0xff]   ;;  %v2940_v52 = vcombine.high %v192_v48, %v200_v49  ;;  %v3477_v56 = vld [vmem:[%s4735_s1 + $0xc0] ss:$8 sps:$4 sm:$0xff]   ;;  %v3484_v61 = vld [vmem:[%s4735_s1 + $0x4d0] ss:$8 sps:$4 sm:$0xff]   ;;  %v2939_v8 = vcombine.low %v192_v48, %v200_v49  ;;  %s191_s23 = scalar_lea.vmem %s4737_s3, %s3272_s24 }
  0x19   : > { %2414 = vmatprep.subr.bf16.mxu0 %v3433_v21  ;;  %v3475_v51 = vld [vmem:[%s4735_s1 + $0x4c4] ss:$8 sps:$4 sm:$0xff]   ;;  %v3478_v57 = vld [vmem:[%s4735_s1 + $0x4c0] ss:$8 sps:$4 sm:$0xff]   ;;  %v3491_v2 = vld [vmem:[%s4735_s1 + $0xf4] ss:$8 sps:$4 sm:$0xff]  }
  0x1a   : > { %v196_v53 = vld [vmem:[%s3962_s5 + $0x20] sm:$0xff]  ;;  %2144 = vmatprep.mubr.bf16.mxu1 %v2940_v52  ;;  %v3493_v3 = vld [vmem:[%s4735_s1 + $0x4f4] ss:$8 sps:$4 sm:$0xff]   ;;  %v3495_v4 = vld [vmem:[%s4735_s1 + $0xf0] ss:$8 sps:$4 sm:$0xff]  }
  0x1b   : > { %2123 = vmatpush1.bf16.msra.mxu1 %v3435_v22  ;;  %v204_v54 = vld [vmem:[%s3962_s5 + $0x60] sm:$0xff]  ;;  %v3496_v5 = vld [vmem:[%s4735_s1 + $0x4f0] ss:$8 sps:$4 sm:$0xff]   ;;  %v3505_v12 = vld [vmem:[%s4735_s1 + $0x114] ss:$8 sps:$4 sm:$0xff]  }
  0x1c   : > { %2415 = vmatpush1.bf16.msra.mxu0 %v3436_v23  ;;  %2124 = vmatprep.subr.bf16.mxu1 %v3437_v24  ;;  %v2948_v55 = vcombine.high %v196_v53, %v204_v54  ;;  %v3485_v62 = vld [vmem:[%s4735_s1 + $0xe4] ss:$8 sps:$4 sm:$0xff]   ;;  %v3489_v0 = vld [vmem:[%s4735_s1 + $0xe0] ss:$8 sps:$4 sm:$0xff]   ;;  %v2947_v10 = vcombine.low %v196_v53, %v204_v54  ;;  %v3508_v13 = vld [vmem:[%s4735_s1 + $0x514] ss:$8 sps:$4 sm:$0xff]  }
  0x1d   : > { %2416 = vmatprep.subr.bf16.mxu0 %v3439_v25  ;;  %v3487_v63 = vld [vmem:[%s4735_s1 + $0x4e4] ss:$8 sps:$4 sm:$0xff]   ;;  %v3490_v1 = vld [vmem:[%s4735_s1 + $0x4e0] ss:$8 sps:$4 sm:$0xff]   ;;  %v3503_v14 = vld [vmem:[%s4735_s1 + $0x110] ss:$8 sps:$4 sm:$0xff]  }
  0x1e   : > { %2436 = vmatprep.mubr.bf16.mxu0 %v2948_v55  ;;  %v3499_v6 = vld [vmem:[%s4735_s1 + $0x104] ss:$8 sps:$4 sm:$0xff]   ;;  %v3497_v9 = vld [vmem:[%s4735_s1 + $0x100] ss:$8 sps:$4 sm:$0xff]   ;;  %v3506_v15 = vld [vmem:[%s4735_s1 + $0x510] ss:$8 sps:$4 sm:$0xff]  }
  0x1f   : > { %2125 = vmatpush1.bf16.msra.mxu1 %v3441_v26  ;;  %v3502_v7 = vld [vmem:[%s4735_s1 + $0x504] ss:$8 sps:$4 sm:$0xff]   ;;  %v3500_v11 = vld [vmem:[%s4735_s1 + $0x500] ss:$8 sps:$4 sm:$0xff]   ;;  %v3517_v22 = vld [vmem:[%s4735_s1 + $0x134] ss:$8 sps:$4 sm:$0xff]  }
  0x20   : > { %2417 = vmatpush1.bf16.msra.mxu0 %v3442_v27  ;;  %2126 = vmatprep.subr.bf16.mxu1 %v3443_v28  ;;  %v3511_v16 = vld [vmem:[%s4735_s1 + $0x124] ss:$8 sps:$4 sm:$0xff]   ;;  %v3509_v18 = vld [vmem:[%s4735_s1 + $0x120] ss:$8 sps:$4 sm:$0xff]   ;;  %v3520_v23 = vld [vmem:[%s4735_s1 + $0x534] ss:$8 sps:$4 sm:$0xff]  }
  0x21   : > { %2418 = vmatprep.subr.bf16.mxu0 %v3445_v29  ;;  %v3514_v17 = vld [vmem:[%s4735_s1 + $0x524] ss:$8 sps:$4 sm:$0xff]   ;;  %v3512_v19 = vld [vmem:[%s4735_s1 + $0x520] ss:$8 sps:$4 sm:$0xff]   ;;  %v3515_v29 = vld [vmem:[%s4735_s1 + $0x130] ss:$8 sps:$4 sm:$0xff]  }
  0x22   : > { %v208_v20 = vld [vmem:[%s3962_s5 + $0x80] sm:$0xff] }
  0x23   : > { %2127 = vmatpush1.bf16.msra.mxu1 %v3447_v30  ;;  %v216_v21 = vld [vmem:[%s3962_s5 + $0xc0] sm:$0xff]  ;;  %v3518_v30 = vld [vmem:[%s4735_s1 + $0x530] ss:$8 sps:$4 sm:$0xff]  }
  0x24   : > { %2419 = vmatpush1.bf16.msra.mxu0 %v3448_v31  ;;  %2128 = vmatprep.subr.bf16.mxu1 %v3449_v32  ;;  %v2956_v24 = vcombine.high %v208_v20, %v216_v21  ;;  %v212_v25 = vld [vmem:[%s3962_s5 + $0xa0] sm:$0xff]  ;;  %v2955_v26 = vcombine.low %v208_v20, %v216_v21  ;;  %v3563_v20 = vld [vmem:[%s4735_s1 + $0x1b0] ss:$8 sps:$4 sm:$0xff]  }
  0x25   : > { %2420 = vmatprep.subr.bf16.mxu0 %v3451_v33  ;;  %v220_v27 = vld [vmem:[%s3962_s5 + $0xe0] sm:$0xff]  ;;  %v3566_v21 = vld [vmem:[%s4735_s1 + $0x5b0] ss:$8 sps:$4 sm:$0xff]  }
  0x26   : > { %v2964_v28 = vcombine.high %v212_v25, %v220_v27  ;;  %v2963_v31 = vcombine.low %v212_v25, %v220_v27  ;;  %v3523_v32 = vld [vmem:[%s4735_s1 + $0x144] ss:$8 sps:$4 sm:$0xff]   ;;  %v3533_v55 = vld [vmem:[%s4735_s1 + $0x160] ss:$8 sps:$4 sm:$0xff]   ;;  %v3580_v27 = vld [vmem:[%s4735_s1 + $0x5d4] ss:$8 sps:$4 sm:$0xff]  }
  0x27   : > { %2129 = vmatpush1.bf16.msra.mxu1 %v3453_v34  ;;  %v3526_v33 = vld [vmem:[%s4735_s1 + $0x544] ss:$8 sps:$4 sm:$0xff]   ;;  %v3572_v25 = vld [vmem:[%s4735_s1 + $0x5c0] ss:$8 sps:$4 sm:$0xff]  }
  0x28   : > { %2421 = vmatpush1.bf16.msra.mxu0 %v3454_v35  ;;  %2130 = vmatprep.subr.bf16.mxu1 %v3455_v36  ;;  %v224_v34 = vld [vmem:[%s3962_s5 + $0x100] sm:$0xff] }
  0x29   : > { %2422 = vmatprep.subr.bf16.mxu0 %v3457_v37  ;;  %v232_v35 = vld [vmem:[%s3962_s5 + $0x140] sm:$0xff] }
  0x2a   : > { %v3521_v36 = vld [vmem:[%s4735_s1 + $0x140] ss:$8 sps:$4 sm:$0xff]   ;;  %v2972_v37 = vcombine.high %v224_v34, %v232_v35 }
  0x2b   : > { %2131 = vmatpush1.bf16.msra.mxu1 %v3459_v38  ;;  %v3524_v38 = vld [vmem:[%s4735_s1 + $0x540] ss:$8 sps:$4 sm:$0xff]  }
  0x2c   : > { %2423 = vmatpush1.bf16.msra.mxu0 %v3460_v39  ;;  %2132 = vmatprep.subr.bf16.mxu1 %v3461_v40  ;;  %v228_v39 = vld [vmem:[%s3962_s5 + $0x120] sm:$0xff] }
  0x2d   : > { %2424 = vmatprep.subr.bf16.mxu0 %v3463_v41  ;;  %v236_v40 = vld [vmem:[%s3962_s5 + $0x160] sm:$0xff]  ;;  %v2971_v41 = vcombine.low %v224_v34, %v232_v35  ;;  %v3589_v34 = vld [vmem:[%s4735_s1 + $0x1f4] ss:$8 sps:$4 sm:$0xff]  }
  0x2e   : > { %v240_v48 = vld [vmem:[%s3962_s5 + $0x180] sm:$0xff]  ;;  %v3592_v35 = vld [vmem:[%s4735_s1 + $0x5f4] ss:$8 sps:$4 sm:$0xff]  }
  0x2f   : > { %2133 = vmatpush1.bf16.msra.mxu1 %v3465_v42  ;;  %v3529_v42 = vld [vmem:[%s4735_s1 + $0x154] ss:$8 sps:$4 sm:$0xff]   ;;  %v248_v49 = vld [vmem:[%s3962_s5 + $0x1c0] sm:$0xff] }
  0x30   : > { %2425 = vmatpush1.bf16.msra.mxu0 %v3466_v43  ;;  %2134 = vmatprep.subr.bf16.mxu1 %v3467_v44  ;;  %v2980_v43 = vcombine.high %v228_v39, %v236_v40  ;;  %v3532_v44 = vld [vmem:[%s4735_s1 + $0x554] ss:$8 sps:$4 sm:$0xff]   ;;  %v2988_v52 = vcombine.high %v240_v48, %v248_v49  ;;  %v244_v53 = vld [vmem:[%s3962_s5 + $0x1a0] sm:$0xff] }
  0x31   : > { %2426 = vmatprep.subr.bf16.mxu0 %v3469_v45  ;;  %v3527_v45 = vld [vmem:[%s4735_s1 + $0x150] ss:$8 sps:$4 sm:$0xff]   ;;  %v252_v54 = vld [vmem:[%s3962_s5 + $0x1e0] sm:$0xff] }
  0x33   : > { %2135 = vmatpush1.bf16.msra.mxu1 %v3471_v46  ;;  %v3530_v46 = vld [vmem:[%s4735_s1 + $0x550] ss:$8 sps:$4 sm:$0xff]  }
  0x34   : > { %2427 = vmatpush1.bf16.msra.mxu0 %v3472_v47  ;;  %2136 = vmatprep.subr.bf16.mxu1 %v3473_v50  ;;  %v2979_v47 = vcombine.low %v228_v39, %v236_v40  ;;  %v3535_v50 = vld [vmem:[%s4735_s1 + $0x164] ss:$8 sps:$4 sm:$0xff]   ;;  %v3593_v40 = vld [vmem:[%s4735_s1 + $0x200] ss:$8 sps:$4 sm:$0xff]  }
  0x35   : > { %2428 = vmatprep.subr.bf16.mxu0 %v3475_v51  ;;  %v3538_v51 = vld [vmem:[%s4735_s1 + $0x564] ss:$8 sps:$4 sm:$0xff]  }
  0x36   : > { %v3598_v39 = vld [vmem:[%s4735_s1 + $0x604] ss:$8 sps:$4 sm:$0xff]  }
  0x37   : > { %2137 = vmatpush1.bf16.msra.mxu1 %v3477_v56  ;;  %v3536_v56 = vld [vmem:[%s4735_s1 + $0x560] ss:$8 sps:$4 sm:$0xff]  }
  0x38   : > { %2429 = vmatpush1.bf16.msra.mxu0 %v3478_v57  ;;  %2138 = vmatprep.subr.bf16.mxu1 %v3479_v58  ;;  %v2996_v57 = vcombine.high %v244_v53, %v252_v54  ;;  %v2987_v58 = vcombine.low %v240_v48, %v248_v49  ;;  %v3601_v48 = vld [vmem:[%s4735_s1 + $0x214] ss:$8 sps:$4 sm:$0xff]  }
  0x39   : > { %2430 = vmatprep.subr.bf16.mxu0 %v3481_v59  ;;  %v3541_v59 = vld [vmem:[%s4735_s1 + $0x174] ss:$8 sps:$4 sm:$0xff]  }
  0x3a   : > { %v3604_v49 = vld [vmem:[%s4735_s1 + $0x614] ss:$8 sps:$4 sm:$0xff]  }
  0x3b   : > { %2139 = vmatpush1.bf16.msra.mxu1 %v3483_v60  ;;  %v3544_v60 = vld [vmem:[%s4735_s1 + $0x574] ss:$8 sps:$4 sm:$0xff]  }
  0x3c   : > { %2431 = vmatpush1.bf16.msra.mxu0 %v3484_v61  ;;  %2140 = vmatprep.subr.bf16.mxu1 %v3485_v62  ;;  %v3539_v61 = vld [vmem:[%s4735_s1 + $0x170] ss:$8 sps:$4 sm:$0xff]  }
  0x3d   : > { %2432 = vmatprep.subr.bf16.mxu0 %v3487_v63  ;;  %v3542_v62 = vld [vmem:[%s4735_s1 + $0x570] ss:$8 sps:$4 sm:$0xff]   ;;  %v4137_v63 = vld [vmem:[%s3962_s5 + $0x8] sm:$0xff] }
  0x3f   : > { %2141 = vmatpush1.bf16.msra.mxu1 %v3489_v0  ;;  %v2995_v0 = vcombine.low %v244_v53, %v252_v54  ;;  %v3602_v53 = vld [vmem:[%s4735_s1 + $0x610] ss:$8 sps:$4 sm:$0xff]   ;;  %v3607_v54 = vld [vmem:[%s4735_s1 + $0x224] ss:$8 sps:$4 sm:$0xff]  }
  0x40   : > { %2433 = vmatpush1.bf16.msra.mxu0 %v3490_v1  ;;  %2142 = vmatprep.subr.bf16.mxu1 %v3491_v2  ;;  %v4140_v1 = vld [vmem:[%s3962_s5 + $0x48] sm:$0xff] }
  0x41   : > { %2434 = vmatprep.subr.bf16.mxu0 %v3493_v3  ;;  %v3547_v2 = vld [vmem:[%s4735_s1 + $0x184] ss:$8 sps:$4 sm:$0xff]  }
  0x42   : > { %v3550_v3 = vld [vmem:[%s4735_s1 + $0x584] ss:$8 sps:$4 sm:$0xff]  }
  0x43   : > { %2143 = vmatpush1.bf16.msra.mxu1 %v3495_v4  ;;  %v2942_v4 = vcombine.high %v4137_v63, %v4140_v1 }
  0x44   : > { %2435 = vmatpush1.bf16.msra.mxu0 %v3496_v5  ;;  %2185 = vmatprep.subr.bf16.mxu1 %v3499_v6  ;;  %v4151_v5 = vld [vmem:[%s3962_s5 + $0x28] sm:$0xff] }
  0x45   : > { %2477 = vmatprep.subr.bf16.mxu0 %v3502_v7  ;;  %v4154_v6 = vld [vmem:[%s3962_s5 + $0x68] sm:$0xff] }
  0x46   : > { %2145 = vmatmul.mubr.bf16.vlgmr.msra.gmra.mrb[0].mxu1 %v2939_v8  ;;  %v2950_v7 = vcombine.high %v4151_v5, %v4154_v6  ;;  %v3545_v8 = vld [vmem:[%s4735_s1 + $0x180] ss:$8 sps:$4 sm:$0xff]  }
  0x47   : > { %2437 = vmatmul.mubr.bf16.vlgmr.msra.gmra.mrb[0].mxu0 %v2947_v10  ;;  %2186 = vmatpush1.bf16.msra.mxu1 %v3497_v9  ;;  %v3548_v9 = vld [vmem:[%s4735_s1 + $0x580] ss:$8 sps:$4 sm:$0xff]   ;;  %v3553_v10 = vld [vmem:[%s4735_s1 + $0x194] ss:$8 sps:$4 sm:$0xff]  }
  0x48   : > { %2478 = vmatpush1.bf16.msra.mxu0 %v3500_v11  ;;  %2187 = vmatprep.subr.bf16.mxu1 %v3505_v12  ;;  %v3556_v11 = vld [vmem:[%s4735_s1 + $0x594] ss:$8 sps:$4 sm:$0xff]   ;;  %v3551_v12 = vld [vmem:[%s4735_s1 + $0x190] ss:$8 sps:$4 sm:$0xff]  }
  0x49   : > { %2479 = vmatprep.subr.bf16.mxu0 %v3508_v13  ;;  %2154 = vmatprep.mubr.bf16.mxu1 %v2956_v24  ;;  %v3554_v13 = vld [vmem:[%s4735_s1 + $0x590] ss:$8 sps:$4 sm:$0xff]   ;;  %v3569_v24 = vld [vmem:[%s4735_s1 + $0x1c0] ss:$8 sps:$4 sm:$0xff]  }
  0x4a   : > { %2446 = vmatprep.mubr.bf16.mxu0 %v2964_v28  ;;  %v3575_v28 = vld [vmem:[%s4735_s1 + $0x1d0] ss:$8 sps:$4 sm:$0xff]  }
  0x4b   : > { %2188 = vmatpush1.bf16.msra.mxu1 %v3503_v14  ;;  %v3559_v14 = vld [vmem:[%s4735_s1 + $0x1a4] ss:$8 sps:$4 sm:$0xff]  }
  0x4c   : > { %2480 = vmatpush1.bf16.msra.mxu0 %v3506_v15  ;;  %2189 = vmatprep.subr.bf16.mxu1 %v3511_v16  ;;  %v3562_v15 = vld [vmem:[%s4735_s1 + $0x5a4] ss:$8 sps:$4 sm:$0xff]   ;;  %v3557_v16 = vld [vmem:[%s4735_s1 + $0x1a0] ss:$8 sps:$4 sm:$0xff]  }
  0x4d   : > { %2481 = vmatprep.subr.bf16.mxu0 %v3514_v17  ;;  %v3560_v17 = vld [vmem:[%s4735_s1 + $0x5a0] ss:$8 sps:$4 sm:$0xff]  }
  0x4e   : > { %2155 = vmatmul.mubr.bf16.gmra.mrb[4].mxu1 %v2955_v26  ;;  %v3577_v26 = vld [vmem:[%s4735_s1 + $0x1d4] ss:$8 sps:$4 sm:$0xff]  }
  0x4f   : > { %2190 = vmatpush1.bf16.msra.mxu1 %v3509_v18  ;;  %2447 = vmatmul.mubr.bf16.gmra.mrb[4].mxu0 %v2963_v31  ;;  %v3565_v18 = vld [vmem:[%s4735_s1 + $0x1b4] ss:$8 sps:$4 sm:$0xff]   ;;  %v3586_v31 = vld [vmem:[%s4735_s1 + $0x5e4] ss:$8 sps:$4 sm:$0xff]  }
  0x50   : > { %2482 = vmatpush1.bf16.msra.mxu0 %v3512_v19  ;;  %2191 = vmatprep.subr.bf16.mxu1 %v3517_v22  ;;  %v3568_v19 = vld [vmem:[%s4735_s1 + $0x5b4] ss:$8 sps:$4 sm:$0xff]   ;;  %v3571_v22 = vld [vmem:[%s4735_s1 + $0x1c4] ss:$8 sps:$4 sm:$0xff]  }
  0x51   : > { %2483 = vmatprep.subr.bf16.mxu0 %v3520_v23  ;;  %2164 = vmatprep.mubr.bf16.mxu1 %v2972_v37  ;;  %v3574_v23 = vld [vmem:[%s4735_s1 + $0x5c4] ss:$8 sps:$4 sm:$0xff]   ;;  %v3590_v37 = vld [vmem:[%s4735_s1 + $0x5f0] ss:$8 sps:$4 sm:$0xff]  }
  0x52   : > { %2456 = vmatprep.mubr.bf16.mxu0 %v2980_v43  ;;  %v2941_v43 = vcombine.low %v4137_v63, %v4140_v1  ;;  %v237_v63 = vld [vmem:[%s3962_s5 + $0x168] sm:$0xff]  ;;  %v3616_v1 = vld [vmem:[%s4735_s1 + $0x634] ss:$8 sps:$4 sm:$0xff]  }
  0x53   : > { %2192 = vmatpush1.bf16.msra.mxu1 %v3515_v29  ;;  %v3578_v29 = vld [vmem:[%s4735_s1 + $0x5d0] ss:$8 sps:$4 sm:$0xff]  }
  0x54   : > { %2484 = vmatpush1.bf16.msra.mxu0 %v3518_v30  ;;  %2193 = vmatprep.subr.bf16.mxu1 %v3523_v32  ;;  %v3583_v30 = vld [vmem:[%s4735_s1 + $0x1e4] ss:$8 sps:$4 sm:$0xff]   ;;  %v3581_v32 = vld [vmem:[%s4735_s1 + $0x1e0] ss:$8 sps:$4 sm:$0xff]  }
  0x55   : > { %2485 = vmatprep.subr.bf16.mxu0 %v3526_v33  ;;  %v3584_v33 = vld [vmem:[%s4735_s1 + $0x5e0] ss:$8 sps:$4 sm:$0xff]  }
  0x56   : > { %2165 = vmatmul.mubr.bf16.gmra.mrb[8].mxu1 %v2971_v41  ;;  %v3596_v41 = vld [vmem:[%s4735_s1 + $0x600] ss:$8 sps:$4 sm:$0xff]  }
  0x57   : > { %2194 = vmatpush1.bf16.msra.mxu1 %v3521_v36  ;;  %2457 = vmatmul.mubr.bf16.gmra.mrb[8].mxu0 %v2979_v47  ;;  %v3587_v36 = vld [vmem:[%s4735_s1 + $0x1f0] ss:$8 sps:$4 sm:$0xff]   ;;  %v221_v47 = vld [vmem:[%s3962_s5 + $0xe8] sm:$0xff] }
  0x58   : > { %2486 = vmatpush1.bf16.msra.mxu0 %v3524_v38  ;;  %2195 = vmatprep.subr.bf16.mxu1 %v3529_v42  ;;  %v3595_v38 = vld [vmem:[%s4735_s1 + $0x204] ss:$8 sps:$4 sm:$0xff]  }
  0x59   : > { %2487 = vmatprep.subr.bf16.mxu0 %v3532_v44  ;;  %2174 = vmatprep.mubr.bf16.mxu1 %v2988_v52  ;;  %v209_v42 = vld [vmem:[%s3962_s5 + $0x88] sm:$0xff]  ;;  %v2949_v44 = vcombine.low %v4151_v5, %v4154_v6  ;;  %v3599_v52 = vld [vmem:[%s4735_s1 + $0x210] ss:$8 sps:$4 sm:$0xff]  }
  0x5a   : > { %2466 = vmatprep.mubr.bf16.mxu0 %v2996_v57  ;;  %v3608_v57 = vld [vmem:[%s4735_s1 + $0x620] ss:$8 sps:$4 sm:$0xff]   ;;  %v3614_v5 = vld [vmem:[%s4735_s1 + $0x630] ss:$8 sps:$4 sm:$0xff]   ;;  %v3619_v6 = vld [vmem:[%s4735_s1 + $0x244] ss:$8 sps:$4 sm:$0xff]  }
  0x5b   : > { %2196 = vmatpush1.bf16.msra.mxu1 %v3527_v45  ;;  %v217_v45 = vld [vmem:[%s3962_s5 + $0xc8] sm:$0xff] }
  0x5c   : > { %2488 = vmatpush1.bf16.msra.mxu0 %v3530_v46  ;;  %2197 = vmatprep.subr.bf16.mxu1 %v3535_v50  ;;  %v213_v46 = vld [vmem:[%s3962_s5 + $0xa8] sm:$0xff]  ;;  %v2958_v50 = vcombine.high %v209_v42, %v217_v45 }
  0x5d   : > { %2489 = vmatprep.subr.bf16.mxu0 %v3538_v51  ;;  %v2966_v51 = vcombine.high %v213_v46, %v221_v47 }
  0x5e   : > { %2175 = vmatmul.mubr.bf16.gmra.mrb[12].mxu1 %v2987_v58  ;;  %v225_v58 = vld [vmem:[%s3962_s5 + $0x108] sm:$0xff] }
  0x5f   : > { %2198 = vmatpush1.bf16.msra.mxu1 %v3533_v55  ;;  %2217 = vmatprep.mubr.bf16.mxu1 %v2942_v4  ;;  %v3610_v55 = vld [vmem:[%s4735_s1 + $0x624] ss:$8 sps:$4 sm:$0xff]   ;;  %v3611_v4 = vld [vmem:[%s4735_s1 + $0x230] ss:$8 sps:$4 sm:$0xff]  }
  0x60   : > { %2490 = vmatpush1.bf16.msra.mxu0 %v3536_v56  ;;  %2199 = vmatprep.subr.bf16.mxu1 %v3541_v59  ;;  %v3605_v56 = vld [vmem:[%s4735_s1 + $0x220] ss:$8 sps:$4 sm:$0xff]  }
  0x61   : > { %2491 = vmatprep.subr.bf16.mxu0 %v3544_v60  ;;  %2467 = vmatmul.mubr.bf16.gmra.mrb[12].mxu0 %v2995_v0  ;;  %v233_v59 = vld [vmem:[%s3962_s5 + $0x148] sm:$0xff]  ;;  %v2957_v60 = vcombine.low %v209_v42, %v217_v45  ;;  %v3613_v0 = vld [vmem:[%s4735_s1 + $0x234] ss:$8 sps:$4 sm:$0xff]   ;;  %v3650_v45 = vld [vmem:[%s4735_s1 + $0x690] ss:$8 sps:$4 sm:$0xff]  }
  0x62   : > { %2509 = vmatprep.mubr.bf16.mxu0 %v2950_v7  ;;  %v3622_v7 = vld [vmem:[%s4735_s1 + $0x644] ss:$8 sps:$4 sm:$0xff]   ;;  %v3649_v42 = vld [vmem:[%s4735_s1 + $0x294] ss:$8 sps:$4 sm:$0xff]  }
  0x63   : > { %2200 = vmatpush1.bf16.msra.mxu1 %v3539_v61  ;;  %v2965_v61 = vcombine.low %v213_v46, %v221_v47  ;;  %v3655_v46 = vld [vmem:[%s4735_s1 + $0x2a4] ss:$8 sps:$4 sm:$0xff]  }
  0x64   : > { %2492 = vmatpush1.bf16.msra.mxu0 %v3542_v62  ;;  %2201 = vmatprep.subr.bf16.mxu1 %v3547_v2  ;;  %v229_v62 = vld [vmem:[%s3962_s5 + $0x128] sm:$0xff]  ;;  %v2974_v2 = vcombine.high %v225_v58, %v233_v59 }
  0x65   : > { %2493 = vmatprep.subr.bf16.mxu0 %v3550_v3  ;;  %v2982_v3 = vcombine.high %v229_v62, %v237_v63  ;;  %v3658_v47 = vld [vmem:[%s4735_s1 + $0x6a4] ss:$8 sps:$4 sm:$0xff]  }
  0x67   : > { %2202 = vmatpush1.bf16.msra.mxu1 %v3545_v8  ;;  %v3617_v8 = vld [vmem:[%s4735_s1 + $0x240] ss:$8 sps:$4 sm:$0xff]  }
  0x68   : > { %2494 = vmatpush1.bf16.msra.mxu0 %v3548_v9  ;;  %2203 = vmatprep.subr.bf16.mxu1 %v3553_v10  ;;  %v3620_v9 = vld [vmem:[%s4735_s1 + $0x640] ss:$8 sps:$4 sm:$0xff]  }
  0x69   : > { %2495 = vmatprep.subr.bf16.mxu0 %v3556_v11  ;;  %v241_v10 = vld [vmem:[%s3962_s5 + $0x188] sm:$0xff] }
  0x6a   : > { %v249_v11 = vld [vmem:[%s3962_s5 + $0x1c8] sm:$0xff] }
  0x6b   : > { %2204 = vmatpush1.bf16.msra.mxu1 %v3551_v12  ;;  %v2973_v12 = vcombine.low %v225_v58, %v233_v59  ;;  %v3673_v58 = vld [vmem:[%s4735_s1 + $0x2d4] ss:$8 sps:$4 sm:$0xff]  }
  0x6c   : > { %2496 = vmatpush1.bf16.msra.mxu0 %v3554_v13  ;;  %2205 = vmatprep.subr.bf16.mxu1 %v3559_v14  ;;  %v2981_v13 = vcombine.low %v229_v62, %v237_v63  ;;  %v245_v14 = vld [vmem:[%s3962_s5 + $0x1a8] sm:$0xff]  ;;  %v3676_v59 = vld [vmem:[%s4735_s1 + $0x6d4] ss:$8 sps:$4 sm:$0xff]  }
  0x6d   : > { %2497 = vmatprep.subr.bf16.mxu0 %v3562_v15  ;;  %v253_v15 = vld [vmem:[%s3962_s5 + $0x1e8] sm:$0xff] }
  0x6e   : > { %v3679_v62 = vld [vmem:[%s4735_s1 + $0x2e4] ss:$8 sps:$4 sm:$0xff]  }
  0x6f   : > { %2206 = vmatpush1.bf16.msra.mxu1 %v3557_v16  ;;  %v3625_v16 = vld [vmem:[%s4735_s1 + $0x254] ss:$8 sps:$4 sm:$0xff]   ;;  %v3682_v63 = vld [vmem:[%s4735_s1 + $0x6e4] ss:$8 sps:$4 sm:$0xff]  }
  0x70   : > { %2498 = vmatpush1.bf16.msra.mxu0 %v3560_v17  ;;  %2207 = vmatprep.subr.bf16.mxu1 %v3565_v18  ;;  %v3628_v17 = vld [vmem:[%s4735_s1 + $0x654] ss:$8 sps:$4 sm:$0xff]   ;;  %v2990_v18 = vcombine.high %v241_v10, %v249_v11 }
  0x71   : > { %2499 = vmatprep.subr.bf16.mxu0 %v3568_v19  ;;  %v2998_v19 = vcombine.high %v245_v14, %v253_v15 }
  0x73   : > { %2208 = vmatpush1.bf16.msra.mxu1 %v3563_v20  ;;  %v3623_v20 = vld [vmem:[%s4735_s1 + $0x250] ss:$8 sps:$4 sm:$0xff]  }
  0x74   : > { %2500 = vmatpush1.bf16.msra.mxu0 %v3566_v21  ;;  %2209 = vmatprep.subr.bf16.mxu1 %v3571_v22  ;;  %v3626_v21 = vld [vmem:[%s4735_s1 + $0x650] ss:$8 sps:$4 sm:$0xff]   ;;  %v3631_v22 = vld [vmem:[%s4735_s1 + $0x264] ss:$8 sps:$4 sm:$0xff]  }
  0x75   : > { %2501 = vmatprep.subr.bf16.mxu0 %v3574_v23  ;;  %v3634_v23 = vld [vmem:[%s4735_s1 + $0x664] ss:$8 sps:$4 sm:$0xff]  }
  0x77   : > { %2210 = vmatpush1.bf16.msra.mxu1 %v3569_v24  ;;  %v3629_v24 = vld [vmem:[%s4735_s1 + $0x260] ss:$8 sps:$4 sm:$0xff]  }
  0x78   : > { %2502 = vmatpush1.bf16.msra.mxu0 %v3572_v25  ;;  %2211 = vmatprep.subr.bf16.mxu1 %v3577_v26  ;;  %v3632_v25 = vld [vmem:[%s4735_s1 + $0x660] ss:$8 sps:$4 sm:$0xff]   ;;  %v4349_v26 = vld [vmem:[%s3962_s5 + $0x10] sm:$0xff] }
  0x79   : > { %2503 = vmatprep.subr.bf16.mxu0 %v3580_v27  ;;  %v4352_v27 = vld [vmem:[%s3962_s5 + $0x50] sm:$0xff] }
  0x7b   : > { %2212 = vmatpush1.bf16.msra.mxu1 %v3575_v28  ;;  %v2989_v28 = vcombine.low %v241_v10, %v249_v11  ;;  %v218_v11 = vld [vmem:[%s3962_s5 + $0xd0] sm:$0xff] }
  0x7c   : > { %2504 = vmatpush1.bf16.msra.mxu0 %v3578_v29  ;;  %2213 = vmatprep.subr.bf16.mxu1 %v3583_v30  ;;  %v2997_v29 = vcombine.low %v245_v14, %v253_v15  ;;  %v4355_v30 = vld [vmem:[%s3962_s5 + $0x30] sm:$0xff]  ;;  %v3689_v14 = vld [vmem:[%s4735_s1 + $0x300] ss:$8 sps:$4 sm:$0xff]  }
  0x7d   : > { %2505 = vmatprep.subr.bf16.mxu0 %v3586_v31  ;;  %v4358_v31 = vld [vmem:[%s3962_s5 + $0x70] sm:$0xff]  ;;  %v3692_v15 = vld [vmem:[%s4735_s1 + $0x700] ss:$8 sps:$4 sm:$0xff]  }
  0x7e   : > { %v2951_v10 = vcombine.low %v4355_v30, %v4358_v31 }
  0x7f   : > { %2214 = vmatpush1.bf16.msra.mxu1 %v3581_v32  ;;  %v3637_v32 = vld [vmem:[%s4735_s1 + $0x274] ss:$8 sps:$4 sm:$0xff]  }
  0x80   : > { %2506 = vmatpush1.bf16.msra.mxu0 %v3584_v33  ;;  %2215 = vmatprep.subr.bf16.mxu1 %v3589_v34  ;;  %v3640_v33 = vld [vmem:[%s4735_s1 + $0x674] ss:$8 sps:$4 sm:$0xff]   ;;  %v2944_v34 = vcombine.high %v4349_v26, %v4352_v27 }
  0x81   : > { %2507 = vmatprep.subr.bf16.mxu0 %v3592_v35  ;;  %v2952_v35 = vcombine.high %v4355_v30, %v4358_v31  ;;  %v3701_v30 = vld [vmem:[%s4735_s1 + $0x320] ss:$8 sps:$4 sm:$0xff]  }
  0x82   : > { %v3704_v31 = vld [vmem:[%s4735_s1 + $0x720] ss:$8 sps:$4 sm:$0xff]  }
  0x83   : > { %2216 = vmatpush1.bf16.msra.mxu1 %v3587_v36  ;;  %v3635_v36 = vld [vmem:[%s4735_s1 + $0x270] ss:$8 sps:$4 sm:$0xff]  }
  0x84   : > { %2508 = vmatpush1.bf16.msra.mxu0 %v3590_v37  ;;  %2258 = vmatprep.subr.bf16.mxu1 %v3595_v38  ;;  %v3638_v37 = vld [vmem:[%s4735_s1 + $0x670] ss:$8 sps:$4 sm:$0xff]   ;;  %v3643_v38 = vld [vmem:[%s4735_s1 + $0x284] ss:$8 sps:$4 sm:$0xff]  }
  0x85   : > { %2550 = vmatprep.subr.bf16.mxu0 %v3598_v39  ;;  %v3646_v39 = vld [vmem:[%s4735_s1 + $0x684] ss:$8 sps:$4 sm:$0xff]  }
  0x86   : > { %2218 = vmatmul.mubr.bf16.vlgmr.msra.gmra.mrb[0].mxu1 %v2941_v43  ;;  %v3652_v43 = vld [vmem:[%s4735_s1 + $0x694] ss:$8 sps:$4 sm:$0xff]  }
  0x87   : > { %2510 = vmatmul.mubr.bf16.vlgmr.msra.gmra.mrb[0].mxu0 %v2949_v44  ;;  %2259 = vmatpush1.bf16.msra.mxu1 %v3593_v40  ;;  %v3641_v40 = vld [vmem:[%s4735_s1 + $0x280] ss:$8 sps:$4 sm:$0xff]   ;;  %v3647_v44 = vld [vmem:[%s4735_s1 + $0x290] ss:$8 sps:$4 sm:$0xff]  }
  0x88   : > { %2551 = vmatpush1.bf16.msra.mxu0 %v3596_v41  ;;  %2260 = vmatprep.subr.bf16.mxu1 %v3601_v48  ;;  %v3644_v41 = vld [vmem:[%s4735_s1 + $0x680] ss:$8 sps:$4 sm:$0xff]  }
  0x89   : > { %2552 = vmatprep.subr.bf16.mxu0 %v3604_v49  ;;  %2227 = vmatprep.mubr.bf16.mxu1 %v2958_v50  ;;  %v3653_v48 = vld [vmem:[%s4735_s1 + $0x2a0] ss:$8 sps:$4 sm:$0xff]   ;;  %v3661_v50 = vld [vmem:[%s4735_s1 + $0x2b4] ss:$8 sps:$4 sm:$0xff]  }
  0x8a   : > { %2519 = vmatprep.mubr.bf16.mxu0 %v2966_v51  ;;  %v3656_v49 = vld [vmem:[%s4735_s1 + $0x6a0] ss:$8 sps:$4 sm:$0xff]   ;;  %v3664_v51 = vld [vmem:[%s4735_s1 + $0x6b4] ss:$8 sps:$4 sm:$0xff]  }
  0x8b   : > { %2261 = vmatpush1.bf16.msra.mxu1 %v3599_v52  ;;  %v3659_v52 = vld [vmem:[%s4735_s1 + $0x2b0] ss:$8 sps:$4 sm:$0xff]  }
  0x8c   : > { %2553 = vmatpush1.bf16.msra.mxu0 %v3602_v53  ;;  %2262 = vmatprep.subr.bf16.mxu1 %v3607_v54  ;;  %v3662_v53 = vld [vmem:[%s4735_s1 + $0x6b0] ss:$8 sps:$4 sm:$0xff]   ;;  %v3667_v54 = vld [vmem:[%s4735_s1 + $0x2c4] ss:$8 sps:$4 sm:$0xff]  }
  0x8d   : > { %2554 = vmatprep.subr.bf16.mxu0 %v3610_v55  ;;  %v3670_v55 = vld [vmem:[%s4735_s1 + $0x6c4] ss:$8 sps:$4 sm:$0xff]  }
  0x8e   : > { %2228 = vmatmul.mubr.bf16.gmra.mrb[4].mxu1 %v2957_v60  ;;  %v3671_v60 = vld [vmem:[%s4735_s1 + $0x2d0] ss:$8 sps:$4 sm:$0xff]  }
  0x8f   : > { %2520 = vmatmul.mubr.bf16.gmra.mrb[4].mxu0 %v2965_v61  ;;  %2263 = vmatpush1.bf16.msra.mxu1 %v3605_v56  ;;  %v3665_v56 = vld [vmem:[%s4735_s1 + $0x2c0] ss:$8 sps:$4 sm:$0xff]   ;;  %v3674_v61 = vld [vmem:[%s4735_s1 + $0x6d0] ss:$8 sps:$4 sm:$0xff]  }
  0x90   : > { %2555 = vmatpush1.bf16.msra.mxu0 %v3608_v57  ;;  %2264 = vmatprep.subr.bf16.mxu1 %v3613_v0  ;;  %v3668_v57 = vld [vmem:[%s4735_s1 + $0x6c0] ss:$8 sps:$4 sm:$0xff]  }
  0x91   : > { %2556 = vmatprep.subr.bf16.mxu0 %v3616_v1  ;;  %2237 = vmatprep.mubr.bf16.mxu1 %v2974_v2  ;;  %v3677_v0 = vld [vmem:[%s4735_s1 + $0x2e0] ss:$8 sps:$4 sm:$0xff]   ;;  %v3685_v2 = vld [vmem:[%s4735_s1 + $0x2f4] ss:$8 sps:$4 sm:$0xff]  }
  0x92   : > { %2529 = vmatprep.mubr.bf16.mxu0 %v2982_v3  ;;  %v3680_v1 = vld [vmem:[%s4735_s1 + $0x6e0] ss:$8 sps:$4 sm:$0xff]   ;;  %v3688_v3 = vld [vmem:[%s4735_s1 + $0x6f4] ss:$8 sps:$4 sm:$0xff]  }
  0x93   : > { %2265 = vmatpush1.bf16.msra.mxu1 %v3611_v4  ;;  %v3683_v4 = vld [vmem:[%s4735_s1 + $0x2f0] ss:$8 sps:$4 sm:$0xff]  }
  0x94   : > { %2557 = vmatpush1.bf16.msra.mxu0 %v3614_v5  ;;  %2266 = vmatprep.subr.bf16.mxu1 %v3619_v6  ;;  %v3686_v5 = vld [vmem:[%s4735_s1 + $0x6f0] ss:$8 sps:$4 sm:$0xff]   ;;  %v3691_v6 = vld [vmem:[%s4735_s1 + $0x304] ss:$8 sps:$4 sm:$0xff]  }
  0x95   : > { %2558 = vmatprep.subr.bf16.mxu0 %v3622_v7  ;;  %v3694_v7 = vld [vmem:[%s4735_s1 + $0x704] ss:$8 sps:$4 sm:$0xff]  }
  0x96   : > { %2238 = vmatmul.mubr.bf16.gmra.mrb[8].mxu1 %v2973_v12  ;;  %v214_v12 = vld [vmem:[%s3962_s5 + $0xb0] sm:$0xff] }
  0x97   : > { %2530 = vmatmul.mubr.bf16.gmra.mrb[8].mxu0 %v2981_v13  ;;  %2267 = vmatpush1.bf16.msra.mxu1 %v3617_v8  ;;  %v210_v8 = vld [vmem:[%s3962_s5 + $0x90] sm:$0xff] }
  0x98   : > { %2559 = vmatpush1.bf16.msra.mxu0 %v3620_v9  ;;  %2268 = vmatprep.subr.bf16.mxu1 %v3625_v16  ;;  %v2943_v9 = vcombine.low %v4349_v26, %v4352_v27  ;;  %v222_v13 = vld [vmem:[%s3962_s5 + $0xf0] sm:$0xff] }
  0x99   : > { %2560 = vmatprep.subr.bf16.mxu0 %v3628_v17  ;;  %2247 = vmatprep.mubr.bf16.mxu1 %v2990_v18  ;;  %v3697_v16 = vld [vmem:[%s4735_s1 + $0x314] ss:$8 sps:$4 sm:$0xff]   ;;  %v2960_v18 = vcombine.high %v210_v8, %v218_v11  ;;  %v2967_v26 = vcombine.low %v214_v12, %v222_v13 }
  0x9a   : > { %2539 = vmatprep.mubr.bf16.mxu0 %v2998_v19  ;;  %v3700_v17 = vld [vmem:[%s4735_s1 + $0x714] ss:$8 sps:$4 sm:$0xff]   ;;  %v2968_v19 = vcombine.high %v214_v12, %v222_v13  ;;  %v3743_v12 = vld [vmem:[%s4735_s1 + $0x390] ss:$8 sps:$4 sm:$0xff]  }
  0x9b   : > { %2269 = vmatpush1.bf16.msra.mxu1 %v3623_v20  ;;  %v3695_v20 = vld [vmem:[%s4735_s1 + $0x310] ss:$8 sps:$4 sm:$0xff]  }
  0x9c   : > { %2561 = vmatpush1.bf16.msra.mxu0 %v3626_v21  ;;  %2270 = vmatprep.subr.bf16.mxu1 %v3631_v22  ;;  %v3698_v21 = vld [vmem:[%s4735_s1 + $0x710] ss:$8 sps:$4 sm:$0xff]   ;;  %v3703_v22 = vld [vmem:[%s4735_s1 + $0x324] ss:$8 sps:$4 sm:$0xff]  }
  0x9d   : > { %2562 = vmatprep.subr.bf16.mxu0 %v3634_v23  ;;  %v3706_v23 = vld [vmem:[%s4735_s1 + $0x724] ss:$8 sps:$4 sm:$0xff]   ;;  %v234_v27 = vld [vmem:[%s3962_s5 + $0x150] sm:$0xff] }
  0x9e   : > { %2248 = vmatmul.mubr.bf16.gmra.mrb[12].mxu1 %v2989_v28  ;;  %v230_v28 = vld [vmem:[%s3962_s5 + $0x130] sm:$0xff] }
  0x9f   : > { %2540 = vmatmul.mubr.bf16.gmra.mrb[12].mxu0 %v2997_v29  ;;  %2271 = vmatpush1.bf16.msra.mxu1 %v3629_v24  ;;  %v226_v24 = vld [vmem:[%s3962_s5 + $0x110] sm:$0xff] }
  0xa0   : > { %2563 = vmatpush1.bf16.msra.mxu0 %v3632_v25  ;;  %2272 = vmatprep.subr.bf16.mxu1 %v3637_v32  ;;  %v2959_v25 = vcombine.low %v210_v8, %v218_v11  ;;  %v238_v29 = vld [vmem:[%s3962_s5 + $0x170] sm:$0xff]  ;;  %v3737_v8 = vld [vmem:[%s4735_s1 + $0x380] ss:$8 sps:$4 sm:$0xff]  }
  0xa1   : > { %2564 = vmatprep.subr.bf16.mxu0 %v3640_v33  ;;  %2290 = vmatprep.mubr.bf16.mxu1 %v2944_v34  ;;  %v3709_v32 = vld [vmem:[%s4735_s1 + $0x334] ss:$8 sps:$4 sm:$0xff]   ;;  %v2976_v34 = vcombine.high %v226_v24, %v234_v27  ;;  %v3746_v13 = vld [vmem:[%s4735_s1 + $0x790] ss:$8 sps:$4 sm:$0xff]  }
  0xa2   : > { %2582 = vmatprep.mubr.bf16.mxu0 %v2952_v35  ;;  %v3712_v33 = vld [vmem:[%s4735_s1 + $0x734] ss:$8 sps:$4 sm:$0xff]   ;;  %v2984_v35 = vcombine.high %v230_v28, %v238_v29 }
  0xa3   : > { %2273 = vmatpush1.bf16.msra.mxu1 %v3635_v36  ;;  %v3707_v36 = vld [vmem:[%s4735_s1 + $0x330] ss:$8 sps:$4 sm:$0xff]   ;;  %v3748_v11 = vld [vmem:[%s4735_s1 + $0x794] ss:$8 sps:$4 sm:$0xff]  }
  0xa4   : > { %2565 = vmatpush1.bf16.msra.mxu0 %v3638_v37  ;;  %2274 = vmatprep.subr.bf16.mxu1 %v3643_v38  ;;  %v3710_v37 = vld [vmem:[%s4735_s1 + $0x730] ss:$8 sps:$4 sm:$0xff]   ;;  %v3715_v38 = vld [vmem:[%s4735_s1 + $0x344] ss:$8 sps:$4 sm:$0xff]  }
  0xa5   : > { %2566 = vmatprep.subr.bf16.mxu0 %v3646_v39  ;;  %v3718_v39 = vld [vmem:[%s4735_s1 + $0x744] ss:$8 sps:$4 sm:$0xff]  }
  0xa7   : > { %2275 = vmatpush1.bf16.msra.mxu1 %v3641_v40  ;;  %v242_v40 = vld [vmem:[%s3962_s5 + $0x190] sm:$0xff] }
  0xa8   : > { %2567 = vmatpush1.bf16.msra.mxu0 %v3644_v41  ;;  %2276 = vmatprep.subr.bf16.mxu1 %v3649_v42  ;;  %v2975_v41 = vcombine.low %v226_v24, %v234_v27  ;;  %v2983_v42 = vcombine.low %v230_v28, %v238_v29  ;;  %v3761_v24 = vld [vmem:[%s4735_s1 + $0x3c0] ss:$8 sps:$4 sm:$0xff]   ;;  %v3772_v27 = vld [vmem:[%s4735_s1 + $0x7d4] ss:$8 sps:$4 sm:$0xff]   ;;  %v3767_v28 = vld [vmem:[%s4735_s1 + $0x3d0] ss:$8 sps:$4 sm:$0xff]  }
  0xa9   : > { %2568 = vmatprep.subr.bf16.mxu0 %v3652_v43  ;;  %v250_v43 = vld [vmem:[%s3962_s5 + $0x1d0] sm:$0xff] }
  0xaa   : > { %v3770_v29 = vld [vmem:[%s4735_s1 + $0x7d0] ss:$8 sps:$4 sm:$0xff]  }
  0xab   : > { %2277 = vmatpush1.bf16.msra.mxu1 %v3647_v44  ;;  %v246_v44 = vld [vmem:[%s3962_s5 + $0x1b0] sm:$0xff] }
  0xac   : > { %2569 = vmatpush1.bf16.msra.mxu0 %v3650_v45  ;;  %2278 = vmatprep.subr.bf16.mxu1 %v3655_v46  ;;  %v254_v45 = vld [vmem:[%s3962_s5 + $0x1f0] sm:$0xff]  ;;  %v3713_v46 = vld [vmem:[%s4735_s1 + $0x340] ss:$8 sps:$4 sm:$0xff]  }
  0xad   : > { %2570 = vmatprep.subr.bf16.mxu0 %v3658_v47  ;;  %v3716_v47 = vld [vmem:[%s4735_s1 + $0x740] ss:$8 sps:$4 sm:$0xff]  }
  0xaf   : > { %2279 = vmatpush1.bf16.msra.mxu1 %v3653_v48  ;;  %v3721_v48 = vld [vmem:[%s4735_s1 + $0x354] ss:$8 sps:$4 sm:$0xff]  }
  0xb0   : > { %2571 = vmatpush1.bf16.msra.mxu0 %v3656_v49  ;;  %2280 = vmatprep.subr.bf16.mxu1 %v3661_v50  ;;  %v3724_v49 = vld [vmem:[%s4735_s1 + $0x754] ss:$8 sps:$4 sm:$0xff]   ;;  %v2992_v50 = vcombine.high %v242_v40, %v250_v43 }
  0xb1   : > { %2572 = vmatprep.subr.bf16.mxu0 %v3664_v51  ;;  %v3000_v51 = vcombine.high %v246_v44, %v254_v45 }
  0xb3   : > { %2281 = vmatpush1.bf16.msra.mxu1 %v3659_v52  ;;  %v3719_v52 = vld [vmem:[%s4735_s1 + $0x350] ss:$8 sps:$4 sm:$0xff]  }
  0xb4   : > { %2573 = vmatpush1.bf16.msra.mxu0 %v3662_v53  ;;  %2282 = vmatprep.subr.bf16.mxu1 %v3667_v54  ;;  %v3722_v53 = vld [vmem:[%s4735_s1 + $0x750] ss:$8 sps:$4 sm:$0xff]   ;;  %v3727_v54 = vld [vmem:[%s4735_s1 + $0x364] ss:$8 sps:$4 sm:$0xff]  }
  0xb5   : > { %2574 = vmatprep.subr.bf16.mxu0 %v3670_v55  ;;  %v3730_v55 = vld [vmem:[%s4735_s1 + $0x764] ss:$8 sps:$4 sm:$0xff]  }
  0xb7   : > { %2283 = vmatpush1.bf16.msra.mxu1 %v3665_v56  ;;  %v4567_v56 = vld [vmem:[%s3962_s5 + $0x18] sm:$0xff] }
  0xb8   : > { %2575 = vmatpush1.bf16.msra.mxu0 %v3668_v57  ;;  %2284 = vmatprep.subr.bf16.mxu1 %v3673_v58  ;;  %v2991_v57 = vcombine.low %v242_v40, %v250_v43  ;;  %v2999_v58 = vcombine.low %v246_v44, %v254_v45  ;;  %v215_v40 = vld [vmem:[%s3962_s5 + $0xb8] sm:$0xff] }
  0xb9   : > { %2576 = vmatprep.subr.bf16.mxu0 %v3676_v59  ;;  %v4570_v59 = vld [vmem:[%s3962_s5 + $0x58] sm:$0xff] }
  0xbb   : > { %2285 = vmatpush1.bf16.msra.mxu1 %v3671_v60  ;;  %v4573_v60 = vld [vmem:[%s3962_s5 + $0x38] sm:$0xff] }
  0xbc   : > { %2577 = vmatpush1.bf16.msra.mxu0 %v3674_v61  ;;  %2286 = vmatprep.subr.bf16.mxu1 %v3679_v62  ;;  %v4576_v61 = vld [vmem:[%s3962_s5 + $0x78] sm:$0xff]  ;;  %v3725_v62 = vld [vmem:[%s4735_s1 + $0x360] ss:$8 sps:$4 sm:$0xff]  }
  0xbd   : > { %2578 = vmatprep.subr.bf16.mxu0 %v3682_v63  ;;  %v3728_v63 = vld [vmem:[%s4735_s1 + $0x760] ss:$8 sps:$4 sm:$0xff]   ;;  %v2953_v43 = vcombine.low %v4573_v60, %v4576_v61 }
  0xbf   : > { %2287 = vmatpush1.bf16.msra.mxu1 %v3677_v0  ;;  %v3733_v0 = vld [vmem:[%s4735_s1 + $0x374] ss:$8 sps:$4 sm:$0xff]  }
  0xc0   : > { %2579 = vmatpush1.bf16.msra.mxu0 %v3680_v1  ;;  %2288 = vmatprep.subr.bf16.mxu1 %v3685_v2  ;;  %v3736_v1 = vld [vmem:[%s4735_s1 + $0x774] ss:$8 sps:$4 sm:$0xff]   ;;  %v2946_v2 = vcombine.high %v4567_v56, %v4570_v59 }
  0xc1   : > { %2580 = vmatprep.subr.bf16.mxu0 %v3688_v3  ;;  %v2954_v3 = vcombine.high %v4573_v60, %v4576_v61 }
  0xc3   : > { %2289 = vmatpush1.bf16.msra.mxu1 %v3683_v4  ;;  %v3731_v4 = vld [vmem:[%s4735_s1 + $0x370] ss:$8 sps:$4 sm:$0xff]  }
  0xc4   : > { %2581 = vmatpush1.bf16.msra.mxu0 %v3686_v5  ;;  %2331 = vmatprep.subr.bf16.mxu1 %v3691_v6  ;;  %v3734_v5 = vld [vmem:[%s4735_s1 + $0x770] ss:$8 sps:$4 sm:$0xff]   ;;  %v3739_v6 = vld [vmem:[%s4735_s1 + $0x384] ss:$8 sps:$4 sm:$0xff]  }
  0xc5   : > { %2623 = vmatprep.subr.bf16.mxu0 %v3694_v7  ;;  %v3742_v7 = vld [vmem:[%s4735_s1 + $0x784] ss:$8 sps:$4 sm:$0xff]  }
  0xc6   : > { %2291 = vmatmul.mubr.bf16.vlgmr.msra.gmra.mrb[0].mxu1 %v2943_v9  ;;  %v3740_v9 = vld [vmem:[%s4735_s1 + $0x780] ss:$8 sps:$4 sm:$0xff]  }
  0xc7   : > { %2583 = vmatmul.mubr.bf16.vlgmr.msra.gmra.mrb[0].mxu0 %v2951_v10  ;;  %2332 = vmatpush1.bf16.msra.mxu1 %v3689_v14  ;;  %v3745_v10 = vld [vmem:[%s4735_s1 + $0x394] ss:$8 sps:$4 sm:$0xff]   ;;  %v3751_v14 = vld [vmem:[%s4735_s1 + $0x3a4] ss:$8 sps:$4 sm:$0xff]  }
  0xc8   : > { %2624 = vmatpush1.bf16.msra.mxu0 %v3692_v15  ;;  %2333 = vmatprep.subr.bf16.mxu1 %v3697_v16  ;;  %v3754_v15 = vld [vmem:[%s4735_s1 + $0x7a4] ss:$8 sps:$4 sm:$0xff]   ;;  %v3749_v16 = vld [vmem:[%s4735_s1 + $0x3a0] ss:$8 sps:$4 sm:$0xff]  }
  0xc9   : > { %2625 = vmatprep.subr.bf16.mxu0 %v3700_v17  ;;  %2300 = vmatprep.mubr.bf16.mxu1 %v2960_v18  ;;  %v3752_v17 = vld [vmem:[%s4735_s1 + $0x7a0] ss:$8 sps:$4 sm:$0xff]   ;;  %v3757_v18 = vld [vmem:[%s4735_s1 + $0x3b4] ss:$8 sps:$4 sm:$0xff]  }
  0xca   : > { %2592 = vmatprep.mubr.bf16.mxu0 %v2968_v19  ;;  %v3760_v19 = vld [vmem:[%s4735_s1 + $0x7b4] ss:$8 sps:$4 sm:$0xff]  }
  0xcb   : > { %2334 = vmatpush1.bf16.msra.mxu1 %v3695_v20  ;;  %v3755_v20 = vld [vmem:[%s4735_s1 + $0x3b0] ss:$8 sps:$4 sm:$0xff]  }
  0xcc   : > { %2626 = vmatpush1.bf16.msra.mxu0 %v3698_v21  ;;  %2335 = vmatprep.subr.bf16.mxu1 %v3703_v22  ;;  %v3758_v21 = vld [vmem:[%s4735_s1 + $0x7b0] ss:$8 sps:$4 sm:$0xff]   ;;  %v3763_v22 = vld [vmem:[%s4735_s1 + $0x3c4] ss:$8 sps:$4 sm:$0xff]  }
  0xcd   : > { %2627 = vmatprep.subr.bf16.mxu0 %v3706_v23  ;;  %v3766_v23 = vld [vmem:[%s4735_s1 + $0x7c4] ss:$8 sps:$4 sm:$0xff]  }
  0xce   : > { %2301 = vmatmul.mubr.bf16.gmra.mrb[4].mxu1 %v2959_v25  ;;  %v3764_v25 = vld [vmem:[%s4735_s1 + $0x7c0] ss:$8 sps:$4 sm:$0xff]  }
  0xcf   : > { %2593 = vmatmul.mubr.bf16.gmra.mrb[4].mxu0 %v2967_v26  ;;  %2336 = vmatpush1.bf16.msra.mxu1 %v3701_v30  ;;  %v3769_v26 = vld [vmem:[%s4735_s1 + $0x3d4] ss:$8 sps:$4 sm:$0xff]   ;;  %v3775_v30 = vld [vmem:[%s4735_s1 + $0x3e4] ss:$8 sps:$4 sm:$0xff]  }
  0xd0   : > { %2628 = vmatpush1.bf16.msra.mxu0 %v3704_v31  ;;  %2337 = vmatprep.subr.bf16.mxu1 %v3709_v32  ;;  %v3778_v31 = vld [vmem:[%s4735_s1 + $0x7e4] ss:$8 sps:$4 sm:$0xff]   ;;  %v3773_v32 = vld [vmem:[%s4735_s1 + $0x3e0] ss:$8 sps:$4 sm:$0xff]  }
  0xd1   : > { %2629 = vmatprep.subr.bf16.mxu0 %v3712_v33  ;;  %2310 = vmatprep.mubr.bf16.mxu1 %v2976_v34  ;;  %v3776_v33 = vld [vmem:[%s4735_s1 + $0x7e0] ss:$8 sps:$4 sm:$0xff]   ;;  %v3781_v34 = vld [vmem:[%s4735_s1 + $0x3f4] ss:$8 sps:$4 sm:$0xff]  }
  0xd2   : > { %2602 = vmatprep.mubr.bf16.mxu0 %v2984_v35  ;;  %v3784_v35 = vld [vmem:[%s4735_s1 + $0x7f4] ss:$8 sps:$4 sm:$0xff]  }
  0xd3   : > { %2338 = vmatpush1.bf16.msra.mxu1 %v3707_v36  ;;  %v3779_v36 = vld [vmem:[%s4735_s1 + $0x3f0] ss:$8 sps:$4 sm:$0xff]  }
  0xd4   : > { %2630 = vmatpush1.bf16.msra.mxu0 %v3710_v37  ;;  %2339 = vmatprep.subr.bf16.mxu1 %v3715_v38  ;;  %v3782_v37 = vld [vmem:[%s4735_s1 + $0x7f0] ss:$8 sps:$4 sm:$0xff]  }
  0xd5   : > { %2631 = vmatprep.subr.bf16.mxu0 %v3718_v39  ;;  %v211_v38 = vld [vmem:[%s3962_s5 + $0x98] sm:$0xff] }
  0xd6   : > { %2311 = vmatmul.mubr.bf16.gmra.mrb[8].mxu1 %v2975_v41  ;;  %v219_v39 = vld [vmem:[%s3962_s5 + $0xd8] sm:$0xff] }
  0xd7   : > { %2603 = vmatmul.mubr.bf16.gmra.mrb[8].mxu0 %v2983_v42  ;;  %2340 = vmatpush1.bf16.msra.mxu1 %v3713_v46  ;;  %v223_v41 = vld [vmem:[%s3962_s5 + $0xf8] sm:$0xff]  ;;  %v2945_v42 = vcombine.low %v4567_v56, %v4570_v59  ;;  %v2962_v44 = vcombine.high %v211_v38, %v219_v39 }
  0xd8   : > { %2632 = vmatpush1.bf16.msra.mxu0 %v3716_v47  ;;  %2341 = vmatprep.subr.bf16.mxu1 %v3721_v48  ;;  %v2970_v45 = vcombine.high %v215_v40, %v223_v41  ;;  %v227_v46 = vld [vmem:[%s3962_s5 + $0x118] sm:$0xff] }
  0xd9   : > { %2633 = vmatprep.subr.bf16.mxu0 %v3724_v49  ;;  %2320 = vmatprep.mubr.bf16.mxu1 %v2992_v50  ;;  %v235_v47 = vld [vmem:[%s3962_s5 + $0x158] sm:$0xff]  ;;  %v2961_v50 = vcombine.low %v211_v38, %v219_v39 }
  0xda   : > { %2612 = vmatprep.mubr.bf16.mxu0 %v3000_v51  ;;  %v231_v48 = vld [vmem:[%s3962_s5 + $0x138] sm:$0xff]  ;;  %v2969_v51 = vcombine.low %v215_v40, %v223_v41 }
  0xdb   : > { %2342 = vmatpush1.bf16.msra.mxu1 %v3719_v52  ;;  %v239_v49 = vld [vmem:[%s3962_s5 + $0x178] sm:$0xff]  ;;  %v2978_v52 = vcombine.high %v227_v46, %v235_v47 }
  0xdc   : > { %2634 = vmatpush1.bf16.msra.mxu0 %v3722_v53  ;;  %2343 = vmatprep.subr.bf16.mxu1 %v3727_v54  ;;  %v2986_v53 = vcombine.high %v231_v48, %v239_v49  ;;  %v243_v54 = vld [vmem:[%s3962_s5 + $0x198] sm:$0xff]  ;;  %v2985_v59 = vcombine.low %v231_v48, %v239_v49 }
  0xdd   : > { %2635 = vmatprep.subr.bf16.mxu0 %v3730_v55  ;;  %v251_v55 = vld [vmem:[%s3962_s5 + $0x1d8] sm:$0xff] }
  0xde   : > { %2321 = vmatmul.mubr.bf16.gmra.mrb[12].mxu1 %v2991_v57  ;;  %v247_v56 = vld [vmem:[%s3962_s5 + $0x1b8] sm:$0xff]  ;;  %v2994_v60 = vcombine.high %v243_v54, %v251_v55 }
  0xdf   : > { %2613 = vmatmul.mubr.bf16.gmra.mrb[12].mxu0 %v2999_v58  ;;  %2344 = vmatpush1.bf16.msra.mxu1 %v3725_v62  ;;  %v255_v57 = vld [vmem:[%s3962_s5 + $0x1f8] sm:$0xff]  ;;  %v2977_v58 = vcombine.low %v227_v46, %v235_v47  ;;  %v2993_v62 = vcombine.low %v243_v54, %v251_v55 }
  0xe0   : > { %2636 = vmatpush1.bf16.msra.mxu0 %v3728_v63  ;;  %2345 = vmatprep.subr.bf16.mxu1 %v3733_v0  ;;  %v3002_v61 = vcombine.high %v247_v56, %v255_v57  ;;  %v3001_v63 = vcombine.low %v247_v56, %v255_v57 }
  0xe1   : > { %2637 = vmatprep.subr.bf16.mxu0 %v3736_v1  ;;  %2363 = vmatprep.mubr.bf16.mxu1 %v2946_v2 }
  0xe2   : > { %2655 = vmatprep.mubr.bf16.mxu0 %v2954_v3 }
  0xe3   : > { %2346 = vmatpush1.bf16.msra.mxu1 %v3731_v4 }
  0xe4   : > { %2638 = vmatpush1.bf16.msra.mxu0 %v3734_v5  ;;  %2347 = vmatprep.subr.bf16.mxu1 %v3739_v6 }
  0xe5   : > { %2639 = vmatprep.subr.bf16.mxu0 %v3742_v7 }
  0xe7   : > { %2348 = vmatpush1.bf16.msra.mxu1 %v3737_v8 }
  0xe8   : > { %2640 = vmatpush1.bf16.msra.mxu0 %v3740_v9  ;;  %2349 = vmatprep.subr.bf16.mxu1 %v3745_v10 }
  0xe9   : > { %2641 = vmatprep.subr.bf16.mxu0 %v3748_v11 }
  0xeb   : > { %2350 = vmatpush1.bf16.msra.mxu1 %v3743_v12 }
  0xec   : > { %2642 = vmatpush1.bf16.msra.mxu0 %v3746_v13  ;;  %2351 = vmatprep.subr.bf16.mxu1 %v3751_v14 }
  0xed   : > { %2643 = vmatprep.subr.bf16.mxu0 %v3754_v15 }
  0xef   : > { %2352 = vmatpush1.bf16.msra.mxu1 %v3749_v16 }
  0xf0   : > { %2644 = vmatpush1.bf16.msra.mxu0 %v3752_v17  ;;  %2353 = vmatprep.subr.bf16.mxu1 %v3757_v18 }
  0xf1   : > { %2645 = vmatprep.subr.bf16.mxu0 %v3760_v19 }
  0xf3   : > { %2354 = vmatpush1.bf16.msra.mxu1 %v3755_v20 }
  0xf4   : > { %2646 = vmatpush1.bf16.msra.mxu0 %v3758_v21  ;;  %2355 = vmatprep.subr.bf16.mxu1 %v3763_v22 }
  0xf5   : > { %2647 = vmatprep.subr.bf16.mxu0 %v3766_v23 }
  0xf7   : > { %2356 = vmatpush1.bf16.msra.mxu1 %v3761_v24 }
  0xf8   : > { %2648 = vmatpush1.bf16.msra.mxu0 %v3764_v25  ;;  %2357 = vmatprep.subr.bf16.mxu1 %v3769_v26 }
  0xf9   : > { %2649 = vmatprep.subr.bf16.mxu0 %v3772_v27 }
  0xfb   : > { %2358 = vmatpush1.bf16.msra.mxu1 %v3767_v28 }
  0xfc   : > { %2650 = vmatpush1.bf16.msra.mxu0 %v3770_v29  ;;  %2359 = vmatprep.subr.bf16.mxu1 %v3775_v30 }
  0xfd   : > { %2651 = vmatprep.subr.bf16.mxu0 %v3778_v31 }
  0xff   : > { %2360 = vmatpush1.bf16.msra.mxu1 %v3773_v32 }
 0x100   : > { %2652 = vmatpush1.bf16.msra.mxu0 %v3776_v33  ;;  %2361 = vmatprep.subr.bf16.mxu1 %v3781_v34 }
 0x101   : > { %2653 = vmatprep.subr.bf16.mxu0 %v3784_v35 }
 0x103   : > { %2362 = vmatpush1.bf16.msra.mxu1 %v3779_v36 }
 0x104   : > { %2654 = vmatpush1.bf16.msra.mxu0 %v3782_v37 }
 0x106   : > { %2364 = vmatmul.mubr.bf16.vlgmr.msra.gmra.mrb[0].mxu1 %v2945_v42 }
 0x107   : > { %2656 = vmatmul.mubr.bf16.vlgmr.msra.gmra.mrb[0].mxu0 %v2953_v43  ;;  %2373 = vmatprep.mubr.bf16.mxu1 %v2962_v44 }
 0x108   : > { %2665 = vmatprep.mubr.bf16.mxu0 %v2970_v45 }
 0x10e   : > { %2374 = vmatmul.mubr.bf16.gmra.mrb[4].mxu1 %v2961_v50 }
 0x10f   : > { %2666 = vmatmul.mubr.bf16.gmra.mrb[4].mxu0 %v2969_v51  ;;  %2383 = vmatprep.mubr.bf16.mxu1 %v2978_v52 }
 0x110   : > { %2675 = vmatprep.mubr.bf16.mxu0 %v2986_v53 }
 0x116   : > { %2384 = vmatmul.mubr.bf16.gmra.mrb[8].mxu1 %v2977_v58 }
 0x117   : > { %2676 = vmatmul.mubr.bf16.gmra.mrb[8].mxu0 %v2985_v59  ;;  %2393 = vmatprep.mubr.bf16.mxu1 %v2994_v60 }
 0x118   : > { %2685 = vmatprep.mubr.bf16.mxu0 %v3002_v61 }
 0x11e   : > { %2394 = vmatmul.mubr.bf16.gmra.mrb[12].mxu1 %v2993_v62 }
 0x11f   : > { %2686 = vmatmul.mubr.bf16.gmra.mrb[12].mxu0 %v3001_v63 }
 0x1d9   : > { %v2365_v0 = vpop.f32.mrb[0].mxu1 }
 0x1da   : > { %v2657_v1 = vpop.f32.mrb[0].mxu0  ;;  %v2367_v3 = vpop.f32.mrb[1].mxu1 }
 0x1db   : > { %v3281_v2 = vadd.f32 %v2657_v1, %v2365_v0  ;;  %v2659_v4 = vpop.f32.mrb[1].mxu0  ;;  %v2369_v6 = vpop.f32.mrb[2].mxu1 }
 0x1dc   : > { %v3282_v5 = vadd.f32 %v2659_v4, %v2367_v3  ;;  %v2661_v7 = vpop.f32.mrb[2].mxu0  ;;  %v2371_v9 = vpop.f32.mrb[3].mxu1 }
 0x1dd   : > { %v3283_v8 = vadd.f32 %v2661_v7, %v2369_v6  ;;  %v2663_v10 = vpop.f32.mrb[3].mxu0  ;;  %v2722_v13 = vmul.f32 %v3281_v2, %v3281_v2 }
 0x1de   : > { %v3273_v11 = vpack.c.bf16 %v3282_v5, %v3281_v2  ;;  %v3284_v12 = vadd.f32 %v2663_v10, %v2371_v9  ;;  %v2723_v16 = vmul.f32 %v3282_v5, %v3282_v5 }
 0x1df   : > { %v2696_v14 = vadd.f32 %v3283_v8, %v3281_v2  ;;  %v2724_v15 = vmul.f32 %v3283_v8, %v3283_v8 }
 0x1e0   : > { %2827 = vst [vmem:[%s4716_s20] sm:$0xff] %v3273_v11  ;;  %v2709_v17 = vadd.f32 %v3284_v12, %v3282_v5  ;;  %v2725_v18 = vmul.f32 %v3284_v12, %v3284_v12  ;;  %v3274_v19 = vpack.c.bf16 %v3284_v12, %v3283_v8 }
 0x1e1   : > { %v2738_v20 = vadd.f32 %v2724_v15, %v2722_v13  ;;  %v2375_v22 = vpop.f32.mrb[4].mxu1 }
 0x1e2   : > { %v2751_v21 = vadd.f32 %v2725_v18, %v2723_v16  ;;  %2828 = vst [vmem:[%s4716_s20 + $0x8] sm:$0xff] %v3274_v19  ;;  %v2667_v23 = vpop.f32.mrb[4].mxu0  ;;  %v2377_v25 = vpop.f32.mrb[5].mxu1 }
 0x1e3   : > { %v3285_v24 = vadd.f32 %v2667_v23, %v2375_v22  ;;  %v2669_v26 = vpop.f32.mrb[5].mxu0  ;;  %v2379_v28 = vpop.f32.mrb[6].mxu1 }
 0x1e4   : > { %v3286_v27 = vadd.f32 %v2669_v26, %v2377_v25  ;;  %v2671_v29 = vpop.f32.mrb[6].mxu0  ;;  %v2381_v33 = vpop.f32.mrb[7].mxu1 }
 0x1e5   : > { %v2697_v30 = vadd.f32 %v3285_v24, %v2696_v14  ;;  %v2726_v31 = vmul.f32 %v3285_v24, %v3285_v24  ;;  %v3287_v32 = vadd.f32 %v2671_v29, %v2379_v28  ;;  %v2673_v34 = vpop.f32.mrb[7].mxu0 }
 0x1e6   : > { %v2710_v35 = vadd.f32 %v3286_v27, %v2709_v17  ;;  %v2727_v36 = vmul.f32 %v3286_v27, %v3286_v27  ;;  %v3275_v37 = vpack.c.bf16 %v3286_v27, %v3285_v24  ;;  %v3288_v38 = vadd.f32 %v2673_v34, %v2381_v33 }
 0x1e7   : > { %v2739_v39 = vadd.f32 %v2738_v20, %v2726_v31  ;;  %v2698_v40 = vadd.f32 %v3287_v32, %v2697_v30  ;;  %v2728_v41 = vmul.f32 %v3287_v32, %v3287_v32 }
 0x1e8   : > { %v2752_v42 = vadd.f32 %v2751_v21, %v2727_v36  ;;  %2829 = vst [vmem:[%s4716_s20 + $0x10] sm:$0xff] %v3275_v37  ;;  %v2711_v43 = vadd.f32 %v3288_v38, %v2710_v35  ;;  %v2729_v44 = vmul.f32 %v3288_v38, %v3288_v38  ;;  %v3276_v45 = vpack.c.bf16 %v3288_v38, %v3287_v32 }
 0x1e9   : > { %v2740_v46 = vadd.f32 %v2739_v39, %v2728_v41  ;;  %v2385_v48 = vpop.f32.mrb[8].mxu1 }
 0x1ea   : > { %v2753_v47 = vadd.f32 %v2752_v42, %v2729_v44  ;;  %2830 = vst [vmem:[%s4716_s20 + $0x18] sm:$0xff] %v3276_v45  ;;  %v2677_v49 = vpop.f32.mrb[8].mxu0  ;;  %v2387_v51 = vpop.f32.mrb[9].mxu1 }
 0x1eb   : > { %v3289_v50 = vadd.f32 %v2677_v49, %v2385_v48  ;;  %v2679_v52 = vpop.f32.mrb[9].mxu0  ;;  %v2389_v54 = vpop.f32.mrb[10].mxu1 }
 0x1ec   : > { %v3290_v53 = vadd.f32 %v2679_v52, %v2387_v51  ;;  %v2681_v55 = vpop.f32.mrb[10].mxu0  ;;  %v2391_v59 = vpop.f32.mrb[11].mxu1 }
 0x1ed   : > { %v2699_v56 = vadd.f32 %v3289_v50, %v2698_v40  ;;  %v2730_v57 = vmul.f32 %v3289_v50, %v3289_v50  ;;  %v3291_v58 = vadd.f32 %v2681_v55, %v2389_v54  ;;  %v2683_v60 = vpop.f32.mrb[11].mxu0 }
 0x1ee   : > { %v2712_v61 = vadd.f32 %v3290_v53, %v2711_v43  ;;  %v2731_v62 = vmul.f32 %v3290_v53, %v3290_v53  ;;  %v3277_v63 = vpack.c.bf16 %v3290_v53, %v3289_v50  ;;  %v3292_v0 = vadd.f32 %v2683_v60, %v2391_v59 }
 0x1ef   : > { %v2741_v1 = vadd.f32 %v2740_v46, %v2730_v57  ;;  %v2700_v2 = vadd.f32 %v3291_v58, %v2699_v56  ;;  %v2732_v3 = vmul.f32 %v3291_v58, %v3291_v58 }
 0x1f0   : > { %v2754_v4 = vadd.f32 %v2753_v47, %v2731_v62  ;;  %2831 = vst [vmem:[%s4716_s20 + $0x20] sm:$0xff] %v3277_v63  ;;  %v2713_v5 = vadd.f32 %v3292_v0, %v2712_v61  ;;  %v2733_v6 = vmul.f32 %v3292_v0, %v3292_v0  ;;  %v3278_v7 = vpack.c.bf16 %v3292_v0, %v3291_v58 }
 0x1f1   : > { %v2742_v8 = vadd.f32 %v2741_v1, %v2732_v3  ;;  %v2395_v10 = vpop.f32.mrb[12].mxu1 }
 0x1f2   : > { %v2755_v9 = vadd.f32 %v2754_v4, %v2733_v6  ;;  %2832 = vst [vmem:[%s4716_s20 + $0x28] sm:$0xff] %v3278_v7  ;;  %v2687_v11 = vpop.f32.mrb[12].mxu0  ;;  %v2397_v13 = vpop.f32.mrb[13].mxu1 }
 0x1f3   : > { %v3293_v12 = vadd.f32 %v2687_v11, %v2395_v10  ;;  %v2689_v14 = vpop.f32.mrb[13].mxu0  ;;  %v2399_v16 = vpop.f32.mrb[14].mxu1 }
 0x1f4   : > { %v3294_v15 = vadd.f32 %v2689_v14, %v2397_v13  ;;  %v2691_v17 = vpop.f32.mrb[14].mxu0  ;;  %v2401_v21 = vpop.f32.mrb[15].mxu1 }
 0x1f5   : > { %v2701_v18 = vadd.f32 %v3293_v12, %v2700_v2  ;;  %v2734_v19 = vmul.f32 %v3293_v12, %v3293_v12  ;;  %v3295_v20 = vadd.f32 %v2691_v17, %v2399_v16  ;;  %v2693_v22 = vpop.f32.mrb[15].mxu0 }
 0x1f6   : > { %v2714_v23 = vadd.f32 %v3294_v15, %v2713_v5  ;;  %v2735_v24 = vmul.f32 %v3294_v15, %v3294_v15  ;;  %v3279_v25 = vpack.c.bf16 %v3294_v15, %v3293_v12  ;;  %v3296_v26 = vadd.f32 %v2693_v22, %v2401_v21 }
 0x1f7   : > { %v2743_v27 = vadd.f32 %v2742_v8, %v2734_v19  ;;  %v2702_v28 = vadd.f32 %v3295_v20, %v2701_v18  ;;  %v2736_v29 = vmul.f32 %v3295_v20, %v3295_v20 }
 0x1f8   : > { %v2756_v30 = vadd.f32 %v2755_v9, %v2735_v24  ;;  %2833 = vst [vmem:[%s4716_s20 + $0x30] sm:$0xff] %v3279_v25  ;;  %v2715_v31 = vadd.f32 %v3296_v26, %v2714_v23  ;;  %v2737_v32 = vmul.f32 %v3296_v26, %v3296_v26  ;;  %v3280_v33 = vpack.c.bf16 %v3296_v26, %v3295_v20 }
 0x1f9   : > { %v2703_v34 = vrot.slane %v2702_v28, 4  ;;  %v2744_v35 = vadd.f32 %v2743_v27, %v2736_v29 }
 0x1fa   : > { %v2716_v36 = vrot.slane %v2715_v31, 4  ;;  %v2757_v37 = vadd.f32 %v2756_v30, %v2737_v32  ;;  %2834 = vst [vmem:[%s4716_s20 + $0x38] sm:$0xff] %v3280_v33 }
 0x1fb   : > { %v2704_v38 = vadd.f32 %v2703_v34, %v2702_v28  ;;  %v2745_v39 = vrot.slane %v2744_v35, 4 }
 0x1fc   : > { %v2717_v40 = vadd.f32 %v2716_v36, %v2715_v31  ;;  %v2758_v41 = vrot.slane %v2757_v37, 4 }
 0x1fd   : > { %v2705_v42 = vrot.slane %v2704_v38, 2  ;;  %v2746_v43 = vadd.f32 %v2745_v39, %v2744_v35 }
 0x1fe   : > { %v2718_v44 = vrot.slane %v2717_v40, 2  ;;  %v2759_v45 = vadd.f32 %v2758_v41, %v2757_v37 }
 0x1ff   : > { %v2706_v46 = vadd.f32 %v2705_v42, %v2704_v38  ;;  %v2747_v47 = vrot.slane %v2746_v43, 2 }
 0x200   : > { %v2719_v48 = vadd.f32 %v2718_v44, %v2717_v40  ;;  %v2760_v49 = vrot.slane %v2759_v45, 2 }
 0x201   : > { %v2707_v50 = vrot.slane %v2706_v46, 1  ;;  %v2748_v51 = vadd.f32 %v2747_v47, %v2746_v43 }
 0x202   : > { %v2720_v52 = vrot.slane %v2719_v48, 1  ;;  %v2761_v53 = vadd.f32 %v2760_v49, %v2759_v45 }
 0x203   : > { %v2749_v54 = vrot.slane %v2748_v51, 1  ;;  %v2708_v56 = vadd.f32 %v2707_v50, %v2706_v46 }
 0x204   : > { %v2762_v55 = vrot.slane %v2761_v53, 1  ;;  %v2721_v58 = vadd.f32 %v2720_v52, %v2719_v48 }
 0x205   : > { %v2750_v57 = vadd.f32 %v2749_v54, %v2748_v51 }
 0x206   : > { %v2763_v59 = vadd.f32 %v2762_v55, %v2761_v53 }
 0x207   : > { %v2765_v60 = vsel %vm2764_vm0, %v2708_v56, %v2750_v57 }
 0x208   : > { %v2766_v61 = vsel %vm2764_vm0, %v2721_v58, %v2763_v59 }
 0x209   : > { %v2769_v62 = vcombine.low %v2765_v60, %v2766_v61 }
 0x20b   : > { %3259 = vst.sshfl [vmem:[%s191_s23] sm:$0x33 pattern:$0x76325410] %v2769_v62 }
 0x20c PF: > { %s14_s12 = sadd.s32 1, %s3791_s12  }
 0x20d   : > { %p11_p5 = scmp.ge.s32.totalorder %s14_s12, 4  }
 0x20f   :  { %13 = sbr.rel (!%p11_p5) target bundleno = 1 (0x1), region = 70 }

// kernel: discriminator_forward.12
= control target key start
LH: loop header
LB: loop body
LE: loop exit
PB: predicated region body
PF: predicated region fallthrough
CT: control target
= control target key end

     0   :  { %s488_s12 = smov 0   ;;  %s579_s0 = inlined_call_operand.vmem [shape: bf16[128,256], index: 0, kind: input, shape index: {}]   ;;  %s580_s1 = inlined_call_operand.vmem [shape: f32[1,256], index: 1, kind: input, shape index: {}]   ;;  %s581_s2 = inlined_call_operand.vmem [shape: f32[1,256], index: 2, kind: input, shape index: {}]   ;;  %s582_s3 = inlined_call_operand.vmem [shape: bf16[128,256], index: 3, kind: output, shape index: {}]  }
   0x1 LB: > { %s421_s13 = sadd.s32 4294967295, %s466_s12   ;;  %p425_p0 = scmp.ge.s32.totalorder %s466_s12, 1  ;;  %s466_s12 = sphi %s488_s12, %s13_s12  }
   0x2   : > { %p139_p1 = scmp.lt.s32.totalorder %s466_s12, 3 }
   0x4   : > { %p140_p2 = pnand %p425_p0, %p139_p1 }
   0x5   : > { %s426_s14 = sshll.u32 (!%p140_p2), %s421_s13, 3  ;;  %v205_v0 = vlaneseq (!%p140_p2)  ;;  %v203_v2 = vld [vmem:[%s580_s1] sm:$0x3] (!%p140_p2) }
   0x6   : > { %143 = sbr.rel (%p140_p2) target bundleno = 49 (0x31), region = 32  ;;  %p166_p3 = scmp.lt.s32.totalorder (!%p140_p2), %s426_s14, 15  ;;  %v231_v5 = vld [vmem:[%s581_s2] sm:$0x3] (!%p140_p2) }
   0x7   : > { %v206_v1 = vshrl.u32 (!%p140_p2), %v205_v0, 7 }
   0x9   : > { %v207_v3 = vsub.s32 (!%p140_p2), 0, %v206_v1  ;;  %v211_v4 = vsub.s32 (!%p140_p2), 1, %v206_v1 }
   0xb   : > { %v512_v6 = vrot.slane (!%p140_p2), %v203_v2, %v207_v3  ;;  %v514_v7 = vrot.slane (!%p140_p2), %v203_v2, %v211_v4  ;;  %v517_v9 = vrot.slane (!%p140_p2), %v231_v5, %v207_v3  ;;  %v519_v10 = vrot.slane (!%p140_p2), %v231_v5, %v211_v4 }
   0xd   : > { %s584_s14 = smov (!%p166_p3, %s426_s14), 15 }
   0xe   : > { %s442_s19 = sshll.u32 %s584_s14, 3 }
   0xf   : > { %s510_s22 = scalar_lea.vmem %s579_s0, %s442_s19  ;;  %s545_s25 = scalar_lea.vmem %s582_s3, %s442_s19 }
  0x10   : > { %v179_v8 = vld [vmem:[%s510_s22] sm:$0xff]  ;;  %v180_v11 = vld [vmem:[%s510_s22 + $0x8] sm:$0xff]  ;;  %v181_v12 = vld [vmem:[%s510_s22 + $0x10] sm:$0xff] }
  0x11   : > { %v187_v13 = vunpack.c.l.bf16 %v179_v8  ;;  %v188_v14 = vunpack.c.h.bf16 %v179_v8  ;;  %v189_v15 = vunpack.c.l.bf16 %v180_v11  ;;  %v190_v16 = vunpack.c.h.bf16 %v180_v11  ;;  %v182_v17 = vld [vmem:[%s510_s22 + $0x18] sm:$0xff]  ;;  %v183_v44 = vld [vmem:[%s510_s22 + $0x20] sm:$0xff]  ;;  %v184_v49 = vld [vmem:[%s510_s22 + $0x28] sm:$0xff] }
  0x12   : > { %v191_v18 = vunpack.c.l.bf16 %v181_v12  ;;  %v192_v19 = vunpack.c.h.bf16 %v181_v12  ;;  %v193_v20 = vunpack.c.l.bf16 %v182_v17  ;;  %v194_v21 = vunpack.c.h.bf16 %v182_v17  ;;  %v185_v60 = vld [vmem:[%s510_s22 + $0x30] sm:$0xff]  ;;  %v186_v61 = vld [vmem:[%s510_s22 + $0x38] sm:$0xff] }
  0x13   : > { %v215_v22 = vmul.f32 %v512_v6, %v187_v13  ;;  %v216_v23 = vmul.f32 %v514_v7, %v188_v14  ;;  %v217_v24 = vmul.f32 %v512_v6, %v189_v15  ;;  %v218_v25 = vmul.f32 %v514_v7, %v190_v16 }
  0x14   : > { %v219_v26 = vmul.f32 %v512_v6, %v191_v18  ;;  %v220_v27 = vmul.f32 %v514_v7, %v192_v19  ;;  %v221_v28 = vmul.f32 %v512_v6, %v193_v20  ;;  %v222_v29 = vmul.f32 %v514_v7, %v194_v21 }
  0x15   : > { %v243_v30 = vadd.f32 %v517_v9, %v215_v22  ;;  %v244_v31 = vadd.f32 %v519_v10, %v216_v23  ;;  %v245_v32 = vadd.f32 %v517_v9, %v217_v24  ;;  %v246_v33 = vadd.f32 %v519_v10, %v218_v25 }
  0x16   : > { %v247_v34 = vadd.f32 %v517_v9, %v219_v26  ;;  %v248_v35 = vadd.f32 %v519_v10, %v220_v27  ;;  %v249_v36 = vadd.f32 %v517_v9, %v221_v28  ;;  %v250_v37 = vadd.f32 %v519_v10, %v222_v29 }
  0x17   : > { %vm259_vm0 = vcmp.ge.f32.partialorder %v243_v30, 0.0  ;;  %vm260_vm1 = vcmp.ge.f32.partialorder %v244_v31, 0.0  ;;  %v275_v38 = vmul.f32 0.2, %v243_v30  ;;  %v276_v39 = vmul.f32 0.2, %v244_v31 }
  0x18   : > { %vm261_vm2 = vcmp.ge.f32.partialorder %v245_v32, 0.0  ;;  %vm262_vm3 = vcmp.ge.f32.partialorder %v246_v33, 0.0  ;;  %v277_v40 = vmul.f32 0.2, %v245_v32  ;;  %v278_v41 = vmul.f32 0.2, %v246_v33 }
  0x19   : > { %v291_v42 = vsel %vm259_vm0, %v243_v30, %v275_v38  ;;  %v292_v43 = vsel %vm260_vm1, %v244_v31, %v276_v39  ;;  %vm263_vm4 = vcmp.ge.f32.partialorder %v247_v34, 0.0  ;;  %vm264_vm5 = vcmp.ge.f32.partialorder %v248_v35, 0.0 }
  0x1a   : > { %v444_v45 = vpack.c.bf16 %v292_v43, %v291_v42  ;;  %v293_v46 = vsel %vm261_vm2, %v245_v32, %v277_v40  ;;  %v294_v47 = vsel %vm262_vm3, %v246_v33, %v278_v41  ;;  %v279_v48 = vmul.f32 0.2, %v247_v34 }
  0x1b   : > { %v445_v50 = vpack.c.bf16 %v294_v47, %v293_v46  ;;  %v280_v51 = vmul.f32 0.2, %v248_v35  ;;  %vm265_vm6 = vcmp.ge.f32.partialorder %v249_v36, 0.0  ;;  %vm266_vm7 = vcmp.ge.f32.partialorder %v250_v37, 0.0 }
  0x1c   : > { %355 = vst [vmem:[%s545_s25] sm:$0xff] %v444_v45  ;;  %v295_v52 = vsel %vm263_vm4, %v247_v34, %v279_v48  ;;  %v281_v53 = vmul.f32 0.2, %v249_v36  ;;  %v282_v54 = vmul.f32 0.2, %v250_v37  ;;  %v195_v55 = vunpack.c.l.bf16 %v183_v44 }
  0x1d   : > { %356 = vst [vmem:[%s545_s25 + $0x8] sm:$0xff] %v445_v50  ;;  %v296_v56 = vsel %vm264_vm5, %v248_v35, %v280_v51  ;;  %v196_v57 = vunpack.c.h.bf16 %v183_v44  ;;  %v197_v58 = vunpack.c.l.bf16 %v184_v49  ;;  %v198_v59 = vunpack.c.h.bf16 %v184_v49 }
  0x1e   : > { %v446_v62 = vpack.c.bf16 %v296_v56, %v295_v52  ;;  %v297_v63 = vsel %vm265_vm6, %v249_v36, %v281_v53  ;;  %v298_v0 = vsel %vm266_vm7, %v250_v37, %v282_v54  ;;  %v223_v1 = vmul.f32 %v512_v6, %v195_v55 }
  0x1f   : > { %v447_v2 = vpack.c.bf16 %v298_v0, %v297_v63  ;;  %v224_v3 = vmul.f32 %v514_v7, %v196_v57  ;;  %v225_v4 = vmul.f32 %v512_v6, %v197_v58  ;;  %v226_v5 = vmul.f32 %v514_v7, %v198_v59 }
  0x20   : > { %357 = vst [vmem:[%s545_s25 + $0x10] sm:$0xff] %v446_v62  ;;  %v251_v8 = vadd.f32 %v517_v9, %v223_v1  ;;  %v199_v11 = vunpack.c.l.bf16 %v185_v60  ;;  %v200_v12 = vunpack.c.h.bf16 %v185_v60  ;;  %v201_v13 = vunpack.c.l.bf16 %v186_v61 }
  0x21   : > { %358 = vst [vmem:[%s545_s25 + $0x18] sm:$0xff] %v447_v2  ;;  %v252_v14 = vadd.f32 %v519_v10, %v224_v3  ;;  %v253_v15 = vadd.f32 %v517_v9, %v225_v4  ;;  %v254_v16 = vadd.f32 %v519_v10, %v226_v5  ;;  %v202_v17 = vunpack.c.h.bf16 %v186_v61 }
  0x22   : > { %vm267_vm8 = vcmp.ge.f32.partialorder %v251_v8, 0.0  ;;  %v283_v18 = vmul.f32 0.2, %v251_v8  ;;  %v227_v19 = vmul.f32 %v512_v6, %v199_v11  ;;  %v228_v20 = vmul.f32 %v514_v7, %v200_v12 }
  0x23   : > { %vm268_vm9 = vcmp.ge.f32.partialorder %v252_v14, 0.0  ;;  %v284_v21 = vmul.f32 0.2, %v252_v14  ;;  %vm269_vm10 = vcmp.ge.f32.partialorder %v253_v15, 0.0  ;;  %vm270_vm11 = vcmp.ge.f32.partialorder %v254_v16, 0.0 }
  0x24   : > { %v299_v22 = vsel %vm267_vm8, %v251_v8, %v283_v18  ;;  %v285_v23 = vmul.f32 0.2, %v253_v15  ;;  %v286_v24 = vmul.f32 0.2, %v254_v16  ;;  %v255_v25 = vadd.f32 %v517_v9, %v227_v19 }
  0x25   : > { %v300_v26 = vsel %vm268_vm9, %v252_v14, %v284_v21  ;;  %v256_v27 = vadd.f32 %v519_v10, %v228_v20  ;;  %v229_v28 = vmul.f32 %v512_v6, %v201_v13  ;;  %v230_v29 = vmul.f32 %v514_v7, %v202_v17 }
  0x26   : > { %v448_v30 = vpack.c.bf16 %v300_v26, %v299_v22  ;;  %v301_v31 = vsel %vm269_vm10, %v253_v15, %v285_v23  ;;  %v302_v32 = vsel %vm270_vm11, %v254_v16, %v286_v24  ;;  %vm271_vm12 = vcmp.ge.f32.partialorder %v255_v25, 0.0 }
  0x27   : > { %v449_v33 = vpack.c.bf16 %v302_v32, %v301_v31  ;;  %vm272_vm13 = vcmp.ge.f32.partialorder %v256_v27, 0.0  ;;  %v287_v34 = vmul.f32 0.2, %v255_v25  ;;  %v288_v35 = vmul.f32 0.2, %v256_v27 }
  0x28   : > { %359 = vst [vmem:[%s545_s25 + $0x20] sm:$0xff] %v448_v30  ;;  %v257_v36 = vadd.f32 %v517_v9, %v229_v28  ;;  %v258_v37 = vadd.f32 %v519_v10, %v230_v29 }
  0x29   : > { %360 = vst [vmem:[%s545_s25 + $0x28] sm:$0xff] %v449_v33  ;;  %v303_v38 = vsel %vm271_vm12, %v255_v25, %v287_v34  ;;  %v304_v6 = vsel %vm272_vm13, %v256_v27, %v288_v35 }
  0x2a   : > { %v450_v39 = vpack.c.bf16 %v304_v6, %v303_v38  ;;  %vm273_vm14 = vcmp.ge.f32.partialorder %v257_v36, 0.0  ;;  %vm274_vm15 = vcmp.ge.f32.partialorder %v258_v37, 0.0  ;;  %v289_v7 = vmul.f32 0.2, %v257_v36 }
  0x2b   : > { %v290_v40 = vmul.f32 0.2, %v258_v37 }
  0x2c   : > { %361 = vst [vmem:[%s545_s25 + $0x30] sm:$0xff] %v450_v39  ;;  %v305_v41 = vsel %vm273_vm14, %v257_v36, %v289_v7 }
  0x2d   : > { %v306_v42 = vsel %vm274_vm15, %v258_v37, %v290_v40 }
  0x2e   : > { %v451_v43 = vpack.c.bf16 %v306_v42, %v305_v41 }
  0x30   : > { %362 = vst [vmem:[%s545_s25 + $0x38] sm:$0xff] %v451_v43 }
  0x31 PF: > { %s13_s12 = sadd.s32 1, %s466_s12  }
  0x32   : > { %p10_p4 = scmp.ge.s32.totalorder %s13_s12, 4  }
  0x34   :  { %12 = sbr.rel (!%p10_p4) target bundleno = 1 (0x1), region = 62 }

// kernel: discriminator_forward.14
= control target key start
LH: loop header
LB: loop body
LE: loop exit
PB: predicated region body
PF: predicated region fallthrough
CT: control target
= control target key end

     0   :  { %s420_s12 = smov 0   ;;  %s450_s0 = inlined_call_operand.vmem [shape: bf16[32,512], index: 0, kind: input, shape index: {}]   ;;  %s451_s1 = inlined_call_operand.vmem [shape: f32[1,512], index: 1, kind: input, shape index: {}]   ;;  %s452_s2 = inlined_call_operand.vmem [shape: f32[1,512], index: 2, kind: input, shape index: {}]   ;;  %s453_s3 = inlined_call_operand.vmem [shape: bf16[32,512], index: 3, kind: output, shape index: {}]  }
   0x1 LB: > { %s361_s13 = sadd.s32 4294967295, %s398_s12   ;;  %p365_p0 = scmp.ge.s32.totalorder %s398_s12, 1  ;;  %s398_s12 = sphi %s420_s12, %s13_s12  }
   0x2   : > { %p139_p1 = scmp.lt.s32.totalorder %s398_s12, 3 }
   0x4   : > { %p140_p2 = pnand %p365_p0, %p139_p1 }
   0x5   : > { %s366_s14 = sshll.u32 (!%p140_p2), %s361_s13, 1  ;;  %v193_v0 = vlaneseq (!%p140_p2)  ;;  %v191_v2 = vld [vmem:[%s451_s1] sm:$0xf] (!%p140_p2) }
   0x6   : > { %143 = sbr.rel (%p140_p2) target bundleno = 34 (0x22), region = 32  ;;  %p166_p3 = scmp.lt.s32.totalorder (!%p140_p2), %s366_s14, 3  ;;  %v221_v3 = vld [vmem:[%s452_s2] sm:$0xf] (!%p140_p2) }
   0x7   : > { %v194_v1 = vshrl.u32 (!%p140_p2), %v193_v0, 7 }
   0x9   : > { %v195_v4 = vsub.s32 (!%p140_p2), 0, %v194_v1  ;;  %v199_v5 = vsub.s32 (!%p140_p2), 1, %v194_v1  ;;  %v203_v6 = vsub.s32 (!%p140_p2), 2, %v194_v1  ;;  %v207_v7 = vsub.s32 (!%p140_p2), 3, %v194_v1 }
   0xb   : > { %v196_v8 = vrot.slane (!%p140_p2), %v191_v2, %v195_v4  ;;  %v200_v9 = vrot.slane (!%p140_p2), %v191_v2, %v199_v5  ;;  %v226_v10 = vrot.slane (!%p140_p2), %v221_v3, %v195_v4  ;;  %v230_v11 = vrot.slane (!%p140_p2), %v221_v3, %v199_v5 }
   0xc   : > { %v204_v15 = vrot.slane (!%p140_p2), %v191_v2, %v203_v6  ;;  %v208_v16 = vrot.slane (!%p140_p2), %v191_v2, %v207_v7  ;;  %v234_v17 = vrot.slane (!%p140_p2), %v221_v3, %v203_v6  ;;  %v238_v18 = vrot.slane (!%p140_p2), %v221_v3, %v207_v7 }
   0xd   : > { %s455_s14 = smov (!%p166_p3, %s366_s14), 3 }
   0xe   : > { %s378_s19 = sshll.u32 %s455_s14, 4 }
   0xf   : > { %s170_s22 = scalar_lea.vmem %s450_s0, %s378_s19  ;;  %s177_s25 = scalar_lea.vmem %s453_s3, %s378_s19 }
  0x10   : > { %v179_v12 = vld [vmem:[%s170_s22] sm:$0xff]  ;;  %v180_v13 = vld [vmem:[%s170_s22 + $0x8] sm:$0xff]  ;;  %v181_v14 = vld [vmem:[%s170_s22 + $0x10] sm:$0xff] }
  0x11   : > { %v182_v19 = vld [vmem:[%s170_s22 + $0x18] sm:$0xff]  ;;  %v183_v20 = vunpack.c.l.bf16 %v179_v12  ;;  %v184_v21 = vunpack.c.h.bf16 %v179_v12  ;;  %v185_v22 = vunpack.c.l.bf16 %v180_v13  ;;  %v186_v23 = vunpack.c.h.bf16 %v180_v13 }
  0x12   : > { %v187_v24 = vunpack.c.l.bf16 %v181_v14  ;;  %v188_v25 = vunpack.c.h.bf16 %v181_v14  ;;  %v189_v26 = vunpack.c.l.bf16 %v182_v19  ;;  %v190_v27 = vunpack.c.h.bf16 %v182_v19 }
  0x13   : > { %v213_v28 = vmul.f32 %v196_v8, %v183_v20  ;;  %v214_v29 = vmul.f32 %v200_v9, %v184_v21  ;;  %v215_v30 = vmul.f32 %v204_v15, %v185_v22  ;;  %v216_v31 = vmul.f32 %v208_v16, %v186_v23 }
  0x14   : > { %v217_v32 = vmul.f32 %v196_v8, %v187_v24  ;;  %v218_v33 = vmul.f32 %v200_v9, %v188_v25  ;;  %v219_v34 = vmul.f32 %v204_v15, %v189_v26  ;;  %v220_v35 = vmul.f32 %v208_v16, %v190_v27 }
  0x15   : > { %v243_v36 = vadd.f32 %v226_v10, %v213_v28  ;;  %v244_v37 = vadd.f32 %v230_v11, %v214_v29  ;;  %v245_v38 = vadd.f32 %v234_v17, %v215_v30  ;;  %v246_v39 = vadd.f32 %v238_v18, %v216_v31 }
  0x16   : > { %v247_v40 = vadd.f32 %v226_v10, %v217_v32  ;;  %v248_v41 = vadd.f32 %v230_v11, %v218_v33  ;;  %v249_v42 = vadd.f32 %v234_v17, %v219_v34  ;;  %v250_v43 = vadd.f32 %v238_v18, %v220_v35 }
  0x17   : > { %vm251_vm0 = vcmp.ge.f32.partialorder %v243_v36, 0.0  ;;  %vm252_vm1 = vcmp.ge.f32.partialorder %v244_v37, 0.0  ;;  %v259_v44 = vmul.f32 0.2, %v243_v36  ;;  %v260_v45 = vmul.f32 0.2, %v244_v37 }
  0x18   : > { %vm253_vm2 = vcmp.ge.f32.partialorder %v245_v38, 0.0  ;;  %vm254_vm3 = vcmp.ge.f32.partialorder %v246_v39, 0.0  ;;  %v261_v46 = vmul.f32 0.2, %v245_v38  ;;  %v262_v47 = vmul.f32 0.2, %v246_v39 }
  0x19   : > { %v267_v48 = vsel %vm251_vm0, %v243_v36, %v259_v44  ;;  %v268_v49 = vsel %vm252_vm1, %v244_v37, %v260_v45  ;;  %vm255_vm4 = vcmp.ge.f32.partialorder %v247_v40, 0.0  ;;  %vm256_vm5 = vcmp.ge.f32.partialorder %v248_v41, 0.0 }
  0x1a   : > { %v380_v50 = vpack.c.bf16 %v268_v49, %v267_v48  ;;  %v269_v51 = vsel %vm253_vm2, %v245_v38, %v261_v46  ;;  %v270_v52 = vsel %vm254_vm3, %v246_v39, %v262_v47  ;;  %v263_v53 = vmul.f32 0.2, %v247_v40 }
  0x1b   : > { %v381_v54 = vpack.c.bf16 %v270_v52, %v269_v51  ;;  %v264_v55 = vmul.f32 0.2, %v248_v41  ;;  %vm257_vm6 = vcmp.ge.f32.partialorder %v249_v42, 0.0  ;;  %vm258_vm7 = vcmp.ge.f32.partialorder %v250_v43, 0.0 }
  0x1c   : > { %299 = vst [vmem:[%s177_s25] sm:$0xff] %v380_v50  ;;  %v271_v56 = vsel %vm255_vm4, %v247_v40, %v263_v53  ;;  %v265_v57 = vmul.f32 0.2, %v249_v42  ;;  %v266_v58 = vmul.f32 0.2, %v250_v43 }
  0x1d   : > { %300 = vst [vmem:[%s177_s25 + $0x8] sm:$0xff] %v381_v54  ;;  %v272_v59 = vsel %vm256_vm5, %v248_v41, %v264_v55 }
  0x1e   : > { %v382_v60 = vpack.c.bf16 %v272_v59, %v271_v56  ;;  %v273_v61 = vsel %vm257_vm6, %v249_v42, %v265_v57  ;;  %v274_v62 = vsel %vm258_vm7, %v250_v43, %v266_v58 }
  0x1f   : > { %v383_v63 = vpack.c.bf16 %v274_v62, %v273_v61 }
  0x20   : > { %301 = vst [vmem:[%s177_s25 + $0x10] sm:$0xff] %v382_v60 }
  0x21   : > { %302 = vst [vmem:[%s177_s25 + $0x18] sm:$0xff] %v383_v63 }
  0x22 PF: > { %s13_s12 = sadd.s32 1, %s398_s12  }
  0x23   : > { %p10_p4 = scmp.ge.s32.totalorder %s13_s12, 4  }
  0x25   :  { %12 = sbr.rel (!%p10_p4) target bundleno = 1 (0x1), region = 62 }

// kernel: discriminator_forward.15
= control target key start
LH: loop header
LB: loop body
LE: loop exit
PB: predicated region body
PF: predicated region fallthrough
CT: control target
= control target key end

     0   :  { %v75_v0 = vlaneseq  ;;  %v1518_v10 = vmov 1983009808   ;;  %vm1371_vm0 = vcmask 1041408   ;;  %vm1507_vm1 = vcmask 1024   ;;  %s2499_s1 = inlined_call_operand.vmem [shape: bf16[1,8192], index: 1, kind: input, shape index: {}]   ;;  %s2500_s0 = inlined_call_operand.vmem [shape: bf16[2,8192], index: 0, kind: input, shape index: {}]   ;;  %s2501_s2 = inlined_call_operand.vmem [shape: f32[2,1], index: 2, kind: output, shape index: {}]  }
   0x1   :  { %v39_v1 = vld [vmem:[%s2499_s1 + $0x20] sm:$0xff]  ;;  %v40_v2 = vld [vmem:[%s2499_s1 + $0x28] sm:$0xff]  ;;  %v41_v4 = vld [vmem:[%s2499_s1 + $0x30] sm:$0xff]  ;;  %v1556_v11 = vunpack.c.l.s4 %v1518_v10 }
   0x2   :  { %v1540_v3 = vshrl.u32 %v75_v0, 7  ;;  %v42_v5 = vld [vmem:[%s2499_s1 + $0x38] sm:$0xff]  ;;  %v1548_v6 = vunpack.c.l.bf16 %v39_v1  ;;  %v1550_v7 = vunpack.c.h.bf16 %v39_v1  ;;  %v1552_v8 = vunpack.c.l.bf16 %v40_v2  ;;  %v1637_v48 = vld [vmem:[%s2500_s0] sm:$0xff]  ;;  %v1642_v49 = vld [vmem:[%s2500_s0 + $0x8] sm:$0xff] }
   0x3   :  { %v1554_v9 = vunpack.c.h.bf16 %v40_v2  ;;  %v1570_v16 = vunpack.c.l.bf16 %v41_v4  ;;  %v1572_v17 = vunpack.c.h.bf16 %v41_v4  ;;  %v1574_v18 = vunpack.c.l.bf16 %v42_v5  ;;  %2522 = vst [vmem:[#allocation4_spill] sm:$0xff] %v1637_v48  ;;  %2523 = vst [vmem:[#allocation5_spill] sm:$0xff] %v1642_v49  ;;  %v1655_v54 = vld [vmem:[%s2500_s0 + $0x20] sm:$0xff]  ;;  %v1663_v56 = vld [vmem:[%s2500_s0 + $0x28] sm:$0xff] }
   0x4   :  { %v1559_v12 = vsub.s32 0, %v1540_v3  ;;  %v1562_v13 = vsub.s32 2, %v1540_v3  ;;  %v1565_v14 = vsub.s32 4, %v1540_v3  ;;  %v1568_v15 = vsub.s32 6, %v1540_v3  ;;  %v35_v55 = vld [vmem:[%s2499_s1] sm:$0xff]  ;;  %v1668_v57 = vld [vmem:[%s2500_s0 + $0x30] sm:$0xff] }
   0x5   :  { %v1576_v19 = vunpack.c.h.bf16 %v42_v5  ;;  %2524 = vst [vmem:[#allocation6_spill] sm:$0xff] %v1668_v57  ;;  %v1673_v58 = vld [vmem:[%s2500_s0 + $0x38] sm:$0xff]  ;;  %v36_v0 = vld [vmem:[%s2499_s1 + $0x8] sm:$0xff]  ;;  %v37_v1 = vld [vmem:[%s2499_s1 + $0x10] sm:$0xff]  ;;  %v1686_v2 = vunpack.c.l.bf16 %v35_v55  ;;  %v719_v4 = vunpack.c.0.s8 %v1556_v11  ;;  %v1701_v11 = vunpack.c.h.bf16 %v35_v55 }
   0x6   :  { %2520 = vst [vmem:[#allocation2_spill] sm:$0xff] %v1562_v13  ;;  %2521 = vst [vmem:[#allocation3_spill] sm:$0xff] %v1565_v14  ;;  %v206_v20 = vrot.slane %v1548_v6, %v1559_v12  ;;  %v210_v21 = vrot.slane %v1548_v6, %v1562_v13  ;;  %v214_v22 = vrot.slane %v1548_v6, %v1565_v14  ;;  %v1696_v60 = vld [vmem:[%s2499_s1 + $0x18] sm:$0xff]  ;;  %v1703_v5 = vunpack.c.l.bf16 %v36_v0 }
   0x7   :  { %v218_v23 = vrot.slane %v1548_v6, %v1568_v15  ;;  %v222_v24 = vrot.slane %v1550_v7, %v1559_v12  ;;  %v226_v25 = vrot.slane %v1550_v7, %v1562_v13  ;;  %v230_v26 = vrot.slane %v1550_v7, %v1565_v14  ;;  %2525 = vst [vmem:[#allocation7_spill] sm:$0xff] %v1673_v58 }
   0x8   :  { %v234_v27 = vrot.slane %v1550_v7, %v1568_v15  ;;  %v238_v28 = vrot.slane %v1552_v8, %v1559_v12  ;;  %v242_v29 = vrot.slane %v1552_v8, %v1562_v13  ;;  %v246_v30 = vrot.slane %v1552_v8, %v1565_v14  ;;  %2526 = vst [vmem:[#allocation8_spill] sm:$0xff] %v1696_v60 }
   0x9   :  { %v250_v31 = vrot.slane %v1552_v8, %v1568_v15  ;;  %v254_v32 = vrot.slane %v1554_v9, %v1559_v12  ;;  %v258_v33 = vrot.slane %v1554_v9, %v1562_v13  ;;  %v262_v34 = vrot.slane %v1554_v9, %v1565_v14 }
   0xa   :  { %v266_v35 = vrot.slane %v1554_v9, %v1568_v15  ;;  %v270_v36 = vrot.slane %v1570_v16, %v1559_v12  ;;  %v274_v37 = vrot.slane %v1570_v16, %v1562_v13  ;;  %v278_v38 = vrot.slane %v1570_v16, %v1565_v14 }
   0xb   :  { %v282_v39 = vrot.slane %v1570_v16, %v1568_v15  ;;  %v286_v40 = vrot.slane %v1572_v17, %v1559_v12  ;;  %v290_v41 = vrot.slane %v1572_v17, %v1562_v13  ;;  %v294_v42 = vrot.slane %v1572_v17, %v1565_v14 }
   0xc   :  { %v298_v43 = vrot.slane %v1572_v17, %v1568_v15  ;;  %v302_v44 = vrot.slane %v1574_v18, %v1559_v12  ;;  %v306_v45 = vrot.slane %v1574_v18, %v1562_v13  ;;  %v310_v46 = vrot.slane %v1574_v18, %v1565_v14 }
   0xd   :  { %v314_v47 = vrot.slane %v1574_v18, %v1568_v15  ;;  %v318_v50 = vrot.slane %v1576_v19, %v1559_v12  ;;  %v322_v51 = vrot.slane %v1576_v19, %v1562_v13  ;;  %v1705_v10 = vunpack.c.h.bf16 %v36_v0 }
   0xe   :  { %v1707_v62 = vunpack.c.l.bf16 %v37_v1  ;;  %v1709_v61 = vunpack.c.h.bf16 %v37_v1  ;;  %v1712_v52 = vunpack.c.l.bf16 %v1696_v60  ;;  %v78_v59 = vrot.slane %v1686_v2, %v1559_v12 }
   0xf   :  { %v82_v63 = vrot.slane %v1686_v2, %v1562_v13  ;;  %v1719_v55 = vsub.s32 %v719_v4, %v1540_v3  ;;  %v1725_v0 = vrot.slane %v206_v20, %v1559_v12  ;;  %v1731_v1 = vrot.slane %v210_v21, %v1559_v12 }
  0x10   :  { %2527 = vst [vmem:[#allocation9_spill] sm:$0xff] %v1709_v61  ;;  %2528 = vst [vmem:[#allocation10_spill] sm:$0xff] %v1712_v52  ;;  %v1737_v53 = vrot.slane %v214_v22, %v1559_v12  ;;  %v1743_v3 = vrot.slane %v218_v23, %v1559_v12  ;;  %v1749_v20 = vrot.slane %v222_v24, %v1559_v12 }
  0x11   :  { %2529 = vst [vmem:[#allocation11_spill] sm:$0xff] %v1719_v55  ;;  %v1755_v21 = vrot.slane %v226_v25, %v1559_v12  ;;  %v1761_v22 = vrot.slane %v230_v26, %v1559_v12  ;;  %v1767_v6 = vrot.slane %v234_v27, %v1559_v12  ;;  %v1773_v23 = vrot.slane %v238_v28, %v1559_v12 }
  0x12   :  { %v1779_v24 = vrot.slane %v242_v29, %v1559_v12  ;;  %v1785_v25 = vrot.slane %v246_v30, %v1559_v12  ;;  %v1791_v7 = vrot.slane %v250_v31, %v1559_v12  ;;  %v1797_v26 = vrot.slane %v254_v32, %v1559_v12 }
  0x13   :  { %v1803_v27 = vrot.slane %v258_v33, %v1559_v12  ;;  %v1809_v28 = vrot.slane %v262_v34, %v1559_v12  ;;  %v1815_v8 = vrot.slane %v266_v35, %v1559_v12  ;;  %v1821_v29 = vrot.slane %v270_v36, %v1559_v12 }
  0x14   :  { %v1827_v30 = vrot.slane %v274_v37, %v1559_v12  ;;  %v1833_v31 = vrot.slane %v278_v38, %v1559_v12  ;;  %v1839_v9 = vrot.slane %v282_v39, %v1559_v12  ;;  %v1845_v32 = vrot.slane %v286_v40, %v1559_v12 }
  0x15   :  { %v1851_v33 = vrot.slane %v290_v41, %v1559_v12  ;;  %v1857_v34 = vrot.slane %v294_v42, %v1559_v12  ;;  %v1863_v16 = vrot.slane %v298_v43, %v1559_v12  ;;  %v1869_v35 = vrot.slane %v302_v44, %v1559_v12 }
  0x16   :  { %v1875_v36 = vrot.slane %v306_v45, %v1559_v12  ;;  %v1881_v37 = vrot.slane %v310_v46, %v1559_v12  ;;  %v1887_v17 = vrot.slane %v314_v47, %v1559_v12  ;;  %v1893_v38 = vrot.slane %v318_v50, %v1559_v12 }
  0x17   :  { %v1899_v39 = vrot.slane %v322_v51, %v1559_v12  ;;  %v2530_v40 = vrot.slane %v1576_v19, %v1565_v14  ;;  %v2531_v18 = vrot.slane %v1576_v19, %v1568_v15  ;;  %v86_v43 = vrot.slane %v1686_v2, %v1565_v14 }
  0x18   :  { %v90_v44 = vrot.slane %v1686_v2, %v1568_v15  ;;  %v94_v45 = vrot.slane %v1701_v11, %v1559_v12  ;;  %v98_v46 = vrot.slane %v1701_v11, %v1562_v13  ;;  %v102_v47 = vrot.slane %v1701_v11, %v1565_v14 }
  0x19   :  { %v1905_v41 = vrot.slane %v2530_v40, %v1559_v12  ;;  %v1911_v42 = vrot.slane %v2531_v18, %v1559_v12  ;;  %v106_v19 = vrot.slane %v1701_v11, %v1568_v15  ;;  %v110_v50 = vrot.slane %v1703_v5, %v1559_v12 }
  0x1a   :  { %v114_v51 = vrot.slane %v1703_v5, %v1562_v13  ;;  %v118_v2 = vrot.slane %v1703_v5, %v1565_v14  ;;  %v122_v4 = vrot.slane %v1703_v5, %v1568_v15  ;;  %v126_v40 = vrot.slane %v1705_v10, %v1559_v12 }
  0x1b   :  { %v130_v18 = vrot.slane %v1705_v10, %v1562_v13  ;;  %v134_v11 = vrot.slane %v1705_v10, %v1565_v14  ;;  %v138_v49 = vrot.slane %v1705_v10, %v1568_v15  ;;  %v142_v48 = vrot.slane %v1707_v62, %v1559_v12 }
  0x1c   :  { %v146_v60 = vrot.slane %v1707_v62, %v1562_v13  ;;  %v150_v5 = vrot.slane %v1707_v62, %v1565_v14  ;;  %v154_v52 = vrot.slane %v1707_v62, %v1568_v15  ;;  %v1950_v61 = vrot.slane %v78_v59, %v1559_v12 }
  0x1d   :  { %v1953_v58 = vrot.slane %v82_v63, %v1559_v12  ;;  %v1956_v10 = vrot.slane %v86_v43, %v1559_v12  ;;  %v1959_v57 = vrot.slane %v90_v44, %v1559_v12  ;;  %v1962_v13 = vrot.slane %v94_v45, %v1559_v12 }
  0x1e   :  { %v1965_v14 = vrot.slane %v98_v46, %v1559_v12  ;;  %v1968_v62 = vrot.slane %v102_v47, %v1559_v12  ;;  %v1971_v59 = vrot.slane %v106_v19, %v1559_v12  ;;  %v1974_v63 = vrot.slane %v110_v50, %v1559_v12 }
  0x1f   :  { %v1977_v43 = vrot.slane %v114_v51, %v1559_v12  ;;  %v1980_v44 = vrot.slane %v118_v2, %v1559_v12  ;;  %v1983_v45 = vrot.slane %v122_v4, %v1559_v12  ;;  %v1986_v46 = vrot.slane %v126_v40, %v1559_v12 }
  0x20   :  { %v1989_v47 = vrot.slane %v130_v18, %v1559_v12  ;;  %v1992_v19 = vrot.slane %v134_v11, %v1559_v12  ;;  %v1995_v50 = vrot.slane %v138_v49, %v1559_v12  ;;  %v1998_v51 = vrot.slane %v142_v48, %v1559_v12 }
  0x21   :  { %v851_v2 = vcombine.low %v1725_v0, %v1731_v1  ;;  %v2003_v4 = vrot.slane %v146_v60, %v1559_v12  ;;  %v2006_v40 = vrot.slane %v150_v5, %v1559_v12  ;;  %v2009_v18 = vrot.slane %v154_v52, %v1559_v12 }
  0x22   :  { %v852_v11 = vcombine.low %v1737_v53, %v1743_v3  ;;  %v715_v49 = vcombine.low %v1950_v61, %v1953_v58  ;;  %v868_v0 = vcombine.low %v1749_v20, %v1755_v21  ;;  %v869_v60 = vcombine.low %v1761_v22, %v1767_v6 }
  0x23   :  { %v859_v48 = vrot.slane %v851_v2, %v1719_v55  ;;  %v716_v1 = vcombine.low %v1956_v10, %v1959_v57  ;;  %v885_v5 = vcombine.low %v1773_v23, %v1779_v24  ;;  %v886_v53 = vcombine.low %v1785_v25, %v1791_v7 }
  0x24   :  { %v866_v52 = vrot.slane %v852_v11, %v1719_v55  ;;  %v876_v58 = vrot.slane %v868_v0, %v1719_v55  ;;  %v883_v61 = vrot.slane %v869_v60, %v1719_v55  ;;  %v902_v3 = vcombine.low %v1797_v26, %v1803_v27 }
  0x25   :  { %v903_v20 = vcombine.low %v1809_v28, %v1815_v8  ;;  %v893_v57 = vrot.slane %v885_v5, %v1719_v55  ;;  %v900_v22 = vrot.slane %v886_v53, %v1719_v55  ;;  %v919_v6 = vcombine.low %v1821_v29, %v1827_v30  ;;  %v2539_v5 = vld [vmem:[#allocation7_spill] sm:$0xff] }
  0x26   :  { %v867_v21 = vcombine.low %v859_v48, %v866_v52  ;;  %v884_v23 = vcombine.low %v876_v58, %v883_v61  ;;  %v910_v24 = vrot.slane %v902_v3, %v1719_v55  ;;  %v920_v7 = vcombine.low %v1833_v31, %v1839_v9 }
  0x27   :  { %v917_v25 = vrot.slane %v903_v20, %v1719_v55  ;;  %v901_v26 = vcombine.low %v893_v57, %v900_v22  ;;  %v927_v27 = vrot.slane %v919_v6, %v1719_v55  ;;  %v936_v28 = vcombine.low %v1845_v32, %v1851_v33  ;;  %v2543_v20 = vld [vmem:[#allocation2_spill] sm:$0xff]  ;;  %v2544_v6 = vld [vmem:[#allocation3_spill] sm:$0xff] }
  0x28   :  { %v937_v8 = vcombine.low %v1857_v34, %v1863_v16  ;;  %v934_v29 = vrot.slane %v920_v7, %v1719_v55  ;;  %v953_v30 = vcombine.low %v1869_v35, %v1875_v36  ;;  %v954_v2 = vcombine.low %v1881_v37, %v1887_v17 }
  0x29   :  { %v918_v10 = vcombine.low %v910_v24, %v917_v25  ;;  %v944_v31 = vrot.slane %v936_v28, %v1719_v55  ;;  %v970_v11 = vcombine.low %v1893_v38, %v1899_v39  ;;  %v971_v32 = vcombine.low %v1905_v41, %v1911_v42 }
  0x2a   :  { %v951_v9 = vrot.slane %v937_v8, %v1719_v55  ;;  %v732_v33 = vcombine.low %v1962_v13, %v1965_v14  ;;  %v935_v34 = vcombine.low %v927_v27, %v934_v29  ;;  %v961_v16 = vrot.slane %v953_v30, %v1719_v55  ;;  %v2124_v29 = vld [vmem:[%s2500_s0 + $0x10] sm:$0xff] }
  0x2b   :  { %v968_v35 = vrot.slane %v954_v2, %v1719_v55  ;;  %v733_v36 = vcombine.low %v1968_v62, %v1971_v59  ;;  %v978_v17 = vrot.slane %v970_v11, %v1719_v55  ;;  %v985_v48 = vrot.slane %v971_v32, %v1719_v55 }
  0x2c   :  { %v952_v37 = vcombine.low %v944_v31, %v951_v9  ;;  %v749_v38 = vcombine.low %v1974_v63, %v1977_v43  ;;  %v750_v39 = vcombine.low %v1980_v44, %v1983_v45  ;;  %v766_v13 = vcombine.low %v1986_v46, %v1989_v47 }
  0x2d   :  { %v969_v14 = vcombine.low %v961_v16, %v968_v35  ;;  %v723_v41 = vrot.slane %v715_v49, %v1719_v55  ;;  %v730_v42 = vrot.slane %v716_v1, %v1719_v55  ;;  %v767_v62 = vcombine.low %v1992_v19, %v1995_v50  ;;  %v2536_v49 = vld [vmem:[#allocation6_spill] sm:$0xff]  ;;  %v2546_v35 = vld [vmem:[#allocation8_spill] sm:$0xff] }
  0x2e   :  { %v986_v59 = vcombine.low %v978_v17, %v985_v48  ;;  %v2532_v0 = vunpack.c.l.bf16 %v1655_v54  ;;  %v2533_v63 = vunpack.c.h.bf16 %v1655_v54  ;;  %v2534_v44 = vunpack.c.l.bf16 %v1663_v56 }
  0x2f   :  { %v2535_v46 = vunpack.c.h.bf16 %v1663_v56  ;;  %v2537_v52 = vunpack.c.l.bf16 %v2536_v49  ;;  %v2538_v19 = vunpack.c.h.bf16 %v2536_v49  ;;  %v2540_v53 = vunpack.c.l.bf16 %v2539_v5  ;;  %v2542_v56 = vld [vmem:[#allocation9_spill] sm:$0xff] }
  0x30   :  { %v1011_v60 = vmul.f32 %v867_v21, %v2532_v0  ;;  %v1012_v43 = vmul.f32 %v884_v23, %v2533_v63  ;;  %v1013_v45 = vmul.f32 %v901_v26, %v2534_v44  ;;  %v2541_v54 = vunpack.c.h.bf16 %v2539_v5  ;;  %v2545_v26 = vld [vmem:[#allocation10_spill] sm:$0xff] }
  0x31   :  { %v2083_v47 = vmul.f32 %v918_v10, %v2535_v46  ;;  %v2087_v1 = vmul.f32 %v935_v34, %v2537_v52  ;;  %v2091_v50 = vmul.f32 %v952_v37, %v2538_v19  ;;  %v2095_v58 = vmul.f32 %v969_v14, %v2540_v53  ;;  %v2551_v19 = vld [vmem:[#allocation5_spill] sm:$0xff] }
  0x32   :  { %v2099_v61 = vmul.f32 %v986_v59, %v2541_v54  ;;  %v158_v3 = vrot.slane %v2542_v56, %v1559_v12  ;;  %v162_v21 = vrot.slane %v2542_v56, %v2543_v20  ;;  %v740_v57 = vrot.slane %v732_v33, %v1719_v55 }
  0x33   :  { %v747_v22 = vrot.slane %v733_v36, %v1719_v55  ;;  %v166_v23 = vrot.slane %v2542_v56, %v2544_v6  ;;  %v170_v24 = vrot.slane %v2542_v56, %v1568_v15  ;;  %v783_v25 = vcombine.low %v1998_v51, %v2003_v4 }
  0x34   :  { %v784_v7 = vcombine.low %v2006_v40, %v2009_v18  ;;  %v174_v27 = vrot.slane %v2545_v26, %v1559_v12  ;;  %v178_v28 = vrot.slane %v2545_v26, %v2543_v20  ;;  %v757_v8 = vrot.slane %v749_v38, %v1719_v55 }
  0x35   :  { %v764_v10 = vrot.slane %v750_v39, %v1719_v55  ;;  %v182_v51 = vrot.slane %v2545_v26, %v2544_v6  ;;  %v731_v4 = vcombine.low %v723_v41, %v730_v42  ;;  %v774_v40 = vrot.slane %v766_v13, %v1719_v55  ;;  %v2547_v13 = vld [vmem:[#allocation4_spill] sm:$0xff] }
  0x36   :  { %v781_v18 = vrot.slane %v767_v62, %v1719_v55  ;;  %v186_v30 = vrot.slane %v2545_v26, %v1568_v15  ;;  %v478_v2 = vrot.slane %v158_v3, %v1559_v12  ;;  %v482_v31 = vrot.slane %v162_v21, %v1559_v12 }
  0x37   :  { %v748_v9 = vcombine.low %v740_v57, %v747_v22  ;;  %v486_v11 = vrot.slane %v166_v23, %v1559_v12  ;;  %v490_v32 = vrot.slane %v170_v24, %v1559_v12  ;;  %v791_v33 = vrot.slane %v783_v25, %v1719_v55 }
  0x38   :  { %v798_v34 = vrot.slane %v784_v7, %v1719_v55  ;;  %v23_v16 = vunpack.c.l.bf16 %v2124_v29  ;;  %v2140_v36 = vunpack.c.h.bf16 %v2546_v35  ;;  %v2143_v37 = vrot.slane %v174_v27, %v1559_v12 }
  0x39   :  { %v765_v17 = vcombine.low %v757_v8, %v764_v10  ;;  %v2146_v48 = vrot.slane %v178_v28, %v1559_v12  ;;  %v2149_v38 = vrot.slane %v182_v51, %v1559_v12  ;;  %v782_v39 = vcombine.low %v774_v40, %v781_v18 }
  0x3a   :  { %v2548_v14 = vunpack.c.l.bf16 %v2547_v13  ;;  %v2154_v42 = vrot.slane %v186_v30, %v1559_v12  ;;  %v800_v62 = vcombine.low %v478_v2, %v482_v31  ;;  %v2549_v59 = vunpack.c.h.bf16 %v2547_v13 }
  0x3b   :  { %v1171_v63 = vcombine.high %v1011_v60, %v1011_v60  ;;  %v799_v44 = vcombine.low %v791_v33, %v798_v34  ;;  %v801_v46 = vcombine.low %v486_v11, %v490_v32  ;;  %v2159_v52 = vrot.slane %v1011_v60, %v1719_v55 }
  0x3c   :  { %v1003_v41 = vmul.f32 %v731_v4, %v2548_v14  ;;  %v1004_v0 = vmul.f32 %v748_v9, %v2549_v59  ;;  %v2552_v5 = vunpack.c.l.bf16 %v2551_v19  ;;  %v1188_v56 = vcombine.high %v1012_v43, %v1012_v43 }
  0x3d   :  { %2550 = vst [vmem:[#allocation6_spill] sm:$0xff] %v2159_v52  ;;  %v2164_v54 = vrot.slane %v1171_v63, %v1719_v55  ;;  %v2167_v3 = vrot.slane %v1012_v43, %v1719_v55  ;;  %v2553_v21 = vunpack.c.h.bf16 %v2551_v19  ;;  %v1205_v23 = vcombine.high %v1013_v45, %v1013_v45 }
  0x3e   :  { %v1035_v49 = vcombine.high %v1003_v41, %v1003_v41  ;;  %v1005_v53 = vmul.f32 %v765_v17, %v2552_v5  ;;  %v1042_v22 = vrot.slane %v1003_v41, %v1719_v55  ;;  %v2173_v24 = vrot.slane %v1013_v45, %v1719_v55 }
  0x3f   :  { %v1006_v57 = vmul.f32 %v782_v39, %v2553_v21  ;;  %v1052_v60 = vcombine.high %v1004_v0, %v1004_v0  ;;  %v1059_v25 = vrot.slane %v1004_v0, %v1719_v55  ;;  %v2177_v7 = vrot.slane %v1188_v56, %v1719_v55 }
  0x40   :  { %v1222_v26 = vcombine.high %v2083_v47, %v2083_v47  ;;  %v1049_v43 = vrot.slane %v1035_v49, %v1719_v55  ;;  %v2183_v27 = vrot.slane %v1205_v23, %v1719_v55  ;;  %v2187_v28 = vrot.slane %v2083_v47, %v1719_v55 }
  0x41   :  { %v1239_v45 = vcombine.high %v2087_v1, %v2087_v1  ;;  %v1069_v8 = vcombine.high %v1005_v53, %v1005_v53  ;;  %v2196_v51 = vrot.slane %v2087_v1, %v1719_v55  ;;  %v1256_v4 = vcombine.high %v2091_v50, %v2091_v50 }
  0x42   :  { %v2192_v10 = vrot.slane %v1222_v26, %v1719_v55  ;;  %v1050_v40 = vcombine.high %v1042_v22, %v1042_v22  ;;  %v1076_v18 = vrot.slane %v1005_v53, %v1719_v55  ;;  %v2206_v30 = vrot.slane %v2091_v50, %v1719_v55 }
  0x43   :  { %v2202_v47 = vrot.slane %v1239_v45, %v1719_v55  ;;  %v1086_v2 = vcombine.high %v1006_v57, %v1006_v57  ;;  %v2209_v31 = vrot.slane %v1006_v57, %v1719_v55  ;;  %v2212_v1 = vrot.slane %v1256_v4, %v1719_v55 }
  0x44   :  { %v1273_v9 = vcombine.high %v2095_v58, %v2095_v58  ;;  %v1051_v11 = vcombine.high %v1049_v43, %v1049_v43  ;;  %v1066_v32 = vrot.slane %v1052_v60, %v1719_v55  ;;  %v2219_v33 = vrot.slane %v2095_v58, %v1719_v55 }
  0x45   :  { %v1290_v50 = vcombine.high %v2099_v61, %v2099_v61  ;;  %v1083_v34 = vrot.slane %v1069_v8, %v1719_v55  ;;  %v2229_v17 = vrot.slane %v2099_v61, %v1719_v55  ;;  %v1372_v39 = vsel %vm1371_vm0, %v1042_v22, 0.0 }
  0x46   :  { %v2225_v35 = vrot.slane %v1273_v9, %v1719_v55  ;;  %v2233_v13 = vrot.slane %v800_v62, %v1719_v55  ;;  %v1373_v14 = vsel %vm1371_vm0, %v1050_v40, 0.0  ;;  %v1375_v41 = vsel %vm1371_vm0, %v1049_v43, 0.0 }
  0x47   :  { %v2236_v58 = vrot.slane %v1290_v50, %v1719_v55  ;;  %v2241_v59 = vrot.slane %v801_v46, %v1719_v55  ;;  %v2243_v0 = vmul.f32 %v799_v44, %v23_v16  ;;  %v1067_v63 = vcombine.high %v1059_v25, %v1059_v25 }
  0x48   :  { %v1374_v61 = vadd.f32 %v1373_v14, %v1372_v39  ;;  %v1084_v49 = vcombine.high %v1076_v18, %v1076_v18  ;;  %v2246_v19 = vrot.slane %v1086_v2, %v1719_v55  ;;  %v1377_v5 = vsel %vm1371_vm0, %v1051_v11, 0.0 }
  0x49   :  { %v1068_v53 = vcombine.high %v1066_v32, %v1066_v32  ;;  %v1085_v56 = vcombine.high %v1083_v34, %v1083_v34  ;;  %v1186_v21 = vcombine.high %v2159_v52, %v2159_v52  ;;  %v1187_v16 = vcombine.high %v2164_v54, %v2164_v54 }
  0x4a   :  { %v1376_v46 = vadd.f32 %v1375_v41, %v1374_v61  ;;  %v1203_v44 = vcombine.high %v2167_v3, %v2167_v3  ;;  %v1220_v57 = vcombine.high %v2173_v24, %v2173_v24  ;;  %v1379_v22 = vsel %vm1371_vm0, %v1059_v25, 0.0 }
  0x4b   :  { %v1204_v23 = vcombine.high %v2177_v7, %v2177_v7  ;;  %v1221_v60 = vcombine.high %v2183_v27, %v2183_v27  ;;  %v1237_v26 = vcombine.high %v2187_v28, %v2187_v28  ;;  %v1238_v45 = vcombine.high %v2192_v10, %v2192_v10 }
  0x4c   :  { %v1378_v43 = vadd.f32 %v1377_v5, %v1376_v46  ;;  %v1254_v8 = vcombine.high %v2196_v51, %v2196_v51  ;;  %v1255_v4 = vcombine.high %v2202_v47, %v2202_v47  ;;  %v1381_v25 = vsel %vm1371_vm0, %v1067_v63, 0.0 }
  0x4d   :  { %v1271_v40 = vcombine.high %v2206_v30, %v2206_v30  ;;  %v1272_v2 = vcombine.high %v2212_v1, %v2212_v1  ;;  %v1288_v9 = vcombine.high %v2219_v33, %v2219_v33  ;;  %v1289_v50 = vcombine.high %v2225_v35, %v2225_v35 }
  0x4e   :  { %v1380_v11 = vadd.f32 %v1379_v22, %v1378_v43  ;;  %v1305_v39 = vcombine.high %v2229_v17, %v2229_v17  ;;  %v1306_v14 = vcombine.high %v2236_v58, %v2236_v58  ;;  %v1383_v41 = vsel %vm1371_vm0, %v1066_v32, 0.0 }
  0x4f   :  { %v1385_v61 = vsel %vm1371_vm0, %v1068_v53, 0.0  ;;  %v1387_v5 = vsel %vm1371_vm0, %v1076_v18, 0.0  ;;  %v1389_v46 = vsel %vm1371_vm0, %v1084_v49, 0.0  ;;  %v1391_v22 = vsel %vm1371_vm0, %v1083_v34, 0.0 }
  0x50   :  { %v1382_v63 = vadd.f32 %v1381_v25, %v1380_v11  ;;  %v1393_v43 = vsel %vm1371_vm0, %v1085_v56, 0.0  ;;  %v2292_v62 = vsel %vm1371_vm0, %v1186_v21, 0.0  ;;  %v2296_v52 = vsel %vm1371_vm0, %v2164_v54, 0.0 }
  0x51   :  { %v2299_v32 = vsel %vm1371_vm0, %v1187_v16, 0.0  ;;  %v2303_v18 = vsel %vm1371_vm0, %v2167_v3, 0.0  ;;  %v2306_v49 = vsel %vm1371_vm0, %v1203_v44, 0.0  ;;  %v2310_v34 = vsel %vm1371_vm0, %v2177_v7, 0.0 }
  0x52   :  { %v1384_v55 = vadd.f32 %v1383_v41, %v1382_v63  ;;  %v2313_v53 = vsel %vm1371_vm0, %v1204_v23, 0.0  ;;  %v2317_v54 = vsel %vm1371_vm0, %v2173_v24, 0.0  ;;  %v2320_v56 = vsel %vm1371_vm0, %v1220_v57, 0.0 }
  0x53   :  { %v2324_v3 = vsel %vm1371_vm0, %v2183_v27, 0.0  ;;  %v2327_v16 = vsel %vm1371_vm0, %v1221_v60, 0.0  ;;  %v2331_v7 = vsel %vm1371_vm0, %v2187_v28, 0.0  ;;  %v2334_v44 = vsel %vm1371_vm0, %v1237_v26, 0.0 }
  0x54   :  { %v1386_v21 = vadd.f32 %v1385_v61, %v1384_v55  ;;  %v2338_v24 = vsel %vm1371_vm0, %v2192_v10, 0.0  ;;  %v2341_v55 = vsel %vm1371_vm0, %v1238_v45, 0.0  ;;  %v2345_v27 = vsel %vm1371_vm0, %v2196_v51, 0.0 }
  0x55   :  { %v2348_v23 = vsel %vm1371_vm0, %v1254_v8, 0.0  ;;  %v2352_v28 = vsel %vm1371_vm0, %v2202_v47, 0.0  ;;  %v2355_v60 = vsel %vm1371_vm0, %v1255_v4, 0.0  ;;  %v2359_v10 = vsel %vm1371_vm0, %v2206_v30, 0.0 }
  0x56   :  { %v1388_v57 = vadd.f32 %v1387_v5, %v1386_v21  ;;  %v2362_v26 = vsel %vm1371_vm0, %v1271_v40, 0.0  ;;  %v2366_v51 = vsel %vm1371_vm0, %v2212_v1, 0.0  ;;  %v2369_v45 = vsel %vm1371_vm0, %v1272_v2, 0.0  ;;  %v14_v5 = vld [vmem:[%s2500_s0 + $0x18] sm:$0xff] }
  0x57   :  { %v2373_v47 = vsel %vm1371_vm0, %v2219_v33, 0.0  ;;  %v2376_v4 = vsel %vm1371_vm0, %v1288_v9, 0.0  ;;  %v2380_v30 = vsel %vm1371_vm0, %v2225_v35, 0.0  ;;  %v2383_v25 = vsel %vm1371_vm0, %v1289_v50, 0.0 }
  0x58   :  { %v1390_v8 = vadd.f32 %v1389_v46, %v1388_v57  ;;  %v2387_v1 = vsel %vm1371_vm0, %v2229_v17, 0.0  ;;  %v2390_v40 = vsel %vm1371_vm0, %v1305_v39, 0.0  ;;  %v2394_v33 = vsel %vm1371_vm0, %v2236_v58, 0.0 }
  0x59   :  { %v24_v2 = vunpack.c.h.bf16 %v2124_v29  ;;  %v190_v35 = vrot.slane %v2140_v36, %v1559_v12  ;;  %v2400_v11 = vsel %vm1371_vm0, %v1306_v14, 0.0  ;;  %v194_v17 = vrot.slane %v2140_v36, %v2543_v20 }
  0x5a   :  { %v1392_v9 = vadd.f32 %v1391_v22, %v1390_v8  ;;  %v198_v50 = vrot.slane %v2140_v36, %v2544_v6  ;;  %v202_v39 = vrot.slane %v2140_v36, %v1568_v15  ;;  %v1395_v58 = vsel %vm1371_vm0, %v2209_v31, 0.0  ;;  %v2554_v15 = vld [vmem:[#allocation11_spill] sm:$0xff] }
  0x5b   :  { %v816_v29 = vcombine.low %v2233_v13, %v2241_v59  ;;  %v817_v41 = vcombine.low %v2143_v37, %v2146_v48  ;;  %v818_v14 = vcombine.low %v2149_v38, %v2154_v42  ;;  %v1102_v20 = vcombine.high %v2246_v19, %v2246_v19 }
  0x5c   :  { %v1394_v63 = vadd.f32 %v1393_v43, %v1392_v9  ;;  %v1103_v6 = vcombine.high %v2243_v0, %v2243_v0  ;;  %v1110_v36 = vrot.slane %v2243_v0, %v2554_v15  ;;  %v2555_v61 = vcombine.high %v2209_v31, %v2209_v31 }
  0x5d   :  { %v510_v37 = vrot.slane %v190_v35, %v1559_v12  ;;  %v514_v48 = vrot.slane %v194_v17, %v1559_v12  ;;  %v518_v38 = vrot.slane %v198_v50, %v1559_v12  ;;  %v1399_v42 = vsel %vm1371_vm0, %v2246_v19, 0.0 }
  0x5e   :  { %v1397_v13 = vsel %vm1371_vm0, %v2555_v61, 0.0  ;;  %v1396_v59 = vadd.f32 %v1395_v58, %v1394_v63  ;;  %v522_v0 = vrot.slane %v202_v39, %v1559_v12  ;;  %v825_v31 = vrot.slane %v817_v41, %v2554_v15 }
  0x5f   :  { %v832_v46 = vrot.slane %v818_v14, %v2554_v15  ;;  %v1008_v43 = vmul.f32 %v816_v29, %v24_v2  ;;  %v1117_v21 = vrot.slane %v1103_v6, %v2554_v15  ;;  %v1118_v57 = vcombine.high %v1110_v36, %v1110_v36 }
  0x60   :  { %v1398_v22 = vadd.f32 %v1397_v13, %v1396_v59  ;;  %v1401_v8 = vsel %vm1371_vm0, %v1102_v20, 0.0  ;;  %v25_v9 = vunpack.c.l.bf16 %v14_v5  ;;  %v1403_v19 = vsel %vm1371_vm0, %v1110_v36, 0.0 }
  0x61   :  { %v833_v17 = vcombine.low %v825_v31, %v832_v46  ;;  %v834_v50 = vcombine.low %v510_v37, %v514_v48  ;;  %v835_v58 = vcombine.low %v518_v38, %v522_v0  ;;  %v1119_v12 = vcombine.high %v1117_v21, %v1117_v21 }
  0x62   :  { %v1400_v35 = vadd.f32 %v1399_v42, %v1398_v22  ;;  %v1120_v39 = vcombine.high %v1008_v43, %v1008_v43  ;;  %v1127_v41 = vrot.slane %v1008_v43, %v2554_v15  ;;  %v1405_v14 = vsel %vm1371_vm0, %v1118_v57, 0.0 }
  0x63   :  { %v1407_v29 = vsel %vm1371_vm0, %v1117_v21, 0.0  ;;  %v842_v6 = vrot.slane %v834_v50, %v2554_v15  ;;  %v849_v20 = vrot.slane %v835_v58, %v2554_v15  ;;  %v1009_v13 = vmul.f32 %v833_v17, %v25_v9 }
  0x64   :  { %v1402_v63 = vadd.f32 %v1401_v8, %v1400_v35  ;;  %v1134_v36 = vrot.slane %v1120_v39, %v2554_v15  ;;  %v1135_v59 = vcombine.high %v1127_v41, %v1127_v41  ;;  %v1409_v37 = vsel %vm1371_vm0, %v1119_v12, 0.0 }
  0x65   :  { %v1411_v38 = vsel %vm1371_vm0, %v1127_v41, 0.0  ;;  %v26_v42 = vunpack.c.h.bf16 %v14_v5  ;;  %v850_v0 = vcombine.low %v842_v6, %v849_v20  ;;  %v1137_v22 = vcombine.high %v1009_v13, %v1009_v13 }
  0x66   :  { %v1404_v2 = vadd.f32 %v1403_v19, %v1402_v63  ;;  %v1136_v46 = vcombine.high %v1134_v36, %v1134_v36  ;;  %v1144_v43 = vrot.slane %v1009_v13, %v2554_v15  ;;  %v1413_v21 = vsel %vm1371_vm0, %v1135_v59, 0.0 }
  0x67   :  { %v1415_v8 = vsel %vm1371_vm0, %v1134_v36, 0.0  ;;  %v1010_v9 = vmul.f32 %v850_v0, %v26_v42  ;;  %v1151_v19 = vrot.slane %v1137_v22, %v2554_v15 }
  0x68   :  { %v1406_v61 = vadd.f32 %v1405_v14, %v1404_v2  ;;  %v1152_v17 = vcombine.high %v1144_v43, %v1144_v43  ;;  %v1417_v50 = vsel %vm1371_vm0, %v1136_v46, 0.0  ;;  %v1419_v5 = vsel %vm1371_vm0, %v1144_v43, 0.0  ;;  %v2556_v43 = vld [vmem:[#allocation6_spill] sm:$0xff] }
  0x69   :  { %v1153_v12 = vcombine.high %v1151_v19, %v1151_v19  ;;  %v1154_v39 = vcombine.high %v1010_v9, %v1010_v9  ;;  %v1161_v41 = vrot.slane %v1010_v9, %v2554_v15 }
  0x6a   :  { %v1408_v48 = vadd.f32 %v1407_v29, %v1406_v61  ;;  %v1421_v14 = vsel %vm1371_vm0, %v1152_v17, 0.0  ;;  %v1423_v29 = vsel %vm1371_vm0, %v1151_v19, 0.0 }
  0x6b   :  { %v1168_v20 = vrot.slane %v1154_v39, %v2554_v15  ;;  %v1169_v61 = vcombine.high %v1161_v41, %v1161_v41  ;;  %v1425_v13 = vsel %vm1371_vm0, %v1153_v12, 0.0  ;;  %v1427_v59 = vsel %vm1371_vm0, %v1161_v41, 0.0 }
  0x6c   :  { %v1410_v31 = vadd.f32 %v1409_v37, %v1408_v48  ;;  %v1435_v15 = vsel %vm1371_vm0, %v2556_v43, 0.0 }
  0x6d   :  { %v1170_v48 = vcombine.high %v1168_v20, %v1168_v20  ;;  %v1431_v0 = vsel %vm1371_vm0, %v1168_v20, 0.0 }
  0x6e   :  { %v1412_v57 = vadd.f32 %v1411_v38, %v1410_v31  ;;  %v1429_v38 = vsel %vm1371_vm0, %v1169_v61, 0.0 }
  0x6f   :  { %v1433_v46 = vsel %vm1371_vm0, %v1170_v48, 0.0 }
  0x70   :  { %v1414_v35 = vadd.f32 %v1413_v21, %v1412_v57 }
  0x72   :  { %v1416_v58 = vadd.f32 %v1415_v8, %v1414_v35 }
  0x74   :  { %v1418_v63 = vadd.f32 %v1417_v50, %v1416_v58 }
  0x76   :  { %v1420_v2 = vadd.f32 %v1419_v5, %v1418_v63 }
  0x78   :  { %v1422_v6 = vadd.f32 %v1421_v14, %v1420_v2 }
  0x7a   :  { %v1424_v36 = vadd.f32 %v1423_v29, %v1422_v6 }
  0x7c   :  { %v1426_v37 = vadd.f32 %v1425_v13, %v1424_v36 }
  0x7e   :  { %v1428_v42 = vadd.f32 %v1427_v59, %v1426_v37 }
  0x80   :  { %v1430_v31 = vadd.f32 %v1429_v38, %v1428_v42 }
  0x82   :  { %v1432_v22 = vadd.f32 %v1431_v0, %v1430_v31 }
  0x84   :  { %v1434_v21 = vadd.f32 %v1433_v46, %v1432_v22 }
  0x86   :  { %v1436_v57 = vadd.f32 %v1435_v15, %v1434_v21 }
  0x88   :  { %v1438_v8 = vadd.f32 %v2292_v62, %v1436_v57 }
  0x8a   :  { %v1440_v35 = vadd.f32 %v2296_v52, %v1438_v8 }
  0x8c   :  { %v1442_v9 = vadd.f32 %v2299_v32, %v1440_v35 }
  0x8e   :  { %v1444_v19 = vadd.f32 %v2303_v18, %v1442_v9 }
  0x90   :  { %v1446_v17 = vadd.f32 %v2306_v49, %v1444_v19 }
  0x92   :  { %v1448_v50 = vadd.f32 %v2310_v34, %v1446_v17 }
  0x94   :  { %v1450_v58 = vadd.f32 %v2313_v53, %v1448_v50 }
  0x96   :  { %v1452_v5 = vadd.f32 %v2317_v54, %v1450_v58 }
  0x98   :  { %v1454_v63 = vadd.f32 %v2320_v56, %v1452_v5 }
  0x9a   :  { %v1456_v12 = vadd.f32 %v2324_v3, %v1454_v63 }
  0x9c   :  { %v1458_v62 = vadd.f32 %v2327_v16, %v1456_v12 }
  0x9e   :  { %v1460_v52 = vadd.f32 %v2331_v7, %v1458_v62 }
  0xa0   :  { %v1462_v32 = vadd.f32 %v2334_v44, %v1460_v52 }
  0xa2   :  { %v1464_v18 = vadd.f32 %v2338_v24, %v1462_v32 }
  0xa4   :  { %v1466_v49 = vadd.f32 %v2341_v55, %v1464_v18 }
  0xa6   :  { %v1468_v34 = vadd.f32 %v2345_v27, %v1466_v49 }
  0xa8   :  { %v1470_v53 = vadd.f32 %v2348_v23, %v1468_v34 }
  0xaa   :  { %v1472_v54 = vadd.f32 %v2352_v28, %v1470_v53 }
  0xac   :  { %v1474_v56 = vadd.f32 %v2355_v60, %v1472_v54 }
  0xae   :  { %v1476_v3 = vadd.f32 %v2359_v10, %v1474_v56 }
  0xb0   :  { %v1478_v16 = vadd.f32 %v2362_v26, %v1476_v3 }
  0xb2   :  { %v1480_v7 = vadd.f32 %v2366_v51, %v1478_v16 }
  0xb4   :  { %v1482_v44 = vadd.f32 %v2369_v45, %v1480_v7 }
  0xb6   :  { %v1484_v24 = vadd.f32 %v2373_v47, %v1482_v44 }
  0xb8   :  { %v1486_v55 = vadd.f32 %v2376_v4, %v1484_v24 }
  0xba   :  { %v1488_v27 = vadd.f32 %v2380_v30, %v1486_v55 }
  0xbc   :  { %v1490_v23 = vadd.f32 %v2383_v25, %v1488_v27 }
  0xbe   :  { %v1492_v28 = vadd.f32 %v2387_v1, %v1490_v23 }
  0xc0   :  { %v1494_v60 = vadd.f32 %v2390_v40, %v1492_v28 }
  0xc2   :  { %v1496_v10 = vadd.f32 %v2394_v33, %v1494_v60 }
  0xc4   :  { %v1498_v26 = vadd.f32 %v2400_v11, %v1496_v10 }
  0xc6   :  { %1499 = vadd.xlane.f32.xlu0 %v1498_v26 }
 0x153   :  { %v1500_v51 = vpop.xlane.xlu0 %1499 }
 0x154   :  { %v1501_v39 = vsub.f32 0.0, %v1500_v51 }
 0x156   :  { %v1502_v45 = vmul.f32 1.442695, %v1501_v39 }
 0x158   :  { %1514 = vpow2.f32 %v1502_v45 }
 0x162   :  { %v1515_v47 = vpop.eup %1514 }
 0x163   :  { %v1504_v41 = vadd.f32 1.0, %v1515_v47 }
 0x165   :  { %1516 = vrcp.f32 %v1504_v41 }
 0x16f   :  { %v1517_v4 = vpop.eup %1516 }
 0x170   :  { %1508 = vst.msk [vmem:[%s2501_s2] sm:$0x3] %vm1507_vm1, %v1517_v4 }

// kernel: discriminator_forward.13
= control target key start
LH: loop header
LB: loop body
LE: loop exit
PB: predicated region body
PF: predicated region fallthrough
CT: control target
= control target key end

     0   :  { %s10891_s12 = smov 0   ;;  %s14173_s0 = inlined_call_operand.vmem [shape: bf16[32,4096], index: 0, kind: input, shape index: {}]   ;;  %s14174_s1 = inlined_call_operand.vmem [shape: bf16[4096,512], index: 1, kind: input, shape index: {}]   ;;  %s14175_s2 = inlined_call_operand.vmem [shape: bf16[32,512], index: 2, kind: output, shape index: {0}]   ;;  %s14176_s3 = inlined_call_operand.vmem [shape: f32[2,2,512], index: 3, kind: output, shape index: {1}]  }
   0x1 LB: > { %s10897_s13 = sadd.s32 4294967295, %s10868_s12   ;;  %p8119_p0 = scmp.ge.s32.totalorder %s10868_s12, 1  ;;  %s10868_s12 = sphi %s10891_s12, %s14_s12  }
   0x2   : > { %p142_p1 = scmp.lt.s32.totalorder %s10868_s12, 3 }
   0x4   : > { %p143_p2 = pnand %p8119_p0, %p142_p1 }
   0x5   : > { %v9326_v0 = vld [vmem:[%s14174_s1 + $0x4] ss:$16 sps:$4 sm:$0xff] (!%p143_p2)   ;;  %v9328_v1 = vld [vmem:[%s14174_s1 + $0xc] ss:$16 sps:$4 sm:$0xff] (!%p143_p2)   ;;  %v9330_v2 = vld [vmem:[%s14174_s1] ss:$16 sps:$4 sm:$0xff] (!%p143_p2)  }
   0x6   : > { %146 = sbr.rel (%p143_p2) target bundleno = 1271 (0x4f7), region = 28  ;;  %6528 = vmatprep.subr.bf16.mxu0 (!%p143_p2), %v9326_v0  ;;  %v9331_v3 = vld [vmem:[%s14174_s1 + $0x8] ss:$16 sps:$4 sm:$0xff] (!%p143_p2)   ;;  %7216 = vmatprep.subr.bf16.mxu1 (!%p143_p2), %v9328_v1  ;;  %v9332_v4 = vld [vmem:[%s14174_s1 + $0x24] ss:$16 sps:$4 sm:$0xff] (!%p143_p2)   ;;  %s8120_s24 = sshll.u32 (!%p143_p2), %s10897_s13, 1 }
   0x7   : > { %6529 = vmatpush1.bf16.msra.mxu0 (!%p143_p2), %v9330_v2  ;;  %7217 = vmatpush1.bf16.msra.mxu1 (!%p143_p2), %v9331_v3  ;;  %v9334_v5 = vld [vmem:[%s14174_s1 + $0x2c] ss:$16 sps:$4 sm:$0xff] (!%p143_p2)   ;;  %v9336_v6 = vld [vmem:[%s14174_s1 + $0x20] ss:$16 sps:$4 sm:$0xff] (!%p143_p2)   ;;  %v9337_v7 = vld [vmem:[%s14174_s1 + $0x28] ss:$16 sps:$4 sm:$0xff] (!%p143_p2)  }
   0x8   : > { %6530 = vmatprep.subr.bf16.mxu0 (!%p143_p2), %v9332_v4  ;;  %7218 = vmatprep.subr.bf16.mxu1 (!%p143_p2), %v9334_v5  ;;  %v9338_v8 = vld [vmem:[%s14174_s1 + $0x44] ss:$16 sps:$4 sm:$0xff] (!%p143_p2)   ;;  %v9340_v9 = vld [vmem:[%s14174_s1 + $0x4c] ss:$16 sps:$4 sm:$0xff] (!%p143_p2)   ;;  %v9342_v10 = vld [vmem:[%s14174_s1 + $0x40] ss:$16 sps:$4 sm:$0xff] (!%p143_p2)  }
   0x9   : > { %v9343_v11 = vld [vmem:[%s14174_s1 + $0x48] ss:$16 sps:$4 sm:$0xff] (!%p143_p2)   ;;  %v9344_v12 = vld [vmem:[%s14174_s1 + $0x64] ss:$16 sps:$4 sm:$0xff] (!%p143_p2)   ;;  %v9346_v13 = vld [vmem:[%s14174_s1 + $0x6c] ss:$16 sps:$4 sm:$0xff] (!%p143_p2)  }
   0xa   : > { %v9348_v14 = vld [vmem:[%s14174_s1 + $0x60] ss:$16 sps:$4 sm:$0xff] (!%p143_p2)   ;;  %v9349_v15 = vld [vmem:[%s14174_s1 + $0x68] ss:$16 sps:$4 sm:$0xff] (!%p143_p2)   ;;  %v9350_v16 = vld [vmem:[%s14174_s1 + $0x84] ss:$16 sps:$4 sm:$0xff] (!%p143_p2)  }
   0xb   : > { %6531 = vmatpush1.bf16.msra.mxu0 (!%p143_p2), %v9336_v6  ;;  %7219 = vmatpush1.bf16.msra.mxu1 (!%p143_p2), %v9337_v7  ;;  %v9352_v17 = vld [vmem:[%s14174_s1 + $0x8c] ss:$16 sps:$4 sm:$0xff] (!%p143_p2)   ;;  %v9354_v18 = vld [vmem:[%s14174_s1 + $0x80] ss:$16 sps:$4 sm:$0xff] (!%p143_p2)   ;;  %v9355_v19 = vld [vmem:[%s14174_s1 + $0x88] ss:$16 sps:$4 sm:$0xff] (!%p143_p2)  }
   0xc   : > { %6532 = vmatprep.subr.bf16.mxu0 (!%p143_p2), %v9338_v8  ;;  %7220 = vmatprep.subr.bf16.mxu1 (!%p143_p2), %v9340_v9  ;;  %v9356_v20 = vld [vmem:[%s14174_s1 + $0xa4] ss:$16 sps:$4 sm:$0xff] (!%p143_p2)   ;;  %v9358_v21 = vld [vmem:[%s14174_s1 + $0xac] ss:$16 sps:$4 sm:$0xff] (!%p143_p2)   ;;  %v9360_v22 = vld [vmem:[%s14174_s1 + $0xa0] ss:$16 sps:$4 sm:$0xff] (!%p143_p2)  }
   0xd   : > { %v9361_v23 = vld [vmem:[%s14174_s1 + $0xa8] ss:$16 sps:$4 sm:$0xff]   ;;  %v9362_v24 = vld [vmem:[%s14174_s1 + $0xc4] ss:$16 sps:$4 sm:$0xff]   ;;  %v9364_v25 = vld [vmem:[%s14174_s1 + $0xcc] ss:$16 sps:$4 sm:$0xff]  }
   0xe   : > { %v9366_v26 = vld [vmem:[%s14174_s1 + $0xc0] ss:$16 sps:$4 sm:$0xff]   ;;  %v9367_v27 = vld [vmem:[%s14174_s1 + $0xc8] ss:$16 sps:$4 sm:$0xff]   ;;  %v9368_v28 = vld [vmem:[%s14174_s1 + $0xe4] ss:$16 sps:$4 sm:$0xff]  }
   0xf   : > { %6533 = vmatpush1.bf16.msra.mxu0 %v9342_v10  ;;  %7221 = vmatpush1.bf16.msra.mxu1 %v9343_v11  ;;  %v9370_v29 = vld [vmem:[%s14174_s1 + $0xec] ss:$16 sps:$4 sm:$0xff]   ;;  %v9372_v30 = vld [vmem:[%s14174_s1 + $0xe0] ss:$16 sps:$4 sm:$0xff]   ;;  %v9373_v31 = vld [vmem:[%s14174_s1 + $0xe8] ss:$16 sps:$4 sm:$0xff]  }
  0x10   : > { %6534 = vmatprep.subr.bf16.mxu0 %v9344_v12  ;;  %7222 = vmatprep.subr.bf16.mxu1 %v9346_v13  ;;  %v9374_v32 = vld [vmem:[%s14174_s1 + $0x104] ss:$16 sps:$4 sm:$0xff]   ;;  %p174_p3 = scmp.lt.s32.totalorder %s8120_s24, 3  ;;  %v9376_v33 = vld [vmem:[%s14174_s1 + $0x10c] ss:$16 sps:$4 sm:$0xff]   ;;  %vm7968_vm0 = vcmask 1040384  }
  0x11   : > { %v9378_v34 = vld [vmem:[%s14174_s1 + $0x100] ss:$16 sps:$4 sm:$0xff]   ;;  %v9379_v35 = vld [vmem:[%s14174_s1 + $0x108] ss:$16 sps:$4 sm:$0xff]   ;;  %v9380_v36 = vld [vmem:[%s14174_s1 + $0x124] ss:$16 sps:$4 sm:$0xff]  }
  0x12   : > { %s14178_s24 = smov (!%p174_p3, %s8120_s24), 3  ;;  %v9382_v37 = vld [vmem:[%s14174_s1 + $0x12c] ss:$16 sps:$4 sm:$0xff]   ;;  %v9384_v38 = vld [vmem:[%s14174_s1 + $0x120] ss:$16 sps:$4 sm:$0xff]   ;;  %p187_p4 = scmp.lt.s32.totalorder %s10897_s13, 1 }
  0x13   : > { %6535 = vmatpush1.bf16.msra.mxu0 %v9348_v14  ;;  %7223 = vmatpush1.bf16.msra.mxu1 %v9349_v15  ;;  %v9385_v39 = vld [vmem:[%s14174_s1 + $0x128] ss:$16 sps:$4 sm:$0xff]   ;;  %v9386_v40 = vld [vmem:[%s14174_s1 + $0x144] ss:$16 sps:$4 sm:$0xff]   ;;  %s9190_s22 = sshll.u32 %s14178_s24, 7  ;;  %s9191_s6 = sshll.u32 %s14178_s24, 4 }
  0x14   : > { %6536 = vmatprep.subr.bf16.mxu0 %v9350_v16  ;;  %7224 = vmatprep.subr.bf16.mxu1 %v9352_v17  ;;  %v9388_v41 = vld [vmem:[%s14174_s1 + $0x14c] ss:$16 sps:$4 sm:$0xff]   ;;  %v9390_v42 = vld [vmem:[%s14174_s1 + $0x140] ss:$16 sps:$4 sm:$0xff]   ;;  %v9391_v43 = vld [vmem:[%s14174_s1 + $0x148] ss:$16 sps:$4 sm:$0xff]   ;;  %s11040_s5 = scalar_lea.vmem %s14173_s0, %s9190_s22  ;;  %s14138_s9 = scalar_lea.vmem %s14175_s2, %s9191_s6 }
  0x15   : > { %v9392_v44 = vld [vmem:[%s14174_s1 + $0x164] ss:$16 sps:$4 sm:$0xff]   ;;  %v9394_v45 = vld [vmem:[%s14174_s1 + $0x16c] ss:$16 sps:$4 sm:$0xff]   ;;  %v9396_v48 = vld [vmem:[%s14174_s1 + $0x160] ss:$16 sps:$4 sm:$0xff]  }
  0x16   : > { %v192_v46 = vld [vmem:[%s11040_s5] sm:$0xff]  ;;  %v9397_v49 = vld [vmem:[%s14174_s1 + $0x168] ss:$16 sps:$4 sm:$0xff]   ;;  %v9400_v52 = vld [vmem:[%s14174_s1 + $0x18c] ss:$16 sps:$4 sm:$0xff]   ;;  %s14180_s13 = smov (!%p187_p4, %s10897_s13), 1 }
  0x17   : > { %6537 = vmatpush1.bf16.msra.mxu0 %v9354_v18  ;;  %7225 = vmatpush1.bf16.msra.mxu1 %v9355_v19  ;;  %v208_v47 = vld [vmem:[%s11040_s5 + $0x80] sm:$0xff]  ;;  %v9403_v54 = vld [vmem:[%s14174_s1 + $0x188] ss:$16 sps:$4 sm:$0xff]   ;;  %v9406_v56 = vld [vmem:[%s14174_s1 + $0x1ac] ss:$16 sps:$4 sm:$0xff]   ;;  %s9192_s24 = sshll.u32 %s14180_s13, 3 }
  0x18   : > { %6538 = vmatprep.subr.bf16.mxu0 %v9356_v20  ;;  %7226 = vmatprep.subr.bf16.mxu1 %v9358_v21  ;;  %v8129_v50 = vcombine.high %v192_v46, %v208_v47  ;;  %v9398_v51 = vld [vmem:[%s14174_s1 + $0x184] ss:$16 sps:$4 sm:$0xff]   ;;  %v9402_v53 = vld [vmem:[%s14174_s1 + $0x180] ss:$16 sps:$4 sm:$0xff]   ;;  %v9409_v58 = vld [vmem:[%s14174_s1 + $0x1a8] ss:$16 sps:$4 sm:$0xff]   ;;  %v8128_v5 = vcombine.low %v192_v46, %v208_v47  ;;  %s191_s11 = scalar_lea.vmem %s14176_s3, %s9192_s24 }
  0x19   : > { %v9404_v55 = vld [vmem:[%s14174_s1 + $0x1a4] ss:$16 sps:$4 sm:$0xff]   ;;  %v9408_v57 = vld [vmem:[%s14174_s1 + $0x1a0] ss:$16 sps:$4 sm:$0xff]   ;;  %v9412_v60 = vld [vmem:[%s14174_s1 + $0x1cc] ss:$16 sps:$4 sm:$0xff]  }
  0x1a   : > { %6560 = vmatprep.mubr.bf16.mxu0 %v8129_v50  ;;  %7248 = vmatprep.mubr.bf16.mxu1 %v8129_v50  ;;  %v9410_v59 = vld [vmem:[%s14174_s1 + $0x1c4] ss:$16 sps:$4 sm:$0xff]   ;;  %v9414_v61 = vld [vmem:[%s14174_s1 + $0x1c0] ss:$16 sps:$4 sm:$0xff]   ;;  %v9415_v62 = vld [vmem:[%s14174_s1 + $0x1c8] ss:$16 sps:$4 sm:$0xff]  }
  0x1b   : > { %6539 = vmatpush1.bf16.msra.mxu0 %v9360_v22  ;;  %7227 = vmatpush1.bf16.msra.mxu1 %v9361_v23  ;;  %v9416_v63 = vld [vmem:[%s14174_s1 + $0x1e4] ss:$16 sps:$4 sm:$0xff]   ;;  %v9418_v0 = vld [vmem:[%s14174_s1 + $0x1ec] ss:$16 sps:$4 sm:$0xff]   ;;  %v9420_v1 = vld [vmem:[%s14174_s1 + $0x1e0] ss:$16 sps:$4 sm:$0xff]  }
  0x1c   : > { %6540 = vmatprep.subr.bf16.mxu0 %v9362_v24  ;;  %7228 = vmatprep.subr.bf16.mxu1 %v9364_v25  ;;  %v9421_v2 = vld [vmem:[%s14174_s1 + $0x1e8] ss:$16 sps:$4 sm:$0xff]   ;;  %v9424_v3 = vld [vmem:[%s14174_s1 + $0x204] ss:$16 sps:$4 sm:$0xff]   ;;  %v9427_v4 = vld [vmem:[%s14174_s1 + $0x20c] ss:$16 sps:$4 sm:$0xff]  }
  0x1d   : > { %v9422_v6 = vld [vmem:[%s14174_s1 + $0x200] ss:$16 sps:$4 sm:$0xff]   ;;  %v9425_v7 = vld [vmem:[%s14174_s1 + $0x208] ss:$16 sps:$4 sm:$0xff]   ;;  %v9430_v8 = vld [vmem:[%s14174_s1 + $0x224] ss:$16 sps:$4 sm:$0xff]  }
  0x1e   : > { %v9433_v9 = vld [vmem:[%s14174_s1 + $0x22c] ss:$16 sps:$4 sm:$0xff]   ;;  %v9428_v10 = vld [vmem:[%s14174_s1 + $0x220] ss:$16 sps:$4 sm:$0xff]   ;;  %v9431_v11 = vld [vmem:[%s14174_s1 + $0x228] ss:$16 sps:$4 sm:$0xff]  }
  0x1f   : > { %6541 = vmatpush1.bf16.msra.mxu0 %v9366_v26  ;;  %7229 = vmatpush1.bf16.msra.mxu1 %v9367_v27  ;;  %v9436_v12 = vld [vmem:[%s14174_s1 + $0x244] ss:$16 sps:$4 sm:$0xff]   ;;  %v9439_v13 = vld [vmem:[%s14174_s1 + $0x24c] ss:$16 sps:$4 sm:$0xff]   ;;  %v9434_v14 = vld [vmem:[%s14174_s1 + $0x240] ss:$16 sps:$4 sm:$0xff]  }
  0x20   : > { %6542 = vmatprep.subr.bf16.mxu0 %v9368_v28  ;;  %7230 = vmatprep.subr.bf16.mxu1 %v9370_v29  ;;  %v9437_v15 = vld [vmem:[%s14174_s1 + $0x248] ss:$16 sps:$4 sm:$0xff]   ;;  %v9442_v16 = vld [vmem:[%s14174_s1 + $0x264] ss:$16 sps:$4 sm:$0xff]   ;;  %v9445_v17 = vld [vmem:[%s14174_s1 + $0x26c] ss:$16 sps:$4 sm:$0xff]  }
  0x21   : > { %v9440_v18 = vld [vmem:[%s14174_s1 + $0x260] ss:$16 sps:$4 sm:$0xff]   ;;  %v9443_v19 = vld [vmem:[%s14174_s1 + $0x268] ss:$16 sps:$4 sm:$0xff]   ;;  %v9448_v20 = vld [vmem:[%s14174_s1 + $0x284] ss:$16 sps:$4 sm:$0xff]  }
  0x22   : > { %v9451_v21 = vld [vmem:[%s14174_s1 + $0x28c] ss:$16 sps:$4 sm:$0xff]   ;;  %v9446_v22 = vld [vmem:[%s14174_s1 + $0x280] ss:$16 sps:$4 sm:$0xff]   ;;  %v9449_v23 = vld [vmem:[%s14174_s1 + $0x288] ss:$16 sps:$4 sm:$0xff]  }
  0x23   : > { %6543 = vmatpush1.bf16.msra.mxu0 %v9372_v30  ;;  %7231 = vmatpush1.bf16.msra.mxu1 %v9373_v31  ;;  %v9454_v24 = vld [vmem:[%s14174_s1 + $0x2a4] ss:$16 sps:$4 sm:$0xff]   ;;  %v9457_v25 = vld [vmem:[%s14174_s1 + $0x2ac] ss:$16 sps:$4 sm:$0xff]   ;;  %v9452_v26 = vld [vmem:[%s14174_s1 + $0x2a0] ss:$16 sps:$4 sm:$0xff]  }
  0x24   : > { %6544 = vmatprep.subr.bf16.mxu0 %v9374_v32  ;;  %7232 = vmatprep.subr.bf16.mxu1 %v9376_v33  ;;  %v9455_v27 = vld [vmem:[%s14174_s1 + $0x2a8] ss:$16 sps:$4 sm:$0xff]   ;;  %v9460_v28 = vld [vmem:[%s14174_s1 + $0x2c4] ss:$16 sps:$4 sm:$0xff]   ;;  %v9463_v29 = vld [vmem:[%s14174_s1 + $0x2cc] ss:$16 sps:$4 sm:$0xff]  }
  0x25   : > { %v11183_v30 = vld [vmem:[%s11040_s5 + $0x8] sm:$0xff]  ;;  %v9458_v32 = vld [vmem:[%s14174_s1 + $0x2c0] ss:$16 sps:$4 sm:$0xff]   ;;  %v9484_v47 = vld [vmem:[%s14174_s1 + $0x344] ss:$16 sps:$4 sm:$0xff]  }
  0x26   : > { %v11186_v31 = vld [vmem:[%s11040_s5 + $0x88] sm:$0xff] }
  0x27   : > { %6545 = vmatpush1.bf16.msra.mxu0 %v9378_v34  ;;  %7233 = vmatpush1.bf16.msra.mxu1 %v9379_v35  ;;  %v9461_v33 = vld [vmem:[%s14174_s1 + $0x2c8] ss:$16 sps:$4 sm:$0xff]   ;;  %v8131_v34 = vcombine.high %v11183_v30, %v11186_v31  ;;  %v9466_v35 = vld [vmem:[%s14174_s1 + $0x2e4] ss:$16 sps:$4 sm:$0xff]  }
  0x28   : > { %6546 = vmatprep.subr.bf16.mxu0 %v9380_v36  ;;  %7234 = vmatprep.subr.bf16.mxu1 %v9382_v37  ;;  %v9469_v36 = vld [vmem:[%s14174_s1 + $0x2ec] ss:$16 sps:$4 sm:$0xff]   ;;  %v9464_v37 = vld [vmem:[%s14174_s1 + $0x2e0] ss:$16 sps:$4 sm:$0xff]   ;;  %v9479_v46 = vld [vmem:[%s14174_s1 + $0x328] ss:$16 sps:$4 sm:$0xff]  }
  0x29   : > { %v9485_v50 = vld [vmem:[%s14174_s1 + $0x348] ss:$16 sps:$4 sm:$0xff]  }
  0x2b   : > { %6547 = vmatpush1.bf16.msra.mxu0 %v9384_v38  ;;  %7235 = vmatpush1.bf16.msra.mxu1 %v9385_v39  ;;  %v9467_v38 = vld [vmem:[%s14174_s1 + $0x2e8] ss:$16 sps:$4 sm:$0xff]   ;;  %v9472_v39 = vld [vmem:[%s14174_s1 + $0x304] ss:$16 sps:$4 sm:$0xff]  }
  0x2c   : > { %6548 = vmatprep.subr.bf16.mxu0 %v9386_v40  ;;  %7236 = vmatprep.subr.bf16.mxu1 %v9388_v41  ;;  %v9475_v40 = vld [vmem:[%s14174_s1 + $0x30c] ss:$16 sps:$4 sm:$0xff]   ;;  %v9470_v41 = vld [vmem:[%s14174_s1 + $0x300] ss:$16 sps:$4 sm:$0xff]  }
  0x2f   : > { %6549 = vmatpush1.bf16.msra.mxu0 %v9390_v42  ;;  %7237 = vmatpush1.bf16.msra.mxu1 %v9391_v43  ;;  %v9473_v42 = vld [vmem:[%s14174_s1 + $0x308] ss:$16 sps:$4 sm:$0xff]   ;;  %v9478_v43 = vld [vmem:[%s14174_s1 + $0x324] ss:$16 sps:$4 sm:$0xff]  }
  0x30   : > { %6550 = vmatprep.subr.bf16.mxu0 %v9392_v44  ;;  %7238 = vmatprep.subr.bf16.mxu1 %v9394_v45  ;;  %v9481_v44 = vld [vmem:[%s14174_s1 + $0x32c] ss:$16 sps:$4 sm:$0xff]   ;;  %v9476_v45 = vld [vmem:[%s14174_s1 + $0x320] ss:$16 sps:$4 sm:$0xff]  }
  0x33   : > { %6551 = vmatpush1.bf16.msra.mxu0 %v9396_v48  ;;  %7239 = vmatpush1.bf16.msra.mxu1 %v9397_v49  ;;  %v9487_v48 = vld [vmem:[%s14174_s1 + $0x34c] ss:$16 sps:$4 sm:$0xff]   ;;  %v9482_v49 = vld [vmem:[%s14174_s1 + $0x340] ss:$16 sps:$4 sm:$0xff]  }
  0x34   : > { %6552 = vmatprep.subr.bf16.mxu0 %v9398_v51  ;;  %7240 = vmatprep.subr.bf16.mxu1 %v9400_v52  ;;  %v9490_v51 = vld [vmem:[%s14174_s1 + $0x364] ss:$16 sps:$4 sm:$0xff]   ;;  %v9493_v52 = vld [vmem:[%s14174_s1 + $0x36c] ss:$16 sps:$4 sm:$0xff]  }
  0x37   : > { %6553 = vmatpush1.bf16.msra.mxu0 %v9402_v53  ;;  %7241 = vmatpush1.bf16.msra.mxu1 %v9403_v54  ;;  %v9488_v53 = vld [vmem:[%s14174_s1 + $0x360] ss:$16 sps:$4 sm:$0xff]   ;;  %v9491_v54 = vld [vmem:[%s14174_s1 + $0x368] ss:$16 sps:$4 sm:$0xff]  }
  0x38   : > { %6554 = vmatprep.subr.bf16.mxu0 %v9404_v55  ;;  %7242 = vmatprep.subr.bf16.mxu1 %v9406_v56  ;;  %v9496_v55 = vld [vmem:[%s14174_s1 + $0x384] ss:$16 sps:$4 sm:$0xff]   ;;  %v9499_v56 = vld [vmem:[%s14174_s1 + $0x38c] ss:$16 sps:$4 sm:$0xff]  }
  0x3b   : > { %6555 = vmatpush1.bf16.msra.mxu0 %v9408_v57  ;;  %7243 = vmatpush1.bf16.msra.mxu1 %v9409_v58  ;;  %v9494_v57 = vld [vmem:[%s14174_s1 + $0x380] ss:$16 sps:$4 sm:$0xff]   ;;  %v9497_v58 = vld [vmem:[%s14174_s1 + $0x388] ss:$16 sps:$4 sm:$0xff]  }
  0x3c   : > { %6556 = vmatprep.subr.bf16.mxu0 %v9410_v59  ;;  %7244 = vmatprep.subr.bf16.mxu1 %v9412_v60  ;;  %v9502_v59 = vld [vmem:[%s14174_s1 + $0x3a4] ss:$16 sps:$4 sm:$0xff]   ;;  %v9505_v60 = vld [vmem:[%s14174_s1 + $0x3ac] ss:$16 sps:$4 sm:$0xff]  }
  0x3f   : > { %6557 = vmatpush1.bf16.msra.mxu0 %v9414_v61  ;;  %7245 = vmatpush1.bf16.msra.mxu1 %v9415_v62  ;;  %v9500_v61 = vld [vmem:[%s14174_s1 + $0x3a0] ss:$16 sps:$4 sm:$0xff]   ;;  %v9503_v62 = vld [vmem:[%s14174_s1 + $0x3a8] ss:$16 sps:$4 sm:$0xff]  }
  0x40   : > { %6558 = vmatprep.subr.bf16.mxu0 %v9416_v63  ;;  %7246 = vmatprep.subr.bf16.mxu1 %v9418_v0  ;;  %v9508_v63 = vld [vmem:[%s14174_s1 + $0x3c4] ss:$16 sps:$4 sm:$0xff]   ;;  %v9511_v0 = vld [vmem:[%s14174_s1 + $0x3cc] ss:$16 sps:$4 sm:$0xff]  }
  0x43   : > { %6559 = vmatpush1.bf16.msra.mxu0 %v9420_v1  ;;  %7247 = vmatpush1.bf16.msra.mxu1 %v9421_v2  ;;  %v9506_v1 = vld [vmem:[%s14174_s1 + $0x3c0] ss:$16 sps:$4 sm:$0xff]   ;;  %v9509_v2 = vld [vmem:[%s14174_s1 + $0x3c8] ss:$16 sps:$4 sm:$0xff]  }
  0x44   : > { %6571 = vmatprep.subr.bf16.mxu0 %v9424_v3  ;;  %7259 = vmatprep.subr.bf16.mxu1 %v9427_v4  ;;  %v9514_v3 = vld [vmem:[%s14174_s1 + $0x3e4] ss:$16 sps:$4 sm:$0xff]   ;;  %v9517_v4 = vld [vmem:[%s14174_s1 + $0x3ec] ss:$16 sps:$4 sm:$0xff]  }
  0x46   : > { %6561 = vmatmul.mubr.bf16.vlgmr.msra.gmra.mrb[0].mxu0 %v8128_v5  ;;  %7249 = vmatmul.mubr.bf16.vlgmr.msra.gmra.mrb[0].mxu1 %v8128_v5  ;;  %v9512_v5 = vld [vmem:[%s14174_s1 + $0x3e0] ss:$16 sps:$4 sm:$0xff]  }
  0x47   : > { %6572 = vmatpush1.bf16.msra.mxu0 %v9422_v6  ;;  %7260 = vmatpush1.bf16.msra.mxu1 %v9425_v7  ;;  %v9515_v6 = vld [vmem:[%s14174_s1 + $0x3e8] ss:$16 sps:$4 sm:$0xff]   ;;  %v9520_v7 = vld [vmem:[%s14174_s1 + $0x404] ss:$16 sps:$4 sm:$0xff]  }
  0x48   : > { %6573 = vmatprep.subr.bf16.mxu0 %v9430_v8  ;;  %7261 = vmatprep.subr.bf16.mxu1 %v9433_v9  ;;  %v9523_v8 = vld [vmem:[%s14174_s1 + $0x40c] ss:$16 sps:$4 sm:$0xff]   ;;  %v8130_v9 = vcombine.low %v11183_v30, %v11186_v31  ;;  %v9545_v30 = vld [vmem:[%s14174_s1 + $0x488] ss:$16 sps:$4 sm:$0xff]   ;;  %v9550_v31 = vld [vmem:[%s14174_s1 + $0x4a4] ss:$16 sps:$4 sm:$0xff]  }
  0x49   : > { %6603 = vmatprep.mubr.bf16.mxu0 %v8131_v34  ;;  %7291 = vmatprep.mubr.bf16.mxu1 %v8131_v34  ;;  %v9551_v34 = vld [vmem:[%s14174_s1 + $0x4a8] ss:$16 sps:$4 sm:$0xff]  }
  0x4b   : > { %6574 = vmatpush1.bf16.msra.mxu0 %v9428_v10  ;;  %7262 = vmatpush1.bf16.msra.mxu1 %v9431_v11  ;;  %v9518_v10 = vld [vmem:[%s14174_s1 + $0x400] ss:$16 sps:$4 sm:$0xff]   ;;  %v9521_v11 = vld [vmem:[%s14174_s1 + $0x408] ss:$16 sps:$4 sm:$0xff]  }
  0x4c   : > { %6575 = vmatprep.subr.bf16.mxu0 %v9436_v12  ;;  %7263 = vmatprep.subr.bf16.mxu1 %v9439_v13  ;;  %v9526_v12 = vld [vmem:[%s14174_s1 + $0x424] ss:$16 sps:$4 sm:$0xff]   ;;  %v9529_v13 = vld [vmem:[%s14174_s1 + $0x42c] ss:$16 sps:$4 sm:$0xff]  }
  0x4f   : > { %6576 = vmatpush1.bf16.msra.mxu0 %v9434_v14  ;;  %7264 = vmatpush1.bf16.msra.mxu1 %v9437_v15  ;;  %v11325_v14 = vld [vmem:[%s11040_s5 + $0x10] sm:$0xff] }
  0x50   : > { %6577 = vmatprep.subr.bf16.mxu0 %v9442_v16  ;;  %7265 = vmatprep.subr.bf16.mxu1 %v9445_v17  ;;  %v11328_v15 = vld [vmem:[%s11040_s5 + $0x90] sm:$0xff] }
  0x51   : > { %v8133_v16 = vcombine.high %v11325_v14, %v11328_v15  ;;  %v9524_v17 = vld [vmem:[%s14174_s1 + $0x420] ss:$16 sps:$4 sm:$0xff]  }
  0x53   : > { %6578 = vmatpush1.bf16.msra.mxu0 %v9440_v18  ;;  %7266 = vmatpush1.bf16.msra.mxu1 %v9443_v19  ;;  %v9527_v18 = vld [vmem:[%s14174_s1 + $0x428] ss:$16 sps:$4 sm:$0xff]   ;;  %v9532_v19 = vld [vmem:[%s14174_s1 + $0x444] ss:$16 sps:$4 sm:$0xff]  }
  0x54   : > { %6579 = vmatprep.subr.bf16.mxu0 %v9448_v20  ;;  %7267 = vmatprep.subr.bf16.mxu1 %v9451_v21  ;;  %v9535_v20 = vld [vmem:[%s14174_s1 + $0x44c] ss:$16 sps:$4 sm:$0xff]   ;;  %v9530_v21 = vld [vmem:[%s14174_s1 + $0x440] ss:$16 sps:$4 sm:$0xff]  }
  0x57   : > { %6580 = vmatpush1.bf16.msra.mxu0 %v9446_v22  ;;  %7268 = vmatpush1.bf16.msra.mxu1 %v9449_v23  ;;  %v9533_v22 = vld [vmem:[%s14174_s1 + $0x448] ss:$16 sps:$4 sm:$0xff]   ;;  %v9538_v23 = vld [vmem:[%s14174_s1 + $0x464] ss:$16 sps:$4 sm:$0xff]  }
  0x58   : > { %6581 = vmatprep.subr.bf16.mxu0 %v9454_v24  ;;  %7269 = vmatprep.subr.bf16.mxu1 %v9457_v25  ;;  %v9541_v24 = vld [vmem:[%s14174_s1 + $0x46c] ss:$16 sps:$4 sm:$0xff]   ;;  %v9536_v25 = vld [vmem:[%s14174_s1 + $0x460] ss:$16 sps:$4 sm:$0xff]  }
  0x5b   : > { %6582 = vmatpush1.bf16.msra.mxu0 %v9452_v26  ;;  %7270 = vmatpush1.bf16.msra.mxu1 %v9455_v27  ;;  %v9539_v26 = vld [vmem:[%s14174_s1 + $0x468] ss:$16 sps:$4 sm:$0xff]   ;;  %v9544_v27 = vld [vmem:[%s14174_s1 + $0x484] ss:$16 sps:$4 sm:$0xff]  }
  0x5c   : > { %6583 = vmatprep.subr.bf16.mxu0 %v9460_v28  ;;  %7271 = vmatprep.subr.bf16.mxu1 %v9463_v29  ;;  %v9547_v28 = vld [vmem:[%s14174_s1 + $0x48c] ss:$16 sps:$4 sm:$0xff]   ;;  %v9542_v29 = vld [vmem:[%s14174_s1 + $0x480] ss:$16 sps:$4 sm:$0xff]  }
  0x5f   : > { %6584 = vmatpush1.bf16.msra.mxu0 %v9458_v32  ;;  %7272 = vmatpush1.bf16.msra.mxu1 %v9461_v33  ;;  %v9553_v32 = vld [vmem:[%s14174_s1 + $0x4ac] ss:$16 sps:$4 sm:$0xff]   ;;  %v9548_v33 = vld [vmem:[%s14174_s1 + $0x4a0] ss:$16 sps:$4 sm:$0xff]  }
  0x60   : > { %6585 = vmatprep.subr.bf16.mxu0 %v9466_v35  ;;  %7273 = vmatprep.subr.bf16.mxu1 %v9469_v36  ;;  %v9556_v35 = vld [vmem:[%s14174_s1 + $0x4c4] ss:$16 sps:$4 sm:$0xff]   ;;  %v9559_v36 = vld [vmem:[%s14174_s1 + $0x4cc] ss:$16 sps:$4 sm:$0xff]  }
  0x63   : > { %6586 = vmatpush1.bf16.msra.mxu0 %v9464_v37  ;;  %7274 = vmatpush1.bf16.msra.mxu1 %v9467_v38  ;;  %v9554_v37 = vld [vmem:[%s14174_s1 + $0x4c0] ss:$16 sps:$4 sm:$0xff]   ;;  %v9557_v38 = vld [vmem:[%s14174_s1 + $0x4c8] ss:$16 sps:$4 sm:$0xff]  }
  0x64   : > { %6587 = vmatprep.subr.bf16.mxu0 %v9472_v39  ;;  %7275 = vmatprep.subr.bf16.mxu1 %v9475_v40  ;;  %v9562_v39 = vld [vmem:[%s14174_s1 + $0x4e4] ss:$16 sps:$4 sm:$0xff]   ;;  %v9565_v40 = vld [vmem:[%s14174_s1 + $0x4ec] ss:$16 sps:$4 sm:$0xff]  }
  0x67   : > { %6588 = vmatpush1.bf16.msra.mxu0 %v9470_v41  ;;  %7276 = vmatpush1.bf16.msra.mxu1 %v9473_v42  ;;  %v9560_v41 = vld [vmem:[%s14174_s1 + $0x4e0] ss:$16 sps:$4 sm:$0xff]   ;;  %v9563_v42 = vld [vmem:[%s14174_s1 + $0x4e8] ss:$16 sps:$4 sm:$0xff]  }
  0x68   : > { %6589 = vmatprep.subr.bf16.mxu0 %v9478_v43  ;;  %7277 = vmatprep.subr.bf16.mxu1 %v9481_v44  ;;  %v9568_v43 = vld [vmem:[%s14174_s1 + $0x504] ss:$16 sps:$4 sm:$0xff]   ;;  %v9571_v44 = vld [vmem:[%s14174_s1 + $0x50c] ss:$16 sps:$4 sm:$0xff]  }
  0x6b   : > { %6590 = vmatpush1.bf16.msra.mxu0 %v9476_v45  ;;  %7278 = vmatpush1.bf16.msra.mxu1 %v9479_v46  ;;  %v9566_v45 = vld [vmem:[%s14174_s1 + $0x500] ss:$16 sps:$4 sm:$0xff]   ;;  %v9569_v46 = vld [vmem:[%s14174_s1 + $0x508] ss:$16 sps:$4 sm:$0xff]  }
  0x6c   : > { %6591 = vmatprep.subr.bf16.mxu0 %v9484_v47  ;;  %7279 = vmatprep.subr.bf16.mxu1 %v9487_v48  ;;  %v9574_v47 = vld [vmem:[%s14174_s1 + $0x524] ss:$16 sps:$4 sm:$0xff]   ;;  %v9577_v48 = vld [vmem:[%s14174_s1 + $0x52c] ss:$16 sps:$4 sm:$0xff]  }
  0x6f   : > { %6592 = vmatpush1.bf16.msra.mxu0 %v9482_v49  ;;  %7280 = vmatpush1.bf16.msra.mxu1 %v9485_v50  ;;  %v9572_v49 = vld [vmem:[%s14174_s1 + $0x520] ss:$16 sps:$4 sm:$0xff]   ;;  %v9575_v50 = vld [vmem:[%s14174_s1 + $0x528] ss:$16 sps:$4 sm:$0xff]  }
  0x70   : > { %6593 = vmatprep.subr.bf16.mxu0 %v9490_v51  ;;  %7281 = vmatprep.subr.bf16.mxu1 %v9493_v52  ;;  %v9580_v51 = vld [vmem:[%s14174_s1 + $0x544] ss:$16 sps:$4 sm:$0xff]   ;;  %v9583_v52 = vld [vmem:[%s14174_s1 + $0x54c] ss:$16 sps:$4 sm:$0xff]  }
  0x73   : > { %6594 = vmatpush1.bf16.msra.mxu0 %v9488_v53  ;;  %7282 = vmatpush1.bf16.msra.mxu1 %v9491_v54  ;;  %v9578_v53 = vld [vmem:[%s14174_s1 + $0x540] ss:$16 sps:$4 sm:$0xff]   ;;  %v9581_v54 = vld [vmem:[%s14174_s1 + $0x548] ss:$16 sps:$4 sm:$0xff]  }
  0x74   : > { %6595 = vmatprep.subr.bf16.mxu0 %v9496_v55  ;;  %7283 = vmatprep.subr.bf16.mxu1 %v9499_v56  ;;  %v9586_v55 = vld [vmem:[%s14174_s1 + $0x564] ss:$16 sps:$4 sm:$0xff]   ;;  %v9589_v56 = vld [vmem:[%s14174_s1 + $0x56c] ss:$16 sps:$4 sm:$0xff]  }
  0x77   : > { %6596 = vmatpush1.bf16.msra.mxu0 %v9494_v57  ;;  %7284 = vmatpush1.bf16.msra.mxu1 %v9497_v58  ;;  %v9584_v57 = vld [vmem:[%s14174_s1 + $0x560] ss:$16 sps:$4 sm:$0xff]   ;;  %v9587_v58 = vld [vmem:[%s14174_s1 + $0x568] ss:$16 sps:$4 sm:$0xff]  }
  0x78   : > { %6597 = vmatprep.subr.bf16.mxu0 %v9502_v59  ;;  %7285 = vmatprep.subr.bf16.mxu1 %v9505_v60  ;;  %v9592_v59 = vld [vmem:[%s14174_s1 + $0x584] ss:$16 sps:$4 sm:$0xff]   ;;  %v9595_v60 = vld [vmem:[%s14174_s1 + $0x58c] ss:$16 sps:$4 sm:$0xff]  }
  0x7b   : > { %6598 = vmatpush1.bf16.msra.mxu0 %v9500_v61  ;;  %7286 = vmatpush1.bf16.msra.mxu1 %v9503_v62  ;;  %v9590_v61 = vld [vmem:[%s14174_s1 + $0x580] ss:$16 sps:$4 sm:$0xff]   ;;  %v9593_v62 = vld [vmem:[%s14174_s1 + $0x588] ss:$16 sps:$4 sm:$0xff]  }
  0x7c   : > { %6599 = vmatprep.subr.bf16.mxu0 %v9508_v63  ;;  %7287 = vmatprep.subr.bf16.mxu1 %v9511_v0  ;;  %v9598_v63 = vld [vmem:[%s14174_s1 + $0x5a4] ss:$16 sps:$4 sm:$0xff]   ;;  %v9601_v0 = vld [vmem:[%s14174_s1 + $0x5ac] ss:$16 sps:$4 sm:$0xff]  }
  0x7f   : > { %6600 = vmatpush1.bf16.msra.mxu0 %v9506_v1  ;;  %7288 = vmatpush1.bf16.msra.mxu1 %v9509_v2  ;;  %v9596_v1 = vld [vmem:[%s14174_s1 + $0x5a0] ss:$16 sps:$4 sm:$0xff]   ;;  %v9599_v2 = vld [vmem:[%s14174_s1 + $0x5a8] ss:$16 sps:$4 sm:$0xff]  }
  0x80   : > { %6601 = vmatprep.subr.bf16.mxu0 %v9514_v3  ;;  %7289 = vmatprep.subr.bf16.mxu1 %v9517_v4  ;;  %v9604_v3 = vld [vmem:[%s14174_s1 + $0x5c4] ss:$16 sps:$4 sm:$0xff]   ;;  %v9607_v4 = vld [vmem:[%s14174_s1 + $0x5cc] ss:$16 sps:$4 sm:$0xff]  }
  0x83   : > { %6602 = vmatpush1.bf16.msra.mxu0 %v9512_v5  ;;  %7290 = vmatpush1.bf16.msra.mxu1 %v9515_v6  ;;  %v9602_v5 = vld [vmem:[%s14174_s1 + $0x5c0] ss:$16 sps:$4 sm:$0xff]   ;;  %v9605_v6 = vld [vmem:[%s14174_s1 + $0x5c8] ss:$16 sps:$4 sm:$0xff]  }
  0x84   : > { %6614 = vmatprep.subr.bf16.mxu0 %v9520_v7  ;;  %7302 = vmatprep.subr.bf16.mxu1 %v9523_v8  ;;  %v9610_v7 = vld [vmem:[%s14174_s1 + $0x5e4] ss:$16 sps:$4 sm:$0xff]   ;;  %v9613_v8 = vld [vmem:[%s14174_s1 + $0x5ec] ss:$16 sps:$4 sm:$0xff]  }
  0x86   : > { %6604 = vmatmul.mubr.bf16.vlgmr.msra.gmra.mrb[0].mxu0 %v8130_v9  ;;  %7292 = vmatmul.mubr.bf16.vlgmr.msra.gmra.mrb[0].mxu1 %v8130_v9  ;;  %v9608_v9 = vld [vmem:[%s14174_s1 + $0x5e0] ss:$16 sps:$4 sm:$0xff]  }
  0x87   : > { %6615 = vmatpush1.bf16.msra.mxu0 %v9518_v10  ;;  %7303 = vmatpush1.bf16.msra.mxu1 %v9521_v11  ;;  %v9611_v10 = vld [vmem:[%s14174_s1 + $0x5e8] ss:$16 sps:$4 sm:$0xff]   ;;  %v9616_v11 = vld [vmem:[%s14174_s1 + $0x604] ss:$16 sps:$4 sm:$0xff]  }
  0x88   : > { %6616 = vmatprep.subr.bf16.mxu0 %v9526_v12  ;;  %7304 = vmatprep.subr.bf16.mxu1 %v9529_v13  ;;  %v9619_v12 = vld [vmem:[%s14174_s1 + $0x60c] ss:$16 sps:$4 sm:$0xff]   ;;  %v9614_v13 = vld [vmem:[%s14174_s1 + $0x600] ss:$16 sps:$4 sm:$0xff]  }
  0x89   : > { %6646 = vmatprep.mubr.bf16.mxu0 %v8133_v16  ;;  %7334 = vmatprep.mubr.bf16.mxu1 %v8133_v16  ;;  %v9617_v16 = vld [vmem:[%s14174_s1 + $0x608] ss:$16 sps:$4 sm:$0xff]  }
  0x8b   : > { %6617 = vmatpush1.bf16.msra.mxu0 %v9524_v17  ;;  %7305 = vmatpush1.bf16.msra.mxu1 %v9527_v18  ;;  %v8132_v17 = vcombine.low %v11325_v14, %v11328_v15  ;;  %v11521_v18 = vld [vmem:[%s11040_s5 + $0x18] sm:$0xff]  ;;  %v9620_v14 = vld [vmem:[%s14174_s1 + $0x620] ss:$16 sps:$4 sm:$0xff]  }
  0x8c   : > { %6618 = vmatprep.subr.bf16.mxu0 %v9532_v19  ;;  %7306 = vmatprep.subr.bf16.mxu1 %v9535_v20  ;;  %v11524_v19 = vld [vmem:[%s11040_s5 + $0x98] sm:$0xff]  ;;  %v9622_v20 = vld [vmem:[%s14174_s1 + $0x624] ss:$16 sps:$4 sm:$0xff]  }
  0x8d   : > { %v9623_v15 = vld [vmem:[%s14174_s1 + $0x628] ss:$16 sps:$4 sm:$0xff]  }
  0x8f   : > { %6619 = vmatpush1.bf16.msra.mxu0 %v9530_v21  ;;  %7307 = vmatpush1.bf16.msra.mxu1 %v9533_v22  ;;  %v9625_v21 = vld [vmem:[%s14174_s1 + $0x62c] ss:$16 sps:$4 sm:$0xff]   ;;  %v8135_v22 = vcombine.high %v11521_v18, %v11524_v19 }
  0x90   : > { %6620 = vmatprep.subr.bf16.mxu0 %v9538_v23  ;;  %7308 = vmatprep.subr.bf16.mxu1 %v9541_v24  ;;  %v9628_v23 = vld [vmem:[%s14174_s1 + $0x644] ss:$16 sps:$4 sm:$0xff]   ;;  %v9631_v24 = vld [vmem:[%s14174_s1 + $0x64c] ss:$16 sps:$4 sm:$0xff]  }
  0x93   : > { %6621 = vmatpush1.bf16.msra.mxu0 %v9536_v25  ;;  %7309 = vmatpush1.bf16.msra.mxu1 %v9539_v26  ;;  %v9626_v25 = vld [vmem:[%s14174_s1 + $0x640] ss:$16 sps:$4 sm:$0xff]   ;;  %v9629_v26 = vld [vmem:[%s14174_s1 + $0x648] ss:$16 sps:$4 sm:$0xff]  }
  0x94   : > { %6622 = vmatprep.subr.bf16.mxu0 %v9544_v27  ;;  %7310 = vmatprep.subr.bf16.mxu1 %v9547_v28  ;;  %v9634_v27 = vld [vmem:[%s14174_s1 + $0x664] ss:$16 sps:$4 sm:$0xff]   ;;  %v9637_v28 = vld [vmem:[%s14174_s1 + $0x66c] ss:$16 sps:$4 sm:$0xff]  }
  0x97   : > { %6623 = vmatpush1.bf16.msra.mxu0 %v9542_v29  ;;  %7311 = vmatpush1.bf16.msra.mxu1 %v9545_v30  ;;  %v9632_v29 = vld [vmem:[%s14174_s1 + $0x660] ss:$16 sps:$4 sm:$0xff]   ;;  %v9635_v30 = vld [vmem:[%s14174_s1 + $0x668] ss:$16 sps:$4 sm:$0xff]  }
  0x98   : > { %6624 = vmatprep.subr.bf16.mxu0 %v9550_v31  ;;  %7312 = vmatprep.subr.bf16.mxu1 %v9553_v32  ;;  %v9640_v31 = vld [vmem:[%s14174_s1 + $0x684] ss:$16 sps:$4 sm:$0xff]   ;;  %v9643_v32 = vld [vmem:[%s14174_s1 + $0x68c] ss:$16 sps:$4 sm:$0xff]  }
  0x9b   : > { %6625 = vmatpush1.bf16.msra.mxu0 %v9548_v33  ;;  %7313 = vmatpush1.bf16.msra.mxu1 %v9551_v34  ;;  %v9638_v33 = vld [vmem:[%s14174_s1 + $0x680] ss:$16 sps:$4 sm:$0xff]   ;;  %v9641_v34 = vld [vmem:[%s14174_s1 + $0x688] ss:$16 sps:$4 sm:$0xff]  }
  0x9c   : > { %6626 = vmatprep.subr.bf16.mxu0 %v9556_v35  ;;  %7314 = vmatprep.subr.bf16.mxu1 %v9559_v36  ;;  %v9646_v35 = vld [vmem:[%s14174_s1 + $0x6a4] ss:$16 sps:$4 sm:$0xff]   ;;  %v9649_v36 = vld [vmem:[%s14174_s1 + $0x6ac] ss:$16 sps:$4 sm:$0xff]  }
  0x9f   : > { %6627 = vmatpush1.bf16.msra.mxu0 %v9554_v37  ;;  %7315 = vmatpush1.bf16.msra.mxu1 %v9557_v38  ;;  %v9644_v37 = vld [vmem:[%s14174_s1 + $0x6a0] ss:$16 sps:$4 sm:$0xff]   ;;  %v9647_v38 = vld [vmem:[%s14174_s1 + $0x6a8] ss:$16 sps:$4 sm:$0xff]  }
  0xa0   : > { %6628 = vmatprep.subr.bf16.mxu0 %v9562_v39  ;;  %7316 = vmatprep.subr.bf16.mxu1 %v9565_v40  ;;  %v9652_v39 = vld [vmem:[%s14174_s1 + $0x6c4] ss:$16 sps:$4 sm:$0xff]   ;;  %v9655_v40 = vld [vmem:[%s14174_s1 + $0x6cc] ss:$16 sps:$4 sm:$0xff]  }
  0xa3   : > { %6629 = vmatpush1.bf16.msra.mxu0 %v9560_v41  ;;  %7317 = vmatpush1.bf16.msra.mxu1 %v9563_v42  ;;  %v9650_v41 = vld [vmem:[%s14174_s1 + $0x6c0] ss:$16 sps:$4 sm:$0xff]   ;;  %v9653_v42 = vld [vmem:[%s14174_s1 + $0x6c8] ss:$16 sps:$4 sm:$0xff]  }
  0xa4   : > { %6630 = vmatprep.subr.bf16.mxu0 %v9568_v43  ;;  %7318 = vmatprep.subr.bf16.mxu1 %v9571_v44  ;;  %v9658_v43 = vld [vmem:[%s14174_s1 + $0x6e4] ss:$16 sps:$4 sm:$0xff]   ;;  %v9661_v44 = vld [vmem:[%s14174_s1 + $0x6ec] ss:$16 sps:$4 sm:$0xff]  }
  0xa7   : > { %6631 = vmatpush1.bf16.msra.mxu0 %v9566_v45  ;;  %7319 = vmatpush1.bf16.msra.mxu1 %v9569_v46  ;;  %v9656_v45 = vld [vmem:[%s14174_s1 + $0x6e0] ss:$16 sps:$4 sm:$0xff]   ;;  %v9659_v46 = vld [vmem:[%s14174_s1 + $0x6e8] ss:$16 sps:$4 sm:$0xff]  }
  0xa8   : > { %6632 = vmatprep.subr.bf16.mxu0 %v9574_v47  ;;  %7320 = vmatprep.subr.bf16.mxu1 %v9577_v48  ;;  %v9664_v47 = vld [vmem:[%s14174_s1 + $0x704] ss:$16 sps:$4 sm:$0xff]   ;;  %v9667_v48 = vld [vmem:[%s14174_s1 + $0x70c] ss:$16 sps:$4 sm:$0xff]  }
  0xab   : > { %6633 = vmatpush1.bf16.msra.mxu0 %v9572_v49  ;;  %7321 = vmatpush1.bf16.msra.mxu1 %v9575_v50  ;;  %v9662_v49 = vld [vmem:[%s14174_s1 + $0x700] ss:$16 sps:$4 sm:$0xff]   ;;  %v9665_v50 = vld [vmem:[%s14174_s1 + $0x708] ss:$16 sps:$4 sm:$0xff]  }
  0xac   : > { %6634 = vmatprep.subr.bf16.mxu0 %v9580_v51  ;;  %7322 = vmatprep.subr.bf16.mxu1 %v9583_v52  ;;  %v9670_v51 = vld [vmem:[%s14174_s1 + $0x724] ss:$16 sps:$4 sm:$0xff]   ;;  %v9673_v52 = vld [vmem:[%s14174_s1 + $0x72c] ss:$16 sps:$4 sm:$0xff]  }
  0xaf   : > { %6635 = vmatpush1.bf16.msra.mxu0 %v9578_v53  ;;  %7323 = vmatpush1.bf16.msra.mxu1 %v9581_v54  ;;  %v9668_v53 = vld [vmem:[%s14174_s1 + $0x720] ss:$16 sps:$4 sm:$0xff]   ;;  %v9671_v54 = vld [vmem:[%s14174_s1 + $0x728] ss:$16 sps:$4 sm:$0xff]  }
  0xb0   : > { %6636 = vmatprep.subr.bf16.mxu0 %v9586_v55  ;;  %7324 = vmatprep.subr.bf16.mxu1 %v9589_v56  ;;  %v9676_v55 = vld [vmem:[%s14174_s1 + $0x744] ss:$16 sps:$4 sm:$0xff]   ;;  %v9679_v56 = vld [vmem:[%s14174_s1 + $0x74c] ss:$16 sps:$4 sm:$0xff]  }
  0xb3   : > { %6637 = vmatpush1.bf16.msra.mxu0 %v9584_v57  ;;  %7325 = vmatpush1.bf16.msra.mxu1 %v9587_v58  ;;  %v9674_v57 = vld [vmem:[%s14174_s1 + $0x740] ss:$16 sps:$4 sm:$0xff]   ;;  %v9677_v58 = vld [vmem:[%s14174_s1 + $0x748] ss:$16 sps:$4 sm:$0xff]  }
  0xb4   : > { %6638 = vmatprep.subr.bf16.mxu0 %v9592_v59  ;;  %7326 = vmatprep.subr.bf16.mxu1 %v9595_v60  ;;  %v9682_v59 = vld [vmem:[%s14174_s1 + $0x764] ss:$16 sps:$4 sm:$0xff]   ;;  %v9685_v60 = vld [vmem:[%s14174_s1 + $0x76c] ss:$16 sps:$4 sm:$0xff]  }
  0xb7   : > { %6639 = vmatpush1.bf16.msra.mxu0 %v9590_v61  ;;  %7327 = vmatpush1.bf16.msra.mxu1 %v9593_v62  ;;  %v9680_v61 = vld [vmem:[%s14174_s1 + $0x760] ss:$16 sps:$4 sm:$0xff]   ;;  %v9683_v62 = vld [vmem:[%s14174_s1 + $0x768] ss:$16 sps:$4 sm:$0xff]  }
  0xb8   : > { %6640 = vmatprep.subr.bf16.mxu0 %v9598_v63  ;;  %7328 = vmatprep.subr.bf16.mxu1 %v9601_v0  ;;  %v9688_v63 = vld [vmem:[%s14174_s1 + $0x784] ss:$16 sps:$4 sm:$0xff]   ;;  %v9691_v0 = vld [vmem:[%s14174_s1 + $0x78c] ss:$16 sps:$4 sm:$0xff]  }
  0xbb   : > { %6641 = vmatpush1.bf16.msra.mxu0 %v9596_v1  ;;  %7329 = vmatpush1.bf16.msra.mxu1 %v9599_v2  ;;  %v9686_v1 = vld [vmem:[%s14174_s1 + $0x780] ss:$16 sps:$4 sm:$0xff]   ;;  %v9689_v2 = vld [vmem:[%s14174_s1 + $0x788] ss:$16 sps:$4 sm:$0xff]  }
  0xbc   : > { %6642 = vmatprep.subr.bf16.mxu0 %v9604_v3  ;;  %7330 = vmatprep.subr.bf16.mxu1 %v9607_v4  ;;  %v9694_v3 = vld [vmem:[%s14174_s1 + $0x7a4] ss:$16 sps:$4 sm:$0xff]   ;;  %v9697_v4 = vld [vmem:[%s14174_s1 + $0x7ac] ss:$16 sps:$4 sm:$0xff]  }
  0xbf   : > { %6643 = vmatpush1.bf16.msra.mxu0 %v9602_v5  ;;  %7331 = vmatpush1.bf16.msra.mxu1 %v9605_v6  ;;  %v9692_v5 = vld [vmem:[%s14174_s1 + $0x7a0] ss:$16 sps:$4 sm:$0xff]   ;;  %v9695_v6 = vld [vmem:[%s14174_s1 + $0x7a8] ss:$16 sps:$4 sm:$0xff]  }
  0xc0   : > { %6644 = vmatprep.subr.bf16.mxu0 %v9610_v7  ;;  %7332 = vmatprep.subr.bf16.mxu1 %v9613_v8  ;;  %v9700_v7 = vld [vmem:[%s14174_s1 + $0x7c4] ss:$16 sps:$4 sm:$0xff]   ;;  %v9703_v8 = vld [vmem:[%s14174_s1 + $0x7cc] ss:$16 sps:$4 sm:$0xff]  }
  0xc3   : > { %6645 = vmatpush1.bf16.msra.mxu0 %v9608_v9  ;;  %7333 = vmatpush1.bf16.msra.mxu1 %v9611_v10  ;;  %v9698_v9 = vld [vmem:[%s14174_s1 + $0x7c0] ss:$16 sps:$4 sm:$0xff]   ;;  %v9701_v10 = vld [vmem:[%s14174_s1 + $0x7c8] ss:$16 sps:$4 sm:$0xff]  }
  0xc4   : > { %6657 = vmatprep.subr.bf16.mxu0 %v9616_v11  ;;  %7345 = vmatprep.subr.bf16.mxu1 %v9619_v12  ;;  %v9706_v11 = vld [vmem:[%s14174_s1 + $0x7e4] ss:$16 sps:$4 sm:$0xff]   ;;  %v9709_v12 = vld [vmem:[%s14174_s1 + $0x7ec] ss:$16 sps:$4 sm:$0xff]  }
  0xc6   : > { %6647 = vmatmul.mubr.bf16.vlgmr.msra.gmra.mrb[0].mxu0 %v8132_v17  ;;  %7335 = vmatmul.mubr.bf16.vlgmr.msra.gmra.mrb[0].mxu1 %v8132_v17  ;;  %v9712_v17 = vld [vmem:[%s14174_s1 + $0x804] ss:$16 sps:$4 sm:$0xff]  }
  0xc7   : > { %6658 = vmatpush1.bf16.msra.mxu0 %v9614_v13  ;;  %7346 = vmatpush1.bf16.msra.mxu1 %v9617_v16  ;;  %v9704_v13 = vld [vmem:[%s14174_s1 + $0x7e0] ss:$16 sps:$4 sm:$0xff]   ;;  %v9707_v16 = vld [vmem:[%s14174_s1 + $0x7e8] ss:$16 sps:$4 sm:$0xff]  }
  0xc8   : > { %6659 = vmatprep.subr.bf16.mxu0 %v9622_v20  ;;  %7347 = vmatprep.subr.bf16.mxu1 %v9625_v21  ;;  %v9715_v20 = vld [vmem:[%s14174_s1 + $0x80c] ss:$16 sps:$4 sm:$0xff]   ;;  %v11715_v21 = vld [vmem:[%s11040_s5 + $0x20] sm:$0xff] }
  0xc9   : > { %6689 = vmatprep.mubr.bf16.mxu0 %v8135_v22  ;;  %7377 = vmatprep.mubr.bf16.mxu1 %v8135_v22  ;;  %v8134_v22 = vcombine.low %v11521_v18, %v11524_v19  ;;  %v9721_v18 = vld [vmem:[%s14174_s1 + $0x82c] ss:$16 sps:$4 sm:$0xff]  }
  0xcb   : > { %6660 = vmatpush1.bf16.msra.mxu0 %v9620_v14  ;;  %7348 = vmatpush1.bf16.msra.mxu1 %v9623_v15  ;;  %v11720_v14 = vld [vmem:[%s11040_s5 + $0xa0] sm:$0xff] }
  0xcc   : > { %6661 = vmatprep.subr.bf16.mxu0 %v9628_v23  ;;  %7349 = vmatprep.subr.bf16.mxu1 %v9631_v24  ;;  %v9710_v15 = vld [vmem:[%s14174_s1 + $0x800] ss:$16 sps:$4 sm:$0xff]   ;;  %v9713_v23 = vld [vmem:[%s14174_s1 + $0x808] ss:$16 sps:$4 sm:$0xff]   ;;  %v9718_v24 = vld [vmem:[%s14174_s1 + $0x824] ss:$16 sps:$4 sm:$0xff]   ;;  %v8137_v19 = vcombine.high %v11715_v21, %v11720_v14 }
  0xcf   : > { %6662 = vmatpush1.bf16.msra.mxu0 %v9626_v25  ;;  %7350 = vmatpush1.bf16.msra.mxu1 %v9629_v26  ;;  %v9716_v25 = vld [vmem:[%s14174_s1 + $0x820] ss:$16 sps:$4 sm:$0xff]   ;;  %v9719_v26 = vld [vmem:[%s14174_s1 + $0x828] ss:$16 sps:$4 sm:$0xff]  }
  0xd0   : > { %6663 = vmatprep.subr.bf16.mxu0 %v9634_v27  ;;  %7351 = vmatprep.subr.bf16.mxu1 %v9637_v28  ;;  %v9724_v27 = vld [vmem:[%s14174_s1 + $0x844] ss:$16 sps:$4 sm:$0xff]   ;;  %v9727_v28 = vld [vmem:[%s14174_s1 + $0x84c] ss:$16 sps:$4 sm:$0xff]  }
  0xd3   : > { %6664 = vmatpush1.bf16.msra.mxu0 %v9632_v29  ;;  %7352 = vmatpush1.bf16.msra.mxu1 %v9635_v30  ;;  %v9722_v29 = vld [vmem:[%s14174_s1 + $0x840] ss:$16 sps:$4 sm:$0xff]   ;;  %v9725_v30 = vld [vmem:[%s14174_s1 + $0x848] ss:$16 sps:$4 sm:$0xff]  }
  0xd4   : > { %6665 = vmatprep.subr.bf16.mxu0 %v9640_v31  ;;  %7353 = vmatprep.subr.bf16.mxu1 %v9643_v32  ;;  %v9730_v31 = vld [vmem:[%s14174_s1 + $0x864] ss:$16 sps:$4 sm:$0xff]   ;;  %v9733_v32 = vld [vmem:[%s14174_s1 + $0x86c] ss:$16 sps:$4 sm:$0xff]  }
  0xd7   : > { %6666 = vmatpush1.bf16.msra.mxu0 %v9638_v33  ;;  %7354 = vmatpush1.bf16.msra.mxu1 %v9641_v34  ;;  %v9728_v33 = vld [vmem:[%s14174_s1 + $0x860] ss:$16 sps:$4 sm:$0xff]   ;;  %v9731_v34 = vld [vmem:[%s14174_s1 + $0x868] ss:$16 sps:$4 sm:$0xff]  }
  0xd8   : > { %6667 = vmatprep.subr.bf16.mxu0 %v9646_v35  ;;  %7355 = vmatprep.subr.bf16.mxu1 %v9649_v36  ;;  %v9736_v35 = vld [vmem:[%s14174_s1 + $0x884] ss:$16 sps:$4 sm:$0xff]   ;;  %v9739_v36 = vld [vmem:[%s14174_s1 + $0x88c] ss:$16 sps:$4 sm:$0xff]  }
  0xdb   : > { %6668 = vmatpush1.bf16.msra.mxu0 %v9644_v37  ;;  %7356 = vmatpush1.bf16.msra.mxu1 %v9647_v38  ;;  %v9734_v37 = vld [vmem:[%s14174_s1 + $0x880] ss:$16 sps:$4 sm:$0xff]   ;;  %v9737_v38 = vld [vmem:[%s14174_s1 + $0x888] ss:$16 sps:$4 sm:$0xff]  }
  0xdc   : > { %6669 = vmatprep.subr.bf16.mxu0 %v9652_v39  ;;  %7357 = vmatprep.subr.bf16.mxu1 %v9655_v40  ;;  %v9742_v39 = vld [vmem:[%s14174_s1 + $0x8a4] ss:$16 sps:$4 sm:$0xff]   ;;  %v9745_v40 = vld [vmem:[%s14174_s1 + $0x8ac] ss:$16 sps:$4 sm:$0xff]  }
  0xdf   : > { %6670 = vmatpush1.bf16.msra.mxu0 %v9650_v41  ;;  %7358 = vmatpush1.bf16.msra.mxu1 %v9653_v42  ;;  %v9740_v41 = vld [vmem:[%s14174_s1 + $0x8a0] ss:$16 sps:$4 sm:$0xff]   ;;  %v9743_v42 = vld [vmem:[%s14174_s1 + $0x8a8] ss:$16 sps:$4 sm:$0xff]  }
  0xe0   : > { %6671 = vmatprep.subr.bf16.mxu0 %v9658_v43  ;;  %7359 = vmatprep.subr.bf16.mxu1 %v9661_v44  ;;  %v9748_v43 = vld [vmem:[%s14174_s1 + $0x8c4] ss:$16 sps:$4 sm:$0xff]   ;;  %v9751_v44 = vld [vmem:[%s14174_s1 + $0x8cc] ss:$16 sps:$4 sm:$0xff]  }
  0xe3   : > { %6672 = vmatpush1.bf16.msra.mxu0 %v9656_v45  ;;  %7360 = vmatpush1.bf16.msra.mxu1 %v9659_v46  ;;  %v9746_v45 = vld [vmem:[%s14174_s1 + $0x8c0] ss:$16 sps:$4 sm:$0xff]   ;;  %v9749_v46 = vld [vmem:[%s14174_s1 + $0x8c8] ss:$16 sps:$4 sm:$0xff]  }
  0xe4   : > { %6673 = vmatprep.subr.bf16.mxu0 %v9664_v47  ;;  %7361 = vmatprep.subr.bf16.mxu1 %v9667_v48  ;;  %v9754_v47 = vld [vmem:[%s14174_s1 + $0x8e4] ss:$16 sps:$4 sm:$0xff]   ;;  %v9757_v48 = vld [vmem:[%s14174_s1 + $0x8ec] ss:$16 sps:$4 sm:$0xff]  }
  0xe7   : > { %6674 = vmatpush1.bf16.msra.mxu0 %v9662_v49  ;;  %7362 = vmatpush1.bf16.msra.mxu1 %v9665_v50  ;;  %v9752_v49 = vld [vmem:[%s14174_s1 + $0x8e0] ss:$16 sps:$4 sm:$0xff]   ;;  %v9755_v50 = vld [vmem:[%s14174_s1 + $0x8e8] ss:$16 sps:$4 sm:$0xff]  }
  0xe8   : > { %6675 = vmatprep.subr.bf16.mxu0 %v9670_v51  ;;  %7363 = vmatprep.subr.bf16.mxu1 %v9673_v52  ;;  %v9760_v51 = vld [vmem:[%s14174_s1 + $0x904] ss:$16 sps:$4 sm:$0xff]   ;;  %v9763_v52 = vld [vmem:[%s14174_s1 + $0x90c] ss:$16 sps:$4 sm:$0xff]  }
  0xeb   : > { %6676 = vmatpush1.bf16.msra.mxu0 %v9668_v53  ;;  %7364 = vmatpush1.bf16.msra.mxu1 %v9671_v54  ;;  %v9758_v53 = vld [vmem:[%s14174_s1 + $0x900] ss:$16 sps:$4 sm:$0xff]   ;;  %v9761_v54 = vld [vmem:[%s14174_s1 + $0x908] ss:$16 sps:$4 sm:$0xff]  }
  0xec   : > { %6677 = vmatprep.subr.bf16.mxu0 %v9676_v55  ;;  %7365 = vmatprep.subr.bf16.mxu1 %v9679_v56  ;;  %v9766_v55 = vld [vmem:[%s14174_s1 + $0x924] ss:$16 sps:$4 sm:$0xff]   ;;  %v9769_v56 = vld [vmem:[%s14174_s1 + $0x92c] ss:$16 sps:$4 sm:$0xff]  }
  0xef   : > { %6678 = vmatpush1.bf16.msra.mxu0 %v9674_v57  ;;  %7366 = vmatpush1.bf16.msra.mxu1 %v9677_v58  ;;  %v9764_v57 = vld [vmem:[%s14174_s1 + $0x920] ss:$16 sps:$4 sm:$0xff]   ;;  %v9767_v58 = vld [vmem:[%s14174_s1 + $0x928] ss:$16 sps:$4 sm:$0xff]  }
  0xf0   : > { %6679 = vmatprep.subr.bf16.mxu0 %v9682_v59  ;;  %7367 = vmatprep.subr.bf16.mxu1 %v9685_v60  ;;  %v9772_v59 = vld [vmem:[%s14174_s1 + $0x944] ss:$16 sps:$4 sm:$0xff]   ;;  %v9775_v60 = vld [vmem:[%s14174_s1 + $0x94c] ss:$16 sps:$4 sm:$0xff]  }
  0xf3   : > { %6680 = vmatpush1.bf16.msra.mxu0 %v9680_v61  ;;  %7368 = vmatpush1.bf16.msra.mxu1 %v9683_v62  ;;  %v9770_v61 = vld [vmem:[%s14174_s1 + $0x940] ss:$16 sps:$4 sm:$0xff]   ;;  %v9773_v62 = vld [vmem:[%s14174_s1 + $0x948] ss:$16 sps:$4 sm:$0xff]  }
  0xf4   : > { %6681 = vmatprep.subr.bf16.mxu0 %v9688_v63  ;;  %7369 = vmatprep.subr.bf16.mxu1 %v9691_v0  ;;  %v9778_v63 = vld [vmem:[%s14174_s1 + $0x964] ss:$16 sps:$4 sm:$0xff]   ;;  %v9781_v0 = vld [vmem:[%s14174_s1 + $0x96c] ss:$16 sps:$4 sm:$0xff]  }
  0xf7   : > { %6682 = vmatpush1.bf16.msra.mxu0 %v9686_v1  ;;  %7370 = vmatpush1.bf16.msra.mxu1 %v9689_v2  ;;  %v9776_v1 = vld [vmem:[%s14174_s1 + $0x960] ss:$16 sps:$4 sm:$0xff]   ;;  %v9779_v2 = vld [vmem:[%s14174_s1 + $0x968] ss:$16 sps:$4 sm:$0xff]  }
  0xf8   : > { %6683 = vmatprep.subr.bf16.mxu0 %v9694_v3  ;;  %7371 = vmatprep.subr.bf16.mxu1 %v9697_v4  ;;  %v9784_v3 = vld [vmem:[%s14174_s1 + $0x984] ss:$16 sps:$4 sm:$0xff]   ;;  %v9787_v4 = vld [vmem:[%s14174_s1 + $0x98c] ss:$16 sps:$4 sm:$0xff]  }
  0xfb   : > { %6684 = vmatpush1.bf16.msra.mxu0 %v9692_v5  ;;  %7372 = vmatpush1.bf16.msra.mxu1 %v9695_v6  ;;  %v9782_v5 = vld [vmem:[%s14174_s1 + $0x980] ss:$16 sps:$4 sm:$0xff]   ;;  %v9785_v6 = vld [vmem:[%s14174_s1 + $0x988] ss:$16 sps:$4 sm:$0xff]  }
  0xfc   : > { %6685 = vmatprep.subr.bf16.mxu0 %v9700_v7  ;;  %7373 = vmatprep.subr.bf16.mxu1 %v9703_v8  ;;  %v9790_v7 = vld [vmem:[%s14174_s1 + $0x9a4] ss:$16 sps:$4 sm:$0xff]   ;;  %v9793_v8 = vld [vmem:[%s14174_s1 + $0x9ac] ss:$16 sps:$4 sm:$0xff]  }
  0xff   : > { %6686 = vmatpush1.bf16.msra.mxu0 %v9698_v9  ;;  %7374 = vmatpush1.bf16.msra.mxu1 %v9701_v10  ;;  %v9788_v9 = vld [vmem:[%s14174_s1 + $0x9a0] ss:$16 sps:$4 sm:$0xff]   ;;  %v9791_v10 = vld [vmem:[%s14174_s1 + $0x9a8] ss:$16 sps:$4 sm:$0xff]  }
 0x100   : > { %6687 = vmatprep.subr.bf16.mxu0 %v9706_v11  ;;  %7375 = vmatprep.subr.bf16.mxu1 %v9709_v12  ;;  %v9796_v11 = vld [vmem:[%s14174_s1 + $0x9c4] ss:$16 sps:$4 sm:$0xff]   ;;  %v9799_v12 = vld [vmem:[%s14174_s1 + $0x9cc] ss:$16 sps:$4 sm:$0xff]  }
 0x103   : > { %6688 = vmatpush1.bf16.msra.mxu0 %v9704_v13  ;;  %7376 = vmatpush1.bf16.msra.mxu1 %v9707_v16  ;;  %v9794_v13 = vld [vmem:[%s14174_s1 + $0x9c0] ss:$16 sps:$4 sm:$0xff]   ;;  %v9797_v16 = vld [vmem:[%s14174_s1 + $0x9c8] ss:$16 sps:$4 sm:$0xff]  }
 0x104   : > { %6700 = vmatprep.subr.bf16.mxu0 %v9712_v17  ;;  %7388 = vmatprep.subr.bf16.mxu1 %v9715_v20  ;;  %v9802_v17 = vld [vmem:[%s14174_s1 + $0x9e4] ss:$16 sps:$4 sm:$0xff]   ;;  %v9805_v20 = vld [vmem:[%s14174_s1 + $0x9ec] ss:$16 sps:$4 sm:$0xff]  }
 0x106   : > { %6690 = vmatmul.mubr.bf16.vlgmr.msra.gmra.mrb[0].mxu0 %v8134_v22  ;;  %7378 = vmatmul.mubr.bf16.vlgmr.msra.gmra.mrb[0].mxu1 %v8134_v22  ;;  %v9800_v22 = vld [vmem:[%s14174_s1 + $0x9e0] ss:$16 sps:$4 sm:$0xff]  }
 0x107   : > { %6701 = vmatpush1.bf16.msra.mxu0 %v9710_v15  ;;  %7389 = vmatpush1.bf16.msra.mxu1 %v9713_v23  ;;  %v9803_v15 = vld [vmem:[%s14174_s1 + $0x9e8] ss:$16 sps:$4 sm:$0xff]   ;;  %v9808_v23 = vld [vmem:[%s14174_s1 + $0xa04] ss:$16 sps:$4 sm:$0xff]  }
 0x108   : > { %6702 = vmatprep.subr.bf16.mxu0 %v9718_v24  ;;  %7390 = vmatprep.subr.bf16.mxu1 %v9721_v18  ;;  %v9811_v24 = vld [vmem:[%s14174_s1 + $0xa0c] ss:$16 sps:$4 sm:$0xff]  }
 0x109   : > { %6732 = vmatprep.mubr.bf16.mxu0 %v8137_v19  ;;  %7420 = vmatprep.mubr.bf16.mxu1 %v8137_v19  ;;  %v11917_v18 = vld [vmem:[%s11040_s5 + $0x28] sm:$0xff] }
 0x10a   : > { %v11920_v19 = vld [vmem:[%s11040_s5 + $0xa8] sm:$0xff] }
 0x10b   : > { %6703 = vmatpush1.bf16.msra.mxu0 %v9716_v25  ;;  %7391 = vmatpush1.bf16.msra.mxu1 %v9719_v26  ;;  %v8136_v25 = vcombine.low %v11715_v21, %v11720_v14  ;;  %v9806_v26 = vld [vmem:[%s14174_s1 + $0xa00] ss:$16 sps:$4 sm:$0xff]   ;;  %v9817_v21 = vld [vmem:[%s14174_s1 + $0xa2c] ss:$16 sps:$4 sm:$0xff]   ;;  %v8139_v14 = vcombine.high %v11917_v18, %v11920_v19 }
 0x10c   : > { %6704 = vmatprep.subr.bf16.mxu0 %v9724_v27  ;;  %7392 = vmatprep.subr.bf16.mxu1 %v9727_v28  ;;  %v9809_v27 = vld [vmem:[%s14174_s1 + $0xa08] ss:$16 sps:$4 sm:$0xff]   ;;  %v9814_v28 = vld [vmem:[%s14174_s1 + $0xa24] ss:$16 sps:$4 sm:$0xff]  }
 0x10f   : > { %6705 = vmatpush1.bf16.msra.mxu0 %v9722_v29  ;;  %7393 = vmatpush1.bf16.msra.mxu1 %v9725_v30  ;;  %v9812_v29 = vld [vmem:[%s14174_s1 + $0xa20] ss:$16 sps:$4 sm:$0xff]   ;;  %v9815_v30 = vld [vmem:[%s14174_s1 + $0xa28] ss:$16 sps:$4 sm:$0xff]  }
 0x110   : > { %6706 = vmatprep.subr.bf16.mxu0 %v9730_v31  ;;  %7394 = vmatprep.subr.bf16.mxu1 %v9733_v32  ;;  %v9820_v31 = vld [vmem:[%s14174_s1 + $0xa44] ss:$16 sps:$4 sm:$0xff]   ;;  %v9823_v32 = vld [vmem:[%s14174_s1 + $0xa4c] ss:$16 sps:$4 sm:$0xff]  }
 0x113   : > { %6707 = vmatpush1.bf16.msra.mxu0 %v9728_v33  ;;  %7395 = vmatpush1.bf16.msra.mxu1 %v9731_v34  ;;  %v9818_v33 = vld [vmem:[%s14174_s1 + $0xa40] ss:$16 sps:$4 sm:$0xff]   ;;  %v9821_v34 = vld [vmem:[%s14174_s1 + $0xa48] ss:$16 sps:$4 sm:$0xff]  }
 0x114   : > { %6708 = vmatprep.subr.bf16.mxu0 %v9736_v35  ;;  %7396 = vmatprep.subr.bf16.mxu1 %v9739_v36  ;;  %v9826_v35 = vld [vmem:[%s14174_s1 + $0xa64] ss:$16 sps:$4 sm:$0xff]   ;;  %v9829_v36 = vld [vmem:[%s14174_s1 + $0xa6c] ss:$16 sps:$4 sm:$0xff]  }
 0x117   : > { %6709 = vmatpush1.bf16.msra.mxu0 %v9734_v37  ;;  %7397 = vmatpush1.bf16.msra.mxu1 %v9737_v38  ;;  %v9824_v37 = vld [vmem:[%s14174_s1 + $0xa60] ss:$16 sps:$4 sm:$0xff]   ;;  %v9827_v38 = vld [vmem:[%s14174_s1 + $0xa68] ss:$16 sps:$4 sm:$0xff]  }
 0x118   : > { %6710 = vmatprep.subr.bf16.mxu0 %v9742_v39  ;;  %7398 = vmatprep.subr.bf16.mxu1 %v9745_v40  ;;  %v9832_v39 = vld [vmem:[%s14174_s1 + $0xa84] ss:$16 sps:$4 sm:$0xff]   ;;  %v9835_v40 = vld [vmem:[%s14174_s1 + $0xa8c] ss:$16 sps:$4 sm:$0xff]  }
 0x11b   : > { %6711 = vmatpush1.bf16.msra.mxu0 %v9740_v41  ;;  %7399 = vmatpush1.bf16.msra.mxu1 %v9743_v42  ;;  %v9830_v41 = vld [vmem:[%s14174_s1 + $0xa80] ss:$16 sps:$4 sm:$0xff]   ;;  %v9833_v42 = vld [vmem:[%s14174_s1 + $0xa88] ss:$16 sps:$4 sm:$0xff]  }
 0x11c   : > { %6712 = vmatprep.subr.bf16.mxu0 %v9748_v43  ;;  %7400 = vmatprep.subr.bf16.mxu1 %v9751_v44  ;;  %v9838_v43 = vld [vmem:[%s14174_s1 + $0xaa4] ss:$16 sps:$4 sm:$0xff]   ;;  %v9841_v44 = vld [vmem:[%s14174_s1 + $0xaac] ss:$16 sps:$4 sm:$0xff]  }
 0x11f   : > { %6713 = vmatpush1.bf16.msra.mxu0 %v9746_v45  ;;  %7401 = vmatpush1.bf16.msra.mxu1 %v9749_v46  ;;  %v9836_v45 = vld [vmem:[%s14174_s1 + $0xaa0] ss:$16 sps:$4 sm:$0xff]   ;;  %v9839_v46 = vld [vmem:[%s14174_s1 + $0xaa8] ss:$16 sps:$4 sm:$0xff]  }
 0x120   : > { %6714 = vmatprep.subr.bf16.mxu0 %v9754_v47  ;;  %7402 = vmatprep.subr.bf16.mxu1 %v9757_v48  ;;  %v9844_v47 = vld [vmem:[%s14174_s1 + $0xac4] ss:$16 sps:$4 sm:$0xff]   ;;  %v9847_v48 = vld [vmem:[%s14174_s1 + $0xacc] ss:$16 sps:$4 sm:$0xff]  }
 0x123   : > { %6715 = vmatpush1.bf16.msra.mxu0 %v9752_v49  ;;  %7403 = vmatpush1.bf16.msra.mxu1 %v9755_v50  ;;  %v9842_v49 = vld [vmem:[%s14174_s1 + $0xac0] ss:$16 sps:$4 sm:$0xff]   ;;  %v9845_v50 = vld [vmem:[%s14174_s1 + $0xac8] ss:$16 sps:$4 sm:$0xff]  }
 0x124   : > { %6716 = vmatprep.subr.bf16.mxu0 %v9760_v51  ;;  %7404 = vmatprep.subr.bf16.mxu1 %v9763_v52  ;;  %v9850_v51 = vld [vmem:[%s14174_s1 + $0xae4] ss:$16 sps:$4 sm:$0xff]   ;;  %v9853_v52 = vld [vmem:[%s14174_s1 + $0xaec] ss:$16 sps:$4 sm:$0xff]  }
 0x127   : > { %6717 = vmatpush1.bf16.msra.mxu0 %v9758_v53  ;;  %7405 = vmatpush1.bf16.msra.mxu1 %v9761_v54  ;;  %v9848_v53 = vld [vmem:[%s14174_s1 + $0xae0] ss:$16 sps:$4 sm:$0xff]   ;;  %v9851_v54 = vld [vmem:[%s14174_s1 + $0xae8] ss:$16 sps:$4 sm:$0xff]  }
 0x128   : > { %6718 = vmatprep.subr.bf16.mxu0 %v9766_v55  ;;  %7406 = vmatprep.subr.bf16.mxu1 %v9769_v56  ;;  %v9856_v55 = vld [vmem:[%s14174_s1 + $0xb04] ss:$16 sps:$4 sm:$0xff]   ;;  %v9859_v56 = vld [vmem:[%s14174_s1 + $0xb0c] ss:$16 sps:$4 sm:$0xff]  }
 0x12b   : > { %6719 = vmatpush1.bf16.msra.mxu0 %v9764_v57  ;;  %7407 = vmatpush1.bf16.msra.mxu1 %v9767_v58  ;;  %v9854_v57 = vld [vmem:[%s14174_s1 + $0xb00] ss:$16 sps:$4 sm:$0xff]   ;;  %v9857_v58 = vld [vmem:[%s14174_s1 + $0xb08] ss:$16 sps:$4 sm:$0xff]  }
 0x12c   : > { %6720 = vmatprep.subr.bf16.mxu0 %v9772_v59  ;;  %7408 = vmatprep.subr.bf16.mxu1 %v9775_v60  ;;  %v9862_v59 = vld [vmem:[%s14174_s1 + $0xb24] ss:$16 sps:$4 sm:$0xff]   ;;  %v9865_v60 = vld [vmem:[%s14174_s1 + $0xb2c] ss:$16 sps:$4 sm:$0xff]  }
 0x12f   : > { %6721 = vmatpush1.bf16.msra.mxu0 %v9770_v61  ;;  %7409 = vmatpush1.bf16.msra.mxu1 %v9773_v62  ;;  %v9860_v61 = vld [vmem:[%s14174_s1 + $0xb20] ss:$16 sps:$4 sm:$0xff]   ;;  %v9863_v62 = vld [vmem:[%s14174_s1 + $0xb28] ss:$16 sps:$4 sm:$0xff]  }
 0x130   : > { %6722 = vmatprep.subr.bf16.mxu0 %v9778_v63  ;;  %7410 = vmatprep.subr.bf16.mxu1 %v9781_v0  ;;  %v9868_v63 = vld [vmem:[%s14174_s1 + $0xb44] ss:$16 sps:$4 sm:$0xff]   ;;  %v9871_v0 = vld [vmem:[%s14174_s1 + $0xb4c] ss:$16 sps:$4 sm:$0xff]  }
 0x133   : > { %6723 = vmatpush1.bf16.msra.mxu0 %v9776_v1  ;;  %7411 = vmatpush1.bf16.msra.mxu1 %v9779_v2  ;;  %v9866_v1 = vld [vmem:[%s14174_s1 + $0xb40] ss:$16 sps:$4 sm:$0xff]   ;;  %v9869_v2 = vld [vmem:[%s14174_s1 + $0xb48] ss:$16 sps:$4 sm:$0xff]  }
 0x134   : > { %6724 = vmatprep.subr.bf16.mxu0 %v9784_v3  ;;  %7412 = vmatprep.subr.bf16.mxu1 %v9787_v4  ;;  %v9874_v3 = vld [vmem:[%s14174_s1 + $0xb64] ss:$16 sps:$4 sm:$0xff]   ;;  %v9877_v4 = vld [vmem:[%s14174_s1 + $0xb6c] ss:$16 sps:$4 sm:$0xff]  }
 0x137   : > { %6725 = vmatpush1.bf16.msra.mxu0 %v9782_v5  ;;  %7413 = vmatpush1.bf16.msra.mxu1 %v9785_v6  ;;  %v9872_v5 = vld [vmem:[%s14174_s1 + $0xb60] ss:$16 sps:$4 sm:$0xff]   ;;  %v9875_v6 = vld [vmem:[%s14174_s1 + $0xb68] ss:$16 sps:$4 sm:$0xff]  }
 0x138   : > { %6726 = vmatprep.subr.bf16.mxu0 %v9790_v7  ;;  %7414 = vmatprep.subr.bf16.mxu1 %v9793_v8  ;;  %v9880_v7 = vld [vmem:[%s14174_s1 + $0xb84] ss:$16 sps:$4 sm:$0xff]   ;;  %v9883_v8 = vld [vmem:[%s14174_s1 + $0xb8c] ss:$16 sps:$4 sm:$0xff]  }
 0x13b   : > { %6727 = vmatpush1.bf16.msra.mxu0 %v9788_v9  ;;  %7415 = vmatpush1.bf16.msra.mxu1 %v9791_v10  ;;  %v9878_v9 = vld [vmem:[%s14174_s1 + $0xb80] ss:$16 sps:$4 sm:$0xff]   ;;  %v9881_v10 = vld [vmem:[%s14174_s1 + $0xb88] ss:$16 sps:$4 sm:$0xff]  }
 0x13c   : > { %6728 = vmatprep.subr.bf16.mxu0 %v9796_v11  ;;  %7416 = vmatprep.subr.bf16.mxu1 %v9799_v12  ;;  %v9886_v11 = vld [vmem:[%s14174_s1 + $0xba4] ss:$16 sps:$4 sm:$0xff]   ;;  %v9889_v12 = vld [vmem:[%s14174_s1 + $0xbac] ss:$16 sps:$4 sm:$0xff]  }
 0x13f   : > { %6729 = vmatpush1.bf16.msra.mxu0 %v9794_v13  ;;  %7417 = vmatpush1.bf16.msra.mxu1 %v9797_v16  ;;  %v9884_v13 = vld [vmem:[%s14174_s1 + $0xba0] ss:$16 sps:$4 sm:$0xff]   ;;  %v9887_v16 = vld [vmem:[%s14174_s1 + $0xba8] ss:$16 sps:$4 sm:$0xff]  }
 0x140   : > { %6730 = vmatprep.subr.bf16.mxu0 %v9802_v17  ;;  %7418 = vmatprep.subr.bf16.mxu1 %v9805_v20  ;;  %v9892_v17 = vld [vmem:[%s14174_s1 + $0xbc4] ss:$16 sps:$4 sm:$0xff]   ;;  %v9895_v20 = vld [vmem:[%s14174_s1 + $0xbcc] ss:$16 sps:$4 sm:$0xff]  }
 0x143   : > { %6731 = vmatpush1.bf16.msra.mxu0 %v9800_v22  ;;  %7419 = vmatpush1.bf16.msra.mxu1 %v9803_v15  ;;  %v9890_v22 = vld [vmem:[%s14174_s1 + $0xbc0] ss:$16 sps:$4 sm:$0xff]   ;;  %v9893_v15 = vld [vmem:[%s14174_s1 + $0xbc8] ss:$16 sps:$4 sm:$0xff]  }
 0x144   : > { %6743 = vmatprep.subr.bf16.mxu0 %v9808_v23  ;;  %7431 = vmatprep.subr.bf16.mxu1 %v9811_v24  ;;  %v9898_v23 = vld [vmem:[%s14174_s1 + $0xbe4] ss:$16 sps:$4 sm:$0xff]   ;;  %v9901_v24 = vld [vmem:[%s14174_s1 + $0xbec] ss:$16 sps:$4 sm:$0xff]  }
 0x146   : > { %6733 = vmatmul.mubr.bf16.vlgmr.msra.gmra.mrb[0].mxu0 %v8136_v25  ;;  %7421 = vmatmul.mubr.bf16.vlgmr.msra.gmra.mrb[0].mxu1 %v8136_v25  ;;  %v9896_v25 = vld [vmem:[%s14174_s1 + $0xbe0] ss:$16 sps:$4 sm:$0xff]  }
 0x147   : > { %6744 = vmatpush1.bf16.msra.mxu0 %v9806_v26  ;;  %7432 = vmatpush1.bf16.msra.mxu1 %v9809_v27  ;;  %v9899_v26 = vld [vmem:[%s14174_s1 + $0xbe8] ss:$16 sps:$4 sm:$0xff]   ;;  %v9904_v27 = vld [vmem:[%s14174_s1 + $0xc04] ss:$16 sps:$4 sm:$0xff]  }
 0x148   : > { %6745 = vmatprep.subr.bf16.mxu0 %v9814_v28  ;;  %7433 = vmatprep.subr.bf16.mxu1 %v9817_v21  ;;  %v9907_v28 = vld [vmem:[%s14174_s1 + $0xc0c] ss:$16 sps:$4 sm:$0xff]   ;;  %v12119_v21 = vld [vmem:[%s11040_s5 + $0x30] sm:$0xff] }
 0x149   : > { %6775 = vmatprep.mubr.bf16.mxu0 %v8139_v14  ;;  %7463 = vmatprep.mubr.bf16.mxu1 %v8139_v14  ;;  %v12122_v14 = vld [vmem:[%s11040_s5 + $0xb0] sm:$0xff] }
 0x14b   : > { %6746 = vmatpush1.bf16.msra.mxu0 %v9812_v29  ;;  %7434 = vmatpush1.bf16.msra.mxu1 %v9815_v30  ;;  %v8138_v29 = vcombine.low %v11917_v18, %v11920_v19  ;;  %v9902_v30 = vld [vmem:[%s14174_s1 + $0xc00] ss:$16 sps:$4 sm:$0xff]   ;;  %v9913_v18 = vld [vmem:[%s14174_s1 + $0xc2c] ss:$16 sps:$4 sm:$0xff]   ;;  %v8141_v19 = vcombine.high %v12119_v21, %v12122_v14 }
 0x14c   : > { %6747 = vmatprep.subr.bf16.mxu0 %v9820_v31  ;;  %7435 = vmatprep.subr.bf16.mxu1 %v9823_v32  ;;  %v9905_v31 = vld [vmem:[%s14174_s1 + $0xc08] ss:$16 sps:$4 sm:$0xff]   ;;  %v9910_v32 = vld [vmem:[%s14174_s1 + $0xc24] ss:$16 sps:$4 sm:$0xff]  }
 0x14f   : > { %6748 = vmatpush1.bf16.msra.mxu0 %v9818_v33  ;;  %7436 = vmatpush1.bf16.msra.mxu1 %v9821_v34  ;;  %v9908_v33 = vld [vmem:[%s14174_s1 + $0xc20] ss:$16 sps:$4 sm:$0xff]   ;;  %v9911_v34 = vld [vmem:[%s14174_s1 + $0xc28] ss:$16 sps:$4 sm:$0xff]  }
 0x150   : > { %6749 = vmatprep.subr.bf16.mxu0 %v9826_v35  ;;  %7437 = vmatprep.subr.bf16.mxu1 %v9829_v36  ;;  %v9916_v35 = vld [vmem:[%s14174_s1 + $0xc44] ss:$16 sps:$4 sm:$0xff]   ;;  %v9919_v36 = vld [vmem:[%s14174_s1 + $0xc4c] ss:$16 sps:$4 sm:$0xff]  }
 0x153   : > { %6750 = vmatpush1.bf16.msra.mxu0 %v9824_v37  ;;  %7438 = vmatpush1.bf16.msra.mxu1 %v9827_v38  ;;  %v9914_v37 = vld [vmem:[%s14174_s1 + $0xc40] ss:$16 sps:$4 sm:$0xff]   ;;  %v9917_v38 = vld [vmem:[%s14174_s1 + $0xc48] ss:$16 sps:$4 sm:$0xff]  }
 0x154   : > { %6751 = vmatprep.subr.bf16.mxu0 %v9832_v39  ;;  %7439 = vmatprep.subr.bf16.mxu1 %v9835_v40  ;;  %v9922_v39 = vld [vmem:[%s14174_s1 + $0xc64] ss:$16 sps:$4 sm:$0xff]   ;;  %v9925_v40 = vld [vmem:[%s14174_s1 + $0xc6c] ss:$16 sps:$4 sm:$0xff]  }
 0x157   : > { %6752 = vmatpush1.bf16.msra.mxu0 %v9830_v41  ;;  %7440 = vmatpush1.bf16.msra.mxu1 %v9833_v42  ;;  %v9920_v41 = vld [vmem:[%s14174_s1 + $0xc60] ss:$16 sps:$4 sm:$0xff]   ;;  %v9923_v42 = vld [vmem:[%s14174_s1 + $0xc68] ss:$16 sps:$4 sm:$0xff]  }
 0x158   : > { %6753 = vmatprep.subr.bf16.mxu0 %v9838_v43  ;;  %7441 = vmatprep.subr.bf16.mxu1 %v9841_v44  ;;  %v9928_v43 = vld [vmem:[%s14174_s1 + $0xc84] ss:$16 sps:$4 sm:$0xff]   ;;  %v9931_v44 = vld [vmem:[%s14174_s1 + $0xc8c] ss:$16 sps:$4 sm:$0xff]  }
 0x15b   : > { %6754 = vmatpush1.bf16.msra.mxu0 %v9836_v45  ;;  %7442 = vmatpush1.bf16.msra.mxu1 %v9839_v46  ;;  %v9926_v45 = vld [vmem:[%s14174_s1 + $0xc80] ss:$16 sps:$4 sm:$0xff]   ;;  %v9929_v46 = vld [vmem:[%s14174_s1 + $0xc88] ss:$16 sps:$4 sm:$0xff]  }
 0x15c   : > { %6755 = vmatprep.subr.bf16.mxu0 %v9844_v47  ;;  %7443 = vmatprep.subr.bf16.mxu1 %v9847_v48  ;;  %v9934_v47 = vld [vmem:[%s14174_s1 + $0xca4] ss:$16 sps:$4 sm:$0xff]   ;;  %v9937_v48 = vld [vmem:[%s14174_s1 + $0xcac] ss:$16 sps:$4 sm:$0xff]  }
 0x15f   : > { %6756 = vmatpush1.bf16.msra.mxu0 %v9842_v49  ;;  %7444 = vmatpush1.bf16.msra.mxu1 %v9845_v50  ;;  %v9932_v49 = vld [vmem:[%s14174_s1 + $0xca0] ss:$16 sps:$4 sm:$0xff]   ;;  %v9935_v50 = vld [vmem:[%s14174_s1 + $0xca8] ss:$16 sps:$4 sm:$0xff]  }
 0x160   : > { %6757 = vmatprep.subr.bf16.mxu0 %v9850_v51  ;;  %7445 = vmatprep.subr.bf16.mxu1 %v9853_v52  ;;  %v9940_v51 = vld [vmem:[%s14174_s1 + $0xcc4] ss:$16 sps:$4 sm:$0xff]   ;;  %v9943_v52 = vld [vmem:[%s14174_s1 + $0xccc] ss:$16 sps:$4 sm:$0xff]  }
 0x163   : > { %6758 = vmatpush1.bf16.msra.mxu0 %v9848_v53  ;;  %7446 = vmatpush1.bf16.msra.mxu1 %v9851_v54  ;;  %v9938_v53 = vld [vmem:[%s14174_s1 + $0xcc0] ss:$16 sps:$4 sm:$0xff]   ;;  %v9941_v54 = vld [vmem:[%s14174_s1 + $0xcc8] ss:$16 sps:$4 sm:$0xff]  }
 0x164   : > { %6759 = vmatprep.subr.bf16.mxu0 %v9856_v55  ;;  %7447 = vmatprep.subr.bf16.mxu1 %v9859_v56  ;;  %v9946_v55 = vld [vmem:[%s14174_s1 + $0xce4] ss:$16 sps:$4 sm:$0xff]   ;;  %v9949_v56 = vld [vmem:[%s14174_s1 + $0xcec] ss:$16 sps:$4 sm:$0xff]  }
 0x167   : > { %6760 = vmatpush1.bf16.msra.mxu0 %v9854_v57  ;;  %7448 = vmatpush1.bf16.msra.mxu1 %v9857_v58  ;;  %v9944_v57 = vld [vmem:[%s14174_s1 + $0xce0] ss:$16 sps:$4 sm:$0xff]   ;;  %v9947_v58 = vld [vmem:[%s14174_s1 + $0xce8] ss:$16 sps:$4 sm:$0xff]  }
 0x168   : > { %6761 = vmatprep.subr.bf16.mxu0 %v9862_v59  ;;  %7449 = vmatprep.subr.bf16.mxu1 %v9865_v60  ;;  %v9952_v59 = vld [vmem:[%s14174_s1 + $0xd04] ss:$16 sps:$4 sm:$0xff]   ;;  %v9955_v60 = vld [vmem:[%s14174_s1 + $0xd0c] ss:$16 sps:$4 sm:$0xff]  }
 0x16b   : > { %6762 = vmatpush1.bf16.msra.mxu0 %v9860_v61  ;;  %7450 = vmatpush1.bf16.msra.mxu1 %v9863_v62  ;;  %v9950_v61 = vld [vmem:[%s14174_s1 + $0xd00] ss:$16 sps:$4 sm:$0xff]   ;;  %v9953_v62 = vld [vmem:[%s14174_s1 + $0xd08] ss:$16 sps:$4 sm:$0xff]  }
 0x16c   : > { %6763 = vmatprep.subr.bf16.mxu0 %v9868_v63  ;;  %7451 = vmatprep.subr.bf16.mxu1 %v9871_v0  ;;  %v9958_v63 = vld [vmem:[%s14174_s1 + $0xd24] ss:$16 sps:$4 sm:$0xff]   ;;  %v9961_v0 = vld [vmem:[%s14174_s1 + $0xd2c] ss:$16 sps:$4 sm:$0xff]  }
 0x16f   : > { %6764 = vmatpush1.bf16.msra.mxu0 %v9866_v1  ;;  %7452 = vmatpush1.bf16.msra.mxu1 %v9869_v2  ;;  %v9956_v1 = vld [vmem:[%s14174_s1 + $0xd20] ss:$16 sps:$4 sm:$0xff]   ;;  %v9959_v2 = vld [vmem:[%s14174_s1 + $0xd28] ss:$16 sps:$4 sm:$0xff]  }
 0x170   : > { %6765 = vmatprep.subr.bf16.mxu0 %v9874_v3  ;;  %7453 = vmatprep.subr.bf16.mxu1 %v9877_v4  ;;  %v9964_v3 = vld [vmem:[%s14174_s1 + $0xd44] ss:$16 sps:$4 sm:$0xff]   ;;  %v9967_v4 = vld [vmem:[%s14174_s1 + $0xd4c] ss:$16 sps:$4 sm:$0xff]  }
 0x173   : > { %6766 = vmatpush1.bf16.msra.mxu0 %v9872_v5  ;;  %7454 = vmatpush1.bf16.msra.mxu1 %v9875_v6  ;;  %v9962_v5 = vld [vmem:[%s14174_s1 + $0xd40] ss:$16 sps:$4 sm:$0xff]   ;;  %v9965_v6 = vld [vmem:[%s14174_s1 + $0xd48] ss:$16 sps:$4 sm:$0xff]  }
 0x174   : > { %6767 = vmatprep.subr.bf16.mxu0 %v9880_v7  ;;  %7455 = vmatprep.subr.bf16.mxu1 %v9883_v8  ;;  %v9970_v7 = vld [vmem:[%s14174_s1 + $0xd64] ss:$16 sps:$4 sm:$0xff]   ;;  %v9973_v8 = vld [vmem:[%s14174_s1 + $0xd6c] ss:$16 sps:$4 sm:$0xff]  }
 0x177   : > { %6768 = vmatpush1.bf16.msra.mxu0 %v9878_v9  ;;  %7456 = vmatpush1.bf16.msra.mxu1 %v9881_v10  ;;  %v9968_v9 = vld [vmem:[%s14174_s1 + $0xd60] ss:$16 sps:$4 sm:$0xff]   ;;  %v9971_v10 = vld [vmem:[%s14174_s1 + $0xd68] ss:$16 sps:$4 sm:$0xff]  }
 0x178   : > { %6769 = vmatprep.subr.bf16.mxu0 %v9886_v11  ;;  %7457 = vmatprep.subr.bf16.mxu1 %v9889_v12  ;;  %v9976_v11 = vld [vmem:[%s14174_s1 + $0xd84] ss:$16 sps:$4 sm:$0xff]   ;;  %v9979_v12 = vld [vmem:[%s14174_s1 + $0xd8c] ss:$16 sps:$4 sm:$0xff]  }
 0x17b   : > { %6770 = vmatpush1.bf16.msra.mxu0 %v9884_v13  ;;  %7458 = vmatpush1.bf16.msra.mxu1 %v9887_v16  ;;  %v9974_v13 = vld [vmem:[%s14174_s1 + $0xd80] ss:$16 sps:$4 sm:$0xff]   ;;  %v9977_v16 = vld [vmem:[%s14174_s1 + $0xd88] ss:$16 sps:$4 sm:$0xff]  }
 0x17c   : > { %6771 = vmatprep.subr.bf16.mxu0 %v9892_v17  ;;  %7459 = vmatprep.subr.bf16.mxu1 %v9895_v20  ;;  %v9982_v17 = vld [vmem:[%s14174_s1 + $0xda4] ss:$16 sps:$4 sm:$0xff]   ;;  %v9985_v20 = vld [vmem:[%s14174_s1 + $0xdac] ss:$16 sps:$4 sm:$0xff]  }
 0x17f   : > { %6772 = vmatpush1.bf16.msra.mxu0 %v9890_v22  ;;  %7460 = vmatpush1.bf16.msra.mxu1 %v9893_v15  ;;  %v9980_v22 = vld [vmem:[%s14174_s1 + $0xda0] ss:$16 sps:$4 sm:$0xff]   ;;  %v9983_v15 = vld [vmem:[%s14174_s1 + $0xda8] ss:$16 sps:$4 sm:$0xff]  }
 0x180   : > { %6773 = vmatprep.subr.bf16.mxu0 %v9898_v23  ;;  %7461 = vmatprep.subr.bf16.mxu1 %v9901_v24  ;;  %v9988_v23 = vld [vmem:[%s14174_s1 + $0xdc4] ss:$16 sps:$4 sm:$0xff]   ;;  %v9991_v24 = vld [vmem:[%s14174_s1 + $0xdcc] ss:$16 sps:$4 sm:$0xff]  }
 0x183   : > { %6774 = vmatpush1.bf16.msra.mxu0 %v9896_v25  ;;  %7462 = vmatpush1.bf16.msra.mxu1 %v9899_v26  ;;  %v9986_v25 = vld [vmem:[%s14174_s1 + $0xdc0] ss:$16 sps:$4 sm:$0xff]   ;;  %v9989_v26 = vld [vmem:[%s14174_s1 + $0xdc8] ss:$16 sps:$4 sm:$0xff]  }
 0x184   : > { %6786 = vmatprep.subr.bf16.mxu0 %v9904_v27  ;;  %7474 = vmatprep.subr.bf16.mxu1 %v9907_v28  ;;  %v9994_v27 = vld [vmem:[%s14174_s1 + $0xde4] ss:$16 sps:$4 sm:$0xff]   ;;  %v9997_v28 = vld [vmem:[%s14174_s1 + $0xdec] ss:$16 sps:$4 sm:$0xff]  }
 0x186   : > { %6776 = vmatmul.mubr.bf16.vlgmr.msra.gmra.mrb[0].mxu0 %v8138_v29  ;;  %7464 = vmatmul.mubr.bf16.vlgmr.msra.gmra.mrb[0].mxu1 %v8138_v29  ;;  %v9992_v29 = vld [vmem:[%s14174_s1 + $0xde0] ss:$16 sps:$4 sm:$0xff]  }
 0x187   : > { %6787 = vmatpush1.bf16.msra.mxu0 %v9902_v30  ;;  %7475 = vmatpush1.bf16.msra.mxu1 %v9905_v31  ;;  %v9995_v30 = vld [vmem:[%s14174_s1 + $0xde8] ss:$16 sps:$4 sm:$0xff]   ;;  %v10000_v31 = vld [vmem:[%s14174_s1 + $0xe04] ss:$16 sps:$4 sm:$0xff]  }
 0x188   : > { %6788 = vmatprep.subr.bf16.mxu0 %v9910_v32  ;;  %7476 = vmatprep.subr.bf16.mxu1 %v9913_v18  ;;  %v10003_v32 = vld [vmem:[%s14174_s1 + $0xe0c] ss:$16 sps:$4 sm:$0xff]  }
 0x189   : > { %6818 = vmatprep.mubr.bf16.mxu0 %v8141_v19  ;;  %7506 = vmatprep.mubr.bf16.mxu1 %v8141_v19  ;;  %v12321_v18 = vld [vmem:[%s11040_s5 + $0x38] sm:$0xff] }
 0x18a   : > { %v12324_v19 = vld [vmem:[%s11040_s5 + $0xb8] sm:$0xff] }
 0x18b   : > { %6789 = vmatpush1.bf16.msra.mxu0 %v9908_v33  ;;  %7477 = vmatpush1.bf16.msra.mxu1 %v9911_v34  ;;  %v8140_v33 = vcombine.low %v12119_v21, %v12122_v14  ;;  %v9998_v34 = vld [vmem:[%s14174_s1 + $0xe00] ss:$16 sps:$4 sm:$0xff]   ;;  %v10009_v21 = vld [vmem:[%s14174_s1 + $0xe2c] ss:$16 sps:$4 sm:$0xff]   ;;  %v8143_v14 = vcombine.high %v12321_v18, %v12324_v19 }
 0x18c   : > { %6790 = vmatprep.subr.bf16.mxu0 %v9916_v35  ;;  %7478 = vmatprep.subr.bf16.mxu1 %v9919_v36  ;;  %v10001_v35 = vld [vmem:[%s14174_s1 + $0xe08] ss:$16 sps:$4 sm:$0xff]   ;;  %v10006_v36 = vld [vmem:[%s14174_s1 + $0xe24] ss:$16 sps:$4 sm:$0xff]  }
 0x18f   : > { %6791 = vmatpush1.bf16.msra.mxu0 %v9914_v37  ;;  %7479 = vmatpush1.bf16.msra.mxu1 %v9917_v38  ;;  %v10004_v37 = vld [vmem:[%s14174_s1 + $0xe20] ss:$16 sps:$4 sm:$0xff]   ;;  %v10007_v38 = vld [vmem:[%s14174_s1 + $0xe28] ss:$16 sps:$4 sm:$0xff]  }
 0x190   : > { %6792 = vmatprep.subr.bf16.mxu0 %v9922_v39  ;;  %7480 = vmatprep.subr.bf16.mxu1 %v9925_v40  ;;  %v10012_v39 = vld [vmem:[%s14174_s1 + $0xe44] ss:$16 sps:$4 sm:$0xff]   ;;  %v10015_v40 = vld [vmem:[%s14174_s1 + $0xe4c] ss:$16 sps:$4 sm:$0xff]  }
 0x193   : > { %6793 = vmatpush1.bf16.msra.mxu0 %v9920_v41  ;;  %7481 = vmatpush1.bf16.msra.mxu1 %v9923_v42  ;;  %v10010_v41 = vld [vmem:[%s14174_s1 + $0xe40] ss:$16 sps:$4 sm:$0xff]   ;;  %v10013_v42 = vld [vmem:[%s14174_s1 + $0xe48] ss:$16 sps:$4 sm:$0xff]  }
 0x194   : > { %6794 = vmatprep.subr.bf16.mxu0 %v9928_v43  ;;  %7482 = vmatprep.subr.bf16.mxu1 %v9931_v44  ;;  %v10018_v43 = vld [vmem:[%s14174_s1 + $0xe64] ss:$16 sps:$4 sm:$0xff]   ;;  %v10021_v44 = vld [vmem:[%s14174_s1 + $0xe6c] ss:$16 sps:$4 sm:$0xff]  }
 0x197   : > { %6795 = vmatpush1.bf16.msra.mxu0 %v9926_v45  ;;  %7483 = vmatpush1.bf16.msra.mxu1 %v9929_v46  ;;  %v10016_v45 = vld [vmem:[%s14174_s1 + $0xe60] ss:$16 sps:$4 sm:$0xff]   ;;  %v10019_v46 = vld [vmem:[%s14174_s1 + $0xe68] ss:$16 sps:$4 sm:$0xff]  }
 0x198   : > { %6796 = vmatprep.subr.bf16.mxu0 %v9934_v47  ;;  %7484 = vmatprep.subr.bf16.mxu1 %v9937_v48  ;;  %v10024_v47 = vld [vmem:[%s14174_s1 + $0xe84] ss:$16 sps:$4 sm:$0xff]   ;;  %v10027_v48 = vld [vmem:[%s14174_s1 + $0xe8c] ss:$16 sps:$4 sm:$0xff]  }
 0x19b   : > { %6797 = vmatpush1.bf16.msra.mxu0 %v9932_v49  ;;  %7485 = vmatpush1.bf16.msra.mxu1 %v9935_v50  ;;  %v10022_v49 = vld [vmem:[%s14174_s1 + $0xe80] ss:$16 sps:$4 sm:$0xff]   ;;  %v10025_v50 = vld [vmem:[%s14174_s1 + $0xe88] ss:$16 sps:$4 sm:$0xff]  }
 0x19c   : > { %6798 = vmatprep.subr.bf16.mxu0 %v9940_v51  ;;  %7486 = vmatprep.subr.bf16.mxu1 %v9943_v52  ;;  %v10030_v51 = vld [vmem:[%s14174_s1 + $0xea4] ss:$16 sps:$4 sm:$0xff]   ;;  %v10033_v52 = vld [vmem:[%s14174_s1 + $0xeac] ss:$16 sps:$4 sm:$0xff]  }
 0x19f   : > { %6799 = vmatpush1.bf16.msra.mxu0 %v9938_v53  ;;  %7487 = vmatpush1.bf16.msra.mxu1 %v9941_v54  ;;  %v10028_v53 = vld [vmem:[%s14174_s1 + $0xea0] ss:$16 sps:$4 sm:$0xff]   ;;  %v10031_v54 = vld [vmem:[%s14174_s1 + $0xea8] ss:$16 sps:$4 sm:$0xff]  }
 0x1a0   : > { %6800 = vmatprep.subr.bf16.mxu0 %v9946_v55  ;;  %7488 = vmatprep.subr.bf16.mxu1 %v9949_v56  ;;  %v10036_v55 = vld [vmem:[%s14174_s1 + $0xec4] ss:$16 sps:$4 sm:$0xff]   ;;  %v10039_v56 = vld [vmem:[%s14174_s1 + $0xecc] ss:$16 sps:$4 sm:$0xff]  }
 0x1a3   : > { %6801 = vmatpush1.bf16.msra.mxu0 %v9944_v57  ;;  %7489 = vmatpush1.bf16.msra.mxu1 %v9947_v58  ;;  %v10034_v57 = vld [vmem:[%s14174_s1 + $0xec0] ss:$16 sps:$4 sm:$0xff]   ;;  %v10037_v58 = vld [vmem:[%s14174_s1 + $0xec8] ss:$16 sps:$4 sm:$0xff]  }
 0x1a4   : > { %6802 = vmatprep.subr.bf16.mxu0 %v9952_v59  ;;  %7490 = vmatprep.subr.bf16.mxu1 %v9955_v60  ;;  %v10042_v59 = vld [vmem:[%s14174_s1 + $0xee4] ss:$16 sps:$4 sm:$0xff]   ;;  %v10045_v60 = vld [vmem:[%s14174_s1 + $0xeec] ss:$16 sps:$4 sm:$0xff]  }
 0x1a7   : > { %6803 = vmatpush1.bf16.msra.mxu0 %v9950_v61  ;;  %7491 = vmatpush1.bf16.msra.mxu1 %v9953_v62  ;;  %v10040_v61 = vld [vmem:[%s14174_s1 + $0xee0] ss:$16 sps:$4 sm:$0xff]   ;;  %v10043_v62 = vld [vmem:[%s14174_s1 + $0xee8] ss:$16 sps:$4 sm:$0xff]  }
 0x1a8   : > { %6804 = vmatprep.subr.bf16.mxu0 %v9958_v63  ;;  %7492 = vmatprep.subr.bf16.mxu1 %v9961_v0  ;;  %v10048_v63 = vld [vmem:[%s14174_s1 + $0xf04] ss:$16 sps:$4 sm:$0xff]   ;;  %v10051_v0 = vld [vmem:[%s14174_s1 + $0xf0c] ss:$16 sps:$4 sm:$0xff]  }
 0x1ab   : > { %6805 = vmatpush1.bf16.msra.mxu0 %v9956_v1  ;;  %7493 = vmatpush1.bf16.msra.mxu1 %v9959_v2  ;;  %v10046_v1 = vld [vmem:[%s14174_s1 + $0xf00] ss:$16 sps:$4 sm:$0xff]   ;;  %v10049_v2 = vld [vmem:[%s14174_s1 + $0xf08] ss:$16 sps:$4 sm:$0xff]  }
 0x1ac   : > { %6806 = vmatprep.subr.bf16.mxu0 %v9964_v3  ;;  %7494 = vmatprep.subr.bf16.mxu1 %v9967_v4  ;;  %v10054_v3 = vld [vmem:[%s14174_s1 + $0xf24] ss:$16 sps:$4 sm:$0xff]   ;;  %v10057_v4 = vld [vmem:[%s14174_s1 + $0xf2c] ss:$16 sps:$4 sm:$0xff]  }
 0x1af   : > { %6807 = vmatpush1.bf16.msra.mxu0 %v9962_v5  ;;  %7495 = vmatpush1.bf16.msra.mxu1 %v9965_v6  ;;  %v10052_v5 = vld [vmem:[%s14174_s1 + $0xf20] ss:$16 sps:$4 sm:$0xff]   ;;  %v10055_v6 = vld [vmem:[%s14174_s1 + $0xf28] ss:$16 sps:$4 sm:$0xff]  }
 0x1b0   : > { %6808 = vmatprep.subr.bf16.mxu0 %v9970_v7  ;;  %7496 = vmatprep.subr.bf16.mxu1 %v9973_v8  ;;  %v10060_v7 = vld [vmem:[%s14174_s1 + $0xf44] ss:$16 sps:$4 sm:$0xff]   ;;  %v10063_v8 = vld [vmem:[%s14174_s1 + $0xf4c] ss:$16 sps:$4 sm:$0xff]  }
 0x1b3   : > { %6809 = vmatpush1.bf16.msra.mxu0 %v9968_v9  ;;  %7497 = vmatpush1.bf16.msra.mxu1 %v9971_v10  ;;  %v10058_v9 = vld [vmem:[%s14174_s1 + $0xf40] ss:$16 sps:$4 sm:$0xff]   ;;  %v10061_v10 = vld [vmem:[%s14174_s1 + $0xf48] ss:$16 sps:$4 sm:$0xff]  }
 0x1b4   : > { %6810 = vmatprep.subr.bf16.mxu0 %v9976_v11  ;;  %7498 = vmatprep.subr.bf16.mxu1 %v9979_v12  ;;  %v10066_v11 = vld [vmem:[%s14174_s1 + $0xf64] ss:$16 sps:$4 sm:$0xff]   ;;  %v10069_v12 = vld [vmem:[%s14174_s1 + $0xf6c] ss:$16 sps:$4 sm:$0xff]  }
 0x1b7   : > { %6811 = vmatpush1.bf16.msra.mxu0 %v9974_v13  ;;  %7499 = vmatpush1.bf16.msra.mxu1 %v9977_v16  ;;  %v10064_v13 = vld [vmem:[%s14174_s1 + $0xf60] ss:$16 sps:$4 sm:$0xff]   ;;  %v10067_v16 = vld [vmem:[%s14174_s1 + $0xf68] ss:$16 sps:$4 sm:$0xff]  }
 0x1b8   : > { %6812 = vmatprep.subr.bf16.mxu0 %v9982_v17  ;;  %7500 = vmatprep.subr.bf16.mxu1 %v9985_v20  ;;  %v10072_v17 = vld [vmem:[%s14174_s1 + $0xf84] ss:$16 sps:$4 sm:$0xff]   ;;  %v10075_v20 = vld [vmem:[%s14174_s1 + $0xf8c] ss:$16 sps:$4 sm:$0xff]  }
 0x1bb   : > { %6813 = vmatpush1.bf16.msra.mxu0 %v9980_v22  ;;  %7501 = vmatpush1.bf16.msra.mxu1 %v9983_v15  ;;  %v10070_v22 = vld [vmem:[%s14174_s1 + $0xf80] ss:$16 sps:$4 sm:$0xff]   ;;  %v10073_v15 = vld [vmem:[%s14174_s1 + $0xf88] ss:$16 sps:$4 sm:$0xff]  }
 0x1bc   : > { %6814 = vmatprep.subr.bf16.mxu0 %v9988_v23  ;;  %7502 = vmatprep.subr.bf16.mxu1 %v9991_v24  ;;  %v10078_v23 = vld [vmem:[%s14174_s1 + $0xfa4] ss:$16 sps:$4 sm:$0xff]   ;;  %v10081_v24 = vld [vmem:[%s14174_s1 + $0xfac] ss:$16 sps:$4 sm:$0xff]  }
 0x1bf   : > { %6815 = vmatpush1.bf16.msra.mxu0 %v9986_v25  ;;  %7503 = vmatpush1.bf16.msra.mxu1 %v9989_v26  ;;  %v10076_v25 = vld [vmem:[%s14174_s1 + $0xfa0] ss:$16 sps:$4 sm:$0xff]   ;;  %v10079_v26 = vld [vmem:[%s14174_s1 + $0xfa8] ss:$16 sps:$4 sm:$0xff]  }
 0x1c0   : > { %6816 = vmatprep.subr.bf16.mxu0 %v9994_v27  ;;  %7504 = vmatprep.subr.bf16.mxu1 %v9997_v28  ;;  %v10084_v27 = vld [vmem:[%s14174_s1 + $0xfc4] ss:$16 sps:$4 sm:$0xff]   ;;  %v10087_v28 = vld [vmem:[%s14174_s1 + $0xfcc] ss:$16 sps:$4 sm:$0xff]  }
 0x1c3   : > { %6817 = vmatpush1.bf16.msra.mxu0 %v9992_v29  ;;  %7505 = vmatpush1.bf16.msra.mxu1 %v9995_v30  ;;  %v10082_v29 = vld [vmem:[%s14174_s1 + $0xfc0] ss:$16 sps:$4 sm:$0xff]   ;;  %v10085_v30 = vld [vmem:[%s14174_s1 + $0xfc8] ss:$16 sps:$4 sm:$0xff]  }
 0x1c4   : > { %6829 = vmatprep.subr.bf16.mxu0 %v10000_v31  ;;  %7517 = vmatprep.subr.bf16.mxu1 %v10003_v32  ;;  %v10090_v31 = vld [vmem:[%s14174_s1 + $0xfe4] ss:$16 sps:$4 sm:$0xff]   ;;  %v10093_v32 = vld [vmem:[%s14174_s1 + $0xfec] ss:$16 sps:$4 sm:$0xff]  }
 0x1c6   : > { %6819 = vmatmul.mubr.bf16.vlgmr.msra.gmra.mrb[0].mxu0 %v8140_v33  ;;  %7507 = vmatmul.mubr.bf16.vlgmr.msra.gmra.mrb[0].mxu1 %v8140_v33  ;;  %v10088_v33 = vld [vmem:[%s14174_s1 + $0xfe0] ss:$16 sps:$4 sm:$0xff]  }
 0x1c7   : > { %6830 = vmatpush1.bf16.msra.mxu0 %v9998_v34  ;;  %7518 = vmatpush1.bf16.msra.mxu1 %v10001_v35  ;;  %v10091_v34 = vld [vmem:[%s14174_s1 + $0xfe8] ss:$16 sps:$4 sm:$0xff]   ;;  %v10096_v35 = vld [vmem:[%s14174_s1 + $0x1004] ss:$16 sps:$4 sm:$0xff]  }
 0x1c8   : > { %6831 = vmatprep.subr.bf16.mxu0 %v10006_v36  ;;  %7519 = vmatprep.subr.bf16.mxu1 %v10009_v21  ;;  %v10099_v36 = vld [vmem:[%s14174_s1 + $0x100c] ss:$16 sps:$4 sm:$0xff]   ;;  %v12523_v21 = vld [vmem:[%s11040_s5 + $0x40] sm:$0xff] }
 0x1c9   : > { %6861 = vmatprep.mubr.bf16.mxu0 %v8143_v14  ;;  %7549 = vmatprep.mubr.bf16.mxu1 %v8143_v14  ;;  %v12526_v14 = vld [vmem:[%s11040_s5 + $0xc0] sm:$0xff] }
 0x1cb   : > { %6832 = vmatpush1.bf16.msra.mxu0 %v10004_v37  ;;  %7520 = vmatpush1.bf16.msra.mxu1 %v10007_v38  ;;  %v8142_v37 = vcombine.low %v12321_v18, %v12324_v19  ;;  %v10094_v38 = vld [vmem:[%s14174_s1 + $0x1000] ss:$16 sps:$4 sm:$0xff]   ;;  %v10105_v18 = vld [vmem:[%s14174_s1 + $0x102c] ss:$16 sps:$4 sm:$0xff]   ;;  %v8145_v19 = vcombine.high %v12523_v21, %v12526_v14 }
 0x1cc   : > { %6833 = vmatprep.subr.bf16.mxu0 %v10012_v39  ;;  %7521 = vmatprep.subr.bf16.mxu1 %v10015_v40  ;;  %v10097_v39 = vld [vmem:[%s14174_s1 + $0x1008] ss:$16 sps:$4 sm:$0xff]   ;;  %v10102_v40 = vld [vmem:[%s14174_s1 + $0x1024] ss:$16 sps:$4 sm:$0xff]  }
 0x1cf   : > { %6834 = vmatpush1.bf16.msra.mxu0 %v10010_v41  ;;  %7522 = vmatpush1.bf16.msra.mxu1 %v10013_v42  ;;  %v10100_v41 = vld [vmem:[%s14174_s1 + $0x1020] ss:$16 sps:$4 sm:$0xff]   ;;  %v10103_v42 = vld [vmem:[%s14174_s1 + $0x1028] ss:$16 sps:$4 sm:$0xff]  }
 0x1d0   : > { %6835 = vmatprep.subr.bf16.mxu0 %v10018_v43  ;;  %7523 = vmatprep.subr.bf16.mxu1 %v10021_v44  ;;  %v10108_v43 = vld [vmem:[%s14174_s1 + $0x1044] ss:$16 sps:$4 sm:$0xff]   ;;  %v10111_v44 = vld [vmem:[%s14174_s1 + $0x104c] ss:$16 sps:$4 sm:$0xff]  }
 0x1d3   : > { %6836 = vmatpush1.bf16.msra.mxu0 %v10016_v45  ;;  %7524 = vmatpush1.bf16.msra.mxu1 %v10019_v46  ;;  %v10106_v45 = vld [vmem:[%s14174_s1 + $0x1040] ss:$16 sps:$4 sm:$0xff]   ;;  %v10109_v46 = vld [vmem:[%s14174_s1 + $0x1048] ss:$16 sps:$4 sm:$0xff]  }
 0x1d4   : > { %6837 = vmatprep.subr.bf16.mxu0 %v10024_v47  ;;  %7525 = vmatprep.subr.bf16.mxu1 %v10027_v48  ;;  %v10114_v47 = vld [vmem:[%s14174_s1 + $0x1064] ss:$16 sps:$4 sm:$0xff]   ;;  %v10117_v48 = vld [vmem:[%s14174_s1 + $0x106c] ss:$16 sps:$4 sm:$0xff]  }
 0x1d7   : > { %6838 = vmatpush1.bf16.msra.mxu0 %v10022_v49  ;;  %7526 = vmatpush1.bf16.msra.mxu1 %v10025_v50  ;;  %v10112_v49 = vld [vmem:[%s14174_s1 + $0x1060] ss:$16 sps:$4 sm:$0xff]   ;;  %v10115_v50 = vld [vmem:[%s14174_s1 + $0x1068] ss:$16 sps:$4 sm:$0xff]  }
 0x1d8   : > { %6839 = vmatprep.subr.bf16.mxu0 %v10030_v51  ;;  %7527 = vmatprep.subr.bf16.mxu1 %v10033_v52  ;;  %v10120_v51 = vld [vmem:[%s14174_s1 + $0x1084] ss:$16 sps:$4 sm:$0xff]   ;;  %v10123_v52 = vld [vmem:[%s14174_s1 + $0x108c] ss:$16 sps:$4 sm:$0xff]  }
 0x1db   : > { %6840 = vmatpush1.bf16.msra.mxu0 %v10028_v53  ;;  %7528 = vmatpush1.bf16.msra.mxu1 %v10031_v54  ;;  %v10118_v53 = vld [vmem:[%s14174_s1 + $0x1080] ss:$16 sps:$4 sm:$0xff]   ;;  %v10121_v54 = vld [vmem:[%s14174_s1 + $0x1088] ss:$16 sps:$4 sm:$0xff]  }
 0x1dc   : > { %6841 = vmatprep.subr.bf16.mxu0 %v10036_v55  ;;  %7529 = vmatprep.subr.bf16.mxu1 %v10039_v56  ;;  %v10126_v55 = vld [vmem:[%s14174_s1 + $0x10a4] ss:$16 sps:$4 sm:$0xff]   ;;  %v10129_v56 = vld [vmem:[%s14174_s1 + $0x10ac] ss:$16 sps:$4 sm:$0xff]  }
 0x1df   : > { %6842 = vmatpush1.bf16.msra.mxu0 %v10034_v57  ;;  %7530 = vmatpush1.bf16.msra.mxu1 %v10037_v58  ;;  %v10124_v57 = vld [vmem:[%s14174_s1 + $0x10a0] ss:$16 sps:$4 sm:$0xff]   ;;  %v10127_v58 = vld [vmem:[%s14174_s1 + $0x10a8] ss:$16 sps:$4 sm:$0xff]  }
 0x1e0   : > { %6843 = vmatprep.subr.bf16.mxu0 %v10042_v59  ;;  %7531 = vmatprep.subr.bf16.mxu1 %v10045_v60  ;;  %v10132_v59 = vld [vmem:[%s14174_s1 + $0x10c4] ss:$16 sps:$4 sm:$0xff]   ;;  %v10135_v60 = vld [vmem:[%s14174_s1 + $0x10cc] ss:$16 sps:$4 sm:$0xff]  }
 0x1e3   : > { %6844 = vmatpush1.bf16.msra.mxu0 %v10040_v61  ;;  %7532 = vmatpush1.bf16.msra.mxu1 %v10043_v62  ;;  %v10130_v61 = vld [vmem:[%s14174_s1 + $0x10c0] ss:$16 sps:$4 sm:$0xff]   ;;  %v10133_v62 = vld [vmem:[%s14174_s1 + $0x10c8] ss:$16 sps:$4 sm:$0xff]  }
 0x1e4   : > { %6845 = vmatprep.subr.bf16.mxu0 %v10048_v63  ;;  %7533 = vmatprep.subr.bf16.mxu1 %v10051_v0  ;;  %v10138_v63 = vld [vmem:[%s14174_s1 + $0x10e4] ss:$16 sps:$4 sm:$0xff]   ;;  %v10141_v0 = vld [vmem:[%s14174_s1 + $0x10ec] ss:$16 sps:$4 sm:$0xff]  }
 0x1e7   : > { %6846 = vmatpush1.bf16.msra.mxu0 %v10046_v1  ;;  %7534 = vmatpush1.bf16.msra.mxu1 %v10049_v2  ;;  %v10136_v1 = vld [vmem:[%s14174_s1 + $0x10e0] ss:$16 sps:$4 sm:$0xff]   ;;  %v10139_v2 = vld [vmem:[%s14174_s1 + $0x10e8] ss:$16 sps:$4 sm:$0xff]  }
 0x1e8   : > { %6847 = vmatprep.subr.bf16.mxu0 %v10054_v3  ;;  %7535 = vmatprep.subr.bf16.mxu1 %v10057_v4  ;;  %v10144_v3 = vld [vmem:[%s14174_s1 + $0x1104] ss:$16 sps:$4 sm:$0xff]   ;;  %v10147_v4 = vld [vmem:[%s14174_s1 + $0x110c] ss:$16 sps:$4 sm:$0xff]  }
 0x1eb   : > { %6848 = vmatpush1.bf16.msra.mxu0 %v10052_v5  ;;  %7536 = vmatpush1.bf16.msra.mxu1 %v10055_v6  ;;  %v10142_v5 = vld [vmem:[%s14174_s1 + $0x1100] ss:$16 sps:$4 sm:$0xff]   ;;  %v10145_v6 = vld [vmem:[%s14174_s1 + $0x1108] ss:$16 sps:$4 sm:$0xff]  }
 0x1ec   : > { %6849 = vmatprep.subr.bf16.mxu0 %v10060_v7  ;;  %7537 = vmatprep.subr.bf16.mxu1 %v10063_v8  ;;  %v10150_v7 = vld [vmem:[%s14174_s1 + $0x1124] ss:$16 sps:$4 sm:$0xff]   ;;  %v10153_v8 = vld [vmem:[%s14174_s1 + $0x112c] ss:$16 sps:$4 sm:$0xff]  }
 0x1ef   : > { %6850 = vmatpush1.bf16.msra.mxu0 %v10058_v9  ;;  %7538 = vmatpush1.bf16.msra.mxu1 %v10061_v10  ;;  %v10148_v9 = vld [vmem:[%s14174_s1 + $0x1120] ss:$16 sps:$4 sm:$0xff]   ;;  %v10151_v10 = vld [vmem:[%s14174_s1 + $0x1128] ss:$16 sps:$4 sm:$0xff]  }
 0x1f0   : > { %6851 = vmatprep.subr.bf16.mxu0 %v10066_v11  ;;  %7539 = vmatprep.subr.bf16.mxu1 %v10069_v12  ;;  %v10156_v11 = vld [vmem:[%s14174_s1 + $0x1144] ss:$16 sps:$4 sm:$0xff]   ;;  %v10159_v12 = vld [vmem:[%s14174_s1 + $0x114c] ss:$16 sps:$4 sm:$0xff]  }
 0x1f3   : > { %6852 = vmatpush1.bf16.msra.mxu0 %v10064_v13  ;;  %7540 = vmatpush1.bf16.msra.mxu1 %v10067_v16  ;;  %v10154_v13 = vld [vmem:[%s14174_s1 + $0x1140] ss:$16 sps:$4 sm:$0xff]   ;;  %v10157_v16 = vld [vmem:[%s14174_s1 + $0x1148] ss:$16 sps:$4 sm:$0xff]  }
 0x1f4   : > { %6853 = vmatprep.subr.bf16.mxu0 %v10072_v17  ;;  %7541 = vmatprep.subr.bf16.mxu1 %v10075_v20  ;;  %v10162_v17 = vld [vmem:[%s14174_s1 + $0x1164] ss:$16 sps:$4 sm:$0xff]   ;;  %v10165_v20 = vld [vmem:[%s14174_s1 + $0x116c] ss:$16 sps:$4 sm:$0xff]  }
 0x1f7   : > { %6854 = vmatpush1.bf16.msra.mxu0 %v10070_v22  ;;  %7542 = vmatpush1.bf16.msra.mxu1 %v10073_v15  ;;  %v10160_v22 = vld [vmem:[%s14174_s1 + $0x1160] ss:$16 sps:$4 sm:$0xff]   ;;  %v10163_v15 = vld [vmem:[%s14174_s1 + $0x1168] ss:$16 sps:$4 sm:$0xff]  }
 0x1f8   : > { %6855 = vmatprep.subr.bf16.mxu0 %v10078_v23  ;;  %7543 = vmatprep.subr.bf16.mxu1 %v10081_v24  ;;  %v10168_v23 = vld [vmem:[%s14174_s1 + $0x1184] ss:$16 sps:$4 sm:$0xff]   ;;  %v10171_v24 = vld [vmem:[%s14174_s1 + $0x118c] ss:$16 sps:$4 sm:$0xff]  }
 0x1fb   : > { %6856 = vmatpush1.bf16.msra.mxu0 %v10076_v25  ;;  %7544 = vmatpush1.bf16.msra.mxu1 %v10079_v26  ;;  %v10166_v25 = vld [vmem:[%s14174_s1 + $0x1180] ss:$16 sps:$4 sm:$0xff]   ;;  %v10169_v26 = vld [vmem:[%s14174_s1 + $0x1188] ss:$16 sps:$4 sm:$0xff]  }
 0x1fc   : > { %6857 = vmatprep.subr.bf16.mxu0 %v10084_v27  ;;  %7545 = vmatprep.subr.bf16.mxu1 %v10087_v28  ;;  %v10174_v27 = vld [vmem:[%s14174_s1 + $0x11a4] ss:$16 sps:$4 sm:$0xff]   ;;  %v10177_v28 = vld [vmem:[%s14174_s1 + $0x11ac] ss:$16 sps:$4 sm:$0xff]  }
 0x1ff   : > { %6858 = vmatpush1.bf16.msra.mxu0 %v10082_v29  ;;  %7546 = vmatpush1.bf16.msra.mxu1 %v10085_v30  ;;  %v10172_v29 = vld [vmem:[%s14174_s1 + $0x11a0] ss:$16 sps:$4 sm:$0xff]   ;;  %v10175_v30 = vld [vmem:[%s14174_s1 + $0x11a8] ss:$16 sps:$4 sm:$0xff]  }
 0x200   : > { %6859 = vmatprep.subr.bf16.mxu0 %v10090_v31  ;;  %7547 = vmatprep.subr.bf16.mxu1 %v10093_v32  ;;  %v10180_v31 = vld [vmem:[%s14174_s1 + $0x11c4] ss:$16 sps:$4 sm:$0xff]   ;;  %v10183_v32 = vld [vmem:[%s14174_s1 + $0x11cc] ss:$16 sps:$4 sm:$0xff]  }
 0x203   : > { %6860 = vmatpush1.bf16.msra.mxu0 %v10088_v33  ;;  %7548 = vmatpush1.bf16.msra.mxu1 %v10091_v34  ;;  %v10178_v33 = vld [vmem:[%s14174_s1 + $0x11c0] ss:$16 sps:$4 sm:$0xff]   ;;  %v10181_v34 = vld [vmem:[%s14174_s1 + $0x11c8] ss:$16 sps:$4 sm:$0xff]  }
 0x204   : > { %6872 = vmatprep.subr.bf16.mxu0 %v10096_v35  ;;  %7560 = vmatprep.subr.bf16.mxu1 %v10099_v36  ;;  %v10186_v35 = vld [vmem:[%s14174_s1 + $0x11e4] ss:$16 sps:$4 sm:$0xff]   ;;  %v10189_v36 = vld [vmem:[%s14174_s1 + $0x11ec] ss:$16 sps:$4 sm:$0xff]  }
 0x206   : > { %6862 = vmatmul.mubr.bf16.vlgmr.msra.gmra.mrb[0].mxu0 %v8142_v37  ;;  %7550 = vmatmul.mubr.bf16.vlgmr.msra.gmra.mrb[0].mxu1 %v8142_v37  ;;  %v10184_v37 = vld [vmem:[%s14174_s1 + $0x11e0] ss:$16 sps:$4 sm:$0xff]  }
 0x207   : > { %6873 = vmatpush1.bf16.msra.mxu0 %v10094_v38  ;;  %7561 = vmatpush1.bf16.msra.mxu1 %v10097_v39  ;;  %v10187_v38 = vld [vmem:[%s14174_s1 + $0x11e8] ss:$16 sps:$4 sm:$0xff]   ;;  %v10192_v39 = vld [vmem:[%s14174_s1 + $0x1204] ss:$16 sps:$4 sm:$0xff]  }
 0x208   : > { %6874 = vmatprep.subr.bf16.mxu0 %v10102_v40  ;;  %7562 = vmatprep.subr.bf16.mxu1 %v10105_v18  ;;  %v10195_v40 = vld [vmem:[%s14174_s1 + $0x120c] ss:$16 sps:$4 sm:$0xff]  }
 0x209   : > { %6904 = vmatprep.mubr.bf16.mxu0 %v8145_v19  ;;  %7592 = vmatprep.mubr.bf16.mxu1 %v8145_v19  ;;  %v12725_v18 = vld [vmem:[%s11040_s5 + $0x48] sm:$0xff] }
 0x20a   : > { %v12728_v19 = vld [vmem:[%s11040_s5 + $0xc8] sm:$0xff] }
 0x20b   : > { %6875 = vmatpush1.bf16.msra.mxu0 %v10100_v41  ;;  %7563 = vmatpush1.bf16.msra.mxu1 %v10103_v42  ;;  %v8144_v41 = vcombine.low %v12523_v21, %v12526_v14  ;;  %v10190_v42 = vld [vmem:[%s14174_s1 + $0x1200] ss:$16 sps:$4 sm:$0xff]   ;;  %v10201_v21 = vld [vmem:[%s14174_s1 + $0x122c] ss:$16 sps:$4 sm:$0xff]   ;;  %v8147_v14 = vcombine.high %v12725_v18, %v12728_v19 }
 0x20c   : > { %6876 = vmatprep.subr.bf16.mxu0 %v10108_v43  ;;  %7564 = vmatprep.subr.bf16.mxu1 %v10111_v44  ;;  %v10193_v43 = vld [vmem:[%s14174_s1 + $0x1208] ss:$16 sps:$4 sm:$0xff]   ;;  %v10198_v44 = vld [vmem:[%s14174_s1 + $0x1224] ss:$16 sps:$4 sm:$0xff]  }
 0x20f   : > { %6877 = vmatpush1.bf16.msra.mxu0 %v10106_v45  ;;  %7565 = vmatpush1.bf16.msra.mxu1 %v10109_v46  ;;  %v10196_v45 = vld [vmem:[%s14174_s1 + $0x1220] ss:$16 sps:$4 sm:$0xff]   ;;  %v10199_v46 = vld [vmem:[%s14174_s1 + $0x1228] ss:$16 sps:$4 sm:$0xff]  }
 0x210   : > { %6878 = vmatprep.subr.bf16.mxu0 %v10114_v47  ;;  %7566 = vmatprep.subr.bf16.mxu1 %v10117_v48  ;;  %v10204_v47 = vld [vmem:[%s14174_s1 + $0x1244] ss:$16 sps:$4 sm:$0xff]   ;;  %v10207_v48 = vld [vmem:[%s14174_s1 + $0x124c] ss:$16 sps:$4 sm:$0xff]  }
 0x213   : > { %6879 = vmatpush1.bf16.msra.mxu0 %v10112_v49  ;;  %7567 = vmatpush1.bf16.msra.mxu1 %v10115_v50  ;;  %v10202_v49 = vld [vmem:[%s14174_s1 + $0x1240] ss:$16 sps:$4 sm:$0xff]   ;;  %v10205_v50 = vld [vmem:[%s14174_s1 + $0x1248] ss:$16 sps:$4 sm:$0xff]  }
 0x214   : > { %6880 = vmatprep.subr.bf16.mxu0 %v10120_v51  ;;  %7568 = vmatprep.subr.bf16.mxu1 %v10123_v52  ;;  %v10210_v51 = vld [vmem:[%s14174_s1 + $0x1264] ss:$16 sps:$4 sm:$0xff]   ;;  %v10213_v52 = vld [vmem:[%s14174_s1 + $0x126c] ss:$16 sps:$4 sm:$0xff]  }
 0x217   : > { %6881 = vmatpush1.bf16.msra.mxu0 %v10118_v53  ;;  %7569 = vmatpush1.bf16.msra.mxu1 %v10121_v54  ;;  %v10208_v53 = vld [vmem:[%s14174_s1 + $0x1260] ss:$16 sps:$4 sm:$0xff]   ;;  %v10211_v54 = vld [vmem:[%s14174_s1 + $0x1268] ss:$16 sps:$4 sm:$0xff]  }
 0x218   : > { %6882 = vmatprep.subr.bf16.mxu0 %v10126_v55  ;;  %7570 = vmatprep.subr.bf16.mxu1 %v10129_v56  ;;  %v10216_v55 = vld [vmem:[%s14174_s1 + $0x1284] ss:$16 sps:$4 sm:$0xff]   ;;  %v10219_v56 = vld [vmem:[%s14174_s1 + $0x128c] ss:$16 sps:$4 sm:$0xff]  }
 0x21b   : > { %6883 = vmatpush1.bf16.msra.mxu0 %v10124_v57  ;;  %7571 = vmatpush1.bf16.msra.mxu1 %v10127_v58  ;;  %v10214_v57 = vld [vmem:[%s14174_s1 + $0x1280] ss:$16 sps:$4 sm:$0xff]   ;;  %v10217_v58 = vld [vmem:[%s14174_s1 + $0x1288] ss:$16 sps:$4 sm:$0xff]  }
 0x21c   : > { %6884 = vmatprep.subr.bf16.mxu0 %v10132_v59  ;;  %7572 = vmatprep.subr.bf16.mxu1 %v10135_v60  ;;  %v10222_v59 = vld [vmem:[%s14174_s1 + $0x12a4] ss:$16 sps:$4 sm:$0xff]   ;;  %v10225_v60 = vld [vmem:[%s14174_s1 + $0x12ac] ss:$16 sps:$4 sm:$0xff]  }
 0x21f   : > { %6885 = vmatpush1.bf16.msra.mxu0 %v10130_v61  ;;  %7573 = vmatpush1.bf16.msra.mxu1 %v10133_v62  ;;  %v10220_v61 = vld [vmem:[%s14174_s1 + $0x12a0] ss:$16 sps:$4 sm:$0xff]   ;;  %v10223_v62 = vld [vmem:[%s14174_s1 + $0x12a8] ss:$16 sps:$4 sm:$0xff]  }
 0x220   : > { %6886 = vmatprep.subr.bf16.mxu0 %v10138_v63  ;;  %7574 = vmatprep.subr.bf16.mxu1 %v10141_v0  ;;  %v10228_v63 = vld [vmem:[%s14174_s1 + $0x12c4] ss:$16 sps:$4 sm:$0xff]   ;;  %v10231_v0 = vld [vmem:[%s14174_s1 + $0x12cc] ss:$16 sps:$4 sm:$0xff]  }
 0x223   : > { %6887 = vmatpush1.bf16.msra.mxu0 %v10136_v1  ;;  %7575 = vmatpush1.bf16.msra.mxu1 %v10139_v2  ;;  %v10226_v1 = vld [vmem:[%s14174_s1 + $0x12c0] ss:$16 sps:$4 sm:$0xff]   ;;  %v10229_v2 = vld [vmem:[%s14174_s1 + $0x12c8] ss:$16 sps:$4 sm:$0xff]  }
 0x224   : > { %6888 = vmatprep.subr.bf16.mxu0 %v10144_v3  ;;  %7576 = vmatprep.subr.bf16.mxu1 %v10147_v4  ;;  %v10234_v3 = vld [vmem:[%s14174_s1 + $0x12e4] ss:$16 sps:$4 sm:$0xff]   ;;  %v10237_v4 = vld [vmem:[%s14174_s1 + $0x12ec] ss:$16 sps:$4 sm:$0xff]  }
 0x227   : > { %6889 = vmatpush1.bf16.msra.mxu0 %v10142_v5  ;;  %7577 = vmatpush1.bf16.msra.mxu1 %v10145_v6  ;;  %v10232_v5 = vld [vmem:[%s14174_s1 + $0x12e0] ss:$16 sps:$4 sm:$0xff]   ;;  %v10235_v6 = vld [vmem:[%s14174_s1 + $0x12e8] ss:$16 sps:$4 sm:$0xff]  }
 0x228   : > { %6890 = vmatprep.subr.bf16.mxu0 %v10150_v7  ;;  %7578 = vmatprep.subr.bf16.mxu1 %v10153_v8  ;;  %v10240_v7 = vld [vmem:[%s14174_s1 + $0x1304] ss:$16 sps:$4 sm:$0xff]   ;;  %v10243_v8 = vld [vmem:[%s14174_s1 + $0x130c] ss:$16 sps:$4 sm:$0xff]  }
 0x22b   : > { %6891 = vmatpush1.bf16.msra.mxu0 %v10148_v9  ;;  %7579 = vmatpush1.bf16.msra.mxu1 %v10151_v10  ;;  %v10238_v9 = vld [vmem:[%s14174_s1 + $0x1300] ss:$16 sps:$4 sm:$0xff]   ;;  %v10241_v10 = vld [vmem:[%s14174_s1 + $0x1308] ss:$16 sps:$4 sm:$0xff]  }
 0x22c   : > { %6892 = vmatprep.subr.bf16.mxu0 %v10156_v11  ;;  %7580 = vmatprep.subr.bf16.mxu1 %v10159_v12  ;;  %v10246_v11 = vld [vmem:[%s14174_s1 + $0x1324] ss:$16 sps:$4 sm:$0xff]   ;;  %v10249_v12 = vld [vmem:[%s14174_s1 + $0x132c] ss:$16 sps:$4 sm:$0xff]  }
 0x22f   : > { %6893 = vmatpush1.bf16.msra.mxu0 %v10154_v13  ;;  %7581 = vmatpush1.bf16.msra.mxu1 %v10157_v16  ;;  %v10244_v13 = vld [vmem:[%s14174_s1 + $0x1320] ss:$16 sps:$4 sm:$0xff]   ;;  %v10247_v16 = vld [vmem:[%s14174_s1 + $0x1328] ss:$16 sps:$4 sm:$0xff]  }
 0x230   : > { %6894 = vmatprep.subr.bf16.mxu0 %v10162_v17  ;;  %7582 = vmatprep.subr.bf16.mxu1 %v10165_v20  ;;  %v10252_v17 = vld [vmem:[%s14174_s1 + $0x1344] ss:$16 sps:$4 sm:$0xff]   ;;  %v10255_v20 = vld [vmem:[%s14174_s1 + $0x134c] ss:$16 sps:$4 sm:$0xff]  }
 0x233   : > { %6895 = vmatpush1.bf16.msra.mxu0 %v10160_v22  ;;  %7583 = vmatpush1.bf16.msra.mxu1 %v10163_v15  ;;  %v10250_v22 = vld [vmem:[%s14174_s1 + $0x1340] ss:$16 sps:$4 sm:$0xff]   ;;  %v10253_v15 = vld [vmem:[%s14174_s1 + $0x1348] ss:$16 sps:$4 sm:$0xff]  }
 0x234   : > { %6896 = vmatprep.subr.bf16.mxu0 %v10168_v23  ;;  %7584 = vmatprep.subr.bf16.mxu1 %v10171_v24  ;;  %v10258_v23 = vld [vmem:[%s14174_s1 + $0x1364] ss:$16 sps:$4 sm:$0xff]   ;;  %v10261_v24 = vld [vmem:[%s14174_s1 + $0x136c] ss:$16 sps:$4 sm:$0xff]  }
 0x237   : > { %6897 = vmatpush1.bf16.msra.mxu0 %v10166_v25  ;;  %7585 = vmatpush1.bf16.msra.mxu1 %v10169_v26  ;;  %v10256_v25 = vld [vmem:[%s14174_s1 + $0x1360] ss:$16 sps:$4 sm:$0xff]   ;;  %v10259_v26 = vld [vmem:[%s14174_s1 + $0x1368] ss:$16 sps:$4 sm:$0xff]  }
 0x238   : > { %6898 = vmatprep.subr.bf16.mxu0 %v10174_v27  ;;  %7586 = vmatprep.subr.bf16.mxu1 %v10177_v28  ;;  %v10264_v27 = vld [vmem:[%s14174_s1 + $0x1384] ss:$16 sps:$4 sm:$0xff]   ;;  %v10267_v28 = vld [vmem:[%s14174_s1 + $0x138c] ss:$16 sps:$4 sm:$0xff]  }
 0x23b   : > { %6899 = vmatpush1.bf16.msra.mxu0 %v10172_v29  ;;  %7587 = vmatpush1.bf16.msra.mxu1 %v10175_v30  ;;  %v10262_v29 = vld [vmem:[%s14174_s1 + $0x1380] ss:$16 sps:$4 sm:$0xff]   ;;  %v10265_v30 = vld [vmem:[%s14174_s1 + $0x1388] ss:$16 sps:$4 sm:$0xff]  }
 0x23c   : > { %6900 = vmatprep.subr.bf16.mxu0 %v10180_v31  ;;  %7588 = vmatprep.subr.bf16.mxu1 %v10183_v32  ;;  %v10270_v31 = vld [vmem:[%s14174_s1 + $0x13a4] ss:$16 sps:$4 sm:$0xff]   ;;  %v10273_v32 = vld [vmem:[%s14174_s1 + $0x13ac] ss:$16 sps:$4 sm:$0xff]  }
 0x23f   : > { %6901 = vmatpush1.bf16.msra.mxu0 %v10178_v33  ;;  %7589 = vmatpush1.bf16.msra.mxu1 %v10181_v34  ;;  %v10268_v33 = vld [vmem:[%s14174_s1 + $0x13a0] ss:$16 sps:$4 sm:$0xff]   ;;  %v10271_v34 = vld [vmem:[%s14174_s1 + $0x13a8] ss:$16 sps:$4 sm:$0xff]  }
 0x240   : > { %6902 = vmatprep.subr.bf16.mxu0 %v10186_v35  ;;  %7590 = vmatprep.subr.bf16.mxu1 %v10189_v36  ;;  %v10276_v35 = vld [vmem:[%s14174_s1 + $0x13c4] ss:$16 sps:$4 sm:$0xff]   ;;  %v10279_v36 = vld [vmem:[%s14174_s1 + $0x13cc] ss:$16 sps:$4 sm:$0xff]  }
 0x243   : > { %6903 = vmatpush1.bf16.msra.mxu0 %v10184_v37  ;;  %7591 = vmatpush1.bf16.msra.mxu1 %v10187_v38  ;;  %v10274_v37 = vld [vmem:[%s14174_s1 + $0x13c0] ss:$16 sps:$4 sm:$0xff]   ;;  %v10277_v38 = vld [vmem:[%s14174_s1 + $0x13c8] ss:$16 sps:$4 sm:$0xff]  }
 0x244   : > { %6915 = vmatprep.subr.bf16.mxu0 %v10192_v39  ;;  %7603 = vmatprep.subr.bf16.mxu1 %v10195_v40  ;;  %v10282_v39 = vld [vmem:[%s14174_s1 + $0x13e4] ss:$16 sps:$4 sm:$0xff]   ;;  %v10285_v40 = vld [vmem:[%s14174_s1 + $0x13ec] ss:$16 sps:$4 sm:$0xff]  }
 0x246   : > { %6905 = vmatmul.mubr.bf16.vlgmr.msra.gmra.mrb[0].mxu0 %v8144_v41  ;;  %7593 = vmatmul.mubr.bf16.vlgmr.msra.gmra.mrb[0].mxu1 %v8144_v41  ;;  %v10280_v41 = vld [vmem:[%s14174_s1 + $0x13e0] ss:$16 sps:$4 sm:$0xff]  }
 0x247   : > { %6916 = vmatpush1.bf16.msra.mxu0 %v10190_v42  ;;  %7604 = vmatpush1.bf16.msra.mxu1 %v10193_v43  ;;  %v10283_v42 = vld [vmem:[%s14174_s1 + $0x13e8] ss:$16 sps:$4 sm:$0xff]   ;;  %v10288_v43 = vld [vmem:[%s14174_s1 + $0x1404] ss:$16 sps:$4 sm:$0xff]  }
 0x248   : > { %6917 = vmatprep.subr.bf16.mxu0 %v10198_v44  ;;  %7605 = vmatprep.subr.bf16.mxu1 %v10201_v21  ;;  %v10291_v44 = vld [vmem:[%s14174_s1 + $0x140c] ss:$16 sps:$4 sm:$0xff]   ;;  %v8146_v21 = vcombine.low %v12725_v18, %v12728_v19  ;;  %v10294_v18 = vld [vmem:[%s14174_s1 + $0x1424] ss:$16 sps:$4 sm:$0xff]  }
 0x249   : > { %6947 = vmatprep.mubr.bf16.mxu0 %v8147_v14  ;;  %7635 = vmatprep.mubr.bf16.mxu1 %v8147_v14  ;;  %v12929_v14 = vld [vmem:[%s11040_s5 + $0x50] sm:$0xff]  ;;  %v10297_v19 = vld [vmem:[%s14174_s1 + $0x142c] ss:$16 sps:$4 sm:$0xff]  }
 0x24b   : > { %6918 = vmatpush1.bf16.msra.mxu0 %v10196_v45  ;;  %7606 = vmatpush1.bf16.msra.mxu1 %v10199_v46  ;;  %v12932_v45 = vld [vmem:[%s11040_s5 + $0xd0] sm:$0xff] }
 0x24c   : > { %6919 = vmatprep.subr.bf16.mxu0 %v10204_v47  ;;  %7607 = vmatprep.subr.bf16.mxu1 %v10207_v48  ;;  %v10286_v46 = vld [vmem:[%s14174_s1 + $0x1400] ss:$16 sps:$4 sm:$0xff]   ;;  %v10289_v47 = vld [vmem:[%s14174_s1 + $0x1408] ss:$16 sps:$4 sm:$0xff]   ;;  %v8149_v48 = vcombine.high %v12929_v14, %v12932_v45 }
 0x24f   : > { %6920 = vmatpush1.bf16.msra.mxu0 %v10202_v49  ;;  %7608 = vmatpush1.bf16.msra.mxu1 %v10205_v50  ;;  %v10292_v49 = vld [vmem:[%s14174_s1 + $0x1420] ss:$16 sps:$4 sm:$0xff]   ;;  %v10295_v50 = vld [vmem:[%s14174_s1 + $0x1428] ss:$16 sps:$4 sm:$0xff]  }
 0x250   : > { %6921 = vmatprep.subr.bf16.mxu0 %v10210_v51  ;;  %7609 = vmatprep.subr.bf16.mxu1 %v10213_v52  ;;  %v10300_v51 = vld [vmem:[%s14174_s1 + $0x1444] ss:$16 sps:$4 sm:$0xff]   ;;  %v10303_v52 = vld [vmem:[%s14174_s1 + $0x144c] ss:$16 sps:$4 sm:$0xff]  }
 0x253   : > { %6922 = vmatpush1.bf16.msra.mxu0 %v10208_v53  ;;  %7610 = vmatpush1.bf16.msra.mxu1 %v10211_v54  ;;  %v10298_v53 = vld [vmem:[%s14174_s1 + $0x1440] ss:$16 sps:$4 sm:$0xff]   ;;  %v10301_v54 = vld [vmem:[%s14174_s1 + $0x1448] ss:$16 sps:$4 sm:$0xff]  }
 0x254   : > { %6923 = vmatprep.subr.bf16.mxu0 %v10216_v55  ;;  %7611 = vmatprep.subr.bf16.mxu1 %v10219_v56  ;;  %v10306_v55 = vld [vmem:[%s14174_s1 + $0x1464] ss:$16 sps:$4 sm:$0xff]   ;;  %v10309_v56 = vld [vmem:[%s14174_s1 + $0x146c] ss:$16 sps:$4 sm:$0xff]  }
 0x257   : > { %6924 = vmatpush1.bf16.msra.mxu0 %v10214_v57  ;;  %7612 = vmatpush1.bf16.msra.mxu1 %v10217_v58  ;;  %v10304_v57 = vld [vmem:[%s14174_s1 + $0x1460] ss:$16 sps:$4 sm:$0xff]   ;;  %v10307_v58 = vld [vmem:[%s14174_s1 + $0x1468] ss:$16 sps:$4 sm:$0xff]  }
 0x258   : > { %6925 = vmatprep.subr.bf16.mxu0 %v10222_v59  ;;  %7613 = vmatprep.subr.bf16.mxu1 %v10225_v60  ;;  %v10312_v59 = vld [vmem:[%s14174_s1 + $0x1484] ss:$16 sps:$4 sm:$0xff]   ;;  %v10315_v60 = vld [vmem:[%s14174_s1 + $0x148c] ss:$16 sps:$4 sm:$0xff]  }
 0x25b   : > { %6926 = vmatpush1.bf16.msra.mxu0 %v10220_v61  ;;  %7614 = vmatpush1.bf16.msra.mxu1 %v10223_v62  ;;  %v10310_v61 = vld [vmem:[%s14174_s1 + $0x1480] ss:$16 sps:$4 sm:$0xff]   ;;  %v10313_v62 = vld [vmem:[%s14174_s1 + $0x1488] ss:$16 sps:$4 sm:$0xff]  }
 0x25c   : > { %6927 = vmatprep.subr.bf16.mxu0 %v10228_v63  ;;  %7615 = vmatprep.subr.bf16.mxu1 %v10231_v0  ;;  %v10318_v63 = vld [vmem:[%s14174_s1 + $0x14a4] ss:$16 sps:$4 sm:$0xff]   ;;  %v10321_v0 = vld [vmem:[%s14174_s1 + $0x14ac] ss:$16 sps:$4 sm:$0xff]  }
 0x25f   : > { %6928 = vmatpush1.bf16.msra.mxu0 %v10226_v1  ;;  %7616 = vmatpush1.bf16.msra.mxu1 %v10229_v2  ;;  %v10316_v1 = vld [vmem:[%s14174_s1 + $0x14a0] ss:$16 sps:$4 sm:$0xff]   ;;  %v10319_v2 = vld [vmem:[%s14174_s1 + $0x14a8] ss:$16 sps:$4 sm:$0xff]  }
 0x260   : > { %6929 = vmatprep.subr.bf16.mxu0 %v10234_v3  ;;  %7617 = vmatprep.subr.bf16.mxu1 %v10237_v4  ;;  %v10324_v3 = vld [vmem:[%s14174_s1 + $0x14c4] ss:$16 sps:$4 sm:$0xff]   ;;  %v10327_v4 = vld [vmem:[%s14174_s1 + $0x14cc] ss:$16 sps:$4 sm:$0xff]  }
 0x263   : > { %6930 = vmatpush1.bf16.msra.mxu0 %v10232_v5  ;;  %7618 = vmatpush1.bf16.msra.mxu1 %v10235_v6  ;;  %v10322_v5 = vld [vmem:[%s14174_s1 + $0x14c0] ss:$16 sps:$4 sm:$0xff]   ;;  %v10325_v6 = vld [vmem:[%s14174_s1 + $0x14c8] ss:$16 sps:$4 sm:$0xff]  }
 0x264   : > { %6931 = vmatprep.subr.bf16.mxu0 %v10240_v7  ;;  %7619 = vmatprep.subr.bf16.mxu1 %v10243_v8  ;;  %v10330_v7 = vld [vmem:[%s14174_s1 + $0x14e4] ss:$16 sps:$4 sm:$0xff]   ;;  %v10333_v8 = vld [vmem:[%s14174_s1 + $0x14ec] ss:$16 sps:$4 sm:$0xff]  }
 0x267   : > { %6932 = vmatpush1.bf16.msra.mxu0 %v10238_v9  ;;  %7620 = vmatpush1.bf16.msra.mxu1 %v10241_v10  ;;  %v10328_v9 = vld [vmem:[%s14174_s1 + $0x14e0] ss:$16 sps:$4 sm:$0xff]   ;;  %v10331_v10 = vld [vmem:[%s14174_s1 + $0x14e8] ss:$16 sps:$4 sm:$0xff]  }
 0x268   : > { %6933 = vmatprep.subr.bf16.mxu0 %v10246_v11  ;;  %7621 = vmatprep.subr.bf16.mxu1 %v10249_v12  ;;  %v10336_v11 = vld [vmem:[%s14174_s1 + $0x1504] ss:$16 sps:$4 sm:$0xff]   ;;  %v10339_v12 = vld [vmem:[%s14174_s1 + $0x150c] ss:$16 sps:$4 sm:$0xff]  }
 0x26b   : > { %6934 = vmatpush1.bf16.msra.mxu0 %v10244_v13  ;;  %7622 = vmatpush1.bf16.msra.mxu1 %v10247_v16  ;;  %v10334_v13 = vld [vmem:[%s14174_s1 + $0x1500] ss:$16 sps:$4 sm:$0xff]   ;;  %v10337_v16 = vld [vmem:[%s14174_s1 + $0x1508] ss:$16 sps:$4 sm:$0xff]  }
 0x26c   : > { %6935 = vmatprep.subr.bf16.mxu0 %v10252_v17  ;;  %7623 = vmatprep.subr.bf16.mxu1 %v10255_v20  ;;  %v10342_v17 = vld [vmem:[%s14174_s1 + $0x1524] ss:$16 sps:$4 sm:$0xff]   ;;  %v10345_v20 = vld [vmem:[%s14174_s1 + $0x152c] ss:$16 sps:$4 sm:$0xff]  }
 0x26f   : > { %6936 = vmatpush1.bf16.msra.mxu0 %v10250_v22  ;;  %7624 = vmatpush1.bf16.msra.mxu1 %v10253_v15  ;;  %v10340_v22 = vld [vmem:[%s14174_s1 + $0x1520] ss:$16 sps:$4 sm:$0xff]   ;;  %v10343_v15 = vld [vmem:[%s14174_s1 + $0x1528] ss:$16 sps:$4 sm:$0xff]  }
 0x270   : > { %6937 = vmatprep.subr.bf16.mxu0 %v10258_v23  ;;  %7625 = vmatprep.subr.bf16.mxu1 %v10261_v24  ;;  %v10348_v23 = vld [vmem:[%s14174_s1 + $0x1544] ss:$16 sps:$4 sm:$0xff]   ;;  %v10351_v24 = vld [vmem:[%s14174_s1 + $0x154c] ss:$16 sps:$4 sm:$0xff]  }
 0x273   : > { %6938 = vmatpush1.bf16.msra.mxu0 %v10256_v25  ;;  %7626 = vmatpush1.bf16.msra.mxu1 %v10259_v26  ;;  %v10346_v25 = vld [vmem:[%s14174_s1 + $0x1540] ss:$16 sps:$4 sm:$0xff]   ;;  %v10349_v26 = vld [vmem:[%s14174_s1 + $0x1548] ss:$16 sps:$4 sm:$0xff]  }
 0x274   : > { %6939 = vmatprep.subr.bf16.mxu0 %v10264_v27  ;;  %7627 = vmatprep.subr.bf16.mxu1 %v10267_v28  ;;  %v10354_v27 = vld [vmem:[%s14174_s1 + $0x1564] ss:$16 sps:$4 sm:$0xff]   ;;  %v10357_v28 = vld [vmem:[%s14174_s1 + $0x156c] ss:$16 sps:$4 sm:$0xff]  }
 0x277   : > { %6940 = vmatpush1.bf16.msra.mxu0 %v10262_v29  ;;  %7628 = vmatpush1.bf16.msra.mxu1 %v10265_v30  ;;  %v10352_v29 = vld [vmem:[%s14174_s1 + $0x1560] ss:$16 sps:$4 sm:$0xff]   ;;  %v10355_v30 = vld [vmem:[%s14174_s1 + $0x1568] ss:$16 sps:$4 sm:$0xff]  }
 0x278   : > { %6941 = vmatprep.subr.bf16.mxu0 %v10270_v31  ;;  %7629 = vmatprep.subr.bf16.mxu1 %v10273_v32  ;;  %v10360_v31 = vld [vmem:[%s14174_s1 + $0x1584] ss:$16 sps:$4 sm:$0xff]   ;;  %v10363_v32 = vld [vmem:[%s14174_s1 + $0x158c] ss:$16 sps:$4 sm:$0xff]  }
 0x27b   : > { %6942 = vmatpush1.bf16.msra.mxu0 %v10268_v33  ;;  %7630 = vmatpush1.bf16.msra.mxu1 %v10271_v34  ;;  %v10358_v33 = vld [vmem:[%s14174_s1 + $0x1580] ss:$16 sps:$4 sm:$0xff]   ;;  %v10361_v34 = vld [vmem:[%s14174_s1 + $0x1588] ss:$16 sps:$4 sm:$0xff]  }
 0x27c   : > { %6943 = vmatprep.subr.bf16.mxu0 %v10276_v35  ;;  %7631 = vmatprep.subr.bf16.mxu1 %v10279_v36  ;;  %v10366_v35 = vld [vmem:[%s14174_s1 + $0x15a4] ss:$16 sps:$4 sm:$0xff]   ;;  %v10369_v36 = vld [vmem:[%s14174_s1 + $0x15ac] ss:$16 sps:$4 sm:$0xff]  }
 0x27f   : > { %6944 = vmatpush1.bf16.msra.mxu0 %v10274_v37  ;;  %7632 = vmatpush1.bf16.msra.mxu1 %v10277_v38  ;;  %v10364_v37 = vld [vmem:[%s14174_s1 + $0x15a0] ss:$16 sps:$4 sm:$0xff]   ;;  %v10367_v38 = vld [vmem:[%s14174_s1 + $0x15a8] ss:$16 sps:$4 sm:$0xff]  }
 0x280   : > { %6945 = vmatprep.subr.bf16.mxu0 %v10282_v39  ;;  %7633 = vmatprep.subr.bf16.mxu1 %v10285_v40  ;;  %v10372_v39 = vld [vmem:[%s14174_s1 + $0x15c4] ss:$16 sps:$4 sm:$0xff]   ;;  %v10375_v40 = vld [vmem:[%s14174_s1 + $0x15cc] ss:$16 sps:$4 sm:$0xff]  }
 0x283   : > { %6946 = vmatpush1.bf16.msra.mxu0 %v10280_v41  ;;  %7634 = vmatpush1.bf16.msra.mxu1 %v10283_v42  ;;  %v10370_v41 = vld [vmem:[%s14174_s1 + $0x15c0] ss:$16 sps:$4 sm:$0xff]   ;;  %v10373_v42 = vld [vmem:[%s14174_s1 + $0x15c8] ss:$16 sps:$4 sm:$0xff]  }
 0x284   : > { %6958 = vmatprep.subr.bf16.mxu0 %v10288_v43  ;;  %7646 = vmatprep.subr.bf16.mxu1 %v10291_v44  ;;  %v10378_v43 = vld [vmem:[%s14174_s1 + $0x15e4] ss:$16 sps:$4 sm:$0xff]   ;;  %v10381_v44 = vld [vmem:[%s14174_s1 + $0x15ec] ss:$16 sps:$4 sm:$0xff]  }
 0x286   : > { %6948 = vmatmul.mubr.bf16.vlgmr.msra.gmra.mrb[0].mxu0 %v8146_v21  ;;  %7636 = vmatmul.mubr.bf16.vlgmr.msra.gmra.mrb[0].mxu1 %v8146_v21  ;;  %v10376_v21 = vld [vmem:[%s14174_s1 + $0x15e0] ss:$16 sps:$4 sm:$0xff]  }
 0x287   : > { %6959 = vmatpush1.bf16.msra.mxu0 %v10286_v46  ;;  %7647 = vmatpush1.bf16.msra.mxu1 %v10289_v47  ;;  %v10379_v46 = vld [vmem:[%s14174_s1 + $0x15e8] ss:$16 sps:$4 sm:$0xff]   ;;  %v10384_v47 = vld [vmem:[%s14174_s1 + $0x1604] ss:$16 sps:$4 sm:$0xff]  }
 0x288   : > { %6960 = vmatprep.subr.bf16.mxu0 %v10294_v18  ;;  %7648 = vmatprep.subr.bf16.mxu1 %v10297_v19  ;;  %v10387_v18 = vld [vmem:[%s14174_s1 + $0x160c] ss:$16 sps:$4 sm:$0xff]   ;;  %v8148_v19 = vcombine.low %v12929_v14, %v12932_v45  ;;  %v10390_v14 = vld [vmem:[%s14174_s1 + $0x1624] ss:$16 sps:$4 sm:$0xff]  }
 0x289   : > { %6990 = vmatprep.mubr.bf16.mxu0 %v8149_v48  ;;  %7678 = vmatprep.mubr.bf16.mxu1 %v8149_v48  ;;  %v13131_v48 = vld [vmem:[%s11040_s5 + $0x58] sm:$0xff] }
 0x28a   : > { %v10393_v45 = vld [vmem:[%s14174_s1 + $0x162c] ss:$16 sps:$4 sm:$0xff]  }
 0x28b   : > { %6961 = vmatpush1.bf16.msra.mxu0 %v10292_v49  ;;  %7649 = vmatpush1.bf16.msra.mxu1 %v10295_v50  ;;  %v13134_v49 = vld [vmem:[%s11040_s5 + $0xd8] sm:$0xff]  ;;  %v10382_v50 = vld [vmem:[%s14174_s1 + $0x1600] ss:$16 sps:$4 sm:$0xff]  }
 0x28c   : > { %6962 = vmatprep.subr.bf16.mxu0 %v10300_v51  ;;  %7650 = vmatprep.subr.bf16.mxu1 %v10303_v52  ;;  %v10385_v51 = vld [vmem:[%s14174_s1 + $0x1608] ss:$16 sps:$4 sm:$0xff]   ;;  %v8151_v52 = vcombine.high %v13131_v48, %v13134_v49 }
 0x28f   : > { %6963 = vmatpush1.bf16.msra.mxu0 %v10298_v53  ;;  %7651 = vmatpush1.bf16.msra.mxu1 %v10301_v54  ;;  %v10388_v53 = vld [vmem:[%s14174_s1 + $0x1620] ss:$16 sps:$4 sm:$0xff]   ;;  %v10391_v54 = vld [vmem:[%s14174_s1 + $0x1628] ss:$16 sps:$4 sm:$0xff]  }
 0x290   : > { %6964 = vmatprep.subr.bf16.mxu0 %v10306_v55  ;;  %7652 = vmatprep.subr.bf16.mxu1 %v10309_v56  ;;  %v10396_v55 = vld [vmem:[%s14174_s1 + $0x1644] ss:$16 sps:$4 sm:$0xff]   ;;  %v10399_v56 = vld [vmem:[%s14174_s1 + $0x164c] ss:$16 sps:$4 sm:$0xff]  }
 0x293   : > { %6965 = vmatpush1.bf16.msra.mxu0 %v10304_v57  ;;  %7653 = vmatpush1.bf16.msra.mxu1 %v10307_v58  ;;  %v10394_v57 = vld [vmem:[%s14174_s1 + $0x1640] ss:$16 sps:$4 sm:$0xff]   ;;  %v10397_v58 = vld [vmem:[%s14174_s1 + $0x1648] ss:$16 sps:$4 sm:$0xff]  }
 0x294   : > { %6966 = vmatprep.subr.bf16.mxu0 %v10312_v59  ;;  %7654 = vmatprep.subr.bf16.mxu1 %v10315_v60  ;;  %v10402_v59 = vld [vmem:[%s14174_s1 + $0x1664] ss:$16 sps:$4 sm:$0xff]   ;;  %v10405_v60 = vld [vmem:[%s14174_s1 + $0x166c] ss:$16 sps:$4 sm:$0xff]  }
 0x297   : > { %6967 = vmatpush1.bf16.msra.mxu0 %v10310_v61  ;;  %7655 = vmatpush1.bf16.msra.mxu1 %v10313_v62  ;;  %v10400_v61 = vld [vmem:[%s14174_s1 + $0x1660] ss:$16 sps:$4 sm:$0xff]   ;;  %v10403_v62 = vld [vmem:[%s14174_s1 + $0x1668] ss:$16 sps:$4 sm:$0xff]  }
 0x298   : > { %6968 = vmatprep.subr.bf16.mxu0 %v10318_v63  ;;  %7656 = vmatprep.subr.bf16.mxu1 %v10321_v0  ;;  %v10408_v63 = vld [vmem:[%s14174_s1 + $0x1684] ss:$16 sps:$4 sm:$0xff]   ;;  %v10411_v0 = vld [vmem:[%s14174_s1 + $0x168c] ss:$16 sps:$4 sm:$0xff]  }
 0x29b   : > { %6969 = vmatpush1.bf16.msra.mxu0 %v10316_v1  ;;  %7657 = vmatpush1.bf16.msra.mxu1 %v10319_v2  ;;  %v10406_v1 = vld [vmem:[%s14174_s1 + $0x1680] ss:$16 sps:$4 sm:$0xff]   ;;  %v10409_v2 = vld [vmem:[%s14174_s1 + $0x1688] ss:$16 sps:$4 sm:$0xff]  }
 0x29c   : > { %6970 = vmatprep.subr.bf16.mxu0 %v10324_v3  ;;  %7658 = vmatprep.subr.bf16.mxu1 %v10327_v4  ;;  %v10414_v3 = vld [vmem:[%s14174_s1 + $0x16a4] ss:$16 sps:$4 sm:$0xff]   ;;  %v10417_v4 = vld [vmem:[%s14174_s1 + $0x16ac] ss:$16 sps:$4 sm:$0xff]  }
 0x29f   : > { %6971 = vmatpush1.bf16.msra.mxu0 %v10322_v5  ;;  %7659 = vmatpush1.bf16.msra.mxu1 %v10325_v6  ;;  %v10412_v5 = vld [vmem:[%s14174_s1 + $0x16a0] ss:$16 sps:$4 sm:$0xff]   ;;  %v10415_v6 = vld [vmem:[%s14174_s1 + $0x16a8] ss:$16 sps:$4 sm:$0xff]  }
 0x2a0   : > { %6972 = vmatprep.subr.bf16.mxu0 %v10330_v7  ;;  %7660 = vmatprep.subr.bf16.mxu1 %v10333_v8  ;;  %v10420_v7 = vld [vmem:[%s14174_s1 + $0x16c4] ss:$16 sps:$4 sm:$0xff]   ;;  %v10423_v8 = vld [vmem:[%s14174_s1 + $0x16cc] ss:$16 sps:$4 sm:$0xff]  }
 0x2a3   : > { %6973 = vmatpush1.bf16.msra.mxu0 %v10328_v9  ;;  %7661 = vmatpush1.bf16.msra.mxu1 %v10331_v10  ;;  %v10418_v9 = vld [vmem:[%s14174_s1 + $0x16c0] ss:$16 sps:$4 sm:$0xff]   ;;  %v10421_v10 = vld [vmem:[%s14174_s1 + $0x16c8] ss:$16 sps:$4 sm:$0xff]  }
 0x2a4   : > { %6974 = vmatprep.subr.bf16.mxu0 %v10336_v11  ;;  %7662 = vmatprep.subr.bf16.mxu1 %v10339_v12  ;;  %v10426_v11 = vld [vmem:[%s14174_s1 + $0x16e4] ss:$16 sps:$4 sm:$0xff]   ;;  %v10429_v12 = vld [vmem:[%s14174_s1 + $0x16ec] ss:$16 sps:$4 sm:$0xff]  }
 0x2a7   : > { %6975 = vmatpush1.bf16.msra.mxu0 %v10334_v13  ;;  %7663 = vmatpush1.bf16.msra.mxu1 %v10337_v16  ;;  %v10424_v13 = vld [vmem:[%s14174_s1 + $0x16e0] ss:$16 sps:$4 sm:$0xff]   ;;  %v10427_v16 = vld [vmem:[%s14174_s1 + $0x16e8] ss:$16 sps:$4 sm:$0xff]  }
 0x2a8   : > { %6976 = vmatprep.subr.bf16.mxu0 %v10342_v17  ;;  %7664 = vmatprep.subr.bf16.mxu1 %v10345_v20  ;;  %v10432_v17 = vld [vmem:[%s14174_s1 + $0x1704] ss:$16 sps:$4 sm:$0xff]   ;;  %v10435_v20 = vld [vmem:[%s14174_s1 + $0x170c] ss:$16 sps:$4 sm:$0xff]  }
 0x2ab   : > { %6977 = vmatpush1.bf16.msra.mxu0 %v10340_v22  ;;  %7665 = vmatpush1.bf16.msra.mxu1 %v10343_v15  ;;  %v10430_v22 = vld [vmem:[%s14174_s1 + $0x1700] ss:$16 sps:$4 sm:$0xff]   ;;  %v10433_v15 = vld [vmem:[%s14174_s1 + $0x1708] ss:$16 sps:$4 sm:$0xff]  }
 0x2ac   : > { %6978 = vmatprep.subr.bf16.mxu0 %v10348_v23  ;;  %7666 = vmatprep.subr.bf16.mxu1 %v10351_v24  ;;  %v10438_v23 = vld [vmem:[%s14174_s1 + $0x1724] ss:$16 sps:$4 sm:$0xff]   ;;  %v10441_v24 = vld [vmem:[%s14174_s1 + $0x172c] ss:$16 sps:$4 sm:$0xff]  }
 0x2af   : > { %6979 = vmatpush1.bf16.msra.mxu0 %v10346_v25  ;;  %7667 = vmatpush1.bf16.msra.mxu1 %v10349_v26  ;;  %v10436_v25 = vld [vmem:[%s14174_s1 + $0x1720] ss:$16 sps:$4 sm:$0xff]   ;;  %v10439_v26 = vld [vmem:[%s14174_s1 + $0x1728] ss:$16 sps:$4 sm:$0xff]  }
 0x2b0   : > { %6980 = vmatprep.subr.bf16.mxu0 %v10354_v27  ;;  %7668 = vmatprep.subr.bf16.mxu1 %v10357_v28  ;;  %v10444_v27 = vld [vmem:[%s14174_s1 + $0x1744] ss:$16 sps:$4 sm:$0xff]   ;;  %v10447_v28 = vld [vmem:[%s14174_s1 + $0x174c] ss:$16 sps:$4 sm:$0xff]  }
 0x2b3   : > { %6981 = vmatpush1.bf16.msra.mxu0 %v10352_v29  ;;  %7669 = vmatpush1.bf16.msra.mxu1 %v10355_v30  ;;  %v10442_v29 = vld [vmem:[%s14174_s1 + $0x1740] ss:$16 sps:$4 sm:$0xff]   ;;  %v10445_v30 = vld [vmem:[%s14174_s1 + $0x1748] ss:$16 sps:$4 sm:$0xff]  }
 0x2b4   : > { %6982 = vmatprep.subr.bf16.mxu0 %v10360_v31  ;;  %7670 = vmatprep.subr.bf16.mxu1 %v10363_v32  ;;  %v10450_v31 = vld [vmem:[%s14174_s1 + $0x1764] ss:$16 sps:$4 sm:$0xff]   ;;  %v10453_v32 = vld [vmem:[%s14174_s1 + $0x176c] ss:$16 sps:$4 sm:$0xff]  }
 0x2b7   : > { %6983 = vmatpush1.bf16.msra.mxu0 %v10358_v33  ;;  %7671 = vmatpush1.bf16.msra.mxu1 %v10361_v34  ;;  %v10448_v33 = vld [vmem:[%s14174_s1 + $0x1760] ss:$16 sps:$4 sm:$0xff]   ;;  %v10451_v34 = vld [vmem:[%s14174_s1 + $0x1768] ss:$16 sps:$4 sm:$0xff]  }
 0x2b8   : > { %6984 = vmatprep.subr.bf16.mxu0 %v10366_v35  ;;  %7672 = vmatprep.subr.bf16.mxu1 %v10369_v36  ;;  %v10456_v35 = vld [vmem:[%s14174_s1 + $0x1784] ss:$16 sps:$4 sm:$0xff]   ;;  %v10459_v36 = vld [vmem:[%s14174_s1 + $0x178c] ss:$16 sps:$4 sm:$0xff]  }
 0x2bb   : > { %6985 = vmatpush1.bf16.msra.mxu0 %v10364_v37  ;;  %7673 = vmatpush1.bf16.msra.mxu1 %v10367_v38  ;;  %v10454_v37 = vld [vmem:[%s14174_s1 + $0x1780] ss:$16 sps:$4 sm:$0xff]   ;;  %v10457_v38 = vld [vmem:[%s14174_s1 + $0x1788] ss:$16 sps:$4 sm:$0xff]  }
 0x2bc   : > { %6986 = vmatprep.subr.bf16.mxu0 %v10372_v39  ;;  %7674 = vmatprep.subr.bf16.mxu1 %v10375_v40  ;;  %v10462_v39 = vld [vmem:[%s14174_s1 + $0x17a4] ss:$16 sps:$4 sm:$0xff]   ;;  %v10465_v40 = vld [vmem:[%s14174_s1 + $0x17ac] ss:$16 sps:$4 sm:$0xff]  }
 0x2bf   : > { %6987 = vmatpush1.bf16.msra.mxu0 %v10370_v41  ;;  %7675 = vmatpush1.bf16.msra.mxu1 %v10373_v42  ;;  %v10460_v41 = vld [vmem:[%s14174_s1 + $0x17a0] ss:$16 sps:$4 sm:$0xff]   ;;  %v10463_v42 = vld [vmem:[%s14174_s1 + $0x17a8] ss:$16 sps:$4 sm:$0xff]  }
 0x2c0   : > { %6988 = vmatprep.subr.bf16.mxu0 %v10378_v43  ;;  %7676 = vmatprep.subr.bf16.mxu1 %v10381_v44  ;;  %v10468_v43 = vld [vmem:[%s14174_s1 + $0x17c4] ss:$16 sps:$4 sm:$0xff]   ;;  %v10471_v44 = vld [vmem:[%s14174_s1 + $0x17cc] ss:$16 sps:$4 sm:$0xff]  }
 0x2c3   : > { %6989 = vmatpush1.bf16.msra.mxu0 %v10376_v21  ;;  %7677 = vmatpush1.bf16.msra.mxu1 %v10379_v46  ;;  %v10466_v21 = vld [vmem:[%s14174_s1 + $0x17c0] ss:$16 sps:$4 sm:$0xff]   ;;  %v10469_v46 = vld [vmem:[%s14174_s1 + $0x17c8] ss:$16 sps:$4 sm:$0xff]  }
 0x2c4   : > { %7001 = vmatprep.subr.bf16.mxu0 %v10384_v47  ;;  %7689 = vmatprep.subr.bf16.mxu1 %v10387_v18  ;;  %v10474_v47 = vld [vmem:[%s14174_s1 + $0x17e4] ss:$16 sps:$4 sm:$0xff]   ;;  %v10477_v18 = vld [vmem:[%s14174_s1 + $0x17ec] ss:$16 sps:$4 sm:$0xff]  }
 0x2c6   : > { %6991 = vmatmul.mubr.bf16.vlgmr.msra.gmra.mrb[0].mxu0 %v8148_v19  ;;  %7679 = vmatmul.mubr.bf16.vlgmr.msra.gmra.mrb[0].mxu1 %v8148_v19  ;;  %v10472_v19 = vld [vmem:[%s14174_s1 + $0x17e0] ss:$16 sps:$4 sm:$0xff]  }
 0x2c7   : > { %7002 = vmatpush1.bf16.msra.mxu0 %v10382_v50  ;;  %7690 = vmatpush1.bf16.msra.mxu1 %v10385_v51  ;;  %v10475_v50 = vld [vmem:[%s14174_s1 + $0x17e8] ss:$16 sps:$4 sm:$0xff]   ;;  %v10480_v51 = vld [vmem:[%s14174_s1 + $0x1804] ss:$16 sps:$4 sm:$0xff]  }
 0x2c8   : > { %7003 = vmatprep.subr.bf16.mxu0 %v10390_v14  ;;  %7691 = vmatprep.subr.bf16.mxu1 %v10393_v45  ;;  %v10483_v14 = vld [vmem:[%s14174_s1 + $0x180c] ss:$16 sps:$4 sm:$0xff]   ;;  %v8150_v45 = vcombine.low %v13131_v48, %v13134_v49  ;;  %v10486_v48 = vld [vmem:[%s14174_s1 + $0x1824] ss:$16 sps:$4 sm:$0xff]  }
 0x2c9   : > { %7033 = vmatprep.mubr.bf16.mxu0 %v8151_v52  ;;  %7721 = vmatprep.mubr.bf16.mxu1 %v8151_v52  ;;  %v13333_v52 = vld [vmem:[%s11040_s5 + $0x60] sm:$0xff]  ;;  %v10489_v49 = vld [vmem:[%s14174_s1 + $0x182c] ss:$16 sps:$4 sm:$0xff]  }
 0x2cb   : > { %7004 = vmatpush1.bf16.msra.mxu0 %v10388_v53  ;;  %7692 = vmatpush1.bf16.msra.mxu1 %v10391_v54  ;;  %v13336_v53 = vld [vmem:[%s11040_s5 + $0xe0] sm:$0xff] }
 0x2cc   : > { %7005 = vmatprep.subr.bf16.mxu0 %v10396_v55  ;;  %7693 = vmatprep.subr.bf16.mxu1 %v10399_v56  ;;  %v10478_v54 = vld [vmem:[%s14174_s1 + $0x1800] ss:$16 sps:$4 sm:$0xff]   ;;  %v10481_v55 = vld [vmem:[%s14174_s1 + $0x1808] ss:$16 sps:$4 sm:$0xff]   ;;  %v8153_v56 = vcombine.high %v13333_v52, %v13336_v53 }
 0x2cf   : > { %7006 = vmatpush1.bf16.msra.mxu0 %v10394_v57  ;;  %7694 = vmatpush1.bf16.msra.mxu1 %v10397_v58  ;;  %v10484_v57 = vld [vmem:[%s14174_s1 + $0x1820] ss:$16 sps:$4 sm:$0xff]   ;;  %v10487_v58 = vld [vmem:[%s14174_s1 + $0x1828] ss:$16 sps:$4 sm:$0xff]  }
 0x2d0   : > { %7007 = vmatprep.subr.bf16.mxu0 %v10402_v59  ;;  %7695 = vmatprep.subr.bf16.mxu1 %v10405_v60  ;;  %v10492_v59 = vld [vmem:[%s14174_s1 + $0x1844] ss:$16 sps:$4 sm:$0xff]   ;;  %v10495_v60 = vld [vmem:[%s14174_s1 + $0x184c] ss:$16 sps:$4 sm:$0xff]  }
 0x2d3   : > { %7008 = vmatpush1.bf16.msra.mxu0 %v10400_v61  ;;  %7696 = vmatpush1.bf16.msra.mxu1 %v10403_v62  ;;  %v10490_v61 = vld [vmem:[%s14174_s1 + $0x1840] ss:$16 sps:$4 sm:$0xff]   ;;  %v10493_v62 = vld [vmem:[%s14174_s1 + $0x1848] ss:$16 sps:$4 sm:$0xff]  }
 0x2d4   : > { %7009 = vmatprep.subr.bf16.mxu0 %v10408_v63  ;;  %7697 = vmatprep.subr.bf16.mxu1 %v10411_v0  ;;  %v10498_v63 = vld [vmem:[%s14174_s1 + $0x1864] ss:$16 sps:$4 sm:$0xff]   ;;  %v10501_v0 = vld [vmem:[%s14174_s1 + $0x186c] ss:$16 sps:$4 sm:$0xff]  }
 0x2d7   : > { %7010 = vmatpush1.bf16.msra.mxu0 %v10406_v1  ;;  %7698 = vmatpush1.bf16.msra.mxu1 %v10409_v2  ;;  %v10496_v1 = vld [vmem:[%s14174_s1 + $0x1860] ss:$16 sps:$4 sm:$0xff]   ;;  %v10499_v2 = vld [vmem:[%s14174_s1 + $0x1868] ss:$16 sps:$4 sm:$0xff]  }
 0x2d8   : > { %7011 = vmatprep.subr.bf16.mxu0 %v10414_v3  ;;  %7699 = vmatprep.subr.bf16.mxu1 %v10417_v4  ;;  %v10504_v3 = vld [vmem:[%s14174_s1 + $0x1884] ss:$16 sps:$4 sm:$0xff]   ;;  %v10507_v4 = vld [vmem:[%s14174_s1 + $0x188c] ss:$16 sps:$4 sm:$0xff]  }
 0x2db   : > { %7012 = vmatpush1.bf16.msra.mxu0 %v10412_v5  ;;  %7700 = vmatpush1.bf16.msra.mxu1 %v10415_v6  ;;  %v10502_v5 = vld [vmem:[%s14174_s1 + $0x1880] ss:$16 sps:$4 sm:$0xff]   ;;  %v10505_v6 = vld [vmem:[%s14174_s1 + $0x1888] ss:$16 sps:$4 sm:$0xff]  }
 0x2dc   : > { %7013 = vmatprep.subr.bf16.mxu0 %v10420_v7  ;;  %7701 = vmatprep.subr.bf16.mxu1 %v10423_v8  ;;  %v10510_v7 = vld [vmem:[%s14174_s1 + $0x18a4] ss:$16 sps:$4 sm:$0xff]   ;;  %v10513_v8 = vld [vmem:[%s14174_s1 + $0x18ac] ss:$16 sps:$4 sm:$0xff]  }
 0x2df   : > { %7014 = vmatpush1.bf16.msra.mxu0 %v10418_v9  ;;  %7702 = vmatpush1.bf16.msra.mxu1 %v10421_v10  ;;  %v10508_v9 = vld [vmem:[%s14174_s1 + $0x18a0] ss:$16 sps:$4 sm:$0xff]   ;;  %v10511_v10 = vld [vmem:[%s14174_s1 + $0x18a8] ss:$16 sps:$4 sm:$0xff]  }
 0x2e0   : > { %7015 = vmatprep.subr.bf16.mxu0 %v10426_v11  ;;  %7703 = vmatprep.subr.bf16.mxu1 %v10429_v12  ;;  %v10516_v11 = vld [vmem:[%s14174_s1 + $0x18c4] ss:$16 sps:$4 sm:$0xff]   ;;  %v10519_v12 = vld [vmem:[%s14174_s1 + $0x18cc] ss:$16 sps:$4 sm:$0xff]  }
 0x2e3   : > { %7016 = vmatpush1.bf16.msra.mxu0 %v10424_v13  ;;  %7704 = vmatpush1.bf16.msra.mxu1 %v10427_v16  ;;  %v10514_v13 = vld [vmem:[%s14174_s1 + $0x18c0] ss:$16 sps:$4 sm:$0xff]   ;;  %v10517_v16 = vld [vmem:[%s14174_s1 + $0x18c8] ss:$16 sps:$4 sm:$0xff]  }
 0x2e4   : > { %7017 = vmatprep.subr.bf16.mxu0 %v10432_v17  ;;  %7705 = vmatprep.subr.bf16.mxu1 %v10435_v20  ;;  %v10522_v17 = vld [vmem:[%s14174_s1 + $0x18e4] ss:$16 sps:$4 sm:$0xff]   ;;  %v10525_v20 = vld [vmem:[%s14174_s1 + $0x18ec] ss:$16 sps:$4 sm:$0xff]  }
 0x2e7   : > { %7018 = vmatpush1.bf16.msra.mxu0 %v10430_v22  ;;  %7706 = vmatpush1.bf16.msra.mxu1 %v10433_v15  ;;  %v10520_v22 = vld [vmem:[%s14174_s1 + $0x18e0] ss:$16 sps:$4 sm:$0xff]   ;;  %v10523_v15 = vld [vmem:[%s14174_s1 + $0x18e8] ss:$16 sps:$4 sm:$0xff]  }
 0x2e8   : > { %7019 = vmatprep.subr.bf16.mxu0 %v10438_v23  ;;  %7707 = vmatprep.subr.bf16.mxu1 %v10441_v24  ;;  %v10528_v23 = vld [vmem:[%s14174_s1 + $0x1904] ss:$16 sps:$4 sm:$0xff]   ;;  %v10531_v24 = vld [vmem:[%s14174_s1 + $0x190c] ss:$16 sps:$4 sm:$0xff]  }
 0x2eb   : > { %7020 = vmatpush1.bf16.msra.mxu0 %v10436_v25  ;;  %7708 = vmatpush1.bf16.msra.mxu1 %v10439_v26  ;;  %v10526_v25 = vld [vmem:[%s14174_s1 + $0x1900] ss:$16 sps:$4 sm:$0xff]   ;;  %v10529_v26 = vld [vmem:[%s14174_s1 + $0x1908] ss:$16 sps:$4 sm:$0xff]  }
 0x2ec   : > { %7021 = vmatprep.subr.bf16.mxu0 %v10444_v27  ;;  %7709 = vmatprep.subr.bf16.mxu1 %v10447_v28  ;;  %v10534_v27 = vld [vmem:[%s14174_s1 + $0x1924] ss:$16 sps:$4 sm:$0xff]   ;;  %v10537_v28 = vld [vmem:[%s14174_s1 + $0x192c] ss:$16 sps:$4 sm:$0xff]  }
 0x2ef   : > { %7022 = vmatpush1.bf16.msra.mxu0 %v10442_v29  ;;  %7710 = vmatpush1.bf16.msra.mxu1 %v10445_v30  ;;  %v10532_v29 = vld [vmem:[%s14174_s1 + $0x1920] ss:$16 sps:$4 sm:$0xff]   ;;  %v10535_v30 = vld [vmem:[%s14174_s1 + $0x1928] ss:$16 sps:$4 sm:$0xff]  }
 0x2f0   : > { %7023 = vmatprep.subr.bf16.mxu0 %v10450_v31  ;;  %7711 = vmatprep.subr.bf16.mxu1 %v10453_v32  ;;  %v10540_v31 = vld [vmem:[%s14174_s1 + $0x1944] ss:$16 sps:$4 sm:$0xff]   ;;  %v10543_v32 = vld [vmem:[%s14174_s1 + $0x194c] ss:$16 sps:$4 sm:$0xff]  }
 0x2f3   : > { %7024 = vmatpush1.bf16.msra.mxu0 %v10448_v33  ;;  %7712 = vmatpush1.bf16.msra.mxu1 %v10451_v34  ;;  %v10538_v33 = vld [vmem:[%s14174_s1 + $0x1940] ss:$16 sps:$4 sm:$0xff]   ;;  %v10541_v34 = vld [vmem:[%s14174_s1 + $0x1948] ss:$16 sps:$4 sm:$0xff]  }
 0x2f4   : > { %7025 = vmatprep.subr.bf16.mxu0 %v10456_v35  ;;  %7713 = vmatprep.subr.bf16.mxu1 %v10459_v36  ;;  %v10546_v35 = vld [vmem:[%s14174_s1 + $0x1964] ss:$16 sps:$4 sm:$0xff]   ;;  %v10549_v36 = vld [vmem:[%s14174_s1 + $0x196c] ss:$16 sps:$4 sm:$0xff]  }
 0x2f7   : > { %7026 = vmatpush1.bf16.msra.mxu0 %v10454_v37  ;;  %7714 = vmatpush1.bf16.msra.mxu1 %v10457_v38  ;;  %v10544_v37 = vld [vmem:[%s14174_s1 + $0x1960] ss:$16 sps:$4 sm:$0xff]   ;;  %v10547_v38 = vld [vmem:[%s14174_s1 + $0x1968] ss:$16 sps:$4 sm:$0xff]  }
 0x2f8   : > { %7027 = vmatprep.subr.bf16.mxu0 %v10462_v39  ;;  %7715 = vmatprep.subr.bf16.mxu1 %v10465_v40  ;;  %v10552_v39 = vld [vmem:[%s14174_s1 + $0x1984] ss:$16 sps:$4 sm:$0xff]   ;;  %v10555_v40 = vld [vmem:[%s14174_s1 + $0x198c] ss:$16 sps:$4 sm:$0xff]  }
 0x2fb   : > { %7028 = vmatpush1.bf16.msra.mxu0 %v10460_v41  ;;  %7716 = vmatpush1.bf16.msra.mxu1 %v10463_v42  ;;  %v10550_v41 = vld [vmem:[%s14174_s1 + $0x1980] ss:$16 sps:$4 sm:$0xff]   ;;  %v10553_v42 = vld [vmem:[%s14174_s1 + $0x1988] ss:$16 sps:$4 sm:$0xff]  }
 0x2fc   : > { %7029 = vmatprep.subr.bf16.mxu0 %v10468_v43  ;;  %7717 = vmatprep.subr.bf16.mxu1 %v10471_v44  ;;  %v10558_v43 = vld [vmem:[%s14174_s1 + $0x19a4] ss:$16 sps:$4 sm:$0xff]   ;;  %v10561_v44 = vld [vmem:[%s14174_s1 + $0x19ac] ss:$16 sps:$4 sm:$0xff]  }
 0x2ff   : > { %7030 = vmatpush1.bf16.msra.mxu0 %v10466_v21  ;;  %7718 = vmatpush1.bf16.msra.mxu1 %v10469_v46  ;;  %v10556_v21 = vld [vmem:[%s14174_s1 + $0x19a0] ss:$16 sps:$4 sm:$0xff]   ;;  %v10559_v46 = vld [vmem:[%s14174_s1 + $0x19a8] ss:$16 sps:$4 sm:$0xff]  }
 0x300   : > { %7031 = vmatprep.subr.bf16.mxu0 %v10474_v47  ;;  %7719 = vmatprep.subr.bf16.mxu1 %v10477_v18  ;;  %v10564_v47 = vld [vmem:[%s14174_s1 + $0x19c4] ss:$16 sps:$4 sm:$0xff]   ;;  %v10567_v18 = vld [vmem:[%s14174_s1 + $0x19cc] ss:$16 sps:$4 sm:$0xff]  }
 0x303   : > { %7032 = vmatpush1.bf16.msra.mxu0 %v10472_v19  ;;  %7720 = vmatpush1.bf16.msra.mxu1 %v10475_v50  ;;  %v10562_v19 = vld [vmem:[%s14174_s1 + $0x19c0] ss:$16 sps:$4 sm:$0xff]   ;;  %v10565_v50 = vld [vmem:[%s14174_s1 + $0x19c8] ss:$16 sps:$4 sm:$0xff]  }
 0x304   : > { %7044 = vmatprep.subr.bf16.mxu0 %v10480_v51  ;;  %7732 = vmatprep.subr.bf16.mxu1 %v10483_v14  ;;  %v10570_v51 = vld [vmem:[%s14174_s1 + $0x19e4] ss:$16 sps:$4 sm:$0xff]   ;;  %v10573_v14 = vld [vmem:[%s14174_s1 + $0x19ec] ss:$16 sps:$4 sm:$0xff]  }
 0x306   : > { %7034 = vmatmul.mubr.bf16.vlgmr.msra.gmra.mrb[0].mxu0 %v8150_v45  ;;  %7722 = vmatmul.mubr.bf16.vlgmr.msra.gmra.mrb[0].mxu1 %v8150_v45  ;;  %v10568_v45 = vld [vmem:[%s14174_s1 + $0x19e0] ss:$16 sps:$4 sm:$0xff]  }
 0x307   : > { %7045 = vmatpush1.bf16.msra.mxu0 %v10478_v54  ;;  %7733 = vmatpush1.bf16.msra.mxu1 %v10481_v55  ;;  %v10571_v54 = vld [vmem:[%s14174_s1 + $0x19e8] ss:$16 sps:$4 sm:$0xff]   ;;  %v10576_v55 = vld [vmem:[%s14174_s1 + $0x1a04] ss:$16 sps:$4 sm:$0xff]  }
 0x308   : > { %7046 = vmatprep.subr.bf16.mxu0 %v10486_v48  ;;  %7734 = vmatprep.subr.bf16.mxu1 %v10489_v49  ;;  %v10579_v48 = vld [vmem:[%s14174_s1 + $0x1a0c] ss:$16 sps:$4 sm:$0xff]   ;;  %v8152_v49 = vcombine.low %v13333_v52, %v13336_v53  ;;  %v10582_v52 = vld [vmem:[%s14174_s1 + $0x1a24] ss:$16 sps:$4 sm:$0xff]  }
 0x309   : > { %7076 = vmatprep.mubr.bf16.mxu0 %v8153_v56  ;;  %7764 = vmatprep.mubr.bf16.mxu1 %v8153_v56  ;;  %v13535_v56 = vld [vmem:[%s11040_s5 + $0x68] sm:$0xff] }
 0x30a   : > { %v10585_v53 = vld [vmem:[%s14174_s1 + $0x1a2c] ss:$16 sps:$4 sm:$0xff]  }
 0x30b   : > { %7047 = vmatpush1.bf16.msra.mxu0 %v10484_v57  ;;  %7735 = vmatpush1.bf16.msra.mxu1 %v10487_v58  ;;  %v13538_v57 = vld [vmem:[%s11040_s5 + $0xe8] sm:$0xff]  ;;  %v10574_v58 = vld [vmem:[%s14174_s1 + $0x1a00] ss:$16 sps:$4 sm:$0xff]  }
 0x30c   : > { %7048 = vmatprep.subr.bf16.mxu0 %v10492_v59  ;;  %7736 = vmatprep.subr.bf16.mxu1 %v10495_v60  ;;  %v10577_v59 = vld [vmem:[%s14174_s1 + $0x1a08] ss:$16 sps:$4 sm:$0xff]   ;;  %v8155_v60 = vcombine.high %v13535_v56, %v13538_v57 }
 0x30f   : > { %7049 = vmatpush1.bf16.msra.mxu0 %v10490_v61  ;;  %7737 = vmatpush1.bf16.msra.mxu1 %v10493_v62  ;;  %v10580_v61 = vld [vmem:[%s14174_s1 + $0x1a20] ss:$16 sps:$4 sm:$0xff]   ;;  %v10583_v62 = vld [vmem:[%s14174_s1 + $0x1a28] ss:$16 sps:$4 sm:$0xff]  }
 0x310   : > { %7050 = vmatprep.subr.bf16.mxu0 %v10498_v63  ;;  %7738 = vmatprep.subr.bf16.mxu1 %v10501_v0  ;;  %v10588_v63 = vld [vmem:[%s14174_s1 + $0x1a44] ss:$16 sps:$4 sm:$0xff]   ;;  %v10591_v0 = vld [vmem:[%s14174_s1 + $0x1a4c] ss:$16 sps:$4 sm:$0xff]  }
 0x313   : > { %7051 = vmatpush1.bf16.msra.mxu0 %v10496_v1  ;;  %7739 = vmatpush1.bf16.msra.mxu1 %v10499_v2  ;;  %v10586_v1 = vld [vmem:[%s14174_s1 + $0x1a40] ss:$16 sps:$4 sm:$0xff]   ;;  %v10589_v2 = vld [vmem:[%s14174_s1 + $0x1a48] ss:$16 sps:$4 sm:$0xff]  }
 0x314   : > { %7052 = vmatprep.subr.bf16.mxu0 %v10504_v3  ;;  %7740 = vmatprep.subr.bf16.mxu1 %v10507_v4  ;;  %v10594_v3 = vld [vmem:[%s14174_s1 + $0x1a64] ss:$16 sps:$4 sm:$0xff]   ;;  %v10597_v4 = vld [vmem:[%s14174_s1 + $0x1a6c] ss:$16 sps:$4 sm:$0xff]  }
 0x317   : > { %7053 = vmatpush1.bf16.msra.mxu0 %v10502_v5  ;;  %7741 = vmatpush1.bf16.msra.mxu1 %v10505_v6  ;;  %v10592_v5 = vld [vmem:[%s14174_s1 + $0x1a60] ss:$16 sps:$4 sm:$0xff]   ;;  %v10595_v6 = vld [vmem:[%s14174_s1 + $0x1a68] ss:$16 sps:$4 sm:$0xff]  }
 0x318   : > { %7054 = vmatprep.subr.bf16.mxu0 %v10510_v7  ;;  %7742 = vmatprep.subr.bf16.mxu1 %v10513_v8  ;;  %v10600_v7 = vld [vmem:[%s14174_s1 + $0x1a84] ss:$16 sps:$4 sm:$0xff]   ;;  %v10603_v8 = vld [vmem:[%s14174_s1 + $0x1a8c] ss:$16 sps:$4 sm:$0xff]  }
 0x31b   : > { %7055 = vmatpush1.bf16.msra.mxu0 %v10508_v9  ;;  %7743 = vmatpush1.bf16.msra.mxu1 %v10511_v10  ;;  %v10598_v9 = vld [vmem:[%s14174_s1 + $0x1a80] ss:$16 sps:$4 sm:$0xff]   ;;  %v10601_v10 = vld [vmem:[%s14174_s1 + $0x1a88] ss:$16 sps:$4 sm:$0xff]  }
 0x31c   : > { %7056 = vmatprep.subr.bf16.mxu0 %v10516_v11  ;;  %7744 = vmatprep.subr.bf16.mxu1 %v10519_v12  ;;  %v10606_v11 = vld [vmem:[%s14174_s1 + $0x1aa4] ss:$16 sps:$4 sm:$0xff]   ;;  %v10609_v12 = vld [vmem:[%s14174_s1 + $0x1aac] ss:$16 sps:$4 sm:$0xff]  }
 0x31f   : > { %7057 = vmatpush1.bf16.msra.mxu0 %v10514_v13  ;;  %7745 = vmatpush1.bf16.msra.mxu1 %v10517_v16  ;;  %v10604_v13 = vld [vmem:[%s14174_s1 + $0x1aa0] ss:$16 sps:$4 sm:$0xff]   ;;  %v10607_v16 = vld [vmem:[%s14174_s1 + $0x1aa8] ss:$16 sps:$4 sm:$0xff]  }
 0x320   : > { %7058 = vmatprep.subr.bf16.mxu0 %v10522_v17  ;;  %7746 = vmatprep.subr.bf16.mxu1 %v10525_v20  ;;  %v10612_v17 = vld [vmem:[%s14174_s1 + $0x1ac4] ss:$16 sps:$4 sm:$0xff]   ;;  %v10615_v20 = vld [vmem:[%s14174_s1 + $0x1acc] ss:$16 sps:$4 sm:$0xff]  }
 0x323   : > { %7059 = vmatpush1.bf16.msra.mxu0 %v10520_v22  ;;  %7747 = vmatpush1.bf16.msra.mxu1 %v10523_v15  ;;  %v10610_v22 = vld [vmem:[%s14174_s1 + $0x1ac0] ss:$16 sps:$4 sm:$0xff]   ;;  %v10613_v15 = vld [vmem:[%s14174_s1 + $0x1ac8] ss:$16 sps:$4 sm:$0xff]  }
 0x324   : > { %7060 = vmatprep.subr.bf16.mxu0 %v10528_v23  ;;  %7748 = vmatprep.subr.bf16.mxu1 %v10531_v24  ;;  %v10618_v23 = vld [vmem:[%s14174_s1 + $0x1ae4] ss:$16 sps:$4 sm:$0xff]   ;;  %v10621_v24 = vld [vmem:[%s14174_s1 + $0x1aec] ss:$16 sps:$4 sm:$0xff]  }
 0x327   : > { %7061 = vmatpush1.bf16.msra.mxu0 %v10526_v25  ;;  %7749 = vmatpush1.bf16.msra.mxu1 %v10529_v26  ;;  %v10616_v25 = vld [vmem:[%s14174_s1 + $0x1ae0] ss:$16 sps:$4 sm:$0xff]   ;;  %v10619_v26 = vld [vmem:[%s14174_s1 + $0x1ae8] ss:$16 sps:$4 sm:$0xff]  }
 0x328   : > { %7062 = vmatprep.subr.bf16.mxu0 %v10534_v27  ;;  %7750 = vmatprep.subr.bf16.mxu1 %v10537_v28  ;;  %v10624_v27 = vld [vmem:[%s14174_s1 + $0x1b04] ss:$16 sps:$4 sm:$0xff]   ;;  %v10627_v28 = vld [vmem:[%s14174_s1 + $0x1b0c] ss:$16 sps:$4 sm:$0xff]  }
 0x32b   : > { %7063 = vmatpush1.bf16.msra.mxu0 %v10532_v29  ;;  %7751 = vmatpush1.bf16.msra.mxu1 %v10535_v30  ;;  %v10622_v29 = vld [vmem:[%s14174_s1 + $0x1b00] ss:$16 sps:$4 sm:$0xff]   ;;  %v10625_v30 = vld [vmem:[%s14174_s1 + $0x1b08] ss:$16 sps:$4 sm:$0xff]  }
 0x32c   : > { %7064 = vmatprep.subr.bf16.mxu0 %v10540_v31  ;;  %7752 = vmatprep.subr.bf16.mxu1 %v10543_v32  ;;  %v10630_v31 = vld [vmem:[%s14174_s1 + $0x1b24] ss:$16 sps:$4 sm:$0xff]   ;;  %v10633_v32 = vld [vmem:[%s14174_s1 + $0x1b2c] ss:$16 sps:$4 sm:$0xff]  }
 0x32f   : > { %7065 = vmatpush1.bf16.msra.mxu0 %v10538_v33  ;;  %7753 = vmatpush1.bf16.msra.mxu1 %v10541_v34  ;;  %v10628_v33 = vld [vmem:[%s14174_s1 + $0x1b20] ss:$16 sps:$4 sm:$0xff]   ;;  %v10631_v34 = vld [vmem:[%s14174_s1 + $0x1b28] ss:$16 sps:$4 sm:$0xff]  }
 0x330   : > { %7066 = vmatprep.subr.bf16.mxu0 %v10546_v35  ;;  %7754 = vmatprep.subr.bf16.mxu1 %v10549_v36  ;;  %v10636_v35 = vld [vmem:[%s14174_s1 + $0x1b44] ss:$16 sps:$4 sm:$0xff]   ;;  %v10639_v36 = vld [vmem:[%s14174_s1 + $0x1b4c] ss:$16 sps:$4 sm:$0xff]  }
 0x333   : > { %7067 = vmatpush1.bf16.msra.mxu0 %v10544_v37  ;;  %7755 = vmatpush1.bf16.msra.mxu1 %v10547_v38  ;;  %v10634_v37 = vld [vmem:[%s14174_s1 + $0x1b40] ss:$16 sps:$4 sm:$0xff]   ;;  %v10637_v38 = vld [vmem:[%s14174_s1 + $0x1b48] ss:$16 sps:$4 sm:$0xff]  }
 0x334   : > { %7068 = vmatprep.subr.bf16.mxu0 %v10552_v39  ;;  %7756 = vmatprep.subr.bf16.mxu1 %v10555_v40  ;;  %v10642_v39 = vld [vmem:[%s14174_s1 + $0x1b64] ss:$16 sps:$4 sm:$0xff]   ;;  %v10645_v40 = vld [vmem:[%s14174_s1 + $0x1b6c] ss:$16 sps:$4 sm:$0xff]  }
 0x337   : > { %7069 = vmatpush1.bf16.msra.mxu0 %v10550_v41  ;;  %7757 = vmatpush1.bf16.msra.mxu1 %v10553_v42  ;;  %v10640_v41 = vld [vmem:[%s14174_s1 + $0x1b60] ss:$16 sps:$4 sm:$0xff]   ;;  %v10643_v42 = vld [vmem:[%s14174_s1 + $0x1b68] ss:$16 sps:$4 sm:$0xff]  }
 0x338   : > { %7070 = vmatprep.subr.bf16.mxu0 %v10558_v43  ;;  %7758 = vmatprep.subr.bf16.mxu1 %v10561_v44  ;;  %v10648_v43 = vld [vmem:[%s14174_s1 + $0x1b84] ss:$16 sps:$4 sm:$0xff]   ;;  %v10651_v44 = vld [vmem:[%s14174_s1 + $0x1b8c] ss:$16 sps:$4 sm:$0xff]  }
 0x33b   : > { %7071 = vmatpush1.bf16.msra.mxu0 %v10556_v21  ;;  %7759 = vmatpush1.bf16.msra.mxu1 %v10559_v46  ;;  %v10646_v21 = vld [vmem:[%s14174_s1 + $0x1b80] ss:$16 sps:$4 sm:$0xff]   ;;  %v10649_v46 = vld [vmem:[%s14174_s1 + $0x1b88] ss:$16 sps:$4 sm:$0xff]  }
 0x33c   : > { %7072 = vmatprep.subr.bf16.mxu0 %v10564_v47  ;;  %7760 = vmatprep.subr.bf16.mxu1 %v10567_v18  ;;  %v10654_v47 = vld [vmem:[%s14174_s1 + $0x1ba4] ss:$16 sps:$4 sm:$0xff]   ;;  %v10657_v18 = vld [vmem:[%s14174_s1 + $0x1bac] ss:$16 sps:$4 sm:$0xff]  }
 0x33f   : > { %7073 = vmatpush1.bf16.msra.mxu0 %v10562_v19  ;;  %7761 = vmatpush1.bf16.msra.mxu1 %v10565_v50  ;;  %v10652_v19 = vld [vmem:[%s14174_s1 + $0x1ba0] ss:$16 sps:$4 sm:$0xff]   ;;  %v10655_v50 = vld [vmem:[%s14174_s1 + $0x1ba8] ss:$16 sps:$4 sm:$0xff]  }
 0x340   : > { %7074 = vmatprep.subr.bf16.mxu0 %v10570_v51  ;;  %7762 = vmatprep.subr.bf16.mxu1 %v10573_v14  ;;  %v10660_v51 = vld [vmem:[%s14174_s1 + $0x1bc4] ss:$16 sps:$4 sm:$0xff]   ;;  %v10663_v14 = vld [vmem:[%s14174_s1 + $0x1bcc] ss:$16 sps:$4 sm:$0xff]  }
 0x343   : > { %7075 = vmatpush1.bf16.msra.mxu0 %v10568_v45  ;;  %7763 = vmatpush1.bf16.msra.mxu1 %v10571_v54  ;;  %v10658_v45 = vld [vmem:[%s14174_s1 + $0x1bc0] ss:$16 sps:$4 sm:$0xff]   ;;  %v10661_v54 = vld [vmem:[%s14174_s1 + $0x1bc8] ss:$16 sps:$4 sm:$0xff]  }
 0x344   : > { %7087 = vmatprep.subr.bf16.mxu0 %v10576_v55  ;;  %7775 = vmatprep.subr.bf16.mxu1 %v10579_v48  ;;  %v10666_v55 = vld [vmem:[%s14174_s1 + $0x1be4] ss:$16 sps:$4 sm:$0xff]   ;;  %v10669_v48 = vld [vmem:[%s14174_s1 + $0x1bec] ss:$16 sps:$4 sm:$0xff]  }
 0x346   : > { %7077 = vmatmul.mubr.bf16.vlgmr.msra.gmra.mrb[0].mxu0 %v8152_v49  ;;  %7765 = vmatmul.mubr.bf16.vlgmr.msra.gmra.mrb[0].mxu1 %v8152_v49  ;;  %v10664_v49 = vld [vmem:[%s14174_s1 + $0x1be0] ss:$16 sps:$4 sm:$0xff]  }
 0x347   : > { %7088 = vmatpush1.bf16.msra.mxu0 %v10574_v58  ;;  %7776 = vmatpush1.bf16.msra.mxu1 %v10577_v59  ;;  %v10667_v58 = vld [vmem:[%s14174_s1 + $0x1be8] ss:$16 sps:$4 sm:$0xff]   ;;  %v10672_v59 = vld [vmem:[%s14174_s1 + $0x1c04] ss:$16 sps:$4 sm:$0xff]  }
 0x348   : > { %7089 = vmatprep.subr.bf16.mxu0 %v10582_v52  ;;  %7777 = vmatprep.subr.bf16.mxu1 %v10585_v53  ;;  %v10675_v52 = vld [vmem:[%s14174_s1 + $0x1c0c] ss:$16 sps:$4 sm:$0xff]   ;;  %v8154_v53 = vcombine.low %v13535_v56, %v13538_v57  ;;  %v10678_v56 = vld [vmem:[%s14174_s1 + $0x1c24] ss:$16 sps:$4 sm:$0xff]  }
 0x349   : > { %7119 = vmatprep.mubr.bf16.mxu0 %v8155_v60  ;;  %7807 = vmatprep.mubr.bf16.mxu1 %v8155_v60  ;;  %v13737_v60 = vld [vmem:[%s11040_s5 + $0x70] sm:$0xff]  ;;  %v10681_v57 = vld [vmem:[%s14174_s1 + $0x1c2c] ss:$16 sps:$4 sm:$0xff]  }
 0x34b   : > { %7090 = vmatpush1.bf16.msra.mxu0 %v10580_v61  ;;  %7778 = vmatpush1.bf16.msra.mxu1 %v10583_v62  ;;  %v13740_v61 = vld [vmem:[%s11040_s5 + $0xf0] sm:$0xff] }
 0x34c   : > { %7091 = vmatprep.subr.bf16.mxu0 %v10588_v63  ;;  %7779 = vmatprep.subr.bf16.mxu1 %v10591_v0  ;;  %v10670_v62 = vld [vmem:[%s14174_s1 + $0x1c00] ss:$16 sps:$4 sm:$0xff]   ;;  %v10673_v63 = vld [vmem:[%s14174_s1 + $0x1c08] ss:$16 sps:$4 sm:$0xff]   ;;  %v8157_v0 = vcombine.high %v13737_v60, %v13740_v61 }
 0x34f   : > { %7092 = vmatpush1.bf16.msra.mxu0 %v10586_v1  ;;  %7780 = vmatpush1.bf16.msra.mxu1 %v10589_v2  ;;  %v10676_v1 = vld [vmem:[%s14174_s1 + $0x1c20] ss:$16 sps:$4 sm:$0xff]   ;;  %v10679_v2 = vld [vmem:[%s14174_s1 + $0x1c28] ss:$16 sps:$4 sm:$0xff]  }
 0x350   : > { %7093 = vmatprep.subr.bf16.mxu0 %v10594_v3  ;;  %7781 = vmatprep.subr.bf16.mxu1 %v10597_v4  ;;  %v10684_v3 = vld [vmem:[%s14174_s1 + $0x1c44] ss:$16 sps:$4 sm:$0xff]   ;;  %v10687_v4 = vld [vmem:[%s14174_s1 + $0x1c4c] ss:$16 sps:$4 sm:$0xff]  }
 0x353   : > { %7094 = vmatpush1.bf16.msra.mxu0 %v10592_v5  ;;  %7782 = vmatpush1.bf16.msra.mxu1 %v10595_v6  ;;  %v10682_v5 = vld [vmem:[%s14174_s1 + $0x1c40] ss:$16 sps:$4 sm:$0xff]   ;;  %v10685_v6 = vld [vmem:[%s14174_s1 + $0x1c48] ss:$16 sps:$4 sm:$0xff]  }
 0x354   : > { %7095 = vmatprep.subr.bf16.mxu0 %v10600_v7  ;;  %7783 = vmatprep.subr.bf16.mxu1 %v10603_v8  ;;  %v10690_v7 = vld [vmem:[%s14174_s1 + $0x1c64] ss:$16 sps:$4 sm:$0xff]   ;;  %v10693_v8 = vld [vmem:[%s14174_s1 + $0x1c6c] ss:$16 sps:$4 sm:$0xff]  }
 0x357   : > { %7096 = vmatpush1.bf16.msra.mxu0 %v10598_v9  ;;  %7784 = vmatpush1.bf16.msra.mxu1 %v10601_v10  ;;  %v10688_v9 = vld [vmem:[%s14174_s1 + $0x1c60] ss:$16 sps:$4 sm:$0xff]   ;;  %v10691_v10 = vld [vmem:[%s14174_s1 + $0x1c68] ss:$16 sps:$4 sm:$0xff]  }
 0x358   : > { %7097 = vmatprep.subr.bf16.mxu0 %v10606_v11  ;;  %7785 = vmatprep.subr.bf16.mxu1 %v10609_v12  ;;  %v10696_v11 = vld [vmem:[%s14174_s1 + $0x1c84] ss:$16 sps:$4 sm:$0xff]   ;;  %v10699_v12 = vld [vmem:[%s14174_s1 + $0x1c8c] ss:$16 sps:$4 sm:$0xff]  }
 0x35b   : > { %7098 = vmatpush1.bf16.msra.mxu0 %v10604_v13  ;;  %7786 = vmatpush1.bf16.msra.mxu1 %v10607_v16  ;;  %v10694_v13 = vld [vmem:[%s14174_s1 + $0x1c80] ss:$16 sps:$4 sm:$0xff]   ;;  %v10697_v16 = vld [vmem:[%s14174_s1 + $0x1c88] ss:$16 sps:$4 sm:$0xff]  }
 0x35c   : > { %7099 = vmatprep.subr.bf16.mxu0 %v10612_v17  ;;  %7787 = vmatprep.subr.bf16.mxu1 %v10615_v20  ;;  %v10702_v17 = vld [vmem:[%s14174_s1 + $0x1ca4] ss:$16 sps:$4 sm:$0xff]   ;;  %v10705_v20 = vld [vmem:[%s14174_s1 + $0x1cac] ss:$16 sps:$4 sm:$0xff]  }
 0x35f   : > { %7100 = vmatpush1.bf16.msra.mxu0 %v10610_v22  ;;  %7788 = vmatpush1.bf16.msra.mxu1 %v10613_v15  ;;  %v10700_v22 = vld [vmem:[%s14174_s1 + $0x1ca0] ss:$16 sps:$4 sm:$0xff]   ;;  %v10703_v15 = vld [vmem:[%s14174_s1 + $0x1ca8] ss:$16 sps:$4 sm:$0xff]  }
 0x360   : > { %7101 = vmatprep.subr.bf16.mxu0 %v10618_v23  ;;  %7789 = vmatprep.subr.bf16.mxu1 %v10621_v24  ;;  %v10708_v23 = vld [vmem:[%s14174_s1 + $0x1cc4] ss:$16 sps:$4 sm:$0xff]   ;;  %v10711_v24 = vld [vmem:[%s14174_s1 + $0x1ccc] ss:$16 sps:$4 sm:$0xff]  }
 0x363   : > { %7102 = vmatpush1.bf16.msra.mxu0 %v10616_v25  ;;  %7790 = vmatpush1.bf16.msra.mxu1 %v10619_v26  ;;  %v10706_v25 = vld [vmem:[%s14174_s1 + $0x1cc0] ss:$16 sps:$4 sm:$0xff]   ;;  %v10709_v26 = vld [vmem:[%s14174_s1 + $0x1cc8] ss:$16 sps:$4 sm:$0xff]  }
 0x364   : > { %7103 = vmatprep.subr.bf16.mxu0 %v10624_v27  ;;  %7791 = vmatprep.subr.bf16.mxu1 %v10627_v28  ;;  %v10714_v27 = vld [vmem:[%s14174_s1 + $0x1ce4] ss:$16 sps:$4 sm:$0xff]   ;;  %v10717_v28 = vld [vmem:[%s14174_s1 + $0x1cec] ss:$16 sps:$4 sm:$0xff]  }
 0x367   : > { %7104 = vmatpush1.bf16.msra.mxu0 %v10622_v29  ;;  %7792 = vmatpush1.bf16.msra.mxu1 %v10625_v30  ;;  %v10712_v29 = vld [vmem:[%s14174_s1 + $0x1ce0] ss:$16 sps:$4 sm:$0xff]   ;;  %v10715_v30 = vld [vmem:[%s14174_s1 + $0x1ce8] ss:$16 sps:$4 sm:$0xff]  }
 0x368   : > { %7105 = vmatprep.subr.bf16.mxu0 %v10630_v31  ;;  %7793 = vmatprep.subr.bf16.mxu1 %v10633_v32  ;;  %v10720_v31 = vld [vmem:[%s14174_s1 + $0x1d04] ss:$16 sps:$4 sm:$0xff]   ;;  %v10723_v32 = vld [vmem:[%s14174_s1 + $0x1d0c] ss:$16 sps:$4 sm:$0xff]  }
 0x36b   : > { %7106 = vmatpush1.bf16.msra.mxu0 %v10628_v33  ;;  %7794 = vmatpush1.bf16.msra.mxu1 %v10631_v34  ;;  %v10718_v33 = vld [vmem:[%s14174_s1 + $0x1d00] ss:$16 sps:$4 sm:$0xff]   ;;  %v10721_v34 = vld [vmem:[%s14174_s1 + $0x1d08] ss:$16 sps:$4 sm:$0xff]  }
 0x36c   : > { %7107 = vmatprep.subr.bf16.mxu0 %v10636_v35  ;;  %7795 = vmatprep.subr.bf16.mxu1 %v10639_v36  ;;  %v10726_v35 = vld [vmem:[%s14174_s1 + $0x1d24] ss:$16 sps:$4 sm:$0xff]   ;;  %v10729_v36 = vld [vmem:[%s14174_s1 + $0x1d2c] ss:$16 sps:$4 sm:$0xff]  }
 0x36f   : > { %7108 = vmatpush1.bf16.msra.mxu0 %v10634_v37  ;;  %7796 = vmatpush1.bf16.msra.mxu1 %v10637_v38  ;;  %v10724_v37 = vld [vmem:[%s14174_s1 + $0x1d20] ss:$16 sps:$4 sm:$0xff]   ;;  %v10727_v38 = vld [vmem:[%s14174_s1 + $0x1d28] ss:$16 sps:$4 sm:$0xff]  }
 0x370   : > { %7109 = vmatprep.subr.bf16.mxu0 %v10642_v39  ;;  %7797 = vmatprep.subr.bf16.mxu1 %v10645_v40  ;;  %v10732_v39 = vld [vmem:[%s14174_s1 + $0x1d44] ss:$16 sps:$4 sm:$0xff]   ;;  %v10735_v40 = vld [vmem:[%s14174_s1 + $0x1d4c] ss:$16 sps:$4 sm:$0xff]  }
 0x373   : > { %7110 = vmatpush1.bf16.msra.mxu0 %v10640_v41  ;;  %7798 = vmatpush1.bf16.msra.mxu1 %v10643_v42  ;;  %v10730_v41 = vld [vmem:[%s14174_s1 + $0x1d40] ss:$16 sps:$4 sm:$0xff]   ;;  %v10733_v42 = vld [vmem:[%s14174_s1 + $0x1d48] ss:$16 sps:$4 sm:$0xff]  }
 0x374   : > { %7111 = vmatprep.subr.bf16.mxu0 %v10648_v43  ;;  %7799 = vmatprep.subr.bf16.mxu1 %v10651_v44  ;;  %v10738_v43 = vld [vmem:[%s14174_s1 + $0x1d64] ss:$16 sps:$4 sm:$0xff]   ;;  %v10741_v44 = vld [vmem:[%s14174_s1 + $0x1d6c] ss:$16 sps:$4 sm:$0xff]  }
 0x377   : > { %7112 = vmatpush1.bf16.msra.mxu0 %v10646_v21  ;;  %7800 = vmatpush1.bf16.msra.mxu1 %v10649_v46  ;;  %v10736_v21 = vld [vmem:[%s14174_s1 + $0x1d60] ss:$16 sps:$4 sm:$0xff]   ;;  %v10739_v46 = vld [vmem:[%s14174_s1 + $0x1d68] ss:$16 sps:$4 sm:$0xff]  }
 0x378   : > { %7113 = vmatprep.subr.bf16.mxu0 %v10654_v47  ;;  %7801 = vmatprep.subr.bf16.mxu1 %v10657_v18  ;;  %v10744_v47 = vld [vmem:[%s14174_s1 + $0x1d84] ss:$16 sps:$4 sm:$0xff]   ;;  %v10747_v18 = vld [vmem:[%s14174_s1 + $0x1d8c] ss:$16 sps:$4 sm:$0xff]  }
 0x37b   : > { %7114 = vmatpush1.bf16.msra.mxu0 %v10652_v19  ;;  %7802 = vmatpush1.bf16.msra.mxu1 %v10655_v50  ;;  %v10742_v19 = vld [vmem:[%s14174_s1 + $0x1d80] ss:$16 sps:$4 sm:$0xff]   ;;  %v10745_v50 = vld [vmem:[%s14174_s1 + $0x1d88] ss:$16 sps:$4 sm:$0xff]  }
 0x37c   : > { %7115 = vmatprep.subr.bf16.mxu0 %v10660_v51  ;;  %7803 = vmatprep.subr.bf16.mxu1 %v10663_v14  ;;  %v10750_v51 = vld [vmem:[%s14174_s1 + $0x1da4] ss:$16 sps:$4 sm:$0xff]   ;;  %v10753_v14 = vld [vmem:[%s14174_s1 + $0x1dac] ss:$16 sps:$4 sm:$0xff]  }
 0x37f   : > { %7116 = vmatpush1.bf16.msra.mxu0 %v10658_v45  ;;  %7804 = vmatpush1.bf16.msra.mxu1 %v10661_v54  ;;  %v10748_v45 = vld [vmem:[%s14174_s1 + $0x1da0] ss:$16 sps:$4 sm:$0xff]   ;;  %v10751_v54 = vld [vmem:[%s14174_s1 + $0x1da8] ss:$16 sps:$4 sm:$0xff]  }
 0x380   : > { %7117 = vmatprep.subr.bf16.mxu0 %v10666_v55  ;;  %7805 = vmatprep.subr.bf16.mxu1 %v10669_v48  ;;  %v10756_v55 = vld [vmem:[%s14174_s1 + $0x1dc4] ss:$16 sps:$4 sm:$0xff]   ;;  %v10759_v48 = vld [vmem:[%s14174_s1 + $0x1dcc] ss:$16 sps:$4 sm:$0xff]  }
 0x383   : > { %7118 = vmatpush1.bf16.msra.mxu0 %v10664_v49  ;;  %7806 = vmatpush1.bf16.msra.mxu1 %v10667_v58  ;;  %v10754_v49 = vld [vmem:[%s14174_s1 + $0x1dc0] ss:$16 sps:$4 sm:$0xff]   ;;  %v10757_v58 = vld [vmem:[%s14174_s1 + $0x1dc8] ss:$16 sps:$4 sm:$0xff]  }
 0x384   : > { %7130 = vmatprep.subr.bf16.mxu0 %v10672_v59  ;;  %7818 = vmatprep.subr.bf16.mxu1 %v10675_v52  ;;  %v10762_v59 = vld [vmem:[%s14174_s1 + $0x1de4] ss:$16 sps:$4 sm:$0xff]   ;;  %v10765_v52 = vld [vmem:[%s14174_s1 + $0x1dec] ss:$16 sps:$4 sm:$0xff]  }
 0x386   : > { %7120 = vmatmul.mubr.bf16.vlgmr.msra.gmra.mrb[0].mxu0 %v8154_v53  ;;  %7808 = vmatmul.mubr.bf16.vlgmr.msra.gmra.mrb[0].mxu1 %v8154_v53  ;;  %v10760_v53 = vld [vmem:[%s14174_s1 + $0x1de0] ss:$16 sps:$4 sm:$0xff]  }
 0x387   : > { %7131 = vmatpush1.bf16.msra.mxu0 %v10670_v62  ;;  %7819 = vmatpush1.bf16.msra.mxu1 %v10673_v63  ;;  %v10763_v62 = vld [vmem:[%s14174_s1 + $0x1de8] ss:$16 sps:$4 sm:$0xff]   ;;  %v10768_v63 = vld [vmem:[%s14174_s1 + $0x1e04] ss:$16 sps:$4 sm:$0xff]  }
 0x388   : > { %7132 = vmatprep.subr.bf16.mxu0 %v10678_v56  ;;  %7820 = vmatprep.subr.bf16.mxu1 %v10681_v57  ;;  %v10771_v56 = vld [vmem:[%s14174_s1 + $0x1e0c] ss:$16 sps:$4 sm:$0xff]   ;;  %v8156_v57 = vcombine.low %v13737_v60, %v13740_v61  ;;  %v10774_v60 = vld [vmem:[%s14174_s1 + $0x1e24] ss:$16 sps:$4 sm:$0xff]  }
 0x389   : > { %7162 = vmatprep.mubr.bf16.mxu0 %v8157_v0  ;;  %7850 = vmatprep.mubr.bf16.mxu1 %v8157_v0  ;;  %v13939_v0 = vld [vmem:[%s11040_s5 + $0x78] sm:$0xff] }
 0x38a   : > { %v10777_v61 = vld [vmem:[%s14174_s1 + $0x1e2c] ss:$16 sps:$4 sm:$0xff]  }
 0x38b   : > { %7133 = vmatpush1.bf16.msra.mxu0 %v10676_v1  ;;  %7821 = vmatpush1.bf16.msra.mxu1 %v10679_v2  ;;  %v13942_v1 = vld [vmem:[%s11040_s5 + $0xf8] sm:$0xff]  ;;  %v10766_v2 = vld [vmem:[%s14174_s1 + $0x1e00] ss:$16 sps:$4 sm:$0xff]  }
 0x38c   : > { %7134 = vmatprep.subr.bf16.mxu0 %v10684_v3  ;;  %7822 = vmatprep.subr.bf16.mxu1 %v10687_v4  ;;  %v10769_v3 = vld [vmem:[%s14174_s1 + $0x1e08] ss:$16 sps:$4 sm:$0xff]   ;;  %v8159_v4 = vcombine.high %v13939_v0, %v13942_v1 }
 0x38f   : > { %7135 = vmatpush1.bf16.msra.mxu0 %v10682_v5  ;;  %7823 = vmatpush1.bf16.msra.mxu1 %v10685_v6  ;;  %v10772_v5 = vld [vmem:[%s14174_s1 + $0x1e20] ss:$16 sps:$4 sm:$0xff]   ;;  %v10775_v6 = vld [vmem:[%s14174_s1 + $0x1e28] ss:$16 sps:$4 sm:$0xff]  }
 0x390   : > { %7136 = vmatprep.subr.bf16.mxu0 %v10690_v7  ;;  %7824 = vmatprep.subr.bf16.mxu1 %v10693_v8  ;;  %v10780_v7 = vld [vmem:[%s14174_s1 + $0x1e44] ss:$16 sps:$4 sm:$0xff]   ;;  %v10783_v8 = vld [vmem:[%s14174_s1 + $0x1e4c] ss:$16 sps:$4 sm:$0xff]  }
 0x393   : > { %7137 = vmatpush1.bf16.msra.mxu0 %v10688_v9  ;;  %7825 = vmatpush1.bf16.msra.mxu1 %v10691_v10  ;;  %v10778_v9 = vld [vmem:[%s14174_s1 + $0x1e40] ss:$16 sps:$4 sm:$0xff]   ;;  %v10781_v10 = vld [vmem:[%s14174_s1 + $0x1e48] ss:$16 sps:$4 sm:$0xff]  }
 0x394   : > { %7138 = vmatprep.subr.bf16.mxu0 %v10696_v11  ;;  %7826 = vmatprep.subr.bf16.mxu1 %v10699_v12  ;;  %v10786_v11 = vld [vmem:[%s14174_s1 + $0x1e64] ss:$16 sps:$4 sm:$0xff]   ;;  %v10789_v12 = vld [vmem:[%s14174_s1 + $0x1e6c] ss:$16 sps:$4 sm:$0xff]  }
 0x397   : > { %7139 = vmatpush1.bf16.msra.mxu0 %v10694_v13  ;;  %7827 = vmatpush1.bf16.msra.mxu1 %v10697_v16  ;;  %v10784_v13 = vld [vmem:[%s14174_s1 + $0x1e60] ss:$16 sps:$4 sm:$0xff]   ;;  %v10787_v16 = vld [vmem:[%s14174_s1 + $0x1e68] ss:$16 sps:$4 sm:$0xff]  }
 0x398   : > { %7140 = vmatprep.subr.bf16.mxu0 %v10702_v17  ;;  %7828 = vmatprep.subr.bf16.mxu1 %v10705_v20  ;;  %v10792_v17 = vld [vmem:[%s14174_s1 + $0x1e84] ss:$16 sps:$4 sm:$0xff]   ;;  %v10795_v20 = vld [vmem:[%s14174_s1 + $0x1e8c] ss:$16 sps:$4 sm:$0xff]  }
 0x39b   : > { %7141 = vmatpush1.bf16.msra.mxu0 %v10700_v22  ;;  %7829 = vmatpush1.bf16.msra.mxu1 %v10703_v15  ;;  %v10790_v22 = vld [vmem:[%s14174_s1 + $0x1e80] ss:$16 sps:$4 sm:$0xff]   ;;  %v10793_v15 = vld [vmem:[%s14174_s1 + $0x1e88] ss:$16 sps:$4 sm:$0xff]  }
 0x39c   : > { %7142 = vmatprep.subr.bf16.mxu0 %v10708_v23  ;;  %7830 = vmatprep.subr.bf16.mxu1 %v10711_v24  ;;  %v10798_v23 = vld [vmem:[%s14174_s1 + $0x1ea4] ss:$16 sps:$4 sm:$0xff]   ;;  %v10801_v24 = vld [vmem:[%s14174_s1 + $0x1eac] ss:$16 sps:$4 sm:$0xff]  }
 0x39f   : > { %7143 = vmatpush1.bf16.msra.mxu0 %v10706_v25  ;;  %7831 = vmatpush1.bf16.msra.mxu1 %v10709_v26  ;;  %v10796_v25 = vld [vmem:[%s14174_s1 + $0x1ea0] ss:$16 sps:$4 sm:$0xff]   ;;  %v10799_v26 = vld [vmem:[%s14174_s1 + $0x1ea8] ss:$16 sps:$4 sm:$0xff]  }
 0x3a0   : > { %7144 = vmatprep.subr.bf16.mxu0 %v10714_v27  ;;  %7832 = vmatprep.subr.bf16.mxu1 %v10717_v28  ;;  %v10804_v27 = vld [vmem:[%s14174_s1 + $0x1ec4] ss:$16 sps:$4 sm:$0xff]   ;;  %v10807_v28 = vld [vmem:[%s14174_s1 + $0x1ecc] ss:$16 sps:$4 sm:$0xff]  }
 0x3a3   : > { %7145 = vmatpush1.bf16.msra.mxu0 %v10712_v29  ;;  %7833 = vmatpush1.bf16.msra.mxu1 %v10715_v30  ;;  %v10802_v29 = vld [vmem:[%s14174_s1 + $0x1ec0] ss:$16 sps:$4 sm:$0xff]   ;;  %v10805_v30 = vld [vmem:[%s14174_s1 + $0x1ec8] ss:$16 sps:$4 sm:$0xff]  }
 0x3a4   : > { %7146 = vmatprep.subr.bf16.mxu0 %v10720_v31  ;;  %7834 = vmatprep.subr.bf16.mxu1 %v10723_v32  ;;  %v10810_v31 = vld [vmem:[%s14174_s1 + $0x1ee4] ss:$16 sps:$4 sm:$0xff]   ;;  %v10813_v32 = vld [vmem:[%s14174_s1 + $0x1eec] ss:$16 sps:$4 sm:$0xff]  }
 0x3a7   : > { %7147 = vmatpush1.bf16.msra.mxu0 %v10718_v33  ;;  %7835 = vmatpush1.bf16.msra.mxu1 %v10721_v34  ;;  %v10808_v33 = vld [vmem:[%s14174_s1 + $0x1ee0] ss:$16 sps:$4 sm:$0xff]   ;;  %v10811_v34 = vld [vmem:[%s14174_s1 + $0x1ee8] ss:$16 sps:$4 sm:$0xff]  }
 0x3a8   : > { %7148 = vmatprep.subr.bf16.mxu0 %v10726_v35  ;;  %7836 = vmatprep.subr.bf16.mxu1 %v10729_v36  ;;  %v10816_v35 = vld [vmem:[%s14174_s1 + $0x1f04] ss:$16 sps:$4 sm:$0xff]   ;;  %v10819_v36 = vld [vmem:[%s14174_s1 + $0x1f0c] ss:$16 sps:$4 sm:$0xff]  }
 0x3ab   : > { %7149 = vmatpush1.bf16.msra.mxu0 %v10724_v37  ;;  %7837 = vmatpush1.bf16.msra.mxu1 %v10727_v38  ;;  %v10814_v37 = vld [vmem:[%s14174_s1 + $0x1f00] ss:$16 sps:$4 sm:$0xff]   ;;  %v10817_v38 = vld [vmem:[%s14174_s1 + $0x1f08] ss:$16 sps:$4 sm:$0xff]  }
 0x3ac   : > { %7150 = vmatprep.subr.bf16.mxu0 %v10732_v39  ;;  %7838 = vmatprep.subr.bf16.mxu1 %v10735_v40  ;;  %v10822_v39 = vld [vmem:[%s14174_s1 + $0x1f24] ss:$16 sps:$4 sm:$0xff]   ;;  %v10825_v40 = vld [vmem:[%s14174_s1 + $0x1f2c] ss:$16 sps:$4 sm:$0xff]  }
 0x3af   : > { %7151 = vmatpush1.bf16.msra.mxu0 %v10730_v41  ;;  %7839 = vmatpush1.bf16.msra.mxu1 %v10733_v42  ;;  %v10820_v41 = vld [vmem:[%s14174_s1 + $0x1f20] ss:$16 sps:$4 sm:$0xff]   ;;  %v10823_v42 = vld [vmem:[%s14174_s1 + $0x1f28] ss:$16 sps:$4 sm:$0xff]  }
 0x3b0   : > { %7152 = vmatprep.subr.bf16.mxu0 %v10738_v43  ;;  %7840 = vmatprep.subr.bf16.mxu1 %v10741_v44  ;;  %v10828_v43 = vld [vmem:[%s14174_s1 + $0x1f44] ss:$16 sps:$4 sm:$0xff]   ;;  %v10831_v44 = vld [vmem:[%s14174_s1 + $0x1f4c] ss:$16 sps:$4 sm:$0xff]  }
 0x3b3   : > { %7153 = vmatpush1.bf16.msra.mxu0 %v10736_v21  ;;  %7841 = vmatpush1.bf16.msra.mxu1 %v10739_v46  ;;  %v10826_v21 = vld [vmem:[%s14174_s1 + $0x1f40] ss:$16 sps:$4 sm:$0xff]   ;;  %v10829_v46 = vld [vmem:[%s14174_s1 + $0x1f48] ss:$16 sps:$4 sm:$0xff]  }
 0x3b4   : > { %7154 = vmatprep.subr.bf16.mxu0 %v10744_v47  ;;  %7842 = vmatprep.subr.bf16.mxu1 %v10747_v18  ;;  %v10834_v47 = vld [vmem:[%s14174_s1 + $0x1f64] ss:$16 sps:$4 sm:$0xff]   ;;  %v10837_v18 = vld [vmem:[%s14174_s1 + $0x1f6c] ss:$16 sps:$4 sm:$0xff]  }
 0x3b7   : > { %7155 = vmatpush1.bf16.msra.mxu0 %v10742_v19  ;;  %7843 = vmatpush1.bf16.msra.mxu1 %v10745_v50  ;;  %v10832_v19 = vld [vmem:[%s14174_s1 + $0x1f60] ss:$16 sps:$4 sm:$0xff]   ;;  %v10835_v50 = vld [vmem:[%s14174_s1 + $0x1f68] ss:$16 sps:$4 sm:$0xff]  }
 0x3b8   : > { %7156 = vmatprep.subr.bf16.mxu0 %v10750_v51  ;;  %7844 = vmatprep.subr.bf16.mxu1 %v10753_v14  ;;  %v10840_v51 = vld [vmem:[%s14174_s1 + $0x1f84] ss:$16 sps:$4 sm:$0xff]   ;;  %v10843_v14 = vld [vmem:[%s14174_s1 + $0x1f8c] ss:$16 sps:$4 sm:$0xff]  }
 0x3bb   : > { %7157 = vmatpush1.bf16.msra.mxu0 %v10748_v45  ;;  %7845 = vmatpush1.bf16.msra.mxu1 %v10751_v54  ;;  %v10838_v45 = vld [vmem:[%s14174_s1 + $0x1f80] ss:$16 sps:$4 sm:$0xff]   ;;  %v10841_v54 = vld [vmem:[%s14174_s1 + $0x1f88] ss:$16 sps:$4 sm:$0xff]  }
 0x3bc   : > { %7158 = vmatprep.subr.bf16.mxu0 %v10756_v55  ;;  %7846 = vmatprep.subr.bf16.mxu1 %v10759_v48  ;;  %v10846_v55 = vld [vmem:[%s14174_s1 + $0x1fa4] ss:$16 sps:$4 sm:$0xff]   ;;  %v10849_v48 = vld [vmem:[%s14174_s1 + $0x1fac] ss:$16 sps:$4 sm:$0xff]  }
 0x3bf   : > { %7159 = vmatpush1.bf16.msra.mxu0 %v10754_v49  ;;  %7847 = vmatpush1.bf16.msra.mxu1 %v10757_v58  ;;  %v10844_v49 = vld [vmem:[%s14174_s1 + $0x1fa0] ss:$16 sps:$4 sm:$0xff]   ;;  %v10847_v58 = vld [vmem:[%s14174_s1 + $0x1fa8] ss:$16 sps:$4 sm:$0xff]  }
 0x3c0   : > { %7160 = vmatprep.subr.bf16.mxu0 %v10762_v59  ;;  %7848 = vmatprep.subr.bf16.mxu1 %v10765_v52  ;;  %v10852_v59 = vld [vmem:[%s14174_s1 + $0x1fc4] ss:$16 sps:$4 sm:$0xff]   ;;  %v10855_v52 = vld [vmem:[%s14174_s1 + $0x1fcc] ss:$16 sps:$4 sm:$0xff]  }
 0x3c3   : > { %7161 = vmatpush1.bf16.msra.mxu0 %v10760_v53  ;;  %7849 = vmatpush1.bf16.msra.mxu1 %v10763_v62  ;;  %v10850_v53 = vld [vmem:[%s14174_s1 + $0x1fc0] ss:$16 sps:$4 sm:$0xff]   ;;  %v10853_v62 = vld [vmem:[%s14174_s1 + $0x1fc8] ss:$16 sps:$4 sm:$0xff]  }
 0x3c4   : > { %7173 = vmatprep.subr.bf16.mxu0 %v10768_v63  ;;  %7861 = vmatprep.subr.bf16.mxu1 %v10771_v56  ;;  %v10858_v63 = vld [vmem:[%s14174_s1 + $0x1fe4] ss:$16 sps:$4 sm:$0xff]   ;;  %v10861_v56 = vld [vmem:[%s14174_s1 + $0x1fec] ss:$16 sps:$4 sm:$0xff]  }
 0x3c6   : > { %7163 = vmatmul.mubr.bf16.vlgmr.msra.gmra.mrb[0].mxu0 %v8156_v57  ;;  %7851 = vmatmul.mubr.bf16.vlgmr.msra.gmra.mrb[0].mxu1 %v8156_v57  ;;  %v10856_v57 = vld [vmem:[%s14174_s1 + $0x1fe0] ss:$16 sps:$4 sm:$0xff]  }
 0x3c7   : > { %7174 = vmatpush1.bf16.msra.mxu0 %v10766_v2  ;;  %7862 = vmatpush1.bf16.msra.mxu1 %v10769_v3  ;;  %v10859_v2 = vld [vmem:[%s14174_s1 + $0x1fe8] ss:$16 sps:$4 sm:$0xff]   ;;  %v8158_v3 = vcombine.low %v13939_v0, %v13942_v1  ;;  %v7982_v1 = vlaneseq }
 0x3c8   : > { %7175 = vmatprep.subr.bf16.mxu0 %v10774_v60  ;;  %7863 = vmatprep.subr.bf16.mxu1 %v10777_v61 }
 0x3c9   : > { %7205 = vmatprep.mubr.bf16.mxu0 %v8159_v4  ;;  %7893 = vmatprep.mubr.bf16.mxu1 %v8159_v4 }
 0x3cb   : > { %7176 = vmatpush1.bf16.msra.mxu0 %v10772_v5  ;;  %7864 = vmatpush1.bf16.msra.mxu1 %v10775_v6 }
 0x3cc   : > { %7177 = vmatprep.subr.bf16.mxu0 %v10780_v7  ;;  %7865 = vmatprep.subr.bf16.mxu1 %v10783_v8  ;;  %v10870_v8 = vmov 1983009808  }
 0x3cd   : > { %v14140_v0 = vunpack.c.l.s4 %v10870_v8 }
 0x3cf   : > { %7178 = vmatpush1.bf16.msra.mxu0 %v10778_v9  ;;  %7866 = vmatpush1.bf16.msra.mxu1 %v10781_v10 }
 0x3d0   : > { %7179 = vmatprep.subr.bf16.mxu0 %v10786_v11  ;;  %7867 = vmatprep.subr.bf16.mxu1 %v10789_v12 }
 0x3d3   : > { %7180 = vmatpush1.bf16.msra.mxu0 %v10784_v13  ;;  %7868 = vmatpush1.bf16.msra.mxu1 %v10787_v16 }
 0x3d4   : > { %7181 = vmatprep.subr.bf16.mxu0 %v10792_v17  ;;  %7869 = vmatprep.subr.bf16.mxu1 %v10795_v20 }
 0x3d7   : > { %7182 = vmatpush1.bf16.msra.mxu0 %v10790_v22  ;;  %7870 = vmatpush1.bf16.msra.mxu1 %v10793_v15 }
 0x3d8   : > { %7183 = vmatprep.subr.bf16.mxu0 %v10798_v23  ;;  %7871 = vmatprep.subr.bf16.mxu1 %v10801_v24 }
 0x3db   : > { %7184 = vmatpush1.bf16.msra.mxu0 %v10796_v25  ;;  %7872 = vmatpush1.bf16.msra.mxu1 %v10799_v26 }
 0x3dc   : > { %7185 = vmatprep.subr.bf16.mxu0 %v10804_v27  ;;  %7873 = vmatprep.subr.bf16.mxu1 %v10807_v28 }
 0x3df   : > { %7186 = vmatpush1.bf16.msra.mxu0 %v10802_v29  ;;  %7874 = vmatpush1.bf16.msra.mxu1 %v10805_v30 }
 0x3e0   : > { %7187 = vmatprep.subr.bf16.mxu0 %v10810_v31  ;;  %7875 = vmatprep.subr.bf16.mxu1 %v10813_v32 }
 0x3e3   : > { %7188 = vmatpush1.bf16.msra.mxu0 %v10808_v33  ;;  %7876 = vmatpush1.bf16.msra.mxu1 %v10811_v34 }
 0x3e4   : > { %7189 = vmatprep.subr.bf16.mxu0 %v10816_v35  ;;  %7877 = vmatprep.subr.bf16.mxu1 %v10819_v36 }
 0x3e7   : > { %7190 = vmatpush1.bf16.msra.mxu0 %v10814_v37  ;;  %7878 = vmatpush1.bf16.msra.mxu1 %v10817_v38 }
 0x3e8   : > { %7191 = vmatprep.subr.bf16.mxu0 %v10822_v39  ;;  %7879 = vmatprep.subr.bf16.mxu1 %v10825_v40 }
 0x3eb   : > { %7192 = vmatpush1.bf16.msra.mxu0 %v10820_v41  ;;  %7880 = vmatpush1.bf16.msra.mxu1 %v10823_v42 }
 0x3ec   : > { %7193 = vmatprep.subr.bf16.mxu0 %v10828_v43  ;;  %7881 = vmatprep.subr.bf16.mxu1 %v10831_v44 }
 0x3ef   : > { %7194 = vmatpush1.bf16.msra.mxu0 %v10826_v21  ;;  %7882 = vmatpush1.bf16.msra.mxu1 %v10829_v46 }
 0x3f0   : > { %7195 = vmatprep.subr.bf16.mxu0 %v10834_v47  ;;  %7883 = vmatprep.subr.bf16.mxu1 %v10837_v18 }
 0x3f3   : > { %7196 = vmatpush1.bf16.msra.mxu0 %v10832_v19  ;;  %7884 = vmatpush1.bf16.msra.mxu1 %v10835_v50 }
 0x3f4   : > { %7197 = vmatprep.subr.bf16.mxu0 %v10840_v51  ;;  %7885 = vmatprep.subr.bf16.mxu1 %v10843_v14 }
 0x3f7   : > { %7198 = vmatpush1.bf16.msra.mxu0 %v10838_v45  ;;  %7886 = vmatpush1.bf16.msra.mxu1 %v10841_v54 }
 0x3f8   : > { %7199 = vmatprep.subr.bf16.mxu0 %v10846_v55  ;;  %7887 = vmatprep.subr.bf16.mxu1 %v10849_v48 }
 0x3fb   : > { %7200 = vmatpush1.bf16.msra.mxu0 %v10844_v49  ;;  %7888 = vmatpush1.bf16.msra.mxu1 %v10847_v58 }
 0x3fc   : > { %7201 = vmatprep.subr.bf16.mxu0 %v10852_v59  ;;  %7889 = vmatprep.subr.bf16.mxu1 %v10855_v52 }
 0x3ff   : > { %7202 = vmatpush1.bf16.msra.mxu0 %v10850_v53  ;;  %7890 = vmatpush1.bf16.msra.mxu1 %v10853_v62 }
 0x400   : > { %7203 = vmatprep.subr.bf16.mxu0 %v10858_v63  ;;  %7891 = vmatprep.subr.bf16.mxu1 %v10861_v56 }
 0x403   : > { %7204 = vmatpush1.bf16.msra.mxu0 %v10856_v57  ;;  %7892 = vmatpush1.bf16.msra.mxu1 %v10859_v2 }
 0x406   : > { %7206 = vmatmul.mubr.bf16.vlgmr.msra.gmra.mrb[0].mxu0 %v8158_v3  ;;  %7894 = vmatmul.mubr.bf16.vlgmr.msra.gmra.mrb[0].mxu1 %v8158_v3 }
 0x4d9   : > { %v7207_v60 = vpop.f32.mrb[0].mxu0  ;;  %v7895_v61 = vpop.f32.mrb[0].mxu1 }
 0x4da   : > { %v7932_v4 = vmul.f32 %v7207_v60, %v7207_v60  ;;  %v7934_v5 = vmul.f32 %v7895_v61, %v7895_v61  ;;  %v7209_v6 = vpop.f32.mrb[1].mxu0  ;;  %v7897_v7 = vpop.f32.mrb[1].mxu1 }
 0x4db   : > { %v7933_v9 = vmul.f32 %v7209_v6, %v7209_v6  ;;  %v9193_v10 = vpack.c.bf16 %v7209_v6, %v7207_v60  ;;  %v7935_v11 = vmul.f32 %v7897_v7, %v7897_v7  ;;  %v9194_v12 = vpack.c.bf16 %v7897_v7, %v7895_v61  ;;  %v7211_v13 = vpop.f32.mrb[2].mxu0  ;;  %v14142_v16 = vpop.f32.mrb[2].mxu1 }
 0x4dc   : > { %v7904_v17 = vadd.f32 %v7211_v13, %v7207_v60  ;;  %v7936_v20 = vmul.f32 %v7211_v13, %v7211_v13  ;;  %v7918_v22 = vadd.f32 %v14142_v16, %v7895_v61  ;;  %v7938_v15 = vmul.f32 %v14142_v16, %v14142_v16  ;;  %v7213_v23 = vpop.f32.mrb[3].mxu0  ;;  %v14147_v24 = vpop.f32.mrb[3].mxu1 }
 0x4dd   : > { %8020 = vst [vmem:[%s14138_s9] sm:$0xff] %v9193_v10  ;;  %8021 = vst [vmem:[%s14138_s9 + $0x8] sm:$0xff] %v9194_v12  ;;  %v7911_v25 = vadd.f32 %v7213_v23, %v7209_v6  ;;  %v7937_v26 = vmul.f32 %v7213_v23, %v7213_v23  ;;  %v9195_v27 = vpack.c.bf16 %v7213_v23, %v7211_v13 }
 0x4de   : > { %v7925_v28 = vadd.f32 %v14147_v24, %v7897_v7  ;;  %v7905_v29 = vrot.slane %v7904_v17, 4  ;;  %v7940_v30 = vadd.f32 %v7936_v20, %v7932_v4  ;;  %v7919_v31 = vrot.slane %v7918_v22, 4 }
 0x4df   : > { %v7954_v32 = vadd.f32 %v7938_v15, %v7934_v5  ;;  %v7912_v33 = vrot.slane %v7911_v25, 4  ;;  %v7947_v34 = vadd.f32 %v7937_v26, %v7933_v9  ;;  %8022 = vst [vmem:[%s14138_s9 + $0x10] sm:$0xff] %v9195_v27  ;;  %v7939_v36 = vmul.f32 %v14147_v24, %v14147_v24 }
 0x4e0   : > { %v7926_v35 = vrot.slane %v7925_v28, 4  ;;  %v7906_v37 = vadd.f32 %v7905_v29, %v7904_v17  ;;  %v7941_v38 = vrot.slane %v7940_v30, 4  ;;  %v7920_v39 = vadd.f32 %v7919_v31, %v7918_v22 }
 0x4e1   : > { %v7955_v40 = vrot.slane %v7954_v32, 4  ;;  %v7913_v41 = vadd.f32 %v7912_v33, %v7911_v25  ;;  %v7948_v42 = vrot.slane %v7947_v34, 4  ;;  %v7961_v44 = vadd.f32 %v7939_v36, %v7935_v11 }
 0x4e2   : > { %v7927_v43 = vadd.f32 %v7926_v35, %v7925_v28  ;;  %v7907_v21 = vrot.slane %v7906_v37, 2  ;;  %v7942_v46 = vadd.f32 %v7941_v38, %v7940_v30  ;;  %v7921_v47 = vrot.slane %v7920_v39, 2 }
 0x4e3   : > { %v7956_v18 = vadd.f32 %v7955_v40, %v7954_v32  ;;  %v7914_v19 = vrot.slane %v7913_v41, 2  ;;  %v7949_v50 = vadd.f32 %v7948_v42, %v7947_v34  ;;  %v7962_v14 = vrot.slane %v7961_v44, 4 }
 0x4e4   : > { %v7928_v51 = vrot.slane %v7927_v43, 2  ;;  %v7908_v45 = vadd.f32 %v7907_v21, %v7906_v37  ;;  %v7943_v54 = vrot.slane %v7942_v46, 2  ;;  %v7922_v55 = vadd.f32 %v7921_v47, %v7920_v39 }
 0x4e5   : > { %v7957_v48 = vrot.slane %v7956_v18, 2  ;;  %v7915_v49 = vadd.f32 %v7914_v19, %v7913_v41  ;;  %v7950_v58 = vrot.slane %v7949_v50, 2  ;;  %v7963_v52 = vadd.f32 %v7962_v14, %v7961_v44 }
 0x4e6   : > { %v7929_v59 = vadd.f32 %v7928_v51, %v7927_v43  ;;  %v7909_v53 = vrot.slane %v7908_v45, 1  ;;  %v7944_v62 = vadd.f32 %v7943_v54, %v7942_v46  ;;  %v7923_v63 = vrot.slane %v7922_v55, 1 }
 0x4e7   : > { %v7958_v56 = vadd.f32 %v7957_v48, %v7956_v18  ;;  %v7916_v57 = vrot.slane %v7915_v49, 1  ;;  %v7951_v2 = vadd.f32 %v7950_v58, %v7949_v50  ;;  %v7964_v3 = vrot.slane %v7963_v52, 2 }
 0x4e8   : > { %v7945_v60 = vrot.slane %v7944_v62, 1  ;;  %v7981_v4 = vunpack.c.0.s8 %v14140_v0  ;;  %v7983_v5 = vshrl.u32 %v7982_v1, 7  ;;  %v7910_v6 = vadd.f32 %v7909_v53, %v7908_v45 }
 0x4e9   : > { %v7959_v61 = vrot.slane %v7958_v56, 1  ;;  %v7952_v7 = vrot.slane %v7951_v2, 1  ;;  %v7930_v8 = vrot.slane %v7929_v59, 1  ;;  %v7965_v9 = vadd.f32 %v7964_v3, %v7963_v52 }
 0x4ea   : > { %v7946_v10 = vadd.f32 %v7945_v60, %v7944_v62  ;;  %v7924_v11 = vadd.f32 %v7923_v63, %v7922_v55  ;;  %v9196_v13 = vpack.c.bf16 %v14147_v24, %v14142_v16  ;;  %v7917_v17 = vadd.f32 %v7916_v57, %v7915_v49 }
 0x4eb   : > { %v7960_v12 = vadd.f32 %v7959_v61, %v7958_v56  ;;  %v7953_v20 = vadd.f32 %v7952_v7, %v7951_v2  ;;  %v7966_v22 = vrot.slane %v7965_v9, 1  ;;  %v7984_v15 = vsub.s32 %v7981_v4, %v7983_v5 }
 0x4ec   : > { %v7969_v0 = vsel %vm7968_vm0, %v7910_v6, %v7946_v10  ;;  %8023 = vst [vmem:[%s14138_s9 + $0x18] sm:$0xff] %v9196_v13  ;;  %v7931_v25 = vadd.f32 %v7930_v8, %v7929_v59 }
 0x4ed   : > { %v7971_v1 = vsel %vm7968_vm0, %v7924_v11, %v7960_v12  ;;  %v7970_v23 = vsel %vm7968_vm0, %v7917_v17, %v7953_v20  ;;  %v7967_v26 = vadd.f32 %v7966_v22, %v7965_v9 }
 0x4ee   : > { %v7977_v27 = vcombine.low %v7969_v0, %v7970_v23 }
 0x4ef   : > { %v7972_v28 = vsel %vm7968_vm0, %v7931_v25, %v7967_v26 }
 0x4f0   : > { %v7985_v29 = vrot.slane %v7977_v27, %v7984_v15  ;;  %v7978_v16 = vcombine.low %v7971_v1, %v7972_v28 }
 0x4f2   : > { %v7992_v24 = vrot.slane %v7978_v16, %v7984_v15 }
 0x4f4   : > { %v7993_v30 = vcombine.low %v7985_v29, %v7992_v24 }
 0x4f6   : > { %7995 = vst [vmem:[%s191_s11] sm:$0xff] %v7993_v30 }
 0x4f7 PF: > { %s14_s12 = sadd.s32 1, %s10868_s12  }
 0x4f8   : > { %p11_p5 = scmp.ge.s32.totalorder %s14_s12, 4  }
 0x4fa   :  { %13 = sbr.rel (!%p11_p5) target bundleno = 1 (0x1), region = 70 }

</bundles_post_ra>
